<compile_context>
chip_gen: v5e
topology: v5e:2x2
jax: 0.10.0
libtpu: 0.0.40
codegen_flags: <defaults>
</compile_context>

<pallas_src>
import jax
import jax.numpy as jnp
from jax.experimental import pallas as pl
from jax.experimental.pallas import tpu as pltpu

_VMEM_LIMIT = 32 * 1024 * 1024


def _pick_hw_tile(hw, n_ch, itemsize, budget_bytes=8 * 1024 * 1024):
    """Largest multiple-of-128 tile of the flattened spatial axis that divides
    hw and keeps ~6 resident buffers under `budget_bytes`. Falls back to a
    single full block when hw is not a multiple of 128 (full-extent last dim
    is always a legal block)."""
    if hw % 128 != 0:
        return hw
    max_t = max(128, budget_bytes // (6 * n_ch * itemsize))
    t = min((max_t // 128) * 128, hw)
    while hw % t != 0:
        t -= 128
    return t


# ---------------------------------------------------------------------------
# Depthwise 3x3 conv (groups == channels), padding=1, with bias.
# ---------------------------------------------------------------------------
def _depthwise3x3_kernel(xp_ref, w_ref, b_ref, o_ref):
    # xp_ref: (C2, H+2, W+2)   w_ref: (9, C2, 1, 1) f32   b_ref: (C2, 1, 1) f32
    # o_ref : (C2, H, W)
    c2, h, w = o_ref.shape
    xp = xp_ref[...].astype(jnp.float32)                  # loaded once, used 9x
    acc = jnp.zeros((c2, h, w), jnp.float32)
    for di in range(3):
        for dj in range(3):
            k = di * 3 + dj
            # per-channel scalar -> (C2, H, 1): sublane broadcast, then the
            # multiply lane-broadcasts it over W (standard (C,1)*(C,W) pattern).
            wk = jnp.broadcast_to(w_ref[k], (c2, h, 1))
            acc = acc + xp[:, di:di + h, dj:dj + w] * wk
    bias = jnp.broadcast_to(b_ref[...], (c2, h, 1))
    o_ref[...] = (acc + bias).astype(o_ref.dtype)


# ---------------------------------------------------------------------------
# Pointwise 1x1 conv (2C -> C) with bias, lane-dense over flattened spatial.
# ---------------------------------------------------------------------------
def _pointwise_kernel(x_ref, w_ref, b_ref, o_ref):
    # x_ref: (C2, T)   w_ref: (C, C2) f32   b_ref: (C, 1) f32   o_ref: (C, T)
    y = jnp.dot(w_ref[...], x_ref[...], preferred_element_type=jnp.float32)
    o_ref[...] = (y + b_ref[...]).astype(o_ref.dtype)


def dsc_forward(xa, xb, dw_w, dw_b, pw_w, pw_b):
    """depthwise_separable_conv applied to cat([xa, xb], channel)."""
    N, c_in, H, W = xa.shape
    c2 = 2 * c_in
    c_out = pw_w.shape[0]
    hw = H * W
    itemsize = jnp.dtype(xa.dtype).itemsize

    x = jnp.concatenate([xa, xb], axis=1)                      # (N, 2C, H, W)
    xp = jnp.pad(x, ((0, 0), (0, 0), (1, 1), (1, 1)))          # (N, 2C, H+2, W+2)

    # Kernel-friendly weight layouts, cast to f32 once in the wrapper.
    w_taps = jnp.transpose(dw_w.reshape(c2, 9), (1, 0)).reshape(9, c2, 1, 1)
    w_taps = w_taps.astype(jnp.float32)
    b_dw = dw_b.reshape(c2, 1, 1).astype(jnp.float32)
    pw_wf = pw_w.astype(jnp.float32)
    pw_bf = pw_b.reshape(c_out, 1).astype(jnp.float32)

    dw_out = pl.pallas_call(
        _depthwise3x3_kernel,
        out_shape=jax.ShapeDtypeStruct((N, c2, H, W), x.dtype),
        grid_spec=pltpu.PrefetchScalarGridSpec(
            num_scalar_prefetch=0,
            grid=(N,),
            in_specs=[
                pl.BlockSpec((pl.Squeezed(), c2, H + 2, W + 2),
                             lambda n: (n, 0, 0, 0)),
                pl.BlockSpec((9, c2, 1, 1), lambda n: (0, 0, 0, 0)),
                pl.BlockSpec((c2, 1, 1), lambda n: (0, 0, 0)),
            ],
            out_specs=pl.BlockSpec((pl.Squeezed(), c2, H, W),
                                   lambda n: (n, 0, 0, 0)),
        ),
        compiler_params=pltpu.CompilerParams(
            dimension_semantics=("parallel",),
            vmem_limit_bytes=_VMEM_LIMIT),
        cost_estimate=pl.CostEstimate(
            flops=int(2 * 9 * N * c2 * hw),
            transcendentals=0,
            bytes_accessed=int(2 * N * c2 * hw * itemsize)),
    )(xp, w_taps, b_dw)

    dw_flat = dw_out.reshape(N, c2, hw)
    T = _pick_hw_tile(hw, max(c2, c_out), itemsize)
    n_t = hw // T

    out_flat = pl.pallas_call(
        _pointwise_kernel,
        out_shape=jax.ShapeDtypeStruct((N, c_out, hw), x.dtype),
        grid_spec=pltpu.PrefetchScalarGridSpec(
            num_scalar_prefetch=0,
            grid=(N, n_t),
            in_specs=[
                pl.BlockSpec((pl.Squeezed(), c2, T), lambda n, t: (n, 0, t)),
                pl.BlockSpec((c_out, c2), lambda n, t: (0, 0)),
                pl.BlockSpec((c_out, 1), lambda n, t: (0, 0)),
            ],
            out_specs=pl.BlockSpec((pl.Squeezed(), c_out, T),
                                   lambda n, t: (n, 0, t)),
        ),
        compiler_params=pltpu.CompilerParams(
            dimension_semantics=("parallel", "parallel"),
            vmem_limit_bytes=_VMEM_LIMIT),
        cost_estimate=pl.CostEstimate(
            flops=int(2 * N * c_out * c2 * hw),
            transcendentals=0,
            bytes_accessed=int(N * (c2 + c_out) * hw * itemsize)),
    )(dw_flat, pw_wf, pw_bf)

    return out_flat.reshape(N, c_out, H, W)


# ---------------------------------------------------------------------------
# CALayer + residual, fused as out = x * (1 + sigmoid(W2 relu(W1 mean(x)))).
# Two-pass, HW-tiled: (1) reduce + MLP -> per-channel scale, (2) rescale.
# ---------------------------------------------------------------------------
def ca_residual_forward(x, w1, w2):
    N, C, H, W = x.shape
    hw = H * W
    itemsize = jnp.dtype(x.dtype).itemsize
    x_flat = x.reshape(N, C, hw)

    T = _pick_hw_tile(hw, C, itemsize)
    n_t = hw // T
    w1f = w1.astype(jnp.float32)
    w2f = w2.astype(jnp.float32)
    inv_hw = 1.0 / float(hw)

    def reduce_kernel(x_ref, w1_ref, w2_ref, scale_ref, acc_ref):
        t = pl.program_id(1)

        @pl.when(t == 0)
        def _init():
            acc_ref[...] = jnp.zeros_like(acc_ref)

        # f32 running sum over the spatial (lane) axis.
        acc_ref[...] += jnp.sum(x_ref[...].astype(jnp.float32),
                                axis=-1, keepdims=True)

        @pl.when(t == pl.num_programs(1) - 1)
        def _finalize():
            mean = acc_ref[...] * inv_hw                          # (C, 1)
            h = jnp.maximum(
                jnp.dot(w1_ref[...], mean,
                        preferred_element_type=jnp.float32), 0.0)  # (C_red, 1)
            y = jax.nn.sigmoid(
                jnp.dot(w2_ref[...], h,
                        preferred_element_type=jnp.float32))       # (C, 1)
            scale_ref[...] = 1.0 + y        # +1 fuses the residual add

    scale = pl.pallas_call(
        reduce_kernel,
        out_shape=jax.ShapeDtypeStruct((N, C, 1), jnp.float32),
        grid_spec=pltpu.PrefetchScalarGridSpec(
            num_scalar_prefetch=0,
            grid=(N, n_t),
            in_specs=[
                pl.BlockSpec((pl.Squeezed(), C, T), lambda n, t: (n, 0, t)),
                pl.BlockSpec(w1f.shape, lambda n, t: (0, 0)),
                pl.BlockSpec(w2f.shape, lambda n, t: (0, 0)),
            ],
            out_specs=pl.BlockSpec((pl.Squeezed(), C, 1),
                                   lambda n, t: (n, 0, 0)),
            scratch_shapes=[pltpu.VMEM((C, 1), jnp.float32)],
        ),
        compiler_params=pltpu.CompilerParams(
            dimension_semantics=("parallel", "arbitrary"),
            vmem_limit_bytes=_VMEM_LIMIT),
        cost_estimate=pl.CostEstimate(
            flops=int(N * C * hw),
            transcendentals=int(N * C),
            bytes_accessed=int(N * C * hw * itemsize)),
    )(x_flat, w1f, w2f)

    def scale_kernel(x_ref, s_ref, o_ref):
        # Rescale in the input dtype: no f32 copy of the x tile.
        o_ref[...] = x_ref[...] * s_ref[...].astype(o_ref.dtype)

    out_flat = pl.pallas_call(
        scale_kernel,
        out_shape=jax.ShapeDtypeStruct((N, C, hw), x.dtype),
        grid_spec=pltpu.PrefetchScalarGridSpec(
            num_scalar_prefetch=0,
            grid=(N, n_t),
            in_specs=[
                pl.BlockSpec((pl.Squeezed(), C, T), lambda n, t: (n, 0, t)),
                pl.BlockSpec((pl.Squeezed(), C, 1), lambda n, t: (n, 0, 0)),
            ],
            out_specs=pl.BlockSpec((pl.Squeezed(), C, T),
                                   lambda n, t: (n, 0, t)),
        ),
        compiler_params=pltpu.CompilerParams(
            dimension_semantics=("parallel", "parallel"),
            vmem_limit_bytes=_VMEM_LIMIT),
        cost_estimate=pl.CostEstimate(
            flops=int(N * C * hw),
            transcendentals=0,
            bytes_accessed=int(2 * N * C * hw * itemsize + N * C * 4)),
    )(x_flat, scale)

    return out_flat.reshape(N, C, H, W)


# ---------------------------------------------------------------------------
# Full S2FB_p forward.
# ---------------------------------------------------------------------------
def s2fb_p_forward(x1, x2, x3, x4, p):
    f34 = dsc_forward(x3, x4, *p["dsc1"])
    f342 = dsc_forward(x2, f34, *p["dsc2"])
    f3421 = dsc_forward(x1, f342, *p["dsc3"])
    return ca_residual_forward(f3421, p["ca_w1"], p["ca_w2"])


# ---------------------------------------------------------------------------
# Pure-JAX reference mirroring the PyTorch module.
# ---------------------------------------------------------------------------
def _dsc_ref(x, dw_w, dw_b, pw_w, pw_b):
    c2 = x.shape[1]
    hi = jax.lax.Precision.HIGHEST
    y = jax.lax.conv_general_dilated(
        x, dw_w.reshape(c2, 1, 3, 3),
        window_strides=(1, 1), padding=((1, 1), (1, 1)),
        dimension_numbers=("NCHW", "OIHW", "NCHW"),
        feature_group_count=c2, precision=hi)
    y = y + dw_b.reshape(1, c2, 1, 1)
    y = jnp.einsum("oc,nchw->nohw", pw_w, y, precision=hi)
    return y + pw_b.reshape(1, -1, 1, 1)


def s2fb_p_ref(x1, x2, x3, x4, p):
    hi = jax.lax.Precision.HIGHEST
    f34 = _dsc_ref(jnp.concatenate([x3, x4], 1), *p["dsc1"])
    f342 = _dsc_ref(jnp.concatenate([x2, f34], 1), *p["dsc2"])
    f3421 = _dsc_ref(jnp.concatenate([x1, f342], 1), *p["dsc3"])
    y = jnp.mean(f3421, axis=(2, 3), keepdims=True)
    y = jax.nn.relu(jnp.einsum("oc,nchw->nohw", p["ca_w1"], y, precision=hi))
    y = jax.nn.sigmoid(jnp.einsum("oc,nchw->nohw", p["ca_w2"], y, precision=hi))
    return f3421 * y + f3421


if __name__ == "__main__":
    N, n_feat, H, W = 2, 16, 16, 16
    reduction = 4
    c2 = 2 * n_feat

    key = jax.random.PRNGKey(0)
    ks = jax.random.split(key, 9)

    x1 = jax.random.normal(ks[0], (N, n_feat, H, W), jnp.float32)
    x2 = jax.random.normal(ks[1], (N, n_feat, H, W), jnp.float32)
    x3 = jax.random.normal(ks[2], (N, n_feat, H, W), jnp.float32)
    x4 = jax.random.normal(ks[3], (N, n_feat, H, W), jnp.float32)

    def dsc_params(k):
        k0, k1, k2, k3 = jax.random.split(k, 4)
        dw_w = jax.random.normal(k0, (c2, 3, 3), jnp.float32) * 0.2
        dw_b = jax.random.normal(k1, (c2,), jnp.float32) * 0.1
        pw_w = jax.random.normal(k2, (n_feat, c2), jnp.float32) * (1.0 / (c2 ** 0.5))
        pw_b = jax.random.normal(k3, (n_feat,), jnp.float32) * 0.1
        return (dw_w, dw_b, pw_w, pw_b)

    params = {
        "dsc1": dsc_params(ks[4]),
        "dsc2": dsc_params(ks[5]),
        "dsc3": dsc_params(ks[6]),
        "ca_w1": jax.random.normal(ks[7], (n_feat // reduction, n_feat),
                                   jnp.float32) * 0.2,
        "ca_w2": jax.random.normal(ks[8], (n_feat, n_feat // reduction),
                                   jnp.float32) * 0.2,
    }

    fwd = jax.jit(s2fb_p_forward)
    out = jax.block_until_ready(fwd(x1, x2, x3, x4, params))
    ref = jax.block_until_ready(s2fb_p_ref(x1, x2, x3, x4, params))

    assert out.shape == (N, n_feat, H, W)
    max_err = float(jnp.max(jnp.abs(out - ref)))
    assert jnp.allclose(out, ref, atol=2e-2, rtol=2e-2), (
        f"mismatch vs reference, max abs err {max_err}")
    print("KERNEL_OK")
</pallas_src>

<mosaic_0001>
module attributes {stable_mosaic.version = 11 : i64} {
  func.func @_depthwise3x3_kernel(%arg0: i32, %arg1: memref<1x32x18x18xf32, #tpu.memory_space<vmem>>, %arg2: memref<9x32x1x1xf32, #tpu.memory_space<vmem>>, %arg3: memref<32x1x1xf32, #tpu.memory_space<vmem>>, %arg4: memref<1x32x16x16xf32, #tpu.memory_space<vmem>>) attributes {dimension_semantics = [#tpu.dimension_semantics<parallel>], iteration_bounds = array<i64: 2>, scalar_prefetch = 0 : i64, scratch_operands = 0 : i64, tpu.core_type = #tpu.core_type<tc>, window_params = [{transform_indices = @transform_0, window_bounds = array<i64: 1, 32, 18, 18>}, {pipeline_mode = #tpu.pipeline_mode<synchronous>, transform_indices = @transform_1, window_bounds = array<i64: 9, 32, 1, 1>}, {pipeline_mode = #tpu.pipeline_mode<synchronous>, transform_indices = @transform_2, window_bounds = array<i64: 32, 1, 1>}, {transform_indices = @transform_3, window_bounds = array<i64: 1, 32, 16, 16>}]} {
    %c0 = arith.constant 0 : index
    %c0_0 = arith.constant 0 : index
    %c0_1 = arith.constant 0 : index
    %c0_2 = arith.constant 0 : index
    %0 = vector.load %arg1[%c0, %c0_0, %c0_1, %c0_2] : memref<1x32x18x18xf32, #tpu.memory_space<vmem>>, vector<1x32x18x18xf32>
    %1 = vector.shape_cast %0 : vector<1x32x18x18xf32> to vector<32x18x18xf32>
    %cst = arith.constant 0.000000e+00 : f32
    %2 = vector.broadcast %cst : f32 to vector<32x16x16xf32>
    %c0_3 = arith.constant 0 : index
    %c0_4 = arith.constant 0 : index
    %c0_5 = arith.constant 0 : index
    %c0_6 = arith.constant 0 : index
    %3 = vector.load %arg2[%c0_3, %c0_4, %c0_5, %c0_6] : memref<9x32x1x1xf32, #tpu.memory_space<vmem>>, vector<1x32x1x1xf32>
    %4 = vector.shape_cast %3 : vector<1x32x1x1xf32> to vector<32x1x1xf32>
    %5 = vector.shape_cast %4 : vector<32x1x1xf32> to vector<32x1x1xf32>
    %6 = vector.broadcast %5 : vector<32x1x1xf32> to vector<32x16x1xf32>
    %7 = vector.extract_strided_slice %1 {offsets = [0, 0, 0], sizes = [32, 16, 16], strides = [1, 1, 1]} : vector<32x18x18xf32> to vector<32x16x16xf32>
    %8 = vector.broadcast %6 : vector<32x16x1xf32> to vector<32x16x16xf32>
    %9 = arith.mulf %7, %8 : vector<32x16x16xf32>
    %10 = arith.addf %2, %9 : vector<32x16x16xf32>
    %c1 = arith.constant 1 : index
    %c0_7 = arith.constant 0 : index
    %c0_8 = arith.constant 0 : index
    %c0_9 = arith.constant 0 : index
    %11 = vector.load %arg2[%c1, %c0_7, %c0_8, %c0_9] : memref<9x32x1x1xf32, #tpu.memory_space<vmem>>, vector<1x32x1x1xf32>
    %12 = vector.shape_cast %11 : vector<1x32x1x1xf32> to vector<32x1x1xf32>
    %13 = vector.shape_cast %12 : vector<32x1x1xf32> to vector<32x1x1xf32>
    %14 = vector.broadcast %13 : vector<32x1x1xf32> to vector<32x16x1xf32>
    %15 = vector.extract_strided_slice %1 {offsets = [0, 0, 1], sizes = [32, 16, 16], strides = [1, 1, 1]} : vector<32x18x18xf32> to vector<32x16x16xf32>
    %16 = vector.broadcast %14 : vector<32x16x1xf32> to vector<32x16x16xf32>
    %17 = arith.mulf %15, %16 : vector<32x16x16xf32>
    %18 = arith.addf %10, %17 : vector<32x16x16xf32>
    %c2 = arith.constant 2 : index
    %c0_10 = arith.constant 0 : index
    %c0_11 = arith.constant 0 : index
    %c0_12 = arith.constant 0 : index
    %19 = vector.load %arg2[%c2, %c0_10, %c0_11, %c0_12] : memref<9x32x1x1xf32, #tpu.memory_space<vmem>>, vector<1x32x1x1xf32>
    %20 = vector.shape_cast %19 : vector<1x32x1x1xf32> to vector<32x1x1xf32>
    %21 = vector.shape_cast %20 : vector<32x1x1xf32> to vector<32x1x1xf32>
    %22 = vector.broadcast %21 : vector<32x1x1xf32> to vector<32x16x1xf32>
    %23 = vector.extract_strided_slice %1 {offsets = [0, 0, 2], sizes = [32, 16, 16], strides = [1, 1, 1]} : vector<32x18x18xf32> to vector<32x16x16xf32>
    %24 = vector.broadcast %22 : vector<32x16x1xf32> to vector<32x16x16xf32>
    %25 = arith.mulf %23, %24 : vector<32x16x16xf32>
    %26 = arith.addf %18, %25 : vector<32x16x16xf32>
    %c3 = arith.constant 3 : index
    %c0_13 = arith.constant 0 : index
    %c0_14 = arith.constant 0 : index
    %c0_15 = arith.constant 0 : index
    %27 = vector.load %arg2[%c3, %c0_13, %c0_14, %c0_15] : memref<9x32x1x1xf32, #tpu.memory_space<vmem>>, vector<1x32x1x1xf32>
    %28 = vector.shape_cast %27 : vector<1x32x1x1xf32> to vector<32x1x1xf32>
    %29 = vector.shape_cast %28 : vector<32x1x1xf32> to vector<32x1x1xf32>
    %30 = vector.broadcast %29 : vector<32x1x1xf32> to vector<32x16x1xf32>
    %31 = vector.extract_strided_slice %1 {offsets = [0, 1, 0], sizes = [32, 16, 16], strides = [1, 1, 1]} : vector<32x18x18xf32> to vector<32x16x16xf32>
    %32 = vector.broadcast %30 : vector<32x16x1xf32> to vector<32x16x16xf32>
    %33 = arith.mulf %31, %32 : vector<32x16x16xf32>
    %34 = arith.addf %26, %33 : vector<32x16x16xf32>
    %c4 = arith.constant 4 : index
    %c0_16 = arith.constant 0 : index
    %c0_17 = arith.constant 0 : index
    %c0_18 = arith.constant 0 : index
    %35 = vector.load %arg2[%c4, %c0_16, %c0_17, %c0_18] : memref<9x32x1x1xf32, #tpu.memory_space<vmem>>, vector<1x32x1x1xf32>
    %36 = vector.shape_cast %35 : vector<1x32x1x1xf32> to vector<32x1x1xf32>
    %37 = vector.shape_cast %36 : vector<32x1x1xf32> to vector<32x1x1xf32>
    %38 = vector.broadcast %37 : vector<32x1x1xf32> to vector<32x16x1xf32>
    %39 = vector.extract_strided_slice %1 {offsets = [0, 1, 1], sizes = [32, 16, 16], strides = [1, 1, 1]} : vector<32x18x18xf32> to vector<32x16x16xf32>
    %40 = vector.broadcast %38 : vector<32x16x1xf32> to vector<32x16x16xf32>
    %41 = arith.mulf %39, %40 : vector<32x16x16xf32>
    %42 = arith.addf %34, %41 : vector<32x16x16xf32>
    %c5 = arith.constant 5 : index
    %c0_19 = arith.constant 0 : index
    %c0_20 = arith.constant 0 : index
    %c0_21 = arith.constant 0 : index
    %43 = vector.load %arg2[%c5, %c0_19, %c0_20, %c0_21] : memref<9x32x1x1xf32, #tpu.memory_space<vmem>>, vector<1x32x1x1xf32>
    %44 = vector.shape_cast %43 : vector<1x32x1x1xf32> to vector<32x1x1xf32>
    %45 = vector.shape_cast %44 : vector<32x1x1xf32> to vector<32x1x1xf32>
    %46 = vector.broadcast %45 : vector<32x1x1xf32> to vector<32x16x1xf32>
    %47 = vector.extract_strided_slice %1 {offsets = [0, 1, 2], sizes = [32, 16, 16], strides = [1, 1, 1]} : vector<32x18x18xf32> to vector<32x16x16xf32>
    %48 = vector.broadcast %46 : vector<32x16x1xf32> to vector<32x16x16xf32>
    %49 = arith.mulf %47, %48 : vector<32x16x16xf32>
    %50 = arith.addf %42, %49 : vector<32x16x16xf32>
    %c6 = arith.constant 6 : index
    %c0_22 = arith.constant 0 : index
    %c0_23 = arith.constant 0 : index
    %c0_24 = arith.constant 0 : index
    %51 = vector.load %arg2[%c6, %c0_22, %c0_23, %c0_24] : memref<9x32x1x1xf32, #tpu.memory_space<vmem>>, vector<1x32x1x1xf32>
    %52 = vector.shape_cast %51 : vector<1x32x1x1xf32> to vector<32x1x1xf32>
    %53 = vector.shape_cast %52 : vector<32x1x1xf32> to vector<32x1x1xf32>
    %54 = vector.broadcast %53 : vector<32x1x1xf32> to vector<32x16x1xf32>
    %55 = vector.extract_strided_slice %1 {offsets = [0, 2, 0], sizes = [32, 16, 16], strides = [1, 1, 1]} : vector<32x18x18xf32> to vector<32x16x16xf32>
    %56 = vector.broadcast %54 : vector<32x16x1xf32> to vector<32x16x16xf32>
    %57 = arith.mulf %55, %56 : vector<32x16x16xf32>
    %58 = arith.addf %50, %57 : vector<32x16x16xf32>
    %c7 = arith.constant 7 : index
    %c0_25 = arith.constant 0 : index
    %c0_26 = arith.constant 0 : index
    %c0_27 = arith.constant 0 : index
    %59 = vector.load %arg2[%c7, %c0_25, %c0_26, %c0_27] : memref<9x32x1x1xf32, #tpu.memory_space<vmem>>, vector<1x32x1x1xf32>
    %60 = vector.shape_cast %59 : vector<1x32x1x1xf32> to vector<32x1x1xf32>
    %61 = vector.shape_cast %60 : vector<32x1x1xf32> to vector<32x1x1xf32>
    %62 = vector.broadcast %61 : vector<32x1x1xf32> to vector<32x16x1xf32>
    %63 = vector.extract_strided_slice %1 {offsets = [0, 2, 1], sizes = [32, 16, 16], strides = [1, 1, 1]} : vector<32x18x18xf32> to vector<32x16x16xf32>
    %64 = vector.broadcast %62 : vector<32x16x1xf32> to vector<32x16x16xf32>
    %65 = arith.mulf %63, %64 : vector<32x16x16xf32>
    %66 = arith.addf %58, %65 : vector<32x16x16xf32>
    %c8 = arith.constant 8 : index
    %c0_28 = arith.constant 0 : index
    %c0_29 = arith.constant 0 : index
    %c0_30 = arith.constant 0 : index
    %67 = vector.load %arg2[%c8, %c0_28, %c0_29, %c0_30] : memref<9x32x1x1xf32, #tpu.memory_space<vmem>>, vector<1x32x1x1xf32>
    %68 = vector.shape_cast %67 : vector<1x32x1x1xf32> to vector<32x1x1xf32>
    %69 = vector.shape_cast %68 : vector<32x1x1xf32> to vector<32x1x1xf32>
    %70 = vector.broadcast %69 : vector<32x1x1xf32> to vector<32x16x1xf32>
    %71 = vector.extract_strided_slice %1 {offsets = [0, 2, 2], sizes = [32, 16, 16], strides = [1, 1, 1]} : vector<32x18x18xf32> to vector<32x16x16xf32>
    %72 = vector.broadcast %70 : vector<32x16x1xf32> to vector<32x16x16xf32>
    %73 = arith.mulf %71, %72 : vector<32x16x16xf32>
    %74 = arith.addf %66, %73 : vector<32x16x16xf32>
    %c0_31 = arith.constant 0 : index
    %c0_32 = arith.constant 0 : index
    %c0_33 = arith.constant 0 : index
    %75 = vector.load %arg3[%c0_31, %c0_32, %c0_33] : memref<32x1x1xf32, #tpu.memory_space<vmem>>, vector<32x1x1xf32>
    %76 = vector.shape_cast %75 : vector<32x1x1xf32> to vector<32x1x1xf32>
    %77 = vector.broadcast %76 : vector<32x1x1xf32> to vector<32x16x1xf32>
    %78 = vector.broadcast %77 : vector<32x16x1xf32> to vector<32x16x16xf32>
    %79 = arith.addf %74, %78 : vector<32x16x16xf32>
    %c0_34 = arith.constant 0 : index
    %c0_35 = arith.constant 0 : index
    %c0_36 = arith.constant 0 : index
    %c0_37 = arith.constant 0 : index
    %80 = vector.load %arg4[%c0_34, %c0_35, %c0_36, %c0_37] : memref<1x32x16x16xf32, #tpu.memory_space<vmem>>, vector<1x32x16x16xf32>
    %81 = vector.shape_cast %80 : vector<1x32x16x16xf32> to vector<32x16x16xf32>
    %82 = vector.shape_cast %79 : vector<32x16x16xf32> to vector<1x32x16x16xf32>
    tpu.vector_store %arg4[%c0_34, %c0_35, %c0_36, %c0_37], %82 {strides = array<i32>} : memref<1x32x16x16xf32, #tpu.memory_space<vmem>>, vector<1x32x16x16xf32>,
    return
  }
  func.func @transform_0(%arg0: i32) -> (i32, i32, i32, i32) {
    %c0_i32 = arith.constant 0 : i32
    %c0_i32_0 = arith.constant 0 : i32
    %c0_i32_1 = arith.constant 0 : i32
    %c0_i32_2 = arith.constant 0 : i32
    return %arg0, %c0_i32, %c0_i32_0, %c0_i32_1 : i32, i32, i32, i32
  }
  func.func @transform_1(%arg0: i32) -> (i32, i32, i32, i32) {
    %c0_i32 = arith.constant 0 : i32
    %c0_i32_0 = arith.constant 0 : i32
    %c0_i32_1 = arith.constant 0 : i32
    %c0_i32_2 = arith.constant 0 : i32
    %c0_i32_3 = arith.constant 0 : i32
    return %c0_i32, %c0_i32_0, %c0_i32_1, %c0_i32_2 : i32, i32, i32, i32
  }
  func.func @transform_2(%arg0: i32) -> (i32, i32, i32) {
    %c0_i32 = arith.constant 0 : i32
    %c0_i32_0 = arith.constant 0 : i32
    %c0_i32_1 = arith.constant 0 : i32
    %c0_i32_2 = arith.constant 0 : i32
    return %c0_i32, %c0_i32_0, %c0_i32_1 : i32, i32, i32
  }
  func.func @transform_3(%arg0: i32) -> (i32, i32, i32, i32) {
    %c0_i32 = arith.constant 0 : i32
    %c0_i32_0 = arith.constant 0 : i32
    %c0_i32_1 = arith.constant 0 : i32
    %c0_i32_2 = arith.constant 0 : i32
    return %arg0, %c0_i32, %c0_i32_0, %c0_i32_1 : i32, i32, i32, i32
  }
}

module attributes {stable_mosaic.version = 11 : i64} {
  func.func @_pointwise_kernel(%arg0: i32, %arg1: i32, %arg2: memref<1x32x256xf32, #tpu.memory_space<vmem>>, %arg3: memref<16x32xf32, #tpu.memory_space<vmem>>, %arg4: memref<16x1xf32, #tpu.memory_space<vmem>>, %arg5: memref<1x16x256xf32, #tpu.memory_space<vmem>>) attributes {dimension_semantics = [#tpu.dimension_semantics<parallel>, #tpu.dimension_semantics<parallel>], iteration_bounds = array<i64: 2, 1>, scalar_prefetch = 0 : i64, scratch_operands = 0 : i64, tpu.core_type = #tpu.core_type<tc>, window_params = [{transform_indices = @transform_0, window_bounds = array<i64: 1, 32, 256>}, {pipeline_mode = #tpu.pipeline_mode<synchronous>, transform_indices = @transform_1, window_bounds = array<i64: 16, 32>}, {pipeline_mode = #tpu.pipeline_mode<synchronous>, transform_indices = @transform_2, window_bounds = array<i64: 16, 1>}, {transform_indices = @transform_3, window_bounds = array<i64: 1, 16, 256>}]} {
    %c0 = arith.constant 0 : index
    %c0_0 = arith.constant 0 : index
    %0 = vector.load %arg3[%c0, %c0_0] : memref<16x32xf32, #tpu.memory_space<vmem>>, vector<16x32xf32>
    %c0_1 = arith.constant 0 : index
    %c0_2 = arith.constant 0 : index
    %c0_3 = arith.constant 0 : index
    %1 = vector.load %arg2[%c0_1, %c0_2, %c0_3] : memref<1x32x256xf32, #tpu.memory_space<vmem>>, vector<1x32x256xf32>
    %2 = vector.shape_cast %1 : vector<1x32x256xf32> to vector<32x256xf32>
    %cst = arith.constant dense<0.000000e+00> : vector<16x256xf32>
    %3 = tpu.matmul %0, %2, %cst {dimension_numbers = #tpu.dot_dimension_numbers<[1], [0], [0], [1], [0, 0, 1, 1], [], []>} : vector<16x32xf32>, vector<32x256xf32>, vector<16x256xf32> -> vector<16x256xf32>
    %c0_4 = arith.constant 0 : index
    %c0_5 = arith.constant 0 : index
    %4 = vector.load %arg4[%c0_4, %c0_5] : memref<16x1xf32, #tpu.memory_space<vmem>>, vector<16x1xf32>
    %5 = vector.broadcast %4 : vector<16x1xf32> to vector<16x256xf32>
    %6 = arith.addf %3, %5 : vector<16x256xf32>
    %c0_6 = arith.constant 0 : index
    %c0_7 = arith.constant 0 : index
    %c0_8 = arith.constant 0 : index
    %7 = vector.load %arg5[%c0_6, %c0_7, %c0_8] : memref<1x16x256xf32, #tpu.memory_space<vmem>>, vector<1x16x256xf32>
    %8 = vector.shape_cast %7 : vector<1x16x256xf32> to vector<16x256xf32>
    %9 = vector.shape_cast %6 : vector<16x256xf32> to vector<1x16x256xf32>
    tpu.vector_store %arg5[%c0_6, %c0_7, %c0_8], %9 {strides = array<i32>} : memref<1x16x256xf32, #tpu.memory_space<vmem>>, vector<1x16x256xf32>,
    return
  }
  func.func @transform_0(%arg0: i32, %arg1: i32) -> (i32, i32, i32) {
    %c0_i32 = arith.constant 0 : i32
    %c0_i32_0 = arith.constant 0 : i32
    return %arg0, %c0_i32, %arg1 : i32, i32, i32
  }
  func.func @transform_1(%arg0: i32, %arg1: i32) -> (i32, i32) {
    %c0_i32 = arith.constant 0 : i32
    %c0_i32_0 = arith.constant 0 : i32
    %c0_i32_1 = arith.constant 0 : i32
    return %c0_i32, %c0_i32_0 : i32, i32
  }
  func.func @transform_2(%arg0: i32, %arg1: i32) -> (i32, i32) {
    %c0_i32 = arith.constant 0 : i32
    %c0_i32_0 = arith.constant 0 : i32
    %c0_i32_1 = arith.constant 0 : i32
    return %c0_i32, %c0_i32_0 : i32, i32
  }
  func.func @transform_3(%arg0: i32, %arg1: i32) -> (i32, i32, i32) {
    %c0_i32 = arith.constant 0 : i32
    %c0_i32_0 = arith.constant 0 : i32
    return %arg0, %c0_i32, %arg1 : i32, i32, i32
  }
}

module attributes {stable_mosaic.version = 11 : i64} {
  func.func @reduce_kernel(%arg0: i32, %arg1: i32, %arg2: memref<1x16x256xf32, #tpu.memory_space<vmem>>, %arg3: memref<4x16xf32, #tpu.memory_space<vmem>>, %arg4: memref<16x4xf32, #tpu.memory_space<vmem>>, %arg5: memref<1x16x1xf32, #tpu.memory_space<vmem>>, %arg6: memref<16x1xf32, #tpu.memory_space<vmem>>) attributes {dimension_semantics = [#tpu.dimension_semantics<parallel>, #tpu.dimension_semantics<arbitrary>], iteration_bounds = array<i64: 2, 1>, scalar_prefetch = 0 : i64, scratch_operands = 1 : i64, tpu.core_type = #tpu.core_type<tc>, window_params = [{transform_indices = @transform_0, window_bounds = array<i64: 1, 16, 256>}, {pipeline_mode = #tpu.pipeline_mode<synchronous>, transform_indices = @transform_1, window_bounds = array<i64: 4, 16>}, {pipeline_mode = #tpu.pipeline_mode<synchronous>, transform_indices = @transform_2, window_bounds = array<i64: 16, 4>}, {transform_indices = @transform_3, window_bounds = array<i64: 1, 16, 1>}]} {
    %c0_i32 = arith.constant 0 : i32
    %0 = arith.cmpi eq, %arg1, %c0_i32 : i32
    %1 = arith.extui %0 : i1 to i32
    %c0_i32_0 = arith.constant 0 : i32
    %2 = arith.cmpi ne, %1, %c0_i32_0 : i32
    scf.if %2 {
      %cst_9 = arith.constant 0.000000e+00 : f32
      %13 = vector.broadcast %cst_9 : f32 to vector<16x1xf32>
      %c0_10 = arith.constant 0 : index
      %c0_11 = arith.constant 0 : index
      %14 = vector.load %arg6[%c0_10, %c0_11] : memref<16x1xf32, #tpu.memory_space<vmem>>, vector<16x1xf32>
      tpu.vector_store %arg6[%c0_10, %c0_11], %13 {strides = array<i32>} : memref<16x1xf32, #tpu.memory_space<vmem>>, vector<16x1xf32>,
    } else {
    }
    %c0 = arith.constant 0 : index
    %c0_1 = arith.constant 0 : index
    %3 = vector.load %arg6[%c0, %c0_1] : memref<16x1xf32, #tpu.memory_space<vmem>>, vector<16x1xf32>
    %c0_2 = arith.constant 0 : index
    %c0_3 = arith.constant 0 : index
    %c0_4 = arith.constant 0 : index
    %4 = vector.load %arg2[%c0_2, %c0_3, %c0_4] : memref<1x16x256xf32, #tpu.memory_space<vmem>>, vector<1x16x256xf32>
    %5 = vector.shape_cast %4 : vector<1x16x256xf32> to vector<16x256xf32>
    %cst = arith.constant dense<0.000000e+00> : vector<16xf32>
    %6 = vector.multi_reduction <add>, %5, %cst [1] : vector<16x256xf32> to vector<16xf32>
    %7 = vector.shape_cast %6 : vector<16xf32> to vector<16x1xf32>
    %8 = arith.addf %3, %7 : vector<16x1xf32>
    %c0_5 = arith.constant 0 : index
    %c0_6 = arith.constant 0 : index
    %9 = vector.load %arg6[%c0_5, %c0_6] : memref<16x1xf32, #tpu.memory_space<vmem>>, vector<16x1xf32>
    tpu.vector_store %arg6[%c0_5, %c0_6], %8 {strides = array<i32>} : memref<16x1xf32, #tpu.memory_space<vmem>>, vector<16x1xf32>,
    %c0_i32_7 = arith.constant 0 : i32
    %10 = arith.cmpi eq, %arg1, %c0_i32_7 : i32
    %11 = arith.extui %10 : i1 to i32
    %c0_i32_8 = arith.constant 0 : i32
    %12 = arith.cmpi ne, %11, %c0_i32_8 : i32
    scf.if %12 {
      %c0_9 = arith.constant 0 : index
      %c0_10 = arith.constant 0 : index
      %13 = vector.load %arg6[%c0_9, %c0_10] : memref<16x1xf32, #tpu.memory_space<vmem>>, vector<16x1xf32>
      %cst_11 = arith.constant 3.906250e-03 : f32
      %14 = vector.broadcast %cst_11 : f32 to vector<16x1xf32>
      %15 = arith.mulf %13, %14 : vector<16x1xf32>
      %c0_12 = arith.constant 0 : index
      %c0_13 = arith.constant 0 : index
      %16 = vector.load %arg3[%c0_12, %c0_13] : memref<4x16xf32, #tpu.memory_space<vmem>>, vector<4x16xf32>
      %cst_14 = arith.constant dense<0.000000e+00> : vector<4x1xf32>
      %17 = tpu.matmul %16, %15, %cst_14 {dimension_numbers = #tpu.dot_dimension_numbers<[1], [0], [0], [1], [0, 0, 1, 1], [], []>} : vector<4x16xf32>, vector<16x1xf32>, vector<4x1xf32> -> vector<4x1xf32>
      %cst_15 = arith.constant 0.000000e+00 : f32
      %18 = vector.broadcast %cst_15 : f32 to vector<4x1xf32>
      %19 = arith.maximumf %17, %18 : vector<4x1xf32>
      %c0_16 = arith.constant 0 : index
      %c0_17 = arith.constant 0 : index
      %20 = vector.load %arg4[%c0_16, %c0_17] : memref<16x4xf32, #tpu.memory_space<vmem>>, vector<16x4xf32>
      %cst_18 = arith.constant dense<0.000000e+00> : vector<16x1xf32>
      %21 = tpu.matmul %20, %19, %cst_18 {dimension_numbers = #tpu.dot_dimension_numbers<[1], [0], [0], [1], [0, 0, 1, 1], [], []>} : vector<16x4xf32>, vector<4x1xf32>, vector<16x1xf32> -> vector<16x1xf32>
      %22 = arith.negf %21 : vector<16x1xf32>
      %23 = math.exp %22 : vector<16x1xf32>
      %cst_19 = arith.constant 1.000000e+00 : f32
      %24 = vector.broadcast %cst_19 : f32 to vector<16x1xf32>
      %25 = arith.addf %24, %23 : vector<16x1xf32>
      %26 = arith.divf %24, %25 : vector<16x1xf32>
      %cst_20 = arith.constant 1.000000e+00 : f32
      %27 = vector.broadcast %cst_20 : f32 to vector<16x1xf32>
      %28 = arith.addf %27, %26 : vector<16x1xf32>
      %c0_21 = arith.constant 0 : index
      %c0_22 = arith.constant 0 : index
      %c0_23 = arith.constant 0 : index
      %29 = vector.load %arg5[%c0_21, %c0_22, %c0_23] : memref<1x16x1xf32, #tpu.memory_space<vmem>>, vector<1x16x1xf32>
      %30 = vector.shape_cast %29 : vector<1x16x1xf32> to vector<16x1xf32>
      %31 = vector.shape_cast %28 : vector<16x1xf32> to vector<1x16x1xf32>
      tpu.vector_store %arg5[%c0_21, %c0_22, %c0_23], %31 {strides = array<i32>} : memref<1x16x1xf32, #tpu.memory_space<vmem>>, vector<1x16x1xf32>,
    } else {
    }
    return
  }
  func.func @transform_0(%arg0: i32, %arg1: i32) -> (i32, i32, i32) {
    %c0_i32 = arith.constant 0 : i32
    %c0_i32_0 = arith.constant 0 : i32
    return %arg0, %c0_i32, %arg1 : i32, i32, i32
  }
  func.func @transform_1(%arg0: i32, %arg1: i32) -> (i32, i32) {
    %c0_i32 = arith.constant 0 : i32
    %c0_i32_0 = arith.constant 0 : i32
    %c0_i32_1 = arith.constant 0 : i32
    return %c0_i32, %c0_i32_0 : i32, i32
  }
  func.func @transform_2(%arg0: i32, %arg1: i32) -> (i32, i32) {
    %c0_i32 = arith.constant 0 : i32
    %c0_i32_0 = arith.constant 0 : i32
    %c0_i32_1 = arith.constant 0 : i32
    return %c0_i32, %c0_i32_0 : i32, i32
  }
  func.func @transform_3(%arg0: i32, %arg1: i32) -> (i32, i32, i32) {
    %c0_i32 = arith.constant 0 : i32
    %c0_i32_0 = arith.constant 0 : i32
    %c0_i32_1 = arith.constant 0 : i32
    return %arg0, %c0_i32, %c0_i32_0 : i32, i32, i32
  }
}

module attributes {stable_mosaic.version = 11 : i64} {
  func.func @scale_kernel(%arg0: i32, %arg1: i32, %arg2: memref<1x16x256xf32, #tpu.memory_space<vmem>>, %arg3: memref<1x16x1xf32, #tpu.memory_space<vmem>>, %arg4: memref<1x16x256xf32, #tpu.memory_space<vmem>>) attributes {dimension_semantics = [#tpu.dimension_semantics<parallel>, #tpu.dimension_semantics<parallel>], iteration_bounds = array<i64: 2, 1>, scalar_prefetch = 0 : i64, scratch_operands = 0 : i64, tpu.core_type = #tpu.core_type<tc>, window_params = [{transform_indices = @transform_0, window_bounds = array<i64: 1, 16, 256>}, {transform_indices = @transform_1, window_bounds = array<i64: 1, 16, 1>}, {transform_indices = @transform_2, window_bounds = array<i64: 1, 16, 256>}]} {
    %c0 = arith.constant 0 : index
    %c0_0 = arith.constant 0 : index
    %c0_1 = arith.constant 0 : index
    %0 = vector.load %arg2[%c0, %c0_0, %c0_1] : memref<1x16x256xf32, #tpu.memory_space<vmem>>, vector<1x16x256xf32>
    %1 = vector.shape_cast %0 : vector<1x16x256xf32> to vector<16x256xf32>
    %c0_2 = arith.constant 0 : index
    %c0_3 = arith.constant 0 : index
    %c0_4 = arith.constant 0 : index
    %2 = vector.load %arg3[%c0_2, %c0_3, %c0_4] : memref<1x16x1xf32, #tpu.memory_space<vmem>>, vector<1x16x1xf32>
    %3 = vector.shape_cast %2 : vector<1x16x1xf32> to vector<16x1xf32>
    %4 = vector.broadcast %3 : vector<16x1xf32> to vector<16x256xf32>
    %5 = arith.mulf %1, %4 : vector<16x256xf32>
    %c0_5 = arith.constant 0 : index
    %c0_6 = arith.constant 0 : index
    %c0_7 = arith.constant 0 : index
    %6 = vector.load %arg4[%c0_5, %c0_6, %c0_7] : memref<1x16x256xf32, #tpu.memory_space<vmem>>, vector<1x16x256xf32>
    %7 = vector.shape_cast %6 : vector<1x16x256xf32> to vector<16x256xf32>
    %8 = vector.shape_cast %5 : vector<16x256xf32> to vector<1x16x256xf32>
    tpu.vector_store %arg4[%c0_5, %c0_6, %c0_7], %8 {strides = array<i32>} : memref<1x16x256xf32, #tpu.memory_space<vmem>>, vector<1x16x256xf32>,
    return
  }
  func.func @transform_0(%arg0: i32, %arg1: i32) -> (i32, i32, i32) {
    %c0_i32 = arith.constant 0 : i32
    %c0_i32_0 = arith.constant 0 : i32
    return %arg0, %c0_i32, %arg1 : i32, i32, i32
  }
  func.func @transform_1(%arg0: i32, %arg1: i32) -> (i32, i32, i32) {
    %c0_i32 = arith.constant 0 : i32
    %c0_i32_0 = arith.constant 0 : i32
    %c0_i32_1 = arith.constant 0 : i32
    return %arg0, %c0_i32, %c0_i32_0 : i32, i32, i32
  }
  func.func @transform_2(%arg0: i32, %arg1: i32) -> (i32, i32, i32) {
    %c0_i32 = arith.constant 0 : i32
    %c0_i32_0 = arith.constant 0 : i32
    return %arg0, %c0_i32, %arg1 : i32, i32, i32
  }
}

</mosaic_0001>

<bundles_post_ra>
// kernel: s2fb_p_forward.9
= control target key start
LH: loop header
LB: loop body
LE: loop exit
PB: predicated region body
PF: predicated region fallthrough
CT: control target
= control target key end

     0   :  { %s472_s12 = smov 0   ;;  %s474_s13 = smov 0   ;;  %s521_s0 = inlined_call_operand.vmem [shape: f32[2,32,256], index: 0, kind: input, shape index: {}]   ;;  %s522_s1 = inlined_call_operand.vmem [shape: f32[16,32], index: 1, kind: input, shape index: {}]   ;;  %s523_s2 = inlined_call_operand.vmem [shape: f32[16,1], index: 2, kind: input, shape index: {}]   ;;  %s524_s3 = inlined_call_operand.vmem [shape: f32[2,16,256], index: 3, kind: output, shape index: {}]  }
   0x1   :  { %s476_s14 = smov 0  }
   0x2 LB: > { %s25_s15 = sadd.s32 1, %s445_s13  ;;  %p380_p0 = scmp.ge.s32.totalorder %s449_s14, 1  ;;  %s449_s14 = sphi %s476_s14, %s13_s14   ;;  %s445_s13 = sphi %s474_s13, %s526_s13   ;;  %s441_s12 = sphi %s472_s12, %s525_s12  }
   0x3   : > { %p27_p1 = scmp.ge.s32.totalorder %s25_s15, 2  ;;  %p158_p2 = scmp.lt.s32.totalorder %s449_s14, 3 }
   0x5   : > { %s528_s15 = smov (%p27_p1, %s25_s15), 0  ;;  %p159_p3 = pnand %p380_p0, %p158_p2 }
   0x6   : > { %p191_p4 = scmp.lt.s32.totalorder (!%p159_p3), %s441_s12, 1 }
   0x7   : > { %162 = sbr.rel (%p159_p3) target bundleno = 160 (0xa0), region = 32 }
   0xc   : > { %v220_v0 = vld [vmem:[%s523_s2] sm:$0xff]  ;;  %v451_v1 = vmov 0   ;;  %s530_s12 = smov (!%p191_p4, %s441_s12), 1  ;;  %vm232_vm0 = vcmask 261120   ;;  %v211_v11 = vld [vmem:[%s522_s1 + $0x8] sm:$0xff] }
   0xd   : > { %426 = vset.pattern.permute.xlu0 %v451_v1  ;;  %s391_s18 = sshll.u32 %s530_s12, 6  ;;  %v210_v10 = vld [vmem:[%s522_s1] sm:$0xff]  ;;  %v221_v12 = vld [vmem:[%s523_s2 + $0x8] sm:$0xff]  ;;  %s392_s28 = sshll.u32 %s530_s12, 5 }
   0xe   : > { %224 = vperm.xlu0 %426, %v220_v0   ;;  %s198_s21 = scalar_lea.vmem %s521_s0, %s391_s18  ;;  %s208_s4 = scalar_lea.vmem %s524_s3, %s392_s28 }
   0xf   : > { %v218_v2 = vld [vmem:[%s198_s21 + $0x30] sm:$0xff]  ;;  %v219_v3 = vld [vmem:[%s198_s21 + $0x38] sm:$0xff]  ;;  %v216_v4 = vld [vmem:[%s198_s21 + $0x20] sm:$0xff] }
  0x10   : > { %251 = vmatpush.msra.mxu0 %v218_v2  ;;  %393 = vmatpush.msra.mxu2 %v218_v2  ;;  %v217_v5 = vld [vmem:[%s198_s21 + $0x28] sm:$0xff]  ;;  %v214_v6 = vld [vmem:[%s198_s21 + $0x10] sm:$0xff]  ;;  %v215_v7 = vld [vmem:[%s198_s21 + $0x18] sm:$0xff] }
  0x11   : > { %274 = vmatpush.msra.mxu1 %v219_v3  ;;  %397 = vmatpush.msra.mxu3 %v219_v3  ;;  %v212_v8 = vld [vmem:[%s198_s21] sm:$0xff]  ;;  %v213_v9 = vld [vmem:[%s198_s21 + $0x8] sm:$0xff] }
  0x12   : > { %252 = vmatpush.msra.mxu0 %v216_v4  ;;  %394 = vmatpush.msra.mxu2 %v216_v4 }
  0x13   : > { %275 = vmatpush.msra.mxu1 %v217_v5  ;;  %398 = vmatpush.msra.mxu3 %v217_v5 }
  0x14   : > { %253 = vmatpush.msra.mxu0 %v214_v6  ;;  %395 = vmatpush.msra.mxu2 %v214_v6 }
  0x15   : > { %276 = vmatpush.msra.mxu1 %v215_v7  ;;  %399 = vmatpush.msra.mxu3 %v215_v7 }
  0x16   : > { %254 = vmatpush.msra.mxu0 %v212_v8  ;;  %396 = vmatpush.msra.mxu2 %v212_v8 }
  0x17   : > { %277 = vmatpush.msra.mxu1 %v213_v9  ;;  %400 = vmatpush.msra.mxu3 %v213_v9 }
  0x18   : > { %385 = vmatmul.msk.f32.vlgmr.msra.gmra.mxu0 %vm232_vm0, %v210_v10  ;;  %386 = vmatmul.msk.f32.vlgmr.msra.gmra.mxu2 %vm232_vm0, %v211_v11 }
  0x19   : > { %387 = vmatmul.msk.f32.vlgmr.msra.gmra.mxu1 %vm232_vm0, %v210_v10  ;;  %388 = vmatmul.msk.f32.vlgmr.msra.gmra.mxu3 %vm232_vm0, %v211_v11 }
  0x1a   : > { %229 = vperm.xlu0 %426, %v221_v12  }
  0x80   : > { %v225_v13 = vpop.permute.xlu0 %224 }
  0x8c   : > { %v230_v18 = vpop.permute.xlu0 %229 }
  0x95   : > { %v256_v14 = vpop.f32.mrf.mxu0 }
  0x96   : > { %v257_v15 = vadd.f32 %v256_v14, %v225_v13  ;;  %v279_v16 = vpop.f32.mrf.mxu1 }
  0x97   : > { %v280_v17 = vadd.f32 %v279_v16, %v225_v13 }
  0x98   : > { %285 = vst [vmem:[%s208_s4] sm:$0xff] %v257_v15 }
  0x99   : > { %286 = vst [vmem:[%s208_s4 + $0x8] sm:$0xff] %v280_v17 }
  0x9b   : > { %v259_v19 = vpop.f32.mrf.mxu2 }
  0x9c   : > { %v260_v20 = vadd.f32 %v259_v19, %v230_v18  ;;  %v282_v21 = vpop.f32.mrf.mxu3 }
  0x9d   : > { %v283_v22 = vadd.f32 %v282_v21, %v230_v18 }
  0x9e   : > { %287 = vst [vmem:[%s208_s4 + $0x10] sm:$0xff] %v260_v20 }
  0x9f   : > { %288 = vst [vmem:[%s208_s4 + $0x18] sm:$0xff] %v283_v22 }
  0xa0 PF: > { %s13_s14 = sadd.s32 1, %s449_s14   ;;  %s525_s12 = smov %s445_s13 }
  0xa1   : > { %p10_p5 = scmp.ge.s32.totalorder %s13_s14, 4   ;;  %s526_s13 = smov %s528_s15 }
  0xa3   :  { %12 = sbr.rel (!%p10_p5) target bundleno = 2 (0x2), region = 62 }

// kernel: s2fb_p_forward.14
= control target key start
LH: loop header
LB: loop body
LE: loop exit
PB: predicated region body
PF: predicated region fallthrough
CT: control target
= control target key end

     0   :  { %s501_s12 = smov 0   ;;  %s503_s13 = smov 0   ;;  %s553_s0 = inlined_call_operand.vmem [shape: f32[2,16,256], index: 0, kind: input, shape index: {}]   ;;  %s554_s1 = inlined_call_operand.vmem [shape: f32[4,16], index: 1, kind: input, shape index: {}]   ;;  %s555_s2 = inlined_call_operand.vmem [shape: f32[16,4], index: 2, kind: input, shape index: {}]   ;;  %s556_s3 = inlined_call_operand.vmem [shape: f32[2,16,1], index: 3, kind: output, shape index: {}]  }
   0x1   :  { %s505_s14 = smov 0  }
   0x2 LB: > { %s25_s15 = sadd.s32 1, %s474_s13  ;;  %p407_p0 = scmp.ge.s32.totalorder %s478_s14, 1  ;;  %s478_s14 = sphi %s505_s14, %s13_s14   ;;  %s474_s13 = sphi %s503_s13, %s558_s13   ;;  %s470_s12 = sphi %s501_s12, %s557_s12  }
   0x3   : > { %p27_p1 = scmp.ge.s32.totalorder %s25_s15, 2  ;;  %p156_p2 = scmp.lt.s32.totalorder %s478_s14, 3 }
   0x5   : > { %s560_s15 = smov (%p27_p1, %s25_s15), 0  ;;  %p157_p3 = pnand %p407_p0, %p156_p2 }
   0x6   : > { %p185_p4 = scmp.lt.s32.totalorder (!%p157_p3), %s470_s12, 1 }
   0x7   : > { %160 = sbr.rel (%p157_p3) target bundleno = 447 (0x1bf), region = 32 }
   0xc   : > { %vm203_vm0 = vcmask 7168   ;;  %v480_v0 = vmov 0.0   ;;  %s562_s12 = smov (!%p185_p4, %s470_s12), 1  ;;  %v230_v17 = vld [vmem:[%s554_s1] sm:$0xf]  ;;  %vm231_vm1 = vcmask 130048  }
   0xd   : > { %205 = vst.msk [vmem:[#allocation2 + $0x8] sm:$0xff] %vm203_vm0, %v480_v0  ;;  %s420_s16 = sshll.u32 %s562_s12, 5  ;;  %vm265_vm2 = vcmask 1043456   ;;  %v256_v20 = vld [vmem:[%s555_s2] sm:$0xff]  ;;  %vm258_vm3 = vcmask 31744   ;;  %v257_v21 = vld [vmem:[%s555_s2 + $0x8] sm:$0xff] }
   0xe   : > { %204 = vst.msk [vmem:[#allocation2] sm:$0xff] %vm203_vm0, %v480_v0  ;;  %s192_s19 = scalar_lea.vmem %s553_s0, %s420_s16  ;;  %s421_s26 = sshll.u32 %s562_s12, 4 }
   0xf   : > { %v210_v1 = vld [vmem:[%s192_s19 + $0x10] sm:$0xff]  ;;  %v211_v2 = vld [vmem:[%s192_s19 + $0x18] sm:$0xff]  ;;  %v208_v4 = vld [vmem:[%s192_s19] sm:$0xff]  ;;  %s198_s29 = scalar_lea.vmem %s556_s3, %s421_s26 }
  0x10   : > { %v215_v3 = vadd.f32 %v211_v2, %v210_v1  ;;  %v209_v5 = vld [vmem:[%s192_s19 + $0x8] sm:$0xff] }
  0x11   : > { %v212_v6 = vadd.f32 %v209_v5, %v208_v4 }
  0x12   : > { %216 = vadd.xlane.f32.xlu0 %v215_v3 }
  0x14   : > { %v207_v7 = vld [vmem:[#allocation2 + $0x8] sm:$0xff] }
  0x15   : > { %v206_v10 = vld [vmem:[#allocation2] sm:$0xff] }
  0x1a   : > { %213 = vadd.xlane.f32.xlu0 %v212_v6 }
  0x85   : > { %v217_v8 = vpop.xlane.xlu0 %216 }
  0x86   : > { %v219_v9 = vadd.f32 %v217_v8, %v207_v7 }
  0x88   : > { %222 = vst.msk [vmem:[#allocation2 + $0x8] sm:$0xff] %vm203_vm0, %v219_v9 }
  0x8d   : > { %v214_v11 = vpop.xlane.xlu0 %213 }
  0x8e   : > { %v218_v12 = vadd.f32 %v214_v11, %v206_v10 }
  0x8f   : > { %v227_v13 = vld [vmem:[#allocation2 + $0x8] sm:$0xff] }
  0x90   : > { %221 = vst.msk [vmem:[#allocation2] sm:$0xff] %vm203_vm0, %v218_v12  ;;  %v229_v14 = vmul.f32 0.00390625, %v227_v13 }
  0x92   : > { %249 = vmatpush.msra.mxu0 %v229_v14 }
  0x97   : > { %v226_v15 = vld [vmem:[#allocation2] sm:$0xff] }
  0x98   : > { %v228_v16 = vmul.f32 0.00390625, %v226_v15 }
  0x9a   : > { %250 = vmatpush.msra.mxu0 %v228_v16 }
  0x9b   : > { %412 = vmatmul.msk.f32.vlgmr.msra.gmra.mxu0 %vm231_vm1, %v230_v17 }
 0x118   : > { %v252_v18 = vpop.f32.mrf.mxu0 }
 0x119   : > { %v255_v19 = vmax.f32 %v252_v18, 0.0 }
 0x11b   : > { %413 = vmatpush.msk.msra.mxu1 %vm265_vm2, %v255_v19  ;;  %422 = vmatpush.msk.msra.mxu2 %vm265_vm2, %v255_v19 }
 0x11c   : > { %414 = vmatmul.msk.f32.vlgmr.msra.gmra.mxu1 %vm258_vm3, %v256_v20  ;;  %415 = vmatmul.msk.f32.vlgmr.msra.gmra.mxu2 %vm258_vm3, %v257_v21 }
 0x199   : > { %v286_v22 = vpop.f32.mrf.mxu1 }
 0x19a   : > { %v416_v23 = vmul.f32 -1.442695, %v286_v22 }
 0x19c   : > { %448 = vpow2.f32 %v416_v23 }
 0x19f   : > { %v289_v24 = vpop.f32.mrf.mxu2 }
 0x1a0   : > { %v417_v25 = vmul.f32 -1.442695, %v289_v24 }
 0x1a2   : > { %v449_v26 = vpop.eup %448  ;;  %450 = vpow2.f32 %v417_v25 }
 0x1a3   : > { %v298_v27 = vadd.f32 1.0, %v449_v26 }
 0x1a5   : > { %452 = vrcp.f32 %v298_v27  ;;  %v311_v33 = vand.u32 2147483648, %v298_v27  ;;  %vm305_vm4 = vweird.f32 %v298_v27  ;;  %v309_v35 = vand.u32 2147483647, %v298_v27 }
 0x1a7   : > { %v312_v39 = vor.u32 1.1754944e-38, %v311_v33  ;;  %vm310_vm7 = vcmp.eq.f32.partialorder %v309_v35, 8.507059e+37 }
 0x1a8   : > { %v451_v28 = vpop.eup %450 }
 0x1a9   : > { %v299_v29 = vadd.f32 1.0, %v451_v28 }
 0x1ab   : > { %v453_v30 = vpop.eup %452  ;;  %454 = vrcp.f32 %v299_v29  ;;  %v326_v43 = vand.u32 2147483648, %v299_v29  ;;  %v324_v46 = vand.u32 2147483647, %v299_v29  ;;  %vm320_vm9 = vweird.f32 %v299_v29 }
 0x1ac   : > { %v301_v31 = vmul.f32 %v453_v30, %v298_v27  ;;  %vm306_vm5 = vweird.f32 %v453_v30 }
 0x1ad   : > { %vm307_vm6 = vmor %vm305_vm4, %vm306_vm5  ;;  %v327_v48 = vor.u32 1.1754944e-38, %v326_v43  ;;  %vm325_vm11 = vcmp.eq.f32.partialorder %v324_v46, 8.507059e+37 }
 0x1ae   : > { %v302_v32 = vsub.f32 1.0, %v301_v31 }
 0x1b0   : > { %v303_v34 = vmul.f32 %v453_v30, %v302_v32 }
 0x1b1   : > { %v455_v36 = vpop.eup %454 }
 0x1b2   : > { %v304_v37 = vadd.f32 %v453_v30, %v303_v34  ;;  %v316_v38 = vmul.f32 %v455_v36, %v299_v29  ;;  %vm321_vm8 = vweird.f32 %v455_v36 }
 0x1b3   : > { %vm322_vm10 = vmor %vm320_vm9, %vm321_vm8 }
 0x1b4   : > { %v308_v40 = vsel %vm307_vm6, %v453_v30, %v304_v37  ;;  %v317_v41 = vsub.f32 1.0, %v316_v38 }
 0x1b5   : > { %v313_v42 = vsel %vm310_vm7, %v312_v39, %v308_v40 }
 0x1b6   : > { %v330_v44 = vadd.f32 1.0, %v313_v42  ;;  %v318_v45 = vmul.f32 %v455_v36, %v317_v41 }
 0x1b8   : > { %332 = vst.msk [vmem:[%s198_s29] sm:$0xff] %vm203_vm0, %v330_v44  ;;  %v319_v47 = vadd.f32 %v455_v36, %v318_v45 }
 0x1ba   : > { %v323_v49 = vsel %vm322_vm10, %v455_v36, %v319_v47 }
 0x1bb   : > { %v328_v50 = vsel %vm325_vm11, %v327_v48, %v323_v49 }
 0x1bc   : > { %v331_v51 = vadd.f32 1.0, %v328_v50 }
 0x1be   : > { %333 = vst.msk [vmem:[%s198_s29 + $0x8] sm:$0xff] %vm203_vm0, %v331_v51 }
 0x1bf PF: > { %s13_s14 = sadd.s32 1, %s478_s14   ;;  %s557_s12 = smov %s474_s13 }
 0x1c0   : > { %p10_p5 = scmp.ge.s32.totalorder %s13_s14, 4   ;;  %s558_s13 = smov %s560_s15 }
 0x1c2   :  { %12 = sbr.rel (!%p10_p5) target bundleno = 2 (0x2), region = 70 }

// kernel: s2fb_p_forward.15
= control target key start
LH: loop header
LB: loop body
LE: loop exit
PB: predicated region body
PF: predicated region fallthrough
CT: control target
= control target key end

     0   :  { %s408_s9 = smov 0   ;;  %s410_s10 = smov 0   ;;  %s444_s0 = inlined_call_operand.vmem [shape: f32[2,16,256], index: 0, kind: input, shape index: {}]   ;;  %s445_s1 = inlined_call_operand.vmem [shape: f32[2,16,1], index: 1, kind: input, shape index: {}]   ;;  %s446_s2 = inlined_call_operand.vmem [shape: f32[2,16,256], index: 2, kind: output, shape index: {}]  }
   0x1   :  { %s412_s11 = smov 0  }
   0x2 LB: > { %s24_s12 = sadd.s32 1, %s386_s10  ;;  %p330_p0 = scmp.ge.s32.totalorder %s390_s11, 1  ;;  %s390_s11 = sphi %s412_s11, %s12_s11   ;;  %s386_s10 = sphi %s410_s10, %s448_s10   ;;  %s382_s9 = sphi %s408_s9, %s447_s9  }
   0x3   : > { %p26_p1 = scmp.ge.s32.totalorder %s24_s12, 2  ;;  %p143_p2 = scmp.lt.s32.totalorder %s390_s11, 3 }
   0x5   : > { %s450_s12 = smov (%p26_p1, %s24_s12), 0  ;;  %p144_p3 = pnand %p330_p0, %p143_p2 }
   0x6   : > { %p179_p4 = scmp.lt.s32.totalorder (!%p144_p3), %s382_s9, 1 }
   0x7   : > { %147 = sbr.rel (%p144_p3) target bundleno = 143 (0x8f), region = 28 }
   0xc   : > { %v392_v0 = vmov 0   ;;  %s452_s9 = smov (!%p179_p4, %s382_s9), 1 }
   0xd   : > { %367 = vset.pattern.permute.xlu0 %v392_v0  ;;  %s340_s13 = sshll.u32 %s452_s9, 4  ;;  %s339_s17 = sshll.u32 %s452_s9, 5 }
   0xe   : > { %s192_s16 = scalar_lea.vmem %s445_s1, %s340_s13  ;;  %s186_s20 = scalar_lea.vmem %s444_s0, %s339_s17 }
   0xf   : > { %v207_v1 = vld [vmem:[%s192_s16] sm:$0xff]  ;;  %v208_v2 = vld [vmem:[%s192_s16 + $0x8] sm:$0xff]  ;;  %s201_s23 = scalar_lea.vmem %s446_s2, %s339_s17  ;;  %v205_v8 = vld [vmem:[%s186_s20 + $0x10] sm:$0xff] }
  0x10   : > { %211 = vperm.xlu0 %367, %v207_v1   ;;  %v203_v3 = vld [vmem:[%s186_s20] sm:$0xff]  ;;  %v204_v4 = vld [vmem:[%s186_s20 + $0x8] sm:$0xff]  ;;  %v206_v9 = vld [vmem:[%s186_s20 + $0x18] sm:$0xff] }
  0x18   : > { %216 = vperm.xlu0 %367, %v208_v2  }
  0x82   : > { %v212_v5 = vpop.permute.xlu0 %211 }
  0x83   : > { %v219_v6 = vmul.f32 %v212_v5, %v203_v3  ;;  %v220_v7 = vmul.f32 %v212_v5, %v204_v4 }
  0x85   : > { %223 = vst [vmem:[%s201_s23] sm:$0xff] %v219_v6 }
  0x86   : > { %224 = vst [vmem:[%s201_s23 + $0x8] sm:$0xff] %v220_v7 }
  0x8a   : > { %v217_v10 = vpop.permute.xlu0 %216 }
  0x8b   : > { %v221_v11 = vmul.f32 %v217_v10, %v205_v8  ;;  %v222_v12 = vmul.f32 %v217_v10, %v206_v9 }
  0x8d   : > { %225 = vst [vmem:[%s201_s23 + $0x10] sm:$0xff] %v221_v11 }
  0x8e   : > { %226 = vst [vmem:[%s201_s23 + $0x18] sm:$0xff] %v222_v12 }
  0x8f PF: > { %s12_s11 = sadd.s32 1, %s390_s11   ;;  %s447_s9 = smov %s386_s10 }
  0x90   : > { %p9_p5 = scmp.ge.s32.totalorder %s12_s11, 4   ;;  %s448_s10 = smov %s450_s12 }
  0x92   :  { %11 = sbr.rel (!%p9_p5) target bundleno = 2 (0x2), region = 61 }

// kernel: s2fb_p_forward.8
= control target key start
LH: loop header
LB: loop body
LE: loop exit
PB: predicated region body
PF: predicated region fallthrough
CT: control target
= control target key end

     0   :  { %s7965_s12 = smov 0   ;;  %s14914_s0 = inlined_call_operand.vmem [shape: f32[2,32,18,18], index: 0, kind: input, shape index: {}]   ;;  %s14915_s1 = inlined_call_operand.vmem [shape: f32[9,32,1,1], index: 1, kind: input, shape index: {}]   ;;  %s14916_s2 = inlined_call_operand.vmem [shape: f32[32,1,1], index: 2, kind: input, shape index: {}]   ;;  %s14917_s3 = inlined_call_operand.vmem [shape: f32[2,32,16,16], index: 3, kind: output, shape index: {}]  }
   0x1 LB: > { %s6989_s13 = sadd.s32 4294967295, %s7940_s12   ;;  %p6993_p0 = scmp.ge.s32.totalorder %s7940_s12, 1  ;;  %s7940_s12 = sphi %s7965_s12, %s13_s12  }
   0x2   : > { %p137_p1 = scmp.lt.s32.totalorder %s7940_s12, 3 }
   0x4   : > { %p138_p2 = pnand %p6993_p0, %p137_p1 }
   0x6   : > { %141 = sbr.rel (%p138_p2) target bundleno = 2266 (0x8da), region = 32 }
   0xb   : > { %v7271_v0 = vld [vmem:[%s14915_s1 + $0x4] ss:$0 sm:$0xff]  ;;  %v7942_v1 = vmov 0   ;;  %v7272_v2 = vld [vmem:[%s14915_s1 + $0x2] ss:$0 sm:$0xff]  ;;  %p161_p3 = scmp.lt.s32.totalorder %s6989_s13, 1 }
   0xc   : > { %7270 = vset.pattern.permute.xlu2 %v7942_v1  ;;  %7269 = vset.pattern.permute.xlu1 %v7942_v1  ;;  %v7273_v3 = vld [vmem:[%s14915_s1] ss:$0 sm:$0xff]  ;;  %v7274_v4 = vld [vmem:[%s14915_s1 + $0x5] ss:$0 sm:$0xff]  ;;  %v7275_v5 = vld [vmem:[%s14915_s1 + $0x3] ss:$0 sm:$0xff] }
   0xd   : > { %7268 = vset.pattern.permute.xlu0 %v7942_v1  ;;  %380 = vperm.xlu2 %7270, %v7271_v0   ;;  %v7276_v6 = vld [vmem:[%s14915_s1 + $0x1] ss:$0 sm:$0xff]  ;;  %v7277_v7 = vld [vmem:[%s14915_s1 + $0x8] ss:$0 sm:$0xff]  ;;  %v7278_v8 = vld [vmem:[%s14915_s1 + $0x7] ss:$0 sm:$0xff] }
   0xe   : > { %372 = vperm.xlu1 %7269, %v7272_v2   ;;  %364 = vperm.xlu0 %7268, %v7273_v3   ;;  %v7279_v9 = vld [vmem:[%s14915_s1 + $0x6] ss:$0 sm:$0xff]  ;;  %v7280_v10 = vld [vmem:[%s14915_s1 + $0xb] ss:$0 sm:$0xff]  ;;  %v7281_v11 = vld [vmem:[%s14915_s1 + $0xa] ss:$0 sm:$0xff] }
   0xf   : > { %v7282_v12 = vld [vmem:[%s14915_s1 + $0x9] ss:$0 sm:$0xff]  ;;  %v7283_v13 = vld [vmem:[%s14915_s1 + $0xe] ss:$0 sm:$0xff]  ;;  %v7284_v14 = vld [vmem:[%s14915_s1 + $0xd] ss:$0 sm:$0xff] }
  0x10   : > { %v7285_v15 = vld [vmem:[%s14915_s1 + $0xc] ss:$0 sm:$0xff]  ;;  %v7286_v16 = vld [vmem:[%s14915_s1 + $0x11] ss:$0 sm:$0xff]  ;;  %v7287_v17 = vld [vmem:[%s14915_s1 + $0x10] ss:$0 sm:$0xff] }
  0x11   : > { %v7288_v18 = vld [vmem:[%s14915_s1 + $0xf] ss:$0 sm:$0xff]  ;;  %v7289_v19 = vld [vmem:[%s14915_s1 + $0x14] ss:$0 sm:$0xff]  ;;  %v7290_v20 = vld [vmem:[%s14915_s1 + $0x13] ss:$0 sm:$0xff] }
  0x12   : > { %v7291_v21 = vld [vmem:[%s14915_s1 + $0x12] ss:$0 sm:$0xff]  ;;  %v7292_v22 = vld [vmem:[%s14915_s1 + $0x17] ss:$0 sm:$0xff]  ;;  %v7293_v23 = vld [vmem:[%s14915_s1 + $0x16] ss:$0 sm:$0xff] }
  0x13   : > { %v7294_v24 = vld [vmem:[%s14915_s1 + $0x15] ss:$0 sm:$0xff]  ;;  %v7295_v25 = vld [vmem:[%s14915_s1 + $0x1a] ss:$0 sm:$0xff]  ;;  %v7296_v26 = vld [vmem:[%s14915_s1 + $0x19] ss:$0 sm:$0xff] }
  0x14   : > { %v7297_v27 = vld [vmem:[%s14915_s1 + $0x18] ss:$0 sm:$0xff]  ;;  %v7298_v28 = vld [vmem:[%s14915_s1 + $0x1d] ss:$0 sm:$0xff]  ;;  %v7299_v29 = vld [vmem:[%s14915_s1 + $0x1c] ss:$0 sm:$0xff] }
  0x15   : > { %384 = vperm.xlu2 %7270, %v7274_v4   ;;  %v7300_v30 = vld [vmem:[%s14915_s1 + $0x1b] ss:$0 sm:$0xff]  ;;  %v7301_v31 = vld [vmem:[%s14915_s1 + $0x20] ss:$0 sm:$0xff]  ;;  %v7302_v32 = vld [vmem:[%s14915_s1 + $0x1f] ss:$0 sm:$0xff] }
  0x16   : > { %376 = vperm.xlu1 %7269, %v7275_v5   ;;  %368 = vperm.xlu0 %7268, %v7276_v6   ;;  %v7303_v33 = vld [vmem:[%s14915_s1 + $0x1e] ss:$0 sm:$0xff]  ;;  %v7304_v34 = vld [vmem:[%s14915_s1 + $0x23] ss:$0 sm:$0xff]  ;;  %v7305_v35 = vld [vmem:[%s14915_s1 + $0x22] ss:$0 sm:$0xff] }
  0x17   : > { %v7306_v36 = vld [vmem:[%s14915_s1 + $0x21] ss:$0 sm:$0xff]  ;;  %v7307_v38 = vld [vmem:[%s14915_s1 + $0x26] ss:$0 sm:$0xff]  ;;  %v7308_v39 = vld [vmem:[%s14915_s1 + $0x25] ss:$0 sm:$0xff] }
  0x18   : > { %v7309_v40 = vld [vmem:[%s14915_s1 + $0x24] ss:$0 sm:$0xff]  ;;  %v7310_v42 = vld [vmem:[%s14915_s1 + $0x29] ss:$0 sm:$0xff]  ;;  %v7311_v43 = vld [vmem:[%s14915_s1 + $0x28] ss:$0 sm:$0xff] }
  0x19   : > { %v7312_v44 = vld [vmem:[%s14915_s1 + $0x27] ss:$0 sm:$0xff]  ;;  %v7313_v46 = vld [vmem:[%s14915_s1 + $0x2c] ss:$0 sm:$0xff]  ;;  %v7314_v47 = vld [vmem:[%s14915_s1 + $0x2b] ss:$0 sm:$0xff] }
  0x1a   : > { %v7315_v48 = vld [vmem:[%s14915_s1 + $0x2a] ss:$0 sm:$0xff]  ;;  %v7316_v52 = vld [vmem:[%s14915_s1 + $0x2f] ss:$0 sm:$0xff]  ;;  %v7317_v53 = vld [vmem:[%s14915_s1 + $0x2e] ss:$0 sm:$0xff] }
  0x1b   : > { %v7318_v54 = vld [vmem:[%s14915_s1 + $0x2d] ss:$0 sm:$0xff]  ;;  %v7319_v58 = vld [vmem:[%s14915_s1 + $0x32] ss:$0 sm:$0xff]  ;;  %v7320_v59 = vld [vmem:[%s14915_s1 + $0x31] ss:$0 sm:$0xff] }
  0x1c   : > { %v7321_v60 = vld [vmem:[%s14915_s1 + $0x30] ss:$0 sm:$0xff]  ;;  %v7322_v0 = vld [vmem:[%s14915_s1 + $0x35] ss:$0 sm:$0xff]  ;;  %v7323_v1 = vld [vmem:[%s14915_s1 + $0x34] ss:$0 sm:$0xff] }
  0x1d   : > { %396 = vperm.xlu2 %7270, %v7277_v7   ;;  %v7324_v2 = vld [vmem:[%s14915_s1 + $0x33] ss:$0 sm:$0xff]  ;;  %v7325_v5 = vld [vmem:[%s14915_s1 + $0x38] ss:$0 sm:$0xff]  ;;  %v7326_v7 = vld [vmem:[%s14915_s1 + $0x37] ss:$0 sm:$0xff] }
  0x1e   : > { %392 = vperm.xlu1 %7269, %v7278_v8   ;;  %388 = vperm.xlu0 %7268, %v7279_v9   ;;  %v7327_v8 = vld [vmem:[%s14915_s1 + $0x36] ss:$0 sm:$0xff]  ;;  %s16648_s13 = smov (!%p161_p3, %s6989_s13), 1  ;;  %s7943_s21 = smov 127   ;;  %vm2254_vm0 = vcmask 1046528   ;;  %vm4626_vm1 = vcmask 1045504  }
  0x1f   : > { %s7256_s15 = smul.u32 768, %s16648_s13  ;;  %vm6869_vm2 = vcmask 130048  }
  0x21   : > { %s8223_s20 = scalar_lea.vmem %s14914_s0, %s7256_s15  ;;  %s7944_s15 = smov 126  }
  0x25   : > { %408 = vperm.xlu2 %7270, %v7280_v10  }
  0x26   : > { %404 = vperm.xlu1 %7269, %v7281_v11   ;;  %400 = vperm.xlu0 %7268, %v7282_v12   ;;  %v7328_v12 = vld [vmem:[%s14915_s1 + $0x3b] ss:$0 sm:$0xff] }
  0x2d   : > { %420 = vperm.xlu2 %7270, %v7283_v13   ;;  %v7329_v13 = vld [vmem:[%s14915_s1 + $0x3a] ss:$0 sm:$0xff] }
  0x2e   : > { %416 = vperm.xlu1 %7269, %v7284_v14   ;;  %412 = vperm.xlu0 %7268, %v7285_v15   ;;  %v7330_v14 = vld [vmem:[%s14915_s1 + $0x39] ss:$0 sm:$0xff] }
  0x35   : > { %432 = vperm.xlu2 %7270, %v7286_v16  }
  0x36   : > { %428 = vperm.xlu1 %7269, %v7287_v17   ;;  %424 = vperm.xlu0 %7268, %v7288_v18   ;;  %v7331_v18 = vld [vmem:[%s14915_s1 + $0x3e] ss:$0 sm:$0xff] }
  0x3d   : > { %444 = vperm.xlu2 %7270, %v7289_v19   ;;  %v7332_v19 = vld [vmem:[%s14915_s1 + $0x3d] ss:$0 sm:$0xff] }
  0x3e   : > { %440 = vperm.xlu1 %7269, %v7290_v20   ;;  %436 = vperm.xlu0 %7268, %v7291_v21   ;;  %v7333_v20 = vld [vmem:[%s14915_s1 + $0x3c] ss:$0 sm:$0xff] }
  0x45   : > { %456 = vperm.xlu2 %7270, %v7292_v22  }
  0x46   : > { %452 = vperm.xlu1 %7269, %v7293_v23   ;;  %448 = vperm.xlu0 %7268, %v7294_v24   ;;  %v7334_v24 = vld [vmem:[%s14915_s1 + $0x3f] ss:$0 sm:$0xff] }
  0x4d   : > { %468 = vperm.xlu2 %7270, %v7295_v25   ;;  %v8226_v25 = vld [vmem:[%s8223_s20] sm:$0xff] }
  0x4e   : > { %464 = vperm.xlu1 %7269, %v7296_v26   ;;  %460 = vperm.xlu0 %7268, %v7297_v27   ;;  %v8229_v26 = vld [vmem:[%s8223_s20 + $0x8] sm:$0xff] }
  0x55   : > { %480 = vperm.xlu2 %7270, %v7298_v28  }
  0x56   : > { %476 = vperm.xlu1 %7269, %v7299_v29   ;;  %472 = vperm.xlu0 %7268, %v7300_v30  }
  0x5d   : > { %717 = vperm.xlu2 %7270, %v7301_v31  }
  0x5e   : > { %488 = vperm.xlu1 %7269, %v7302_v32   ;;  %484 = vperm.xlu0 %7268, %v7303_v33  }
  0x65   : > { %729 = vperm.xlu2 %7270, %v7304_v34  }
  0x66   : > { %725 = vperm.xlu1 %7269, %v7305_v35   ;;  %721 = vperm.xlu0 %7268, %v7306_v36  }
  0x67   : > { %v8081_v37 = vpop.permute.xlu2 %380 }
  0x68   : > { %15145 = vst [vmem:[#allocation2_spill] sm:$0xff] %v8081_v37  ;;  %v8519_v37 = vld [vmem:[%s8223_s20 + $0x248] sm:$0xff] }
  0x69   : > { %15186 = vst [vmem:[#allocation43_spill] sm:$0xff] %v8519_v37 }
  0x6d   : > { %741 = vperm.xlu2 %7270, %v7307_v38  }
  0x6e   : > { %737 = vperm.xlu1 %7269, %v7308_v39   ;;  %733 = vperm.xlu0 %7268, %v7309_v40  }
  0x6f   : > { %v8092_v41 = vpop.permute.xlu2 %384 }
  0x70   : > { %15146 = vst [vmem:[#allocation3_spill] sm:$0xff] %v8092_v41 }
  0x75   : > { %753 = vperm.xlu2 %7270, %v7310_v42   ;;  %v8252_v42 = vld [vmem:[%s8223_s20 + $0x30] sm:$0xff] }
  0x76   : > { %749 = vperm.xlu1 %7269, %v7311_v43   ;;  %745 = vperm.xlu0 %7268, %v7312_v44   ;;  %v8255_v44 = vld [vmem:[%s8223_s20 + $0x18] sm:$0xff] }
  0x77   : > { %v8103_v45 = vpop.permute.xlu2 %396 }
  0x78   : > { %15147 = vst [vmem:[#allocation4_spill] sm:$0xff] %v8103_v45  ;;  %v8498_v45 = vld [vmem:[%s8223_s20 + $0x228] sm:$0xff] }
  0x79   : > { %15182 = vst [vmem:[#allocation39_spill] sm:$0xff] %v8498_v45 }
  0x7d   : > { %765 = vperm.xlu2 %7270, %v7313_v46   ;;  %v8258_v46 = vld [vmem:[%s8223_s20 + $0x20] sm:$0xff] }
  0x7e   : > { %761 = vperm.xlu1 %7269, %v7314_v47   ;;  %757 = vperm.xlu0 %7268, %v7315_v48  }
  0x7f   : > { %v8114_v49 = vpop.permute.xlu2 %408 }
  0x80   : > { %15148 = vst [vmem:[#allocation5_spill] sm:$0xff] %v8114_v49  ;;  %v8116_v50 = vpop.permute.xlu1 %372  ;;  %v8118_v51 = vpop.permute.xlu0 %364 }
  0x81   : > { %15149 = vst [vmem:[#allocation6_spill] sm:$0xff] %v8116_v50 }
  0x82   : > { %15150 = vst [vmem:[#allocation7_spill] sm:$0xff] %v8118_v51  ;;  %v8478_v51 = vld [vmem:[%s8223_s20 + $0x1e8] sm:$0xff] }
  0x85   : > { %777 = vperm.xlu2 %7270, %v7316_v52  }
  0x86   : > { %773 = vperm.xlu1 %7269, %v7317_v53   ;;  %769 = vperm.xlu0 %7268, %v7318_v54  }
  0x87   : > { %v8129_v55 = vpop.permute.xlu2 %420 }
  0x88   : > { %15151 = vst [vmem:[#allocation8_spill] sm:$0xff] %v8129_v55  ;;  %v8131_v56 = vpop.permute.xlu1 %376  ;;  %v8133_v57 = vpop.permute.xlu0 %368  ;;  %v8475_v55 = vld [vmem:[%s8223_s20 + $0x200] sm:$0xff] }
  0x89   : > { %15152 = vst [vmem:[#allocation9_spill] sm:$0xff] %v8131_v56 }
  0x8a   : > { %15153 = vst [vmem:[#allocation10_spill] sm:$0xff] %v8133_v57  ;;  %v8457_v57 = vld [vmem:[%s8223_s20 + $0x1c8] sm:$0xff] }
  0x8d   : > { %789 = vperm.xlu2 %7270, %v7319_v58   ;;  %v8267_v58 = vld [vmem:[%s8223_s20 + $0x50] sm:$0xff] }
  0x8e   : > { %785 = vperm.xlu1 %7269, %v7320_v59   ;;  %781 = vperm.xlu0 %7268, %v7321_v60   ;;  %v8270_v59 = vld [vmem:[%s8223_s20 + $0x38] sm:$0xff]  ;;  %v8273_v60 = vld [vmem:[%s8223_s20 + $0x48] sm:$0xff] }
  0x8f   : > { %v8144_v61 = vpop.permute.xlu2 %432 }
  0x90   : > { %15154 = vst [vmem:[#allocation11_spill] sm:$0xff] %v8144_v61  ;;  %v8146_v62 = vpop.permute.xlu1 %392  ;;  %v8148_v63 = vpop.permute.xlu0 %388  ;;  %v8454_v61 = vld [vmem:[%s8223_s20 + $0x1e0] sm:$0xff] }
  0x91   : > { %15155 = vst [vmem:[#allocation12_spill] sm:$0xff] %v8146_v62 }
  0x92   : > { %15156 = vst [vmem:[#allocation13_spill] sm:$0xff] %v8148_v63  ;;  %v8439_v63 = vld [vmem:[%s8223_s20 + $0x1b0] sm:$0xff] }
  0x95   : > { %801 = vperm.xlu2 %7270, %v7322_v0  }
  0x96   : > { %797 = vperm.xlu1 %7269, %v7323_v1   ;;  %793 = vperm.xlu0 %7268, %v7324_v2  }
  0x97   : > { %v8159_v3 = vpop.permute.xlu2 %444 }
  0x98   : > { %15157 = vst [vmem:[#allocation14_spill] sm:$0xff] %v8159_v3  ;;  %v8161_v4 = vpop.permute.xlu1 %404  ;;  %v8166_v6 = vpop.permute.xlu0 %400  ;;  %v8436_v3 = vld [vmem:[%s8223_s20 + $0x1a0] sm:$0xff] }
  0x99   : > { %15158 = vst [vmem:[#allocation15_spill] sm:$0xff] %v8161_v4  ;;  %v8433_v4 = vld [vmem:[%s8223_s20 + $0x1b8] sm:$0xff] }
  0x9a   : > { %15159 = vst [vmem:[#allocation16_spill] sm:$0xff] %v8166_v6  ;;  %v8422_v6 = vld [vmem:[%s8223_s20 + $0x188] sm:$0xff] }
  0x9d   : > { %813 = vperm.xlu2 %7270, %v7325_v5  }
  0x9e   : > { %809 = vperm.xlu1 %7269, %v7326_v7   ;;  %805 = vperm.xlu0 %7268, %v7327_v8   ;;  %v8282_v8 = vld [vmem:[%s8223_s20 + $0x78] sm:$0xff] }
  0x9f   : > { %v8174_v9 = vpop.permute.xlu2 %456 }
  0xa0   : > { %15160 = vst [vmem:[#allocation17_spill] sm:$0xff] %v8174_v9  ;;  %v8176_v10 = vpop.permute.xlu1 %416  ;;  %v8178_v11 = vpop.permute.xlu0 %412  ;;  %v8419_v9 = vld [vmem:[%s8223_s20 + $0x180] sm:$0xff] }
  0xa1   : > { %15161 = vst [vmem:[#allocation18_spill] sm:$0xff] %v8176_v10 }
  0xa2   : > { %15162 = vst [vmem:[#allocation19_spill] sm:$0xff] %v8178_v11  ;;  %v8416_v11 = vld [vmem:[%s8223_s20 + $0x198] sm:$0xff] }
  0xa5   : > { %825 = vperm.xlu2 %7270, %v7328_v12   ;;  %v8285_v12 = vld [vmem:[%s8223_s20 + $0x60] sm:$0xff] }
  0xa6   : > { %821 = vperm.xlu1 %7269, %v7329_v13   ;;  %817 = vperm.xlu0 %7268, %v7330_v14   ;;  %v8288_v13 = vld [vmem:[%s8223_s20 + $0x68] sm:$0xff] }
  0xa7   : > { %v8189_v15 = vpop.permute.xlu2 %468 }
  0xa8   : > { %15163 = vst [vmem:[#allocation20_spill] sm:$0xff] %v8189_v15  ;;  %v8193_v16 = vpop.permute.xlu1 %428  ;;  %v8195_v17 = vpop.permute.xlu0 %424  ;;  %v8403_v15 = vld [vmem:[%s8223_s20 + $0x168] sm:$0xff] }
  0xa9   : > { %15164 = vst [vmem:[#allocation21_spill] sm:$0xff] %v8193_v16  ;;  %v8400_v16 = vld [vmem:[%s8223_s20 + $0x158] sm:$0xff] }
  0xaa   : > { %15165 = vst [vmem:[#allocation22_spill] sm:$0xff] %v8195_v17 }
  0xad   : > { %837 = vperm.xlu2 %7270, %v7331_v18  }
  0xae   : > { %833 = vperm.xlu1 %7269, %v7332_v19   ;;  %829 = vperm.xlu0 %7268, %v7333_v20  }
  0xaf   : > { %v8210_v21 = vpop.permute.xlu2 %480 }
  0xb0   : > { %15166 = vst [vmem:[#allocation23_spill] sm:$0xff] %v8210_v21  ;;  %v8213_v22 = vpop.permute.xlu1 %440  ;;  %v8215_v23 = vpop.permute.xlu0 %436 }
  0xb1   : > { %15167 = vst [vmem:[#allocation24_spill] sm:$0xff] %v8213_v22  ;;  %v8386_v22 = vld [vmem:[%s8223_s20 + $0x140] sm:$0xff] }
  0xb2   : > { %15168 = vst [vmem:[#allocation25_spill] sm:$0xff] %v8215_v23  ;;  %v8383_v23 = vld [vmem:[%s8223_s20 + $0x138] sm:$0xff] }
  0xb6   : > { %841 = vperm.xlu0 %7268, %v7334_v24   ;;  %v8297_v24 = vld [vmem:[%s8223_s20 + $0x98] sm:$0xff] }
  0xb7   : > { %v718_v27 = vpop.permute.xlu2 %717 }
  0xb8   : > { %v844_v28 = vmul.f32 %v718_v27, %v8226_v25  ;;  %v845_v29 = vmul.f32 %v718_v27, %v8229_v26  ;;  %v8233_v30 = vpop.permute.xlu1 %452  ;;  %v8235_v31 = vpop.permute.xlu0 %448  ;;  %v8300_v27 = vld [vmem:[%s8223_s20 + $0x80] sm:$0xff] }
  0xb9   : > { %15169 = vst [vmem:[#allocation26_spill] sm:$0xff] %v8233_v30  ;;  %v8380_v30 = vld [vmem:[%s8223_s20 + $0x150] sm:$0xff] }
  0xba   : > { %15170 = vst [vmem:[#allocation27_spill] sm:$0xff] %v8235_v31  ;;  %974 = vrot.lane.b32.xlu2 %v845_v29, %s7943_s21  ;;  %972 = vrot.lane.b32.xlu1 %v844_v28, %s7943_s21  ;;  %v8303_v28 = vld [vmem:[%s8223_s20 + $0x90] sm:$0xff] }
  0xbf   : > { %v730_v36 = vpop.permute.xlu2 %729 }
  0xc0   : > { %v8239_v32 = vpop.permute.xlu1 %464  ;;  %v8241_v33 = vpop.permute.xlu0 %460  ;;  %v851_v0 = vmul.f32 %v730_v36, %v8267_v58  ;;  %v850_v1 = vmul.f32 %v730_v36, %v8273_v60 }
  0xc1   : > { %15171 = vst [vmem:[#allocation28_spill] sm:$0xff] %v8239_v32 }
  0xc2   : > { %15172 = vst [vmem:[#allocation29_spill] sm:$0xff] %v8241_v33  ;;  %v8369_v33 = vld [vmem:[%s8223_s20 + $0x120] sm:$0xff] }
  0xc7   : > { %v742_v40 = vpop.permute.xlu2 %741 }
  0xc8   : > { %v8243_v34 = vpop.permute.xlu1 %476  ;;  %v8245_v35 = vpop.permute.xlu0 %472  ;;  %v857_v29 = vmul.f32 %v742_v40, %v8297_v24  ;;  %v856_v36 = vmul.f32 %v742_v40, %v8303_v28  ;;  %v8320_v40 = vld [vmem:[%s8223_s20 + $0xb0] sm:$0xff] }
  0xc9   : > { %15173 = vst [vmem:[#allocation30_spill] sm:$0xff] %v8243_v34  ;;  %v8366_v34 = vld [vmem:[%s8223_s20 + $0x110] sm:$0xff] }
  0xca   : > { %15174 = vst [vmem:[#allocation31_spill] sm:$0xff] %v8245_v35 }
  0xcf   : > { %v754_v54 = vpop.permute.xlu2 %753 }
  0xd0   : > { %v8247_v38 = vpop.permute.xlu1 %488  ;;  %v8249_v39 = vpop.permute.xlu0 %484 }
  0xd1   : > { %15175 = vst [vmem:[#allocation32_spill] sm:$0xff] %v8247_v38  ;;  %v8354_v38 = vld [vmem:[%s8223_s20 + $0xf8] sm:$0xff] }
  0xd2   : > { %15176 = vst [vmem:[#allocation33_spill] sm:$0xff] %v8249_v39  ;;  %v8351_v39 = vld [vmem:[%s8223_s20 + $0xf0] sm:$0xff] }
  0xd7   : > { %v766_v14 = vpop.permute.xlu2 %765 }
  0xd8   : > { %v726_v43 = vpop.permute.xlu1 %725  ;;  %v722_v48 = vpop.permute.xlu0 %721 }
  0xd9   : > { %v848_v47 = vmul.f32 %v726_v43, %v8252_v42  ;;  %v846_v52 = vmul.f32 %v722_v48, %v8255_v44  ;;  %v847_v53 = vmul.f32 %v722_v48, %v8258_v46  ;;  %v849_v2 = vmul.f32 %v726_v43, %v8270_v59 }
  0xdb   : > { %980 = vrot.lane.b32.xlu2 %v848_v47, %s7943_s21  ;;  %976 = vrot.lane.b32.xlu0 %v846_v52, %s7943_s21 }
  0xdc   : > { %978 = vrot.lane.b32.xlu1 %v847_v53, %s7943_s21  ;;  %v8314_v53 = vld [vmem:[%s8223_s20 + $0xc0] sm:$0xff] }
  0xdf   : > { %v8308_v47 = vpop.permute.xlu2 %777 }
  0xe0   : > { %v738_v5 = vpop.permute.xlu1 %737  ;;  %v734_v7 = vpop.permute.xlu0 %733 }
  0xe1   : > { %v854_v18 = vmul.f32 %v738_v5, %v8282_v8  ;;  %v852_v19 = vmul.f32 %v734_v7, %v8285_v12  ;;  %v853_v20 = vmul.f32 %v734_v7, %v8288_v13  ;;  %v855_v43 = vmul.f32 %v738_v5, %v8300_v27 }
  0xe3   : > { %986 = vrot.lane.b32.xlu2 %v851_v0, %s7943_s21  ;;  %982 = vrot.lane.b32.xlu0 %v849_v2, %s7943_s21  ;;  %v8317_v0 = vld [vmem:[%s8223_s20 + $0xa8] sm:$0xff] }
  0xe4   : > { %984 = vrot.lane.b32.xlu1 %v850_v1, %s7943_s21 }
  0xe7   : > { %v8328_v7 = vpop.permute.xlu2 %789 }
  0xe8   : > { %v750_v48 = vpop.permute.xlu1 %749  ;;  %v746_v52 = vpop.permute.xlu0 %745 }
  0xe9   : > { %v860_v1 = vmul.f32 %v750_v48, %v8314_v53  ;;  %v858_v2 = vmul.f32 %v746_v52, %v8317_v0  ;;  %v859_v5 = vmul.f32 %v746_v52, %v8320_v40 }
  0xeb   : > { %992 = vrot.lane.b32.xlu2 %v854_v18, %s7943_s21  ;;  %988 = vrot.lane.b32.xlu0 %v852_v19, %s7943_s21  ;;  %v8331_v18 = vld [vmem:[%s8223_s20 + $0xe0] sm:$0xff] }
  0xec   : > { %990 = vrot.lane.b32.xlu1 %v853_v20, %s7943_s21  ;;  %v8334_v20 = vld [vmem:[%s8223_s20 + $0xc8] sm:$0xff] }
  0xed   : > { %v861_v52 = vmul.f32 %v750_v48, %v8334_v20 }
  0xf0   : > { %v758_v19 = vpop.permute.xlu0 %757 }
  0xf1   : > { %v864_v48 = vmul.f32 %v758_v19, %v8351_v39 }
  0xf3   : > { %998 = vrot.lane.b32.xlu2 %v857_v29, %s7943_s21  ;;  %994 = vrot.lane.b32.xlu0 %v855_v43, %s7943_s21  ;;  %v8337_v29 = vld [vmem:[%s8223_s20 + $0xd8] sm:$0xff] }
  0xf4   : > { %996 = vrot.lane.b32.xlu1 %v856_v36, %s7943_s21  ;;  %v863_v36 = vmul.f32 %v754_v54, %v8331_v18  ;;  %v862_v43 = vmul.f32 %v754_v54, %v8337_v29 }
  0xf8   : > { %v770_v35 = vpop.permute.xlu0 %769 }
  0xfb   : > { %1004 = vrot.lane.b32.xlu2 %v860_v1, %s7943_s21  ;;  %1000 = vrot.lane.b32.xlu0 %v858_v2, %s7943_s21  ;;  %v762_v1 = vpop.permute.xlu1 %761  ;;  %v8345_v2 = vpop.permute.xlu2 %801 }
  0xfc   : > { %1002 = vrot.lane.b32.xlu1 %v859_v5, %s7943_s21  ;;  %v8348_v5 = vld [vmem:[%s8223_s20 + $0x108] sm:$0xff]  ;;  %v867_v31 = vmul.f32 %v762_v1, %v8366_v34 }
  0xfd   : > { %v866_v54 = vmul.f32 %v762_v1, %v8348_v5  ;;  %v870_v1 = vmul.f32 %v770_v35, %v8383_v23 }
 0x103   : > { %1010 = vrot.lane.b32.xlu2 %v863_v36, %s7943_s21  ;;  %1006 = vrot.lane.b32.xlu0 %v861_v52, %s7943_s21  ;;  %v865_v36 = vmul.f32 %v758_v19, %v8354_v38  ;;  %v774_v52 = vpop.permute.xlu1 %773  ;;  %v8372_v19 = vpop.permute.xlu2 %813 }
 0x104   : > { %1008 = vrot.lane.b32.xlu1 %v862_v43, %s7943_s21  ;;  %v8363_v43 = vld [vmem:[%s8223_s20 + $0x128] sm:$0xff] }
 0x105   : > { %v869_v32 = vmul.f32 %v766_v14, %v8363_v43 }
 0x10b   : > { %1016 = vrot.lane.b32.xlu2 %v866_v54, %s7943_s21  ;;  %1012 = vrot.lane.b32.xlu0 %v864_v48, %s7943_s21  ;;  %v868_v54 = vmul.f32 %v766_v14, %v8369_v33  ;;  %v782_v48 = vpop.permute.xlu0 %781  ;;  %v872_v14 = vmul.f32 %v774_v52, %v8380_v30  ;;  %v8391_v21 = vpop.permute.xlu2 %825 }
 0x10c   : > { %1014 = vrot.lane.b32.xlu1 %v865_v36, %s7943_s21  ;;  %v786_v36 = vpop.permute.xlu1 %785 }
 0x113   : > { %1022 = vrot.lane.b32.xlu2 %v869_v32, %s7943_s21  ;;  %1018 = vrot.lane.b32.xlu0 %v867_v31, %s7943_s21  ;;  %v871_v32 = vmul.f32 %v770_v35, %v8386_v22  ;;  %v794_v31 = vpop.permute.xlu0 %793 }
 0x114   : > { %1020 = vrot.lane.b32.xlu1 %v868_v54, %s7943_s21  ;;  %v8397_v54 = vld [vmem:[%s8223_s20 + $0x170] sm:$0xff]  ;;  %v798_v17 = vpop.permute.xlu1 %797 }
 0x115   : > { %v875_v35 = vmul.f32 %v8308_v47, %v8397_v54 }
 0x11b   : > { %1028 = vrot.lane.b32.xlu2 %v872_v14, %s7943_s21  ;;  %1024 = vrot.lane.b32.xlu0 %v870_v1, %s7943_s21  ;;  %v874_v14 = vmul.f32 %v8308_v47, %v8403_v15  ;;  %v873_v1 = vmul.f32 %v774_v52, %v8400_v16  ;;  %v806_v10 = vpop.permute.xlu0 %805  ;;  %v878_v47 = vmul.f32 %v786_v36, %v8416_v11 }
 0x11c   : > { %1026 = vrot.lane.b32.xlu1 %v871_v32, %s7943_s21  ;;  %v8413_v32 = vpop.permute.xlu2 %837  ;;  %v876_v52 = vmul.f32 %v782_v48, %v8419_v9 }
 0x123   : > { %1034 = vrot.lane.b32.xlu2 %v875_v35, %s7943_s21  ;;  %1030 = vrot.lane.b32.xlu0 %v873_v1, %s7943_s21  ;;  %v877_v35 = vmul.f32 %v782_v48, %v8422_v6  ;;  %v810_v1 = vpop.permute.xlu1 %809  ;;  %v881_v48 = vmul.f32 %v8328_v7, %v8433_v4  ;;  %v818_v62 = vpop.permute.xlu0 %817 }
 0x124   : > { %1032 = vrot.lane.b32.xlu1 %v874_v14, %s7943_s21  ;;  %v8430_v14 = vpop.permute.xlu2 %974 }
 0x125   : > { %15177 = vst [vmem:[#allocation34_spill] sm:$0xff] %v8430_v14 }
 0x12b   : > { %1040 = vrot.lane.b32.xlu2 %v878_v47, %s7943_s21  ;;  %1036 = vrot.lane.b32.xlu0 %v876_v52, %s7943_s21  ;;  %v880_v47 = vmul.f32 %v8328_v7, %v8439_v63  ;;  %v879_v52 = vmul.f32 %v786_v36, %v8436_v3  ;;  %v8460_v7 = vld [vmem:[%s8223_s20 + $0x1d0] sm:$0xff]  ;;  %v884_v36 = vmul.f32 %v798_v17, %v8454_v61 }
 0x12c   : > { %1038 = vrot.lane.b32.xlu1 %v877_v35, %s7943_s21  ;;  %v8447_v35 = vpop.permute.xlu1 %821  ;;  %v883_v56 = vmul.f32 %v794_v31, %v8460_v7 }
 0x133   : > { %1046 = vrot.lane.b32.xlu2 %v881_v48, %s7943_s21  ;;  %1042 = vrot.lane.b32.xlu0 %v879_v52, %s7943_s21  ;;  %v882_v48 = vmul.f32 %v794_v31, %v8457_v57  ;;  %v8466_v52 = vpop.permute.xlu0 %829  ;;  %v8481_v31 = vld [vmem:[%s8223_s20 + $0x1f8] sm:$0xff] }
 0x134   : > { %1044 = vrot.lane.b32.xlu1 %v880_v47, %s7943_s21 }
 0x135   : > { %v8451_v14 = vpop.permute.xlu2 %980 }
 0x136   : > { %15178 = vst [vmem:[#allocation35_spill] sm:$0xff] %v8451_v14  ;;  %v8472_v14 = vpop.permute.xlu1 %833 }
 0x13b   : > { %1052 = vrot.lane.b32.xlu2 %v884_v36, %s7943_s21  ;;  %1048 = vrot.lane.b32.xlu0 %v882_v48, %s7943_s21  ;;  %v887_v36 = vmul.f32 %v8345_v2, %v8475_v55  ;;  %v886_v48 = vmul.f32 %v8345_v2, %v8481_v31  ;;  %v8493_v50 = vpop.permute.xlu0 %841  ;;  %v8501_v2 = vld [vmem:[%s8223_s20 + $0x210] sm:$0xff] }
 0x13c   : > { %1050 = vrot.lane.b32.xlu1 %v883_v56, %s7943_s21  ;;  %v885_v56 = vmul.f32 %v798_v17, %v8478_v51  ;;  %v8504_v17 = vld [vmem:[%s8223_s20 + $0x218] sm:$0xff] }
 0x13d   : > { %v8470_v47 = vpop.permute.xlu2 %986 }
 0x13e   : > { %15179 = vst [vmem:[#allocation36_spill] sm:$0xff] %v8470_v47  ;;  %v8495_v49 = vpop.permute.xlu1 %972 }
 0x13f   : > { %15181 = vst [vmem:[#allocation38_spill] sm:$0xff] %v8495_v49 }
 0x143   : > { %1058 = vrot.lane.b32.xlu2 %v887_v36, %s7943_s21  ;;  %1054 = vrot.lane.b32.xlu0 %v885_v56, %s7943_s21  ;;  %v890_v36 = vmul.f32 %v810_v1, %v8498_v45  ;;  %v888_v56 = vmul.f32 %v806_v10, %v8501_v2  ;;  %v8522_v45 = vld [vmem:[%s8223_s20 + $0x230] sm:$0xff] }
 0x144   : > { %1056 = vrot.lane.b32.xlu1 %v886_v48, %s7943_s21  ;;  %v889_v48 = vmul.f32 %v806_v10, %v8504_v17  ;;  %v8525_v10 = vld [vmem:[%s8223_s20 + $0x240] sm:$0xff] }
 0x145   : > { %v8491_v47 = vpop.permute.xlu2 %992 }
 0x146   : > { %15180 = vst [vmem:[#allocation37_spill] sm:$0xff] %v8491_v47 }
 0x14b   : > { %1064 = vrot.lane.b32.xlu2 %v890_v36, %s7943_s21  ;;  %1060 = vrot.lane.b32.xlu0 %v888_v56, %s7943_s21  ;;  %v893_v36 = vmul.f32 %v8372_v19, %v8519_v37  ;;  %v892_v56 = vmul.f32 %v8372_v19, %v8525_v10  ;;  %v8542_v37 = vld [vmem:[%s8223_s20 + $0x270] sm:$0xff]  ;;  %v8545_v19 = vld [vmem:[%s8223_s20 + $0x258] sm:$0xff] }
 0x14c   : > { %1062 = vrot.lane.b32.xlu1 %v889_v48, %s7943_s21  ;;  %v891_v48 = vmul.f32 %v810_v1, %v8522_v45  ;;  %15190 = vst [vmem:[#allocation47_spill] sm:$0xff] %v8542_v37  ;;  %v8548_v1 = vld [vmem:[%s8223_s20 + $0x260] sm:$0xff] }
 0x14d   : > { %v8512_v47 = vpop.permute.xlu2 %998  ;;  %v8514_v49 = vpop.permute.xlu0 %976  ;;  %15191 = vst [vmem:[#allocation48_spill] sm:$0xff] %v8545_v19 }
 0x14e   : > { %15183 = vst [vmem:[#allocation40_spill] sm:$0xff] %v8512_v47  ;;  %v8516_v41 = vpop.permute.xlu1 %978 }
 0x14f   : > { %15184 = vst [vmem:[#allocation41_spill] sm:$0xff] %v8514_v49 }
 0x150   : > { %15185 = vst [vmem:[#allocation42_spill] sm:$0xff] %v8516_v41 }
 0x153   : > { %1070 = vrot.lane.b32.xlu2 %v893_v36, %s7943_s21  ;;  %1066 = vrot.lane.b32.xlu0 %v891_v48, %s7943_s21  ;;  %v896_v36 = vmul.f32 %v8447_v35, %v8542_v37  ;;  %v895_v48 = vmul.f32 %v818_v62, %v8548_v1  ;;  %v8564_v37 = vld [vmem:[%s8223_s20 + $0x290] sm:$0xff] }
 0x154   : > { %1068 = vrot.lane.b32.xlu1 %v892_v56, %s7943_s21  ;;  %v894_v56 = vmul.f32 %v818_v62, %v8545_v19  ;;  %15195 = vst [vmem:[#allocation52_spill] sm:$0xff] %v8564_v37  ;;  %v8567_v19 = vld [vmem:[%s8223_s20 + $0x278] sm:$0xff]  ;;  %v8570_v62 = vld [vmem:[%s8223_s20 + $0x288] sm:$0xff] }
 0x155   : > { %v8535_v41 = vpop.permute.xlu2 %1004  ;;  %v8537_v49 = vpop.permute.xlu0 %982  ;;  %15196 = vst [vmem:[#allocation53_spill] sm:$0xff] %v8567_v19 }
 0x156   : > { %15187 = vst [vmem:[#allocation44_spill] sm:$0xff] %v8535_v41  ;;  %v8539_v47 = vpop.permute.xlu1 %984 }
 0x157   : > { %15188 = vst [vmem:[#allocation45_spill] sm:$0xff] %v8537_v49 }
 0x158   : > { %15189 = vst [vmem:[#allocation46_spill] sm:$0xff] %v8539_v47 }
 0x15b   : > { %1076 = vrot.lane.b32.xlu2 %v896_v36, %s7943_s21  ;;  %1072 = vrot.lane.b32.xlu0 %v894_v56, %s7943_s21  ;;  %v899_v36 = vmul.f32 %v8391_v21, %v8564_v37  ;;  %v898_v56 = vmul.f32 %v8391_v21, %v8570_v62  ;;  %v8588_v37 = vld [vmem:[%s8223_s20 + $0x2b8] sm:$0xff]  ;;  %v8591_v21 = vld [vmem:[%s8223_s20 + $0x2a0] sm:$0xff] }
 0x15c   : > { %1074 = vrot.lane.b32.xlu1 %v895_v48, %s7943_s21  ;;  %v897_v48 = vmul.f32 %v8447_v35, %v8567_v19  ;;  %15200 = vst [vmem:[#allocation57_spill] sm:$0xff] %v8588_v37  ;;  %v8594_v35 = vld [vmem:[%s8223_s20 + $0x2a8] sm:$0xff]  ;;  %v8618_v19 = vld [vmem:[%s8223_s20 + $0x2d0] sm:$0xff] }
 0x15d   : > { %v8557_v47 = vpop.permute.xlu2 %1010  ;;  %v8559_v49 = vpop.permute.xlu0 %988  ;;  %15201 = vst [vmem:[#allocation58_spill] sm:$0xff] %v8591_v21 }
 0x15e   : > { %15192 = vst [vmem:[#allocation49_spill] sm:$0xff] %v8557_v47  ;;  %v8561_v41 = vpop.permute.xlu1 %990 }
 0x15f   : > { %15193 = vst [vmem:[#allocation50_spill] sm:$0xff] %v8559_v49 }
 0x160   : > { %15194 = vst [vmem:[#allocation51_spill] sm:$0xff] %v8561_v41 }
 0x163   : > { %1082 = vrot.lane.b32.xlu2 %v899_v36, %s7943_s21  ;;  %1078 = vrot.lane.b32.xlu0 %v897_v48, %s7943_s21  ;;  %v902_v36 = vmul.f32 %v8472_v14, %v8588_v37  ;;  %v901_v48 = vmul.f32 %v8466_v52, %v8594_v35  ;;  %v8612_v37 = vld [vmem:[%s8223_s20 + $0x2d8] sm:$0xff] }
 0x164   : > { %1080 = vrot.lane.b32.xlu1 %v898_v56, %s7943_s21  ;;  %v900_v56 = vmul.f32 %v8466_v52, %v8591_v21  ;;  %15205 = vst [vmem:[#allocation62_spill] sm:$0xff] %v8612_v37  ;;  %v8615_v21 = vld [vmem:[%s8223_s20 + $0x2c0] sm:$0xff]  ;;  %v905_v52 = vmul.f32 %v8413_v32, %v8612_v37  ;;  %v8642_v37 = vld [vmem:[%s8223_s20 + $0x2f0] sm:$0xff] }
 0x165   : > { %v8581_v41 = vpop.permute.xlu2 %1016  ;;  %v8583_v47 = vpop.permute.xlu0 %994  ;;  %15209 = vst [vmem:[#allocation66_spill] sm:$0xff] %v8642_v37 }
 0x166   : > { %15197 = vst [vmem:[#allocation54_spill] sm:$0xff] %v8581_v41  ;;  %v8585_v49 = vpop.permute.xlu1 %996 }
 0x167   : > { %15198 = vst [vmem:[#allocation55_spill] sm:$0xff] %v8583_v47 }
 0x168   : > { %15199 = vst [vmem:[#allocation56_spill] sm:$0xff] %v8585_v49 }
 0x16b   : > { %1088 = vrot.lane.b32.xlu2 %v902_v36, %s7943_s21  ;;  %1084 = vrot.lane.b32.xlu0 %v900_v56, %s7943_s21  ;;  %v904_v36 = vmul.f32 %v8413_v32, %v8618_v19  ;;  %v903_v56 = vmul.f32 %v8472_v14, %v8615_v21  ;;  %v8639_v32 = vld [vmem:[%s8223_s20 + $0x2e8] sm:$0xff] }
 0x16c   : > { %1086 = vrot.lane.b32.xlu1 %v901_v48, %s7943_s21  ;;  %v906_v14 = vmul.f32 %v8493_v50, %v8639_v32 }
 0x16d   : > { %v8605_v49 = vpop.permute.xlu2 %1022  ;;  %v8607_v47 = vpop.permute.xlu0 %1000 }
 0x16e   : > { %15202 = vst [vmem:[#allocation59_spill] sm:$0xff] %v8605_v49  ;;  %v8609_v41 = vpop.permute.xlu1 %1002 }
 0x16f   : > { %15203 = vst [vmem:[#allocation60_spill] sm:$0xff] %v8607_v47  ;;  %v7335_v47 = vld [vmem:[%s14915_s1 + $0x40] ss:$0 sm:$0xff] }
 0x170   : > { %15204 = vst [vmem:[#allocation61_spill] sm:$0xff] %v8609_v41 }
 0x173   : > { %1094 = vrot.lane.b32.xlu2 %v905_v52, %s7943_s21  ;;  %1090 = vrot.lane.b32.xlu0 %v903_v56, %s7943_s21  ;;  %v907_v52 = vmul.f32 %v8493_v50, %v8642_v37  ;;  %v7338_v50 = vld [vmem:[%s14915_s1 + $0x42] ss:$0 sm:$0xff] }
 0x174   : > { %1092 = vrot.lane.b32.xlu1 %v904_v36, %s7943_s21 }
 0x175   : > { %v8629_v48 = vpop.permute.xlu2 %1028  ;;  %v8631_v41 = vpop.permute.xlu0 %1006 }
 0x176   : > { %15206 = vst [vmem:[#allocation63_spill] sm:$0xff] %v8629_v48  ;;  %v8633_v49 = vpop.permute.xlu1 %1008  ;;  %v7336_v48 = vld [vmem:[%s14915_s1 + $0x41] ss:$0 sm:$0xff] }
 0x177   : > { %15207 = vst [vmem:[#allocation64_spill] sm:$0xff] %v8631_v41  ;;  %v7337_v41 = vld [vmem:[%s14915_s1 + $0x43] ss:$0 sm:$0xff] }
 0x178   : > { %15208 = vst [vmem:[#allocation65_spill] sm:$0xff] %v8633_v49 }
 0x17b   : > { %1326 = vperm.xlu2 %7270, %v7335_v47   ;;  %1096 = vrot.lane.b32.xlu0 %v906_v14, %s7943_s21 }
 0x17c   : > { %1098 = vrot.lane.b32.xlu1 %v907_v52, %s7943_s21 }
 0x17d   : > { %v8650_v36 = vpop.permute.xlu2 %1034  ;;  %v8652_v56 = vpop.permute.xlu0 %1012 }
 0x17e   : > { %15210 = vst [vmem:[#allocation67_spill] sm:$0xff] %v8650_v36  ;;  %v8654_v49 = vpop.permute.xlu1 %1014 }
 0x17f   : > { %15211 = vst [vmem:[#allocation68_spill] sm:$0xff] %v8652_v56  ;;  %v7339_v56 = vld [vmem:[%s14915_s1 + $0x44] ss:$0 sm:$0xff] }
 0x180   : > { %15212 = vst [vmem:[#allocation69_spill] sm:$0xff] %v8654_v49  ;;  %v7340_v49 = vld [vmem:[%s14915_s1 + $0x46] ss:$0 sm:$0xff] }
 0x183   : > { %1338 = vperm.xlu2 %7270, %v7337_v41   ;;  %1330 = vperm.xlu0 %7268, %v7336_v48   ;;  %v7341_v41 = vld [vmem:[%s14915_s1 + $0x45] ss:$0 sm:$0xff] }
 0x184   : > { %1334 = vperm.xlu1 %7269, %v7338_v50  }
 0x185   : > { %v8665_v47 = vpop.permute.xlu2 %1040  ;;  %v8667_v14 = vpop.permute.xlu0 %1018 }
 0x186   : > { %15213 = vst [vmem:[#allocation70_spill] sm:$0xff] %v8665_v47  ;;  %v8669_v52 = vpop.permute.xlu1 %1020  ;;  %v7342_v47 = vld [vmem:[%s14915_s1 + $0x47] ss:$0 sm:$0xff] }
 0x187   : > { %15214 = vst [vmem:[#allocation71_spill] sm:$0xff] %v8667_v14  ;;  %v7343_v14 = vld [vmem:[%s14915_s1 + $0x49] ss:$0 sm:$0xff] }
 0x188   : > { %15215 = vst [vmem:[#allocation72_spill] sm:$0xff] %v8669_v52 }
 0x18b   : > { %1350 = vperm.xlu2 %7270, %v7340_v49   ;;  %1342 = vperm.xlu0 %7268, %v7339_v56   ;;  %v7344_v49 = vld [vmem:[%s14915_s1 + $0x48] ss:$0 sm:$0xff] }
 0x18c   : > { %1346 = vperm.xlu1 %7269, %v7341_v41  }
 0x18d   : > { %v8680_v48 = vpop.permute.xlu2 %1046  ;;  %v8682_v50 = vpop.permute.xlu0 %1024 }
 0x18e   : > { %15216 = vst [vmem:[#allocation73_spill] sm:$0xff] %v8680_v48  ;;  %v8684_v52 = vpop.permute.xlu1 %1026  ;;  %v7346_v48 = vld [vmem:[%s14915_s1 + $0x4c] ss:$0 sm:$0xff] }
 0x18f   : > { %15217 = vst [vmem:[#allocation74_spill] sm:$0xff] %v8682_v50  ;;  %v7345_v50 = vld [vmem:[%s14915_s1 + $0x4a] ss:$0 sm:$0xff] }
 0x190   : > { %15218 = vst [vmem:[#allocation75_spill] sm:$0xff] %v8684_v52 }
 0x193   : > { %1362 = vperm.xlu2 %7270, %v7343_v14   ;;  %1354 = vperm.xlu0 %7268, %v7342_v47   ;;  %v7347_v14 = vld [vmem:[%s14915_s1 + $0x4b] ss:$0 sm:$0xff] }
 0x194   : > { %1358 = vperm.xlu1 %7269, %v7344_v49  }
 0x195   : > { %v8695_v56 = vpop.permute.xlu2 %1052  ;;  %v8697_v41 = vpop.permute.xlu0 %1030 }
 0x196   : > { %15219 = vst [vmem:[#allocation76_spill] sm:$0xff] %v8695_v56  ;;  %v8699_v52 = vpop.permute.xlu1 %1032  ;;  %v7349_v56 = vld [vmem:[%s14915_s1 + $0x4f] ss:$0 sm:$0xff] }
 0x197   : > { %15220 = vst [vmem:[#allocation77_spill] sm:$0xff] %v8697_v41  ;;  %v7348_v41 = vld [vmem:[%s14915_s1 + $0x4d] ss:$0 sm:$0xff] }
 0x198   : > { %15221 = vst [vmem:[#allocation78_spill] sm:$0xff] %v8699_v52 }
 0x19b   : > { %1374 = vperm.xlu2 %7270, %v7346_v48   ;;  %1366 = vperm.xlu0 %7268, %v7345_v50   ;;  %v7350_v48 = vld [vmem:[%s14915_s1 + $0x4e] ss:$0 sm:$0xff] }
 0x19c   : > { %1370 = vperm.xlu1 %7269, %v7347_v14  }
 0x19d   : > { %v8710_v47 = vpop.permute.xlu2 %1058  ;;  %v8712_v49 = vpop.permute.xlu0 %1036 }
 0x19e   : > { %15222 = vst [vmem:[#allocation79_spill] sm:$0xff] %v8710_v47  ;;  %v8714_v52 = vpop.permute.xlu1 %1038  ;;  %v7352_v47 = vld [vmem:[%s14915_s1 + $0x52] ss:$0 sm:$0xff] }
 0x19f   : > { %15223 = vst [vmem:[#allocation80_spill] sm:$0xff] %v8712_v49  ;;  %v7351_v49 = vld [vmem:[%s14915_s1 + $0x50] ss:$0 sm:$0xff] }
 0x1a0   : > { %15224 = vst [vmem:[#allocation81_spill] sm:$0xff] %v8714_v52 }
 0x1a3   : > { %1386 = vperm.xlu2 %7270, %v7349_v56   ;;  %1378 = vperm.xlu0 %7268, %v7348_v41   ;;  %v7353_v56 = vld [vmem:[%s14915_s1 + $0x51] ss:$0 sm:$0xff] }
 0x1a4   : > { %1382 = vperm.xlu1 %7269, %v7350_v48  }
 0x1a5   : > { %v8725_v50 = vpop.permute.xlu2 %1064  ;;  %v8727_v14 = vpop.permute.xlu0 %1042 }
 0x1a6   : > { %15225 = vst [vmem:[#allocation82_spill] sm:$0xff] %v8725_v50  ;;  %v8729_v52 = vpop.permute.xlu1 %1044  ;;  %v7355_v50 = vld [vmem:[%s14915_s1 + $0x55] ss:$0 sm:$0xff] }
 0x1a7   : > { %15226 = vst [vmem:[#allocation83_spill] sm:$0xff] %v8727_v14  ;;  %v7354_v14 = vld [vmem:[%s14915_s1 + $0x53] ss:$0 sm:$0xff] }
 0x1a8   : > { %15227 = vst [vmem:[#allocation84_spill] sm:$0xff] %v8729_v52 }
 0x1ab   : > { %1398 = vperm.xlu2 %7270, %v7352_v47   ;;  %1390 = vperm.xlu0 %7268, %v7351_v49   ;;  %v7356_v47 = vld [vmem:[%s14915_s1 + $0x54] ss:$0 sm:$0xff] }
 0x1ac   : > { %1394 = vperm.xlu1 %7269, %v7353_v56  }
 0x1ad   : > { %v8740_v41 = vpop.permute.xlu2 %1070  ;;  %v8742_v48 = vpop.permute.xlu0 %1048 }
 0x1ae   : > { %15228 = vst [vmem:[#allocation85_spill] sm:$0xff] %v8740_v41  ;;  %v8744_v52 = vpop.permute.xlu1 %1050  ;;  %v7358_v41 = vld [vmem:[%s14915_s1 + $0x58] ss:$0 sm:$0xff] }
 0x1af   : > { %15229 = vst [vmem:[#allocation86_spill] sm:$0xff] %v8742_v48  ;;  %v7357_v48 = vld [vmem:[%s14915_s1 + $0x56] ss:$0 sm:$0xff] }
 0x1b0   : > { %15230 = vst [vmem:[#allocation87_spill] sm:$0xff] %v8744_v52 }
 0x1b3   : > { %1410 = vperm.xlu2 %7270, %v7355_v50   ;;  %1402 = vperm.xlu0 %7268, %v7354_v14   ;;  %v7359_v50 = vld [vmem:[%s14915_s1 + $0x57] ss:$0 sm:$0xff] }
 0x1b4   : > { %1406 = vperm.xlu1 %7269, %v7356_v47  }
 0x1b5   : > { %v8755_v49 = vpop.permute.xlu2 %1076  ;;  %v8757_v56 = vpop.permute.xlu0 %1054 }
 0x1b6   : > { %15231 = vst [vmem:[#allocation88_spill] sm:$0xff] %v8755_v49  ;;  %v8759_v52 = vpop.permute.xlu1 %1056  ;;  %v7361_v49 = vld [vmem:[%s14915_s1 + $0x5b] ss:$0 sm:$0xff] }
 0x1b7   : > { %15232 = vst [vmem:[#allocation89_spill] sm:$0xff] %v8757_v56  ;;  %v7360_v56 = vld [vmem:[%s14915_s1 + $0x59] ss:$0 sm:$0xff] }
 0x1b8   : > { %15233 = vst [vmem:[#allocation90_spill] sm:$0xff] %v8759_v52 }
 0x1bb   : > { %1422 = vperm.xlu2 %7270, %v7358_v41   ;;  %1414 = vperm.xlu0 %7268, %v7357_v48   ;;  %v7362_v41 = vld [vmem:[%s14915_s1 + $0x5a] ss:$0 sm:$0xff] }
 0x1bc   : > { %1418 = vperm.xlu1 %7269, %v7359_v50  }
 0x1bd   : > { %v8770_v14 = vpop.permute.xlu2 %1082  ;;  %v8772_v47 = vpop.permute.xlu0 %1060 }
 0x1be   : > { %15234 = vst [vmem:[#allocation91_spill] sm:$0xff] %v8770_v14  ;;  %v8774_v52 = vpop.permute.xlu1 %1062  ;;  %v7363_v14 = vld [vmem:[%s14915_s1 + $0x5c] ss:$0 sm:$0xff] }
 0x1bf   : > { %15235 = vst [vmem:[#allocation92_spill] sm:$0xff] %v8772_v47  ;;  %v7364_v47 = vld [vmem:[%s14915_s1 + $0x5e] ss:$0 sm:$0xff] }
 0x1c0   : > { %15236 = vst [vmem:[#allocation93_spill] sm:$0xff] %v8774_v52 }
 0x1c3   : > { %1434 = vperm.xlu2 %7270, %v7361_v49   ;;  %1426 = vperm.xlu0 %7268, %v7360_v56   ;;  %v7365_v49 = vld [vmem:[%s14915_s1 + $0x5d] ss:$0 sm:$0xff] }
 0x1c4   : > { %1430 = vperm.xlu1 %7269, %v7362_v41  }
 0x1c5   : > { %v8785_v48 = vpop.permute.xlu2 %1088  ;;  %v8787_v50 = vpop.permute.xlu0 %1066 }
 0x1c6   : > { %15237 = vst [vmem:[#allocation94_spill] sm:$0xff] %v8785_v48  ;;  %v8789_v52 = vpop.permute.xlu1 %1068  ;;  %v7366_v48 = vld [vmem:[%s14915_s1 + $0x5f] ss:$0 sm:$0xff] }
 0x1c7   : > { %15238 = vst [vmem:[#allocation95_spill] sm:$0xff] %v8787_v50 }
 0x1c8   : > { %15239 = vst [vmem:[#allocation96_spill] sm:$0xff] %v8789_v52 }
 0x1cb   : > { %1446 = vperm.xlu2 %7270, %v7364_v47   ;;  %1438 = vperm.xlu0 %7268, %v7363_v14  }
 0x1cc   : > { %1442 = vperm.xlu1 %7269, %v7365_v49  }
 0x1cd   : > { %v8800_v56 = vpop.permute.xlu2 %1094  ;;  %v8802_v41 = vpop.permute.xlu0 %1072 }
 0x1ce   : > { %15240 = vst [vmem:[#allocation97_spill] sm:$0xff] %v8800_v56  ;;  %v8804_v52 = vpop.permute.xlu1 %1074 }
 0x1cf   : > { %15241 = vst [vmem:[#allocation98_spill] sm:$0xff] %v8802_v41 }
 0x1d0   : > { %15242 = vst [vmem:[#allocation99_spill] sm:$0xff] %v8804_v52 }
 0x1d3   : > { %1450 = vperm.xlu0 %7268, %v7366_v48  }
 0x1d5   : > { %v1327_v50 = vpop.permute.xlu2 %1326  ;;  %v8809_v36 = vpop.permute.xlu0 %1078 }
 0x1d6   : > { %15243 = vst [vmem:[#allocation100_spill] sm:$0xff] %v8809_v36  ;;  %v1453_v37 = vmul.f32 %v1327_v50, %v8226_v25  ;;  %v1454_v47 = vmul.f32 %v1327_v50, %v8229_v26  ;;  %v8813_v14 = vpop.permute.xlu1 %1080 }
 0x1d7   : > { %15244 = vst [vmem:[#allocation101_spill] sm:$0xff] %v8813_v14 }
 0x1d8   : > { %1583 = vrot.lane.b32.xlu2 %v1454_v47, %s7944_s15  ;;  %1581 = vrot.lane.b32.xlu1 %v1453_v37, %s7944_s15 }
 0x1dd   : > { %v8817_v49 = vpop.permute.xlu0 %1084  ;;  %v1339_v36 = vpop.permute.xlu2 %1338 }
 0x1de   : > { %15245 = vst [vmem:[#allocation102_spill] sm:$0xff] %v8817_v49  ;;  %v8819_v52 = vpop.permute.xlu1 %1086 }
 0x1df   : > { %15246 = vst [vmem:[#allocation103_spill] sm:$0xff] %v8819_v52 }
 0x1e5   : > { %v8821_v56 = vpop.permute.xlu0 %1090  ;;  %v1351_v26 = vpop.permute.xlu2 %1350 }
 0x1e6   : > { %15247 = vst [vmem:[#allocation104_spill] sm:$0xff] %v8821_v56  ;;  %v8823_v48 = vpop.permute.xlu1 %1092  ;;  %v1460_v56 = vmul.f32 %v1339_v36, %v8267_v58  ;;  %v1465_v58 = vmul.f32 %v1351_v26, %v8303_v28 }
 0x1e7   : > { %15248 = vst [vmem:[#allocation105_spill] sm:$0xff] %v8823_v48 }
 0x1ed   : > { %v8825_v41 = vpop.permute.xlu0 %1096  ;;  %v1363_v48 = vpop.permute.xlu2 %1362 }
 0x1ee   : > { %15249 = vst [vmem:[#allocation106_spill] sm:$0xff] %v8825_v41  ;;  %v8827_v25 = vpop.permute.xlu1 %1098  ;;  %v1459_v41 = vmul.f32 %v1339_v36, %v8273_v60  ;;  %v1466_v60 = vmul.f32 %v1351_v26, %v8297_v24  ;;  %v1471_v28 = vmul.f32 %v1363_v48, %v8337_v29  ;;  %v1472_v26 = vmul.f32 %v1363_v48, %v8331_v18 }
 0x1ef   : > { %15250 = vst [vmem:[#allocation107_spill] sm:$0xff] %v8827_v25 }
 0x1f5   : > { %v1331_v50 = vpop.permute.xlu0 %1330 }
 0x1f6   : > { %v1335_v14 = vpop.permute.xlu1 %1334  ;;  %v1455_v47 = vmul.f32 %v1331_v50, %v8255_v44  ;;  %v1456_v37 = vmul.f32 %v1331_v50, %v8258_v46 }
 0x1f7   : > { %v1457_v49 = vmul.f32 %v1335_v14, %v8252_v42  ;;  %v1458_v25 = vmul.f32 %v1335_v14, %v8270_v59 }
 0x1f8   : > { %1585 = vrot.lane.b32.xlu0 %v1455_v47, %s7944_s15  ;;  %1587 = vrot.lane.b32.xlu1 %v1456_v37, %s7944_s15 }
 0x1f9   : > { %1589 = vrot.lane.b32.xlu2 %v1457_v49, %s7944_s15  ;;  %v1375_v49 = vpop.permute.xlu2 %1374 }
 0x1fa   : > { %v1477_v18 = vmul.f32 %v1375_v49, %v8369_v33  ;;  %v1478_v48 = vmul.f32 %v1375_v49, %v8363_v43 }
 0x1fd   : > { %v1343_v42 = vpop.permute.xlu0 %1342 }
 0x1fe   : > { %v1347_v44 = vpop.permute.xlu1 %1346  ;;  %v1461_v46 = vmul.f32 %v1343_v42, %v8285_v12  ;;  %v1462_v50 = vmul.f32 %v1343_v42, %v8288_v13 }
 0x1ff   : > { %v1463_v47 = vmul.f32 %v1347_v44, %v8282_v8  ;;  %v1464_v59 = vmul.f32 %v1347_v44, %v8300_v27 }
 0x200   : > { %1593 = vrot.lane.b32.xlu1 %v1459_v41, %s7944_s15  ;;  %1591 = vrot.lane.b32.xlu0 %v1458_v25, %s7944_s15 }
 0x201   : > { %1595 = vrot.lane.b32.xlu2 %v1460_v56, %s7944_s15  ;;  %v1387_v12 = vpop.permute.xlu2 %1386 }
 0x202   : > { %v1483_v49 = vmul.f32 %v1387_v12, %v8403_v15 }
 0x205   : > { %v1355_v8 = vpop.permute.xlu0 %1354 }
 0x206   : > { %v1359_v13 = vpop.permute.xlu1 %1358  ;;  %v1467_v36 = vmul.f32 %v1355_v8, %v8317_v0  ;;  %v1468_v56 = vmul.f32 %v1355_v8, %v8320_v40 }
 0x207   : > { %v1469_v41 = vmul.f32 %v1359_v13, %v8314_v53  ;;  %v1470_v14 = vmul.f32 %v1359_v13, %v8334_v20 }
 0x208   : > { %1599 = vrot.lane.b32.xlu1 %v1462_v50, %s7944_s15  ;;  %1597 = vrot.lane.b32.xlu0 %v1461_v46, %s7944_s15 }
 0x209   : > { %1601 = vrot.lane.b32.xlu2 %v1463_v47, %s7944_s15  ;;  %v1399_v24 = vpop.permute.xlu2 %1398 }
 0x20d   : > { %v1367_v27 = vpop.permute.xlu0 %1366 }
 0x20e   : > { %v1371_v25 = vpop.permute.xlu1 %1370  ;;  %v1473_v0 = vmul.f32 %v1367_v27, %v8351_v39  ;;  %v1474_v40 = vmul.f32 %v1367_v27, %v8354_v38 }
 0x20f   : > { %v1475_v29 = vmul.f32 %v1371_v25, %v8348_v5  ;;  %v1476_v20 = vmul.f32 %v1371_v25, %v8366_v34 }
 0x210   : > { %1605 = vrot.lane.b32.xlu1 %v1465_v58, %s7944_s15  ;;  %1603 = vrot.lane.b32.xlu0 %v1464_v59, %s7944_s15 }
 0x211   : > { %1607 = vrot.lane.b32.xlu2 %v1466_v60, %s7944_s15  ;;  %v8865_v53 = vpop.permute.xlu2 %1410 }
 0x215   : > { %v1379_v37 = vpop.permute.xlu0 %1378 }
 0x216   : > { %v1383_v42 = vpop.permute.xlu1 %1382  ;;  %v1479_v5 = vmul.f32 %v1379_v37, %v8383_v23  ;;  %v1480_v46 = vmul.f32 %v1379_v37, %v8386_v22  ;;  %v1484_v23 = vmul.f32 %v1387_v12, %v8397_v54  ;;  %v1489_v54 = vmul.f32 %v1399_v24, %v8439_v63 }
 0x217   : > { %v1481_v33 = vmul.f32 %v1383_v42, %v8380_v30  ;;  %v1482_v47 = vmul.f32 %v1383_v42, %v8400_v16  ;;  %v15264_v42 = vld [vmem:[#allocation48_spill] sm:$0xff] }
 0x218   : > { %1611 = vrot.lane.b32.xlu1 %v1468_v56, %s7944_s15  ;;  %1609 = vrot.lane.b32.xlu0 %v1467_v36, %s7944_s15 }
 0x219   : > { %1613 = vrot.lane.b32.xlu2 %v1469_v41, %s7944_s15  ;;  %v8876_v44 = vpop.permute.xlu2 %1422  ;;  %v1495_v41 = vmul.f32 %v8865_v53, %v8481_v31 }
 0x21d   : > { %v1391_v39 = vpop.permute.xlu0 %1390 }
 0x21e   : > { %v1395_v38 = vpop.permute.xlu1 %1394  ;;  %v1485_v58 = vmul.f32 %v1391_v39, %v8419_v9  ;;  %v1486_v59 = vmul.f32 %v1391_v39, %v8422_v6  ;;  %v1490_v9 = vmul.f32 %v1399_v24, %v8433_v4 }
 0x21f   : > { %v1487_v15 = vmul.f32 %v1395_v38, %v8416_v11  ;;  %v1488_v12 = vmul.f32 %v1395_v38, %v8436_v3 }
 0x220   : > { %1617 = vrot.lane.b32.xlu1 %v1471_v28, %s7944_s15  ;;  %1615 = vrot.lane.b32.xlu0 %v1470_v14, %s7944_s15  ;;  %v15256_v14 = vld [vmem:[#allocation39_spill] sm:$0xff] }
 0x221   : > { %1619 = vrot.lane.b32.xlu2 %v1472_v26, %s7944_s15  ;;  %v8886_v34 = vpop.permute.xlu2 %1434 }
 0x222   : > { %v1507_v38 = vmul.f32 %v8886_v34, %v8570_v62 }
 0x225   : > { %v1403_v43 = vpop.permute.xlu0 %1402 }
 0x226   : > { %v1407_v50 = vpop.permute.xlu1 %1406  ;;  %v1491_v11 = vmul.f32 %v1403_v43, %v8457_v57  ;;  %v1492_v36 = vmul.f32 %v1403_v43, %v8460_v7  ;;  %v1496_v57 = vmul.f32 %v8865_v53, %v8475_v55  ;;  %v1501_v53 = vmul.f32 %v8876_v44, %v8525_v10 }
 0x227   : > { %v1493_v63 = vmul.f32 %v1407_v50, %v8454_v61  ;;  %v1494_v24 = vmul.f32 %v1407_v50, %v8478_v51 }
 0x228   : > { %1623 = vrot.lane.b32.xlu1 %v1474_v40, %s7944_s15  ;;  %1621 = vrot.lane.b32.xlu0 %v1473_v0, %s7944_s15 }
 0x229   : > { %1625 = vrot.lane.b32.xlu2 %v1475_v29, %s7944_s15  ;;  %v8895_v22 = vpop.permute.xlu2 %1446 }
 0x22d   : > { %v1415_v30 = vpop.permute.xlu0 %1414 }
 0x22e   : > { %v1419_v60 = vpop.permute.xlu1 %1418  ;;  %v1497_v28 = vmul.f32 %v1415_v30, %v8501_v2  ;;  %v1498_v31 = vmul.f32 %v1415_v30, %v8504_v17  ;;  %v15260_v17 = vld [vmem:[#allocation43_spill] sm:$0xff]  ;;  %v15275_v30 = vld [vmem:[#allocation57_spill] sm:$0xff] }
 0x22f   : > { %v1499_v51 = vmul.f32 %v1419_v60, %v15256_v14  ;;  %v1500_v2 = vmul.f32 %v1419_v60, %v8522_v45  ;;  %v1502_v0 = vmul.f32 %v8876_v44, %v15260_v17  ;;  %v15265_v45 = vld [vmem:[#allocation47_spill] sm:$0xff]  ;;  %v7373_v14 = vld [vmem:[%s14915_s1 + $0x66] ss:$0 sm:$0xff] }
 0x230   : > { %1629 = vrot.lane.b32.xlu1 %v1477_v18, %s7944_s15  ;;  %1627 = vrot.lane.b32.xlu0 %v1476_v20, %s7944_s15  ;;  %v7374_v17 = vld [vmem:[%s14915_s1 + $0x68] ss:$0 sm:$0xff] }
 0x231   : > { %1631 = vrot.lane.b32.xlu2 %v1478_v48, %s7944_s15 }
 0x232   : > { %v8903_v16 = vpop.permute.xlu2 %1583 }
 0x233   : > { %15251 = vst [vmem:[#allocation108_spill] sm:$0xff] %v8903_v16  ;;  %v9596_v16 = vld [vmem:[%s8223_s20 + $0x180] sm:$0xff] }
 0x234   : > { %15362 = vst [vmem:[#allocation199_spill] sm:$0xff] %v9596_v16 }
 0x235   : > { %v1427_v8 = vpop.permute.xlu0 %1426 }
 0x236   : > { %v1431_v13 = vpop.permute.xlu1 %1430  ;;  %v1503_v18 = vmul.f32 %v1427_v8, %v15264_v42  ;;  %v1504_v10 = vmul.f32 %v1427_v8, %v8548_v1  ;;  %v15270_v1 = vld [vmem:[#allocation52_spill] sm:$0xff]  ;;  %v7376_v42 = vld [vmem:[%s14915_s1 + $0x69] ss:$0 sm:$0xff] }
 0x237   : > { %v1505_v20 = vmul.f32 %v1431_v13, %v15265_v45 }
 0x238   : > { %1635 = vrot.lane.b32.xlu1 %v1480_v46, %s7944_s15  ;;  %1633 = vrot.lane.b32.xlu0 %v1479_v5, %s7944_s15  ;;  %v15269_v5 = vld [vmem:[#allocation53_spill] sm:$0xff] }
 0x239   : > { %1637 = vrot.lane.b32.xlu2 %v1481_v33, %s7944_s15  ;;  %v1506_v46 = vmul.f32 %v1431_v13, %v15269_v5  ;;  %v1508_v33 = vmul.f32 %v8886_v34, %v15270_v1  ;;  %v7379_v5 = vld [vmem:[%s14915_s1 + $0x6c] ss:$0 sm:$0xff] }
 0x23d   : > { %v1439_v56 = vpop.permute.xlu0 %1438 }
 0x23e   : > { %v1443_v3 = vpop.permute.xlu1 %1442  ;;  %v1510_v62 = vmul.f32 %v1439_v56, %v8594_v35  ;;  %v15279_v35 = vld [vmem:[#allocation62_spill] sm:$0xff] }
 0x240   : > { %1641 = vrot.lane.b32.xlu1 %v1483_v49, %s7944_s15  ;;  %1639 = vrot.lane.b32.xlu0 %v1482_v47, %s7944_s15  ;;  %v15274_v47 = vld [vmem:[#allocation58_spill] sm:$0xff] }
 0x241   : > { %1643 = vrot.lane.b32.xlu2 %v1484_v23, %s7944_s15  ;;  %v1509_v23 = vmul.f32 %v1439_v56, %v15274_v47  ;;  %v7380_v47 = vld [vmem:[%s14915_s1 + $0x6e] ss:$0 sm:$0xff] }
 0x245   : > { %v1451_v61 = vpop.permute.xlu0 %1450 }
 0x248   : > { %1647 = vrot.lane.b32.xlu1 %v1486_v59, %s7944_s15  ;;  %1645 = vrot.lane.b32.xlu0 %v1485_v58, %s7944_s15  ;;  %v1511_v58 = vmul.f32 %v1443_v3, %v15275_v30 }
 0x249   : > { %1649 = vrot.lane.b32.xlu2 %v1487_v15, %s7944_s15  ;;  %v1513_v15 = vmul.f32 %v8895_v22, %v8618_v19  ;;  %v7367_v19 = vld [vmem:[%s14915_s1 + $0x60] ss:$0 sm:$0xff] }
 0x24a   : > { %v8929_v7 = vpop.permute.xlu1 %1581 }
 0x24b   : > { %15254 = vst [vmem:[#allocation111_spill] sm:$0xff] %v8929_v7 }
 0x250   : > { %1653 = vrot.lane.b32.xlu1 %v1489_v54, %s7944_s15  ;;  %1651 = vrot.lane.b32.xlu0 %v1488_v12, %s7944_s15  ;;  %v1512_v54 = vmul.f32 %v1443_v3, %v8615_v21  ;;  %v1514_v12 = vmul.f32 %v8895_v22, %v15279_v35  ;;  %v1515_v21 = vmul.f32 %v1451_v61, %v8639_v32  ;;  %v7368_v3 = vld [vmem:[%s14915_s1 + $0x62] ss:$0 sm:$0xff]  ;;  %v7369_v32 = vld [vmem:[%s14915_s1 + $0x61] ss:$0 sm:$0xff] }
 0x251   : > { %1655 = vrot.lane.b32.xlu2 %v1490_v9, %s7944_s15  ;;  %v7384_v35 = vld [vmem:[%s14915_s1 + $0x70] ss:$0 sm:$0xff] }
 0x253   : > { %v8911_v6 = vpop.permute.xlu2 %1589 }
 0x254   : > { %15252 = vst [vmem:[#allocation109_spill] sm:$0xff] %v8911_v6 }
 0x258   : > { %1659 = vrot.lane.b32.xlu1 %v1492_v36, %s7944_s15  ;;  %1657 = vrot.lane.b32.xlu0 %v1491_v11, %s7944_s15  ;;  %v15283_v11 = vld [vmem:[#allocation66_spill] sm:$0xff] }
 0x259   : > { %1661 = vrot.lane.b32.xlu2 %v1493_v63, %s7944_s15  ;;  %v1516_v22 = vmul.f32 %v1451_v61, %v15283_v11 }
 0x25b   : > { %v8919_v4 = vpop.permute.xlu2 %1595 }
 0x25c   : > { %15253 = vst [vmem:[#allocation110_spill] sm:$0xff] %v8919_v4  ;;  %v9576_v4 = vld [vmem:[%s8223_s20 + $0x148] sm:$0x3] }
 0x25d   : > { %15359 = vst [vmem:[#allocation196_spill] sm:$0xff] %v9576_v4 }
 0x260   : > { %1665 = vrot.lane.b32.xlu1 %v1495_v41, %s7944_s15  ;;  %1663 = vrot.lane.b32.xlu0 %v1494_v24, %s7944_s15  ;;  %v7370_v41 = vld [vmem:[%s14915_s1 + $0x63] ss:$0 sm:$0xff] }
 0x261   : > { %1667 = vrot.lane.b32.xlu2 %v1496_v57, %s7944_s15 }
 0x263   : > { %v8931_v27 = vpop.permute.xlu2 %1601 }
 0x264   : > { %15255 = vst [vmem:[#allocation112_spill] sm:$0xff] %v8931_v27 }
 0x268   : > { %1671 = vrot.lane.b32.xlu1 %v1498_v31, %s7944_s15  ;;  %1669 = vrot.lane.b32.xlu0 %v1497_v28, %s7944_s15  ;;  %v7371_v28 = vld [vmem:[%s14915_s1 + $0x65] ss:$0 sm:$0xff]  ;;  %v7372_v31 = vld [vmem:[%s14915_s1 + $0x64] ss:$0 sm:$0xff] }
 0x269   : > { %1673 = vrot.lane.b32.xlu2 %v1499_v51, %s7944_s15 }
 0x26a   : > { %v8939_v55 = vpop.permute.xlu0 %1585  ;;  %v8941_v25 = vpop.permute.xlu1 %1587 }
 0x26b   : > { %15257 = vst [vmem:[#allocation39_spill] sm:$0xff] %v8939_v55  ;;  %v8943_v26 = vpop.permute.xlu2 %1607  ;;  %v9571_v55 = vld [vmem:[%s8223_s20 + $0x160] sm:$0x3] }
 0x26c   : > { %15258 = vst [vmem:[#allocation113_spill] sm:$0xff] %v8941_v25 }
 0x26d   : > { %15259 = vst [vmem:[#allocation114_spill] sm:$0xff] %v8943_v26 }
 0x26e   : > { %15358 = vst [vmem:[#allocation195_spill] sm:$0xff] %v9571_v55 }
 0x270   : > { %1677 = vrot.lane.b32.xlu1 %v1501_v53, %s7944_s15  ;;  %1675 = vrot.lane.b32.xlu0 %v1500_v2, %s7944_s15 }
 0x271   : > { %1679 = vrot.lane.b32.xlu2 %v1502_v0, %s7944_s15  ;;  %v7375_v0 = vld [vmem:[%s14915_s1 + $0x67] ss:$0 sm:$0xff] }
 0x272   : > { %v8953_v40 = vpop.permute.xlu0 %1591  ;;  %v8955_v37 = vpop.permute.xlu1 %1593 }
 0x273   : > { %15261 = vst [vmem:[#allocation43_spill] sm:$0xff] %v8953_v40  ;;  %v8957_v29 = vpop.permute.xlu2 %1613 }
 0x274   : > { %15262 = vst [vmem:[#allocation115_spill] sm:$0xff] %v8955_v37 }
 0x275   : > { %15263 = vst [vmem:[#allocation116_spill] sm:$0xff] %v8957_v29 }
 0x278   : > { %1683 = vrot.lane.b32.xlu1 %v1504_v10, %s7944_s15  ;;  %1681 = vrot.lane.b32.xlu0 %v1503_v18, %s7944_s15 }
 0x279   : > { %1685 = vrot.lane.b32.xlu2 %v1505_v20, %s7944_s15  ;;  %v7377_v20 = vld [vmem:[%s14915_s1 + $0x6b] ss:$0 sm:$0xff] }
 0x27a   : > { %v8965_v48 = vpop.permute.xlu0 %1597  ;;  %v8967_v44 = vpop.permute.xlu1 %1599 }
 0x27b   : > { %15266 = vst [vmem:[#allocation48_spill] sm:$0xff] %v8965_v48  ;;  %v8969_v39 = vpop.permute.xlu2 %1619  ;;  %v9543_v48 = vld [vmem:[%s8223_s20 + $0x138] sm:$0xff] }
 0x27c   : > { %15267 = vst [vmem:[#allocation47_spill] sm:$0xff] %v8967_v44 }
 0x27d   : > { %15268 = vst [vmem:[#allocation117_spill] sm:$0xff] %v8969_v39 }
 0x280   : > { %1689 = vrot.lane.b32.xlu1 %v1507_v38, %s7944_s15  ;;  %1687 = vrot.lane.b32.xlu0 %v1506_v46, %s7944_s15  ;;  %v7378_v38 = vld [vmem:[%s14915_s1 + $0x6a] ss:$0 sm:$0xff] }
 0x281   : > { %1691 = vrot.lane.b32.xlu2 %v1508_v33, %s7944_s15 }
 0x282   : > { %v8979_v43 = vpop.permute.xlu0 %1603  ;;  %v8981_v50 = vpop.permute.xlu1 %1605 }
 0x283   : > { %15271 = vst [vmem:[#allocation53_spill] sm:$0xff] %v8979_v43  ;;  %v8983_v49 = vpop.permute.xlu2 %1625  ;;  %v9521_v43 = vld [vmem:[%s8223_s20 + $0x100] sm:$0x3] }
 0x284   : > { %15272 = vst [vmem:[#allocation52_spill] sm:$0xff] %v8981_v50 }
 0x285   : > { %15273 = vst [vmem:[#allocation118_spill] sm:$0xff] %v8983_v49  ;;  %v9518_v49 = vld [vmem:[%s8223_s20 + $0x118] sm:$0x3] }
 0x288   : > { %1695 = vrot.lane.b32.xlu1 %v1510_v62, %s7944_s15  ;;  %1693 = vrot.lane.b32.xlu0 %v1509_v23, %s7944_s15  ;;  %v7381_v23 = vld [vmem:[%s14915_s1 + $0x6d] ss:$0 sm:$0xff]  ;;  %v7382_v62 = vld [vmem:[%s14915_s1 + $0x6f] ss:$0 sm:$0xff] }
 0x289   : > { %1697 = vrot.lane.b32.xlu2 %v1511_v58, %s7944_s15 }
 0x28a   : > { %v8991_v34 = vpop.permute.xlu0 %1609  ;;  %v8993_v59 = vpop.permute.xlu1 %1611 }
 0x28b   : > { %15276 = vst [vmem:[#allocation58_spill] sm:$0xff] %v8991_v34  ;;  %v8995_v60 = vpop.permute.xlu2 %1631 }
 0x28c   : > { %15277 = vst [vmem:[#allocation57_spill] sm:$0xff] %v8993_v59 }
 0x28d   : > { %15278 = vst [vmem:[#allocation119_spill] sm:$0xff] %v8995_v60 }
 0x290   : > { %1701 = vrot.lane.b32.xlu1 %v1513_v15, %s7944_s15  ;;  %1699 = vrot.lane.b32.xlu0 %v1512_v54, %s7944_s15  ;;  %v7383_v54 = vld [vmem:[%s14915_s1 + $0x71] ss:$0 sm:$0xff] }
 0x291   : > { %1703 = vrot.lane.b32.xlu2 %v1514_v12, %s7944_s15  ;;  %v7385_v12 = vld [vmem:[%s14915_s1 + $0x72] ss:$0 sm:$0xff] }
 0x292   : > { %v9005_v8 = vpop.permute.xlu0 %1615  ;;  %v9007_v9 = vpop.permute.xlu1 %1617 }
 0x293   : > { %15280 = vst [vmem:[#allocation62_spill] sm:$0xff] %v9005_v8  ;;  %v9009_v13 = vpop.permute.xlu2 %1637  ;;  %v9493_v8 = vld [vmem:[%s8223_s20 + $0xf8] sm:$0xff] }
 0x294   : > { %15281 = vst [vmem:[#allocation120_spill] sm:$0xff] %v9007_v9  ;;  %v9488_v9 = vld [vmem:[%s8223_s20 + $0xf0] sm:$0xff] }
 0x295   : > { %15282 = vst [vmem:[#allocation121_spill] sm:$0xff] %v9009_v13 }
 0x298   : > { %1707 = vrot.lane.b32.xlu1 %v1516_v22, %s7944_s15  ;;  %1705 = vrot.lane.b32.xlu0 %v1515_v21, %s7944_s15  ;;  %v7386_v22 = vld [vmem:[%s14915_s1 + $0x74] ss:$0 sm:$0xff] }
 0x299   : > { %1935 = vperm.xlu2 %7270, %v7367_v19  }
 0x29a   : > { %v9018_v36 = vpop.permute.xlu0 %1621  ;;  %v9020_v63 = vpop.permute.xlu1 %1623 }
 0x29b   : > { %15284 = vst [vmem:[#allocation66_spill] sm:$0xff] %v9018_v36  ;;  %v9022_v56 = vpop.permute.xlu2 %1643  ;;  %v9469_v36 = vld [vmem:[%s8223_s20 + $0xc8] sm:$0xff] }
 0x29c   : > { %15285 = vst [vmem:[#allocation122_spill] sm:$0xff] %v9020_v63  ;;  %v9463_v63 = vld [vmem:[%s8223_s20 + $0xd0] sm:$0x3] }
 0x29d   : > { %15286 = vst [vmem:[#allocation123_spill] sm:$0xff] %v9022_v56  ;;  %v9466_v56 = vld [vmem:[%s8223_s20 + $0xb8] sm:$0x3] }
 0x2a0   : > { %1943 = vperm.xlu1 %7269, %v7368_v3   ;;  %1939 = vperm.xlu0 %7268, %v7369_v32   ;;  %v7387_v3 = vld [vmem:[%s14915_s1 + $0x73] ss:$0 sm:$0xff]  ;;  %v7388_v32 = vld [vmem:[%s14915_s1 + $0x75] ss:$0 sm:$0xff] }
 0x2a1   : > { %1947 = vperm.xlu2 %7270, %v7370_v41  }
 0x2a2   : > { %v9033_v24 = vpop.permute.xlu0 %1627  ;;  %v9035_v57 = vpop.permute.xlu1 %1629 }
 0x2a3   : > { %15287 = vst [vmem:[#allocation124_spill] sm:$0xff] %v9033_v24  ;;  %v9037_v61 = vpop.permute.xlu2 %1649 }
 0x2a4   : > { %15288 = vst [vmem:[#allocation125_spill] sm:$0xff] %v9035_v57 }
 0x2a5   : > { %15289 = vst [vmem:[#allocation126_spill] sm:$0xff] %v9037_v61 }
 0x2a8   : > { %1955 = vperm.xlu1 %7269, %v7371_v28   ;;  %1951 = vperm.xlu0 %7268, %v7372_v31  }
 0x2a9   : > { %1959 = vperm.xlu2 %7270, %v7373_v14   ;;  %v7389_v14 = vld [vmem:[%s14915_s1 + $0x77] ss:$0 sm:$0xff] }
 0x2aa   : > { %v9048_v51 = vpop.permute.xlu0 %1633  ;;  %v9050_v53 = vpop.permute.xlu1 %1635 }
 0x2ab   : > { %15290 = vst [vmem:[#allocation127_spill] sm:$0xff] %v9048_v51  ;;  %v9052_v2 = vpop.permute.xlu2 %1655 }
 0x2ac   : > { %15291 = vst [vmem:[#allocation128_spill] sm:$0xff] %v9050_v53  ;;  %v9435_v53 = vld [vmem:[%s8223_s20 + $0xa8] sm:$0xff] }
 0x2ad   : > { %15292 = vst [vmem:[#allocation129_spill] sm:$0xff] %v9052_v2  ;;  %v9418_v2 = vld [vmem:[%s8223_s20 + $0x80] sm:$0xff] }
 0x2b0   : > { %1967 = vperm.xlu1 %7269, %v7374_v17   ;;  %1963 = vperm.xlu0 %7268, %v7375_v0   ;;  %v7390_v17 = vld [vmem:[%s14915_s1 + $0x76] ss:$0 sm:$0xff]  ;;  %v7391_v0 = vld [vmem:[%s14915_s1 + $0x78] ss:$0 sm:$0xff] }
 0x2b1   : > { %1971 = vperm.xlu2 %7270, %v7376_v42  }
 0x2b2   : > { %v9063_v18 = vpop.permute.xlu0 %1639  ;;  %v9065_v10 = vpop.permute.xlu1 %1641 }
 0x2b3   : > { %15293 = vst [vmem:[#allocation130_spill] sm:$0xff] %v9063_v18  ;;  %v9067_v45 = vpop.permute.xlu2 %1661  ;;  %v185_v18 = vld [vmem:[%s8223_s20 + $0x70] sm:$0x3] }
 0x2b4   : > { %15294 = vst [vmem:[#allocation131_spill] sm:$0xff] %v9065_v10 }
 0x2b5   : > { %15295 = vst [vmem:[#allocation132_spill] sm:$0xff] %v9067_v45  ;;  %v9414_v45 = vld [vmem:[%s8223_s20 + $0x88] sm:$0x3] }
 0x2b8   : > { %1979 = vperm.xlu1 %7269, %v7377_v20   ;;  %1975 = vperm.xlu0 %7268, %v7378_v38  }
 0x2b9   : > { %1983 = vperm.xlu2 %7270, %v7379_v5   ;;  %v7392_v5 = vld [vmem:[%s14915_s1 + $0x7a] ss:$0 sm:$0xff] }
 0x2ba   : > { %v9078_v46 = vpop.permute.xlu0 %1645  ;;  %v9080_v1 = vpop.permute.xlu1 %1647 }
 0x2bb   : > { %15296 = vst [vmem:[#allocation133_spill] sm:$0xff] %v9078_v46  ;;  %v9082_v33 = vpop.permute.xlu2 %1667 }
 0x2bc   : > { %15297 = vst [vmem:[#allocation134_spill] sm:$0xff] %v9080_v1  ;;  %v9396_v1 = vld [vmem:[%s8223_s20 + $0x58] sm:$0x3] }
 0x2bd   : > { %15298 = vst [vmem:[#allocation135_spill] sm:$0xff] %v9082_v33 }
 0x2c0   : > { %1991 = vperm.xlu1 %7269, %v7380_v47   ;;  %1987 = vperm.xlu0 %7268, %v7381_v23   ;;  %v7393_v47 = vld [vmem:[%s14915_s1 + $0x79] ss:$0 sm:$0xff]  ;;  %v7394_v23 = vld [vmem:[%s14915_s1 + $0x7b] ss:$0 sm:$0xff] }
 0x2c1   : > { %1995 = vperm.xlu2 %7270, %v7382_v62  }
 0x2c2   : > { %v9093_v30 = vpop.permute.xlu0 %1651  ;;  %v9095_v58 = vpop.permute.xlu1 %1653 }
 0x2c3   : > { %15299 = vst [vmem:[#allocation136_spill] sm:$0xff] %v9093_v30  ;;  %v9097_v15 = vpop.permute.xlu2 %1673 }
 0x2c4   : > { %15300 = vst [vmem:[#allocation137_spill] sm:$0xff] %v9095_v58 }
 0x2c5   : > { %15301 = vst [vmem:[#allocation138_spill] sm:$0xff] %v9097_v15 }
 0x2c8   : > { %2003 = vperm.xlu1 %7269, %v7383_v54   ;;  %1999 = vperm.xlu0 %7268, %v7384_v35  }
 0x2c9   : > { %2007 = vperm.xlu2 %7270, %v7385_v12   ;;  %v7395_v12 = vld [vmem:[%s14915_s1 + $0x7d] ss:$0 sm:$0xff] }
 0x2ca   : > { %v9108_v19 = vpop.permute.xlu0 %1657  ;;  %v9110_v21 = vpop.permute.xlu1 %1659 }
 0x2cb   : > { %15302 = vst [vmem:[#allocation139_spill] sm:$0xff] %v9108_v19  ;;  %v9112_v11 = vpop.permute.xlu2 %1679  ;;  %v9390_v19 = vld [vmem:[%s8223_s20 + $0x68] sm:$0xff] }
 0x2cc   : > { %15303 = vst [vmem:[#allocation140_spill] sm:$0xff] %v9110_v21 }
 0x2cd   : > { %15304 = vst [vmem:[#allocation141_spill] sm:$0xff] %v9112_v11  ;;  %v179_v11 = vld [vmem:[%s8223_s20 + $0x40] sm:$0x3] }
 0x2d0   : > { %2015 = vperm.xlu1 %7269, %v7386_v22   ;;  %2011 = vperm.xlu0 %7268, %v7387_v3   ;;  %v7396_v22 = vld [vmem:[%s14915_s1 + $0x7c] ss:$0 sm:$0xff]  ;;  %v7397_v3 = vld [vmem:[%s14915_s1 + $0x7e] ss:$0 sm:$0xff] }
 0x2d1   : > { %2019 = vperm.xlu2 %7270, %v7388_v32  }
 0x2d2   : > { %v9123_v41 = vpop.permute.xlu0 %1663  ;;  %v9125_v28 = vpop.permute.xlu1 %1665 }
 0x2d3   : > { %15305 = vst [vmem:[#allocation142_spill] sm:$0xff] %v9123_v41  ;;  %v9127_v31 = vpop.permute.xlu2 %1685 }
 0x2d4   : > { %15306 = vst [vmem:[#allocation143_spill] sm:$0xff] %v9125_v28  ;;  %v176_v28 = vld [vmem:[%s8223_s20 + $0x28] sm:$0x3] }
 0x2d5   : > { %15307 = vst [vmem:[#allocation144_spill] sm:$0xff] %v9127_v31 }
 0x2d8   : > { %2027 = vperm.xlu1 %7269, %v7389_v14   ;;  %2023 = vperm.xlu0 %7268, %v7390_v17  }
 0x2d9   : > { %2031 = vperm.xlu2 %7270, %v7391_v0   ;;  %v7398_v0 = vld [vmem:[%s14915_s1 + $0x80] ss:$0 sm:$0xff] }
 0x2da   : > { %v9138_v42 = vpop.permute.xlu0 %1669  ;;  %v9140_v20 = vpop.permute.xlu1 %1671 }
 0x2db   : > { %15308 = vst [vmem:[#allocation145_spill] sm:$0xff] %v9138_v42  ;;  %v9142_v38 = vpop.permute.xlu2 %1691  ;;  %v173_v42 = vld [vmem:[%s8223_s20 + $0x10] sm:$0x3] }
 0x2dc   : > { %15309 = vst [vmem:[#allocation146_spill] sm:$0xff] %v9140_v20 }
 0x2dd   : > { %15310 = vst [vmem:[#allocation147_spill] sm:$0xff] %v9142_v38 }
 0x2e0   : > { %2039 = vperm.xlu1 %7269, %v7392_v5   ;;  %2035 = vperm.xlu0 %7268, %v7393_v47   ;;  %v7399_v5 = vld [vmem:[%s14915_s1 + $0x7f] ss:$0 sm:$0xff]  ;;  %v7400_v47 = vld [vmem:[%s14915_s1 + $0x81] ss:$0 sm:$0xff] }
 0x2e1   : > { %2043 = vperm.xlu2 %7270, %v7394_v23  }
 0x2e2   : > { %v9153_v62 = vpop.permute.xlu0 %1675  ;;  %v9155_v54 = vpop.permute.xlu1 %1677 }
 0x2e3   : > { %15311 = vst [vmem:[#allocation148_spill] sm:$0xff] %v9153_v62  ;;  %v9157_v35 = vpop.permute.xlu2 %1697 }
 0x2e4   : > { %15312 = vst [vmem:[#allocation149_spill] sm:$0xff] %v9155_v54 }
 0x2e5   : > { %15313 = vst [vmem:[#allocation150_spill] sm:$0xff] %v9157_v35  ;;  %v9348_v35 = vld [vmem:[%s8223_s20 + $0x20] sm:$0xff] }
 0x2e8   : > { %2051 = vperm.xlu1 %7269, %v7395_v12   ;;  %2047 = vperm.xlu0 %7268, %v7396_v22  }
 0x2e9   : > { %2055 = vperm.xlu2 %7270, %v7397_v3   ;;  %v7401_v3 = vld [vmem:[%s14915_s1 + $0x83] ss:$0 sm:$0xff] }
 0x2ea   : > { %v9168_v32 = vpop.permute.xlu0 %1681  ;;  %v9170_v14 = vpop.permute.xlu1 %1683 }
 0x2eb   : > { %15314 = vst [vmem:[#allocation151_spill] sm:$0xff] %v9168_v32  ;;  %v9172_v17 = vpop.permute.xlu2 %1703  ;;  %v9344_v32 = vld [vmem:[%s8223_s20 + $0x18] sm:$0xff] }
 0x2ec   : > { %15315 = vst [vmem:[#allocation152_spill] sm:$0xff] %v9170_v14  ;;  %v7405_v14 = vld [vmem:[%s14915_s1 + $0x85] ss:$0 sm:$0xff] }
 0x2ed   : > { %15316 = vst [vmem:[#allocation153_spill] sm:$0xff] %v9172_v17  ;;  %v7402_v17 = vld [vmem:[%s14915_s1 + $0x82] ss:$0 sm:$0xff] }
 0x2f0   : > { %2641 = vperm.xlu1 %7269, %v7398_v0   ;;  %2059 = vperm.xlu0 %7268, %v7399_v5   ;;  %v7403_v0 = vld [vmem:[%s14915_s1 + $0x84] ss:$0 sm:$0xff] }
 0x2f1   : > { %2645 = vperm.xlu2 %7270, %v7400_v47  }
 0x2f2   : > { %v9183_v23 = vpop.permute.xlu0 %1687  ;;  %v9185_v12 = vpop.permute.xlu1 %1689 }
 0x2f3   : > { %15317 = vst [vmem:[#allocation154_spill] sm:$0xff] %v9183_v23  ;;  %v9187_v22 = vpop.permute.xlu2 %1935  ;;  %v7404_v23 = vld [vmem:[%s14915_s1 + $0x86] ss:$0 sm:$0xff] }
 0x2f4   : > { %15318 = vst [vmem:[#allocation155_spill] sm:$0xff] %v9185_v12 }
 0x2f5   : > { %15319 = vst [vmem:[#allocation156_spill] sm:$0xff] %v9187_v22 }
 0x2f8   : > { %2653 = vperm.xlu1 %7269, %v7401_v3   ;;  %2649 = vperm.xlu0 %7268, %v7402_v17   ;;  %v7406_v3 = vld [vmem:[%s14915_s1 + $0x87] ss:$0 sm:$0xff] }
 0x2f9   : > { %2657 = vperm.xlu2 %7270, %v7403_v0  }
 0x2fa   : > { %v9198_v5 = vpop.permute.xlu0 %1693  ;;  %v9200_v47 = vpop.permute.xlu1 %1695 }
 0x2fb   : > { %15320 = vst [vmem:[#allocation157_spill] sm:$0xff] %v9198_v5  ;;  %v9202_v12 = vpop.permute.xlu2 %1947  ;;  %v7407_v5 = vld [vmem:[%s14915_s1 + $0x89] ss:$0 sm:$0xff] }
 0x2fc   : > { %15321 = vst [vmem:[#allocation158_spill] sm:$0xff] %v9200_v47 }
 0x2fd   : > { %15322 = vst [vmem:[#allocation159_spill] sm:$0xff] %v9202_v12  ;;  %v7408_v12 = vld [vmem:[%s14915_s1 + $0x88] ss:$0 sm:$0xff] }
 0x300   : > { %2665 = vperm.xlu1 %7269, %v7404_v23   ;;  %2661 = vperm.xlu0 %7268, %v7405_v14   ;;  %v7409_v23 = vld [vmem:[%s14915_s1 + $0x8a] ss:$0 sm:$0xff] }
 0x301   : > { %2669 = vperm.xlu2 %7270, %v7406_v3  }
 0x302   : > { %v9213_v17 = vpop.permute.xlu0 %1699  ;;  %v9215_v0 = vpop.permute.xlu1 %1701 }
 0x303   : > { %15323 = vst [vmem:[#allocation160_spill] sm:$0xff] %v9213_v17  ;;  %v9217_v47 = vpop.permute.xlu2 %1959  ;;  %v7410_v17 = vld [vmem:[%s14915_s1 + $0x8c] ss:$0 sm:$0xff] }
 0x304   : > { %15324 = vst [vmem:[#allocation161_spill] sm:$0xff] %v9215_v0 }
 0x305   : > { %15325 = vst [vmem:[#allocation162_spill] sm:$0xff] %v9217_v47  ;;  %v7411_v47 = vld [vmem:[%s14915_s1 + $0x8b] ss:$0 sm:$0xff] }
 0x308   : > { %2677 = vperm.xlu1 %7269, %v7407_v5   ;;  %2673 = vperm.xlu0 %7268, %v7408_v12   ;;  %v7412_v5 = vld [vmem:[%s14915_s1 + $0x8d] ss:$0 sm:$0xff] }
 0x309   : > { %2681 = vperm.xlu2 %7270, %v7409_v23  }
 0x30a   : > { %v9228_v14 = vpop.permute.xlu0 %1705  ;;  %v9230_v3 = vpop.permute.xlu1 %1707 }
 0x30b   : > { %15326 = vst [vmem:[#allocation163_spill] sm:$0xff] %v9228_v14  ;;  %v9232_v0 = vpop.permute.xlu2 %1971  ;;  %v7413_v14 = vld [vmem:[%s14915_s1 + $0x8f] ss:$0 sm:$0xff] }
 0x30c   : > { %15327 = vst [vmem:[#allocation164_spill] sm:$0xff] %v9230_v3 }
 0x30d   : > { %15328 = vst [vmem:[#allocation165_spill] sm:$0xff] %v9232_v0  ;;  %v7414_v0 = vld [vmem:[%s14915_s1 + $0x8e] ss:$0 sm:$0xff] }
 0x310   : > { %2689 = vperm.xlu1 %7269, %v7410_v17   ;;  %2685 = vperm.xlu0 %7268, %v7411_v47   ;;  %v7415_v17 = vld [vmem:[%s14915_s1 + $0x90] ss:$0 sm:$0xff] }
 0x311   : > { %2693 = vperm.xlu2 %7270, %v7412_v5  }
 0x312   : > { %v9243_v12 = vpop.permute.xlu0 %1939  ;;  %v9245_v23 = vpop.permute.xlu1 %1943 }
 0x313   : > { %15329 = vst [vmem:[#allocation166_spill] sm:$0xff] %v9243_v12  ;;  %v9247_v3 = vpop.permute.xlu2 %1983  ;;  %v7417_v12 = vld [vmem:[%s14915_s1 + $0x91] ss:$0 sm:$0xff] }
 0x314   : > { %15330 = vst [vmem:[#allocation167_spill] sm:$0xff] %v9245_v23 }
 0x315   : > { %15331 = vst [vmem:[#allocation168_spill] sm:$0xff] %v9247_v3  ;;  %v7416_v3 = vld [vmem:[%s14915_s1 + $0x92] ss:$0 sm:$0xff] }
 0x318   : > { %2701 = vperm.xlu1 %7269, %v7413_v14   ;;  %2697 = vperm.xlu0 %7268, %v7414_v0   ;;  %v7418_v14 = vld [vmem:[%s14915_s1 + $0x93] ss:$0 sm:$0xff] }
 0x319   : > { %2705 = vperm.xlu2 %7270, %v7415_v17  }
 0x31a   : > { %v9258_v47 = vpop.permute.xlu0 %1951  ;;  %v9260_v5 = vpop.permute.xlu1 %1955 }
 0x31b   : > { %15332 = vst [vmem:[#allocation169_spill] sm:$0xff] %v9258_v47  ;;  %v9262_v23 = vpop.permute.xlu2 %1995  ;;  %v7420_v47 = vld [vmem:[%s14915_s1 + $0x94] ss:$0 sm:$0xff] }
 0x31c   : > { %15333 = vst [vmem:[#allocation170_spill] sm:$0xff] %v9260_v5 }
 0x31d   : > { %15334 = vst [vmem:[#allocation171_spill] sm:$0xff] %v9262_v23  ;;  %v7419_v23 = vld [vmem:[%s14915_s1 + $0x95] ss:$0 sm:$0xff] }
 0x320   : > { %2713 = vperm.xlu1 %7269, %v7416_v3   ;;  %2709 = vperm.xlu0 %7268, %v7417_v12   ;;  %v7421_v3 = vld [vmem:[%s14915_s1 + $0x96] ss:$0 sm:$0xff] }
 0x321   : > { %2717 = vperm.xlu2 %7270, %v7418_v14  }
 0x322   : > { %v9273_v0 = vpop.permute.xlu0 %1963  ;;  %v9275_v17 = vpop.permute.xlu1 %1967 }
 0x323   : > { %15335 = vst [vmem:[#allocation172_spill] sm:$0xff] %v9273_v0  ;;  %v9277_v5 = vpop.permute.xlu2 %2007  ;;  %v7423_v0 = vld [vmem:[%s14915_s1 + $0x97] ss:$0 sm:$0xff] }
 0x324   : > { %15336 = vst [vmem:[#allocation173_spill] sm:$0xff] %v9275_v17 }
 0x325   : > { %15337 = vst [vmem:[#allocation174_spill] sm:$0xff] %v9277_v5  ;;  %v7422_v5 = vld [vmem:[%s14915_s1 + $0x98] ss:$0 sm:$0xff] }
 0x328   : > { %2725 = vperm.xlu1 %7269, %v7419_v23   ;;  %2721 = vperm.xlu0 %7268, %v7420_v47   ;;  %v7424_v23 = vld [vmem:[%s14915_s1 + $0x99] ss:$0 sm:$0xff] }
 0x329   : > { %2729 = vperm.xlu2 %7270, %v7421_v3  }
 0x32a   : > { %v9288_v12 = vpop.permute.xlu0 %1975  ;;  %v9290_v14 = vpop.permute.xlu1 %1979 }
 0x32b   : > { %15338 = vst [vmem:[#allocation175_spill] sm:$0xff] %v9288_v12  ;;  %v9292_v17 = vpop.permute.xlu2 %2019  ;;  %v7426_v12 = vld [vmem:[%s14915_s1 + $0x9a] ss:$0 sm:$0xff] }
 0x32c   : > { %15339 = vst [vmem:[#allocation176_spill] sm:$0xff] %v9290_v14  ;;  %v7425_v14 = vld [vmem:[%s14915_s1 + $0x9b] ss:$0 sm:$0xff] }
 0x32d   : > { %15340 = vst [vmem:[#allocation177_spill] sm:$0xff] %v9292_v17 }
 0x330   : > { %2737 = vperm.xlu1 %7269, %v7422_v5   ;;  %2733 = vperm.xlu0 %7268, %v7423_v0   ;;  %v7427_v5 = vld [vmem:[%s14915_s1 + $0x9c] ss:$0 sm:$0xff] }
 0x331   : > { %2741 = vperm.xlu2 %7270, %v7424_v23  }
 0x332   : > { %v9303_v47 = vpop.permute.xlu0 %1987  ;;  %v9305_v3 = vpop.permute.xlu1 %1991 }
 0x333   : > { %15341 = vst [vmem:[#allocation178_spill] sm:$0xff] %v9303_v47  ;;  %v9307_v17 = vpop.permute.xlu2 %2031  ;;  %v7429_v47 = vld [vmem:[%s14915_s1 + $0x9d] ss:$0 sm:$0xff] }
 0x334   : > { %15342 = vst [vmem:[#allocation179_spill] sm:$0xff] %v9305_v3 }
 0x335   : > { %15343 = vst [vmem:[#allocation180_spill] sm:$0xff] %v9307_v17  ;;  %v7428_v17 = vld [vmem:[%s14915_s1 + $0x9e] ss:$0 sm:$0xff] }
 0x338   : > { %2749 = vperm.xlu1 %7269, %v7425_v14   ;;  %2745 = vperm.xlu0 %7268, %v7426_v12   ;;  %v7430_v12 = vld [vmem:[%s14915_s1 + $0x9f] ss:$0 sm:$0xff] }
 0x339   : > { %2753 = vperm.xlu2 %7270, %v7427_v5  }
 0x33a   : > { %v9318_v0 = vpop.permute.xlu0 %1999  ;;  %v9320_v23 = vpop.permute.xlu1 %2003 }
 0x33b   : > { %15344 = vst [vmem:[#allocation181_spill] sm:$0xff] %v9318_v0  ;;  %v9322_v3 = vpop.permute.xlu2 %2043 }
 0x33c   : > { %15345 = vst [vmem:[#allocation182_spill] sm:$0xff] %v9320_v23 }
 0x33d   : > { %15346 = vst [vmem:[#allocation183_spill] sm:$0xff] %v9322_v3 }
 0x340   : > { %2761 = vperm.xlu1 %7269, %v7428_v17   ;;  %2757 = vperm.xlu0 %7268, %v7429_v47  }
 0x341   : > { %2765 = vperm.xlu2 %7270, %v7430_v12  }
 0x342   : > { %v9333_v14 = vpop.permute.xlu0 %2011  ;;  %v9335_v5 = vpop.permute.xlu1 %2015 }
 0x343   : > { %15347 = vst [vmem:[#allocation184_spill] sm:$0xff] %v9333_v14  ;;  %v9337_v23 = vpop.permute.xlu2 %2055 }
 0x344   : > { %15348 = vst [vmem:[#allocation185_spill] sm:$0xff] %v9335_v5 }
 0x345   : > { %15349 = vst [vmem:[#allocation186_spill] sm:$0xff] %v9337_v23 }
 0x34a   : > { %v9339_v3 = vpop.permute.xlu0 %2023  ;;  %v9341_v0 = vpop.permute.xlu1 %2027 }
 0x34b   : > { %15350 = vst [vmem:[#allocation187_spill] sm:$0xff] %v9339_v3  ;;  %v2646_v22 = vpop.permute.xlu2 %2645 }
 0x34c   : > { %15351 = vst [vmem:[#allocation188_spill] sm:$0xff] %v9341_v0  ;;  %v2771_v54 = vmul.f32 %v9344_v32, %v2646_v22  ;;  %v2772_v17 = vmul.f32 %v9348_v35, %v2646_v22 }
 0x34e   : > { %v2965_v47 = vrot.slane %v2771_v54, 1  ;;  %v2966_v12 = vrot.slane %v2772_v17, 1  ;;  %v7593_v17 = vld [vmem:[%s8223_s20] sm:$0xff] }
 0x350   : > { %v2967_v5 = vsel %vm2254_vm0, %v2965_v47, %v2966_v12  ;;  %v9366_v47 = vld [vmem:[%s8223_s20 + $0x8] sm:$0xff] }
 0x351   : > { %3124 = vrot.lane.b32.xlu2 %v2967_v5, %s7943_s21 }
 0x352   : > { %v9353_v0 = vpop.permute.xlu0 %2035  ;;  %v9355_v3 = vpop.permute.xlu1 %2039 }
 0x353   : > { %15352 = vst [vmem:[#allocation189_spill] sm:$0xff] %v9353_v0  ;;  %v2658_v62 = vpop.permute.xlu2 %2657 }
 0x354   : > { %15353 = vst [vmem:[#allocation190_spill] sm:$0xff] %v9355_v3  ;;  %v2781_v58 = vmul.f32 %v9390_v19, %v2658_v62 }
 0x35a   : > { %v9357_v23 = vpop.permute.xlu0 %2047  ;;  %v9359_v14 = vpop.permute.xlu1 %2051 }
 0x35b   : > { %15354 = vst [vmem:[#allocation191_spill] sm:$0xff] %v9357_v23 }
 0x35c   : > { %15355 = vst [vmem:[#allocation192_spill] sm:$0xff] %v9359_v14  ;;  %v2773_v14 = vmul.f32 %v2646_v22, %v176_v28  ;;  %v9382_v28 = vld [vmem:[%s8223_s20 + $0x38] sm:$0xff] }
 0x362   : > { %v9361_v20 = vpop.permute.xlu0 %2059  ;;  %v2642_v54 = vpop.permute.xlu1 %2641 }
 0x363   : > { %15356 = vst [vmem:[#allocation193_spill] sm:$0xff] %v9361_v20  ;;  %v2768_v38 = vmul.f32 %v7593_v17, %v2642_v54  ;;  %v2769_v5 = vmul.f32 %v9366_v47, %v2642_v54  ;;  %v2770_v0 = vmul.f32 %v2642_v54, %v173_v42  ;;  %v9373_v17 = vpop.permute.xlu2 %2669  ;;  %v9378_v42 = vld [vmem:[%s8223_s20 + $0x30] sm:$0xff] }
 0x365   : > { %v2960_v3 = vrot.slane %v2768_v38, 1  ;;  %v2961_v31 = vrot.slane %v2769_v5, 1  ;;  %v2963_v23 = vrot.slane %v2770_v0, 1  ;;  %v9386_v5 = vld [vmem:[%s8223_s20 + $0x60] sm:$0xff] }
 0x367   : > { %v2964_v41 = vsel %vm2254_vm0, %v2961_v31, %v2963_v23  ;;  %v2962_v20 = vsel %vm2254_vm0, %v2960_v3, %v2961_v31  ;;  %v2968_v3 = vrot.slane %v2773_v14, 1  ;;  %v9404_v14 = vld [vmem:[%s8223_s20 + $0x50] sm:$0xff] }
 0x368   : > { %3122 = vrot.lane.b32.xlu1 %v2964_v41, %s7943_s21  ;;  %3120 = vrot.lane.b32.xlu0 %v2962_v20, %s7943_s21  ;;  %v2780_v20 = vmul.f32 %v9386_v5, %v2658_v62 }
 0x36a   : > { %v2650_v21 = vpop.permute.xlu0 %2649  ;;  %v2654_v41 = vpop.permute.xlu1 %2653 }
 0x36b   : > { %v2774_v38 = vmul.f32 %v9378_v42, %v2650_v21  ;;  %v2775_v31 = vmul.f32 %v9382_v28, %v2650_v21  ;;  %v2776_v22 = vmul.f32 %v2650_v21, %v179_v11  ;;  %v9400_v21 = vld [vmem:[%s8223_s20 + $0x48] sm:$0xff] }
 0x36c   : > { %v2777_v11 = vmul.f32 %v9400_v21, %v2654_v41 }
 0x36d   : > { %v2970_v0 = vrot.slane %v2774_v38, 1  ;;  %v2971_v23 = vrot.slane %v2775_v31, 1  ;;  %v2973_v54 = vrot.slane %v2776_v22, 1  ;;  %v2778_v38 = vmul.f32 %v9404_v14, %v2654_v41 }
 0x36e   : > { %v2779_v31 = vmul.f32 %v2654_v41, %v9396_v1  ;;  %v2969_v22 = vsel %vm2254_vm0, %v2966_v12, %v2968_v3  ;;  %v2975_v33 = vrot.slane %v2777_v11, 1  ;;  %v2782_v41 = vmul.f32 %v2658_v62, %v185_v18 }
 0x36f   : > { %v2974_v15 = vsel %vm2254_vm0, %v2971_v23, %v2973_v54  ;;  %v2972_v30 = vsel %vm2254_vm0, %v2970_v0, %v2971_v23  ;;  %v2981_v0 = vrot.slane %v2781_v58, 1  ;;  %v9411_v23 = vpop.permute.xlu2 %2681  ;;  %v2976_v46 = vrot.slane %v2778_v38, 1  ;;  %v9425_v58 = vld [vmem:[%s8223_s20 + $0x78] sm:$0xff] }
 0x370   : > { %3130 = vrot.lane.b32.xlu2 %v2974_v15, %s7943_s21  ;;  %3128 = vrot.lane.b32.xlu1 %v2972_v30, %s7943_s21  ;;  %v2980_v15 = vrot.slane %v2780_v20, 1  ;;  %v2978_v10 = vrot.slane %v2779_v31, 1  ;;  %v2983_v62 = vrot.slane %v2782_v41, 1  ;;  %v9451_v41 = vld [vmem:[%s8223_s20 + $0x90] sm:$0xff] }
 0x371   : > { %3126 = vrot.lane.b32.xlu0 %v2969_v22, %s7943_s21  ;;  %v2977_v38 = vsel %vm2254_vm0, %v2975_v33, %v2976_v46 }
 0x372   : > { %v2662_v54 = vpop.permute.xlu0 %2661  ;;  %v2982_v3 = vsel %vm2254_vm0, %v2980_v15, %v2981_v0  ;;  %v2979_v11 = vsel %vm2254_vm0, %v2976_v46, %v2978_v10  ;;  %v2789_v10 = vmul.f32 %v9435_v53, %v9373_v17 }
 0x373   : > { %v2784_v12 = vmul.f32 %v9418_v2, %v2662_v54  ;;  %v2785_v30 = vmul.f32 %v2662_v54, %v9414_v45  ;;  %v2783_v20 = vmul.f32 %v9425_v58, %v2662_v54  ;;  %v9440_v54 = vld [vmem:[%s8223_s20 + $0xb0] sm:$0xff] }
 0x374   : > { %v2790_v46 = vmul.f32 %v9440_v54, %v9373_v17 }
 0x375   : > { %v2986_v31 = vrot.slane %v2784_v12, 1  ;;  %v2988_v18 = vrot.slane %v2785_v30, 1  ;;  %v2985_v22 = vrot.slane %v2783_v20, 1  ;;  %v9446_v12 = vld [vmem:[%s8223_s20 + $0xa0] sm:$0x3]  ;;  %v2984_v30 = vsel %vm2254_vm0, %v2981_v0, %v2983_v62 }
 0x376   : > { %v2995_v0 = vrot.slane %v2789_v10, 1  ;;  %v2996_v62 = vrot.slane %v2790_v46, 1  ;;  %v2791_v10 = vmul.f32 %v9373_v17, %v9466_v56 }
 0x377   : > { %v9432_v15 = vpop.permute.xlu2 %2693  ;;  %v2989_v33 = vsel %vm2254_vm0, %v2986_v31, %v2988_v18  ;;  %v2987_v18 = vsel %vm2254_vm0, %v2985_v22, %v2986_v31 }
 0x378   : > { %3136 = vrot.lane.b32.xlu2 %v2982_v3, %s7943_s21  ;;  %3134 = vrot.lane.b32.xlu1 %v2979_v11, %s7943_s21  ;;  %v2666_v3 = vpop.permute.xlu1 %2665  ;;  %v9455_v11 = vld [vmem:[%s8223_s20 + $0x98] sm:$0xff]  ;;  %v2997_v22 = vsel %vm2254_vm0, %v2995_v0, %v2996_v62  ;;  %v2998_v0 = vrot.slane %v2791_v10, 1 }
 0x379   : > { %3132 = vrot.lane.b32.xlu0 %v2977_v38, %s7943_s21  ;;  %v2786_v20 = vmul.f32 %v9451_v41, %v2666_v3  ;;  %v2787_v38 = vmul.f32 %v9455_v11, %v2666_v3  ;;  %v2788_v51 = vmul.f32 %v2666_v3, %v9446_v12 }
 0x37b   : > { %v2990_v57 = vrot.slane %v2786_v20, 1  ;;  %v2991_v61 = vrot.slane %v2787_v38, 1  ;;  %v2993_v24 = vrot.slane %v2788_v51, 1  ;;  %v9480_v51 = vld [vmem:[%s8223_s20 + $0xc0] sm:$0xff] }
 0x37d   : > { %v2994_v20 = vsel %vm2254_vm0, %v2991_v61, %v2993_v24  ;;  %v2992_v38 = vsel %vm2254_vm0, %v2990_v57, %v2991_v61  ;;  %v2799_v24 = vmul.f32 %v9493_v8, %v9411_v23  ;;  %v9499_v61 = vld [vmem:[%s8223_s20 + $0xe8] sm:$0x3] }
 0x37f   : > { %v9476_v46 = vpop.permute.xlu2 %2705 }
 0x380   : > { %3142 = vrot.lane.b32.xlu2 %v2989_v33, %s7943_s21  ;;  %3140 = vrot.lane.b32.xlu1 %v2987_v18, %s7943_s21  ;;  %v2674_v33 = vpop.permute.xlu0 %2673 }
 0x381   : > { %3138 = vrot.lane.b32.xlu0 %v2984_v30, %s7943_s21  ;;  %v2793_v3 = vmul.f32 %v9469_v36, %v2674_v33  ;;  %v2794_v31 = vmul.f32 %v2674_v33, %v9463_v63  ;;  %v2792_v30 = vmul.f32 %v9480_v51, %v2674_v33  ;;  %v2798_v33 = vmul.f32 %v9488_v9, %v9411_v23 }
 0x383   : > { %v3001_v17 = vrot.slane %v2793_v3, 1  ;;  %v3003_v18 = vrot.slane %v2794_v31, 1  ;;  %v3000_v13 = vrot.slane %v2792_v30, 1  ;;  %v2999_v3 = vsel %vm2254_vm0, %v2996_v62, %v2998_v0  ;;  %v9504_v31 = vld [vmem:[%s8223_s20 + $0xd8] sm:$0xff]  ;;  %v9508_v30 = vld [vmem:[%s8223_s20 + $0xe0] sm:$0xff] }
 0x384   : > { %v3010_v62 = vrot.slane %v2798_v33, 1  ;;  %v3011_v0 = vrot.slane %v2799_v24, 1  ;;  %v2800_v33 = vmul.f32 %v9411_v23, %v9521_v43 }
 0x385   : > { %v3004_v57 = vsel %vm2254_vm0, %v3001_v17, %v3003_v18  ;;  %v3002_v18 = vsel %vm2254_vm0, %v3000_v13, %v3001_v17 }
 0x386   : > { %v3013_v44 = vrot.slane %v2800_v33, 1 }
 0x387   : > { %v9513_v59 = vpop.permute.xlu2 %2717 }
 0x388   : > { %3148 = vrot.lane.b32.xlu2 %v2997_v22, %s7943_s21  ;;  %3146 = vrot.lane.b32.xlu1 %v2994_v20, %s7943_s21  ;;  %v2678_v22 = vpop.permute.xlu1 %2677 }
 0x389   : > { %3144 = vrot.lane.b32.xlu0 %v2992_v38, %s7943_s21  ;;  %v2795_v10 = vmul.f32 %v9504_v31, %v2678_v22  ;;  %v2796_v20 = vmul.f32 %v9508_v30, %v2678_v22  ;;  %v2797_v38 = vmul.f32 %v2678_v22, %v9499_v61  ;;  %v9524_v22 = vld [vmem:[%s8223_s20 + $0x110] sm:$0xff] }
 0x38b   : > { %v3005_v60 = vrot.slane %v2795_v10, 1  ;;  %v3006_v34 = vrot.slane %v2796_v20, 1  ;;  %v3008_v50 = vrot.slane %v2797_v38, 1  ;;  %v9533_v10 = vld [vmem:[%s8223_s20 + $0x108] sm:$0xff] }
 0x38d   : > { %v3009_v38 = vsel %vm2254_vm0, %v3006_v34, %v3008_v50  ;;  %v9548_v50 = vld [vmem:[%s8223_s20 + $0x140] sm:$0xff] }
 0x38f   : > { %v9540_v39 = vpop.permute.xlu2 %2729 }
 0x390   : > { %3154 = vrot.lane.b32.xlu2 %v3004_v57, %s7943_s21  ;;  %3152 = vrot.lane.b32.xlu1 %v3002_v18, %s7943_s21  ;;  %v2686_v57 = vpop.permute.xlu0 %2685  ;;  %v2690_v24 = vpop.permute.xlu1 %2689  ;;  %v3007_v18 = vsel %vm2254_vm0, %v3005_v60, %v3006_v34  ;;  %v2808_v34 = vmul.f32 %v9548_v50, %v9432_v15 }
 0x391   : > { %3150 = vrot.lane.b32.xlu0 %v2999_v3, %s7943_s21  ;;  %v2802_v13 = vmul.f32 %v9524_v22, %v2686_v57  ;;  %v2803_v17 = vmul.f32 %v2686_v57, %v9518_v49  ;;  %v3012_v3 = vsel %vm2254_vm0, %v3010_v62, %v3011_v0  ;;  %v2801_v20 = vmul.f32 %v9533_v10, %v2686_v57 }
 0x392   : > { %v2807_v57 = vmul.f32 %v9543_v48, %v9432_v15 }
 0x393   : > { %v3016_v23 = vrot.slane %v2802_v13, 1  ;;  %v3018_v62 = vrot.slane %v2803_v17, 1  ;;  %v3014_v13 = vsel %vm2254_vm0, %v3011_v0, %v3013_v44  ;;  %v9559_v17 = vld [vmem:[%s8223_s20 + $0x120] sm:$0xff]  ;;  %v3026_v0 = vrot.slane %v2808_v34, 1 }
 0x394   : > { %15357 = vst [vmem:[#allocation194_spill] sm:$0xff] %v9559_v17  ;;  %v2804_v33 = vmul.f32 %v9559_v17, %v2690_v24  ;;  %v3025_v44 = vrot.slane %v2807_v57, 1  ;;  %v2809_v57 = vmul.f32 %v9432_v15, %v9576_v4  ;;  %v9690_v17 = vld [vmem:[%s8223_s20 + $0x1d8] sm:$0x3] }
 0x395   : > { %v3019_v60 = vsel %vm2254_vm0, %v3016_v23, %v3018_v62  ;;  %15377 = vst [vmem:[#allocation214_spill] sm:$0xff] %v9690_v17 }
 0x396   : > { %v3028_v6 = vrot.slane %v2809_v57, 1  ;;  %v9614_v57 = vld [vmem:[%s8223_s20 + $0x168] sm:$0xff] }
 0x397   : > { %v9573_v27 = vpop.permute.xlu2 %2741  ;;  %15365 = vst [vmem:[#allocation202_spill] sm:$0xff] %v9614_v57 }
 0x398   : > { %3160 = vrot.lane.b32.xlu2 %v3012_v3, %s7943_s21  ;;  %3158 = vrot.lane.b32.xlu1 %v3009_v38, %s7943_s21  ;;  %v3015_v3 = vrot.slane %v2801_v20, 1  ;;  %v9554_v38 = vld [vmem:[%s8223_s20 + $0x130] sm:$0x3]  ;;  %v9563_v20 = vld [vmem:[%s8223_s20 + $0x128] sm:$0xff]  ;;  %v2698_v62 = vpop.permute.xlu0 %2697  ;;  %v2702_v40 = vpop.permute.xlu1 %2701 }
 0x399   : > { %3156 = vrot.lane.b32.xlu0 %v3007_v18, %s7943_s21  ;;  %v2805_v18 = vmul.f32 %v9563_v20, %v2690_v24  ;;  %v2806_v37 = vmul.f32 %v2690_v24, %v9554_v38  ;;  %v9579_v24 = vld [vmem:[%s8223_s20 + $0x158] sm:$0xff] }
 0x39a   : > { %v3017_v29 = vsel %vm2254_vm0, %v3015_v3, %v3016_v23  ;;  %15360 = vst [vmem:[#allocation197_spill] sm:$0xff] %v9579_v24  ;;  %v2811_v23 = vmul.f32 %v9579_v24, %v2698_v62  ;;  %v3027_v3 = vsel %vm2254_vm0, %v3025_v44, %v3026_v0 }
 0x39b   : > { %v3021_v25 = vrot.slane %v2805_v18, 1  ;;  %v3023_v26 = vrot.slane %v2806_v37, 1  ;;  %v9588_v37 = vld [vmem:[%s8223_s20 + $0x150] sm:$0xff] }
 0x39c   : > { %15361 = vst [vmem:[#allocation198_spill] sm:$0xff] %v9588_v37  ;;  %v2810_v34 = vmul.f32 %v9588_v37, %v2698_v62  ;;  %v3031_v18 = vrot.slane %v2811_v23, 1  ;;  %v9687_v37 = vld [vmem:[%s8223_s20 + $0x1f0] sm:$0x3] }
 0x39d   : > { %15376 = vst [vmem:[#allocation213_spill] sm:$0xff] %v9687_v37 }
 0x39e   : > { %v3030_v7 = vrot.slane %v2810_v34, 1  ;;  %v2813_v34 = vmul.f32 %v9614_v57, %v2702_v40 }
 0x39f   : > { %v9609_v23 = vpop.permute.xlu2 %2753 }
 0x3a0   : > { %3166 = vrot.lane.b32.xlu2 %v3019_v60, %s7943_s21  ;;  %3164 = vrot.lane.b32.xlu1 %v3017_v29, %s7943_s21  ;;  %v3020_v60 = vrot.slane %v2804_v33, 1  ;;  %v2812_v29 = vmul.f32 %v2698_v62, %v9571_v55  ;;  %v2710_v15 = vpop.permute.xlu0 %2709  ;;  %v2816_v62 = vmul.f32 %v9596_v16, %v9476_v46  ;;  %v9626_v55 = vld [vmem:[%s8223_s20 + $0x1a8] sm:$0x3] }
 0x3a1   : > { %3162 = vrot.lane.b32.xlu0 %v3014_v13, %s7943_s21  ;;  %v3024_v13 = vsel %vm2254_vm0, %v3021_v25, %v3023_v26  ;;  %v9601_v26 = vld [vmem:[%s8223_s20 + $0x188] sm:$0xff]  ;;  %15367 = vst [vmem:[#allocation204_spill] sm:$0xff] %v9626_v55 }
 0x3a2   : > { %v3022_v33 = vsel %vm2254_vm0, %v3020_v60, %v3021_v25  ;;  %v3033_v44 = vrot.slane %v2812_v29, 1  ;;  %15363 = vst [vmem:[#allocation200_spill] sm:$0xff] %v9601_v26  ;;  %v2817_v25 = vmul.f32 %v9601_v26, %v9476_v46  ;;  %v3029_v29 = vsel %vm2254_vm0, %v3026_v0, %v3028_v6 }
 0x3a3   : > { %v3032_v26 = vsel %vm2254_vm0, %v3030_v7, %v3031_v18  ;;  %v3040_v6 = vrot.slane %v2816_v62, 1 }
 0x3a4   : > { %v3034_v60 = vsel %vm2254_vm0, %v3031_v18, %v3033_v44  ;;  %v3041_v0 = vrot.slane %v2817_v25, 1  ;;  %v2821_v18 = vmul.f32 %v2710_v15, %v9626_v55  ;;  %v9653_v55 = vld [vmem:[%s8223_s20 + $0x1c8] sm:$0xff] }
 0x3a5   : > { %15371 = vst [vmem:[#allocation208_spill] sm:$0xff] %v9653_v55 }
 0x3a6   : > { %v3042_v62 = vsel %vm2254_vm0, %v3040_v6, %v3041_v0 }
 0x3a8   : > { %3172 = vrot.lane.b32.xlu2 %v3027_v3, %s7943_s21  ;;  %3170 = vrot.lane.b32.xlu1 %v3024_v13, %s7943_s21  ;;  %v2714_v3 = vpop.permute.xlu1 %2713  ;;  %v9607_v13 = vld [vmem:[%s8223_s20 + $0x178] sm:$0x3]  ;;  %v2722_v57 = vpop.permute.xlu0 %2721 }
 0x3a9   : > { %3168 = vrot.lane.b32.xlu0 %v3022_v33, %s7943_s21  ;;  %15364 = vst [vmem:[#allocation201_spill] sm:$0xff] %v9607_v13  ;;  %v9618_v33 = vld [vmem:[%s8223_s20 + $0x170] sm:$0xff]  ;;  %v2815_v44 = vmul.f32 %v2702_v40, %v9607_v13 }
 0x3aa   : > { %15366 = vst [vmem:[#allocation203_spill] sm:$0xff] %v9618_v33  ;;  %v2814_v52 = vmul.f32 %v9618_v33, %v2702_v40  ;;  %v9631_v33 = vld [vmem:[%s8223_s20 + $0x190] sm:$0x3]  ;;  %v9634_v40 = vld [vmem:[%s8223_s20 + $0x1a0] sm:$0xff] }
 0x3ab   : > { %v3038_v4 = vrot.slane %v2815_v44, 1  ;;  %15368 = vst [vmem:[#allocation205_spill] sm:$0xff] %v9631_v33  ;;  %v2820_v7 = vmul.f32 %v9634_v40, %v2710_v15  ;;  %v9648_v44 = vpop.permute.xlu2 %2765 }
 0x3ac   : > { %v3036_v16 = vrot.slane %v2814_v52, 1  ;;  %15369 = vst [vmem:[#allocation206_spill] sm:$0xff] %v9634_v40  ;;  %v2818_v52 = vmul.f32 %v9476_v46, %v9631_v33  ;;  %v3048_v46 = vrot.slane %v2821_v18, 1 }
 0x3ad   : > { %v3046_v6 = vrot.slane %v2820_v7, 1 }
 0x3b0   : > { %3178 = vrot.lane.b32.xlu2 %v3034_v60, %s7943_s21  ;;  %3176 = vrot.lane.b32.xlu1 %v3032_v26, %s7943_s21  ;;  %v3035_v60 = vrot.slane %v2813_v34, 1  ;;  %v9628_v24 = vpop.permute.xlu1 %2725  ;;  %v9643_v26 = vld [vmem:[%s8223_s20 + $0x198] sm:$0xff] }
 0x3b1   : > { %3174 = vrot.lane.b32.xlu0 %v3029_v29, %s7943_s21  ;;  %15370 = vst [vmem:[#allocation207_spill] sm:$0xff] %v9643_v26  ;;  %v2819_v25 = vmul.f32 %v9643_v26, %v2710_v15  ;;  %v3039_v29 = vsel %vm2254_vm0, %v3036_v16, %v3038_v4  ;;  %v2825_v15 = vmul.f32 %v9653_v55, %v9513_v59  ;;  %v9658_v4 = vld [vmem:[%s8223_s20 + $0x1d0] sm:$0xff] }
 0x3b2   : > { %v3037_v34 = vsel %vm2254_vm0, %v3035_v60, %v3036_v16  ;;  %15372 = vst [vmem:[#allocation209_spill] sm:$0xff] %v9658_v4  ;;  %v2826_v16 = vmul.f32 %v9658_v4, %v9513_v59  ;;  %v9662_v60 = vpop.permute.xlu0 %2733  ;;  %v9677_v4 = vld [vmem:[%s8223_s20 + $0x1b8] sm:$0xff] }
 0x3b3   : > { %v3045_v33 = vrot.slane %v2819_v25, 1  ;;  %15374 = vst [vmem:[#allocation211_spill] sm:$0xff] %v9677_v4  ;;  %v2823_v55 = vmul.f32 %v9677_v4, %v2714_v3  ;;  %v9682_v26 = vpop.permute.xlu2 %3124  ;;  %v9693_v4 = vld [vmem:[%s8223_s20 + $0x1e8] sm:$0xff] }
 0x3b4   : > { %15375 = vst [vmem:[#allocation212_spill] sm:$0xff] %v9682_v26 }
 0x3b5   : > { %v3047_v40 = vsel %vm2254_vm0, %v3045_v33, %v3046_v6  ;;  %v3051_v13 = vrot.slane %v2823_v55, 1  ;;  %15378 = vst [vmem:[#allocation215_spill] sm:$0xff] %v9693_v4  ;;  %v2830_v33 = vmul.f32 %v2722_v57, %v9687_v37  ;;  %v9702_v55 = vld [vmem:[%s8223_s20 + $0x1e0] sm:$0xff] }
 0x3b6   : > { %15379 = vst [vmem:[#allocation216_spill] sm:$0xff] %v9702_v55 }
 0x3b8   : > { %3184 = vrot.lane.b32.xlu2 %v3042_v62, %s7943_s21  ;;  %3182 = vrot.lane.b32.xlu1 %v3039_v29, %s7943_s21  ;;  %v3043_v62 = vrot.slane %v2818_v52, 1  ;;  %v3049_v29 = vsel %vm2254_vm0, %v3046_v6, %v3048_v46  ;;  %v9668_v7 = vpop.permute.xlu1 %2737  ;;  %v9673_v52 = vld [vmem:[%s8223_s20 + $0x1b0] sm:$0xff] }
 0x3b9   : > { %3180 = vrot.lane.b32.xlu0 %v3037_v34, %s7943_s21  ;;  %v9666_v34 = vld [vmem:[%s8223_s20 + $0x1c0] sm:$0x3]  ;;  %15373 = vst [vmem:[#allocation210_spill] sm:$0xff] %v9673_v52  ;;  %v2822_v25 = vmul.f32 %v9673_v52, %v2714_v3 }
 0x3ba   : > { %v3044_v18 = vsel %vm2254_vm0, %v3041_v0, %v3043_v62  ;;  %v2824_v46 = vmul.f32 %v2714_v3, %v9666_v34  ;;  %v3055_v0 = vrot.slane %v2825_v15, 1  ;;  %v3056_v62 = vrot.slane %v2826_v16, 1  ;;  %v9705_v16 = vpop.permute.xlu0 %2745 }
 0x3bb   : > { %v2829_v3 = vmul.f32 %v9693_v4, %v2722_v57  ;;  %v2828_v15 = vmul.f32 %v9702_v55, %v2722_v57  ;;  %v9753_v55 = vld [vmem:[%s8223_s20 + $0x238] sm:$0x3] }
 0x3bc   : > { %v3053_v52 = vrot.slane %v2824_v46, 1  ;;  %v3057_v6 = vsel %vm2254_vm0, %v3055_v0, %v3056_v62  ;;  %15386 = vst [vmem:[#allocation223_spill] sm:$0xff] %v9753_v55 }
 0x3bd   : > { %v3061_v0 = vrot.slane %v2829_v3, 1  ;;  %v3060_v26 = vrot.slane %v2828_v15, 1  ;;  %v9737_v15 = vld [vmem:[%s8223_s20 + $0x200] sm:$0xff] }
 0x3be   : > { %15384 = vst [vmem:[#allocation221_spill] sm:$0xff] %v9737_v15 }
 0x3c0   : > { %3190 = vrot.lane.b32.xlu2 %v3049_v29, %s7943_s21  ;;  %3188 = vrot.lane.b32.xlu1 %v3047_v40, %s7943_s21  ;;  %v3050_v29 = vrot.slane %v2822_v25, 1  ;;  %v2827_v40 = vmul.f32 %v9513_v59, %v9690_v17  ;;  %v9709_v46 = vpop.permute.xlu1 %2749  ;;  %v9716_v17 = vld [vmem:[%s8223_s20 + $0x210] sm:$0xff] }
 0x3c1   : > { %3186 = vrot.lane.b32.xlu0 %v3044_v18, %s7943_s21  ;;  %v3054_v18 = vsel %vm2254_vm0, %v3051_v13, %v3053_v52  ;;  %15381 = vst [vmem:[#allocation218_spill] sm:$0xff] %v9716_v17  ;;  %v2834_v52 = vmul.f32 %v9716_v17, %v9540_v39 }
 0x3c2   : > { %v3052_v25 = vsel %vm2254_vm0, %v3050_v29, %v3051_v13  ;;  %v3058_v57 = vrot.slane %v2827_v40, 1  ;;  %v9721_v13 = vld [vmem:[%s8223_s20 + $0x218] sm:$0xff] }
 0x3c3   : > { %15382 = vst [vmem:[#allocation219_spill] sm:$0xff] %v9721_v13  ;;  %v2835_v29 = vmul.f32 %v9721_v13, %v9540_v39  ;;  %v9748_v13 = vpop.permute.xlu0 %2757 }
 0x3c4   : > { %v3059_v3 = vsel %vm2254_vm0, %v3056_v62, %v3058_v57  ;;  %v3070_v57 = vrot.slane %v2834_v52, 1  ;;  %v2839_v52 = vmul.f32 %v9662_v60, %v9753_v55 }
 0x3c8   : > { %3196 = vrot.lane.b32.xlu2 %v3057_v6, %s7943_s21  ;;  %3194 = vrot.lane.b32.xlu1 %v3054_v18, %s7943_s21  ;;  %v3063_v6 = vrot.slane %v2830_v33, 1  ;;  %v9732_v33 = vld [vmem:[%s8223_s20 + $0x1f8] sm:$0xff]  ;;  %v9750_v17 = vpop.permute.xlu1 %2761 }
 0x3c9   : > { %3192 = vrot.lane.b32.xlu0 %v3052_v25, %s7943_s21  ;;  %v9727_v25 = vld [vmem:[%s8223_s20 + $0x208] sm:$0x3]  ;;  %15383 = vst [vmem:[#allocation220_spill] sm:$0xff] %v9732_v33  ;;  %v2831_v40 = vmul.f32 %v9732_v33, %v9628_v24  ;;  %v3071_v33 = vrot.slane %v2835_v29, 1 }
 0x3ca   : > { %v9713_v59 = vpop.permute.xlu2 %3130  ;;  %v3064_v18 = vsel %vm2254_vm0, %v3061_v0, %v3063_v6  ;;  %v2833_v6 = vmul.f32 %v9628_v24, %v9727_v25 }
 0x3cb   : > { %15380 = vst [vmem:[#allocation217_spill] sm:$0xff] %v9713_v59  ;;  %v2832_v59 = vmul.f32 %v9737_v15, %v9628_v24  ;;  %v3065_v37 = vrot.slane %v2831_v40, 1  ;;  %v9756_v24 = vld [vmem:[%s8223_s20 + $0x220] sm:$0x3]  ;;  %v3072_v29 = vsel %vm2254_vm0, %v3070_v57, %v3071_v33 }
 0x3cc   : > { %v3068_v4 = vrot.slane %v2833_v6, 1  ;;  %15387 = vst [vmem:[#allocation224_spill] sm:$0xff] %v9756_v24 }
 0x3cd   : > { %v3066_v15 = vrot.slane %v2832_v59, 1  ;;  %v9770_v59 = vld [vmem:[%s8223_s20 + $0x228] sm:$0xff] }
 0x3ce   : > { %15389 = vst [vmem:[#allocation226_spill] sm:$0xff] %v9770_v59  ;;  %v2837_v40 = vmul.f32 %v9770_v59, %v9662_v60  ;;  %v9822_v59 = vld [vmem:[%s8223_s20 + $0x280] sm:$0x3] }
 0x3cf   : > { %v3069_v6 = vsel %vm2254_vm0, %v3066_v15, %v3068_v4  ;;  %v9785_v4 = vld [vmem:[%s8223_s20 + $0x258] sm:$0xff]  ;;  %15400 = vst [vmem:[#allocation237_spill] sm:$0xff] %v9822_v59 }
 0x3d0   : > { %3202 = vrot.lane.b32.xlu2 %v3064_v18, %s7943_s21  ;;  %v3062_v18 = vsel %vm2254_vm0, %v3060_v26, %v3061_v0  ;;  %v9759_v26 = vld [vmem:[%s8223_s20 + $0x230] sm:$0xff]  ;;  %15393 = vst [vmem:[#allocation230_spill] sm:$0xff] %v9785_v4 }
 0x3d1   : > { %3200 = vrot.lane.b32.xlu1 %v3062_v18, %s7943_s21  ;;  %3198 = vrot.lane.b32.xlu0 %v3059_v3, %s7943_s21  ;;  %15388 = vst [vmem:[#allocation225_spill] sm:$0xff] %v9759_v26  ;;  %v2838_v0 = vmul.f32 %v9759_v26, %v9662_v60  ;;  %v2836_v3 = vmul.f32 %v9540_v39, %v9756_v24  ;;  %v3075_v60 = vrot.slane %v2837_v40, 1 }
 0x3d2   : > { %v9746_v62 = vpop.permute.xlu2 %3136  ;;  %v3067_v18 = vsel %vm2254_vm0, %v3065_v37, %v3066_v15  ;;  %v2843_v37 = vmul.f32 %v9785_v4, %v9573_v27  ;;  %v9790_v15 = vld [vmem:[%s8223_s20 + $0x260] sm:$0xff] }
 0x3d3   : > { %15385 = vst [vmem:[#allocation222_spill] sm:$0xff] %v9746_v62  ;;  %v3076_v39 = vrot.slane %v2838_v0, 1  ;;  %v3073_v62 = vrot.slane %v2836_v3, 1  ;;  %v9801_v3 = vld [vmem:[%s8223_s20 + $0x240] sm:$0xff] }
 0x3d4   : > { %15394 = vst [vmem:[#allocation231_spill] sm:$0xff] %v9790_v15  ;;  %v2840_v40 = vmul.f32 %v9801_v3, %v9668_v7 }
 0x3d5   : > { %15395 = vst [vmem:[#allocation232_spill] sm:$0xff] %v9801_v3 }
 0x3d6   : > { %v3080_v4 = vrot.slane %v2840_v40, 1 }
 0x3d8   : > { %3208 = vrot.lane.b32.xlu2 %v3072_v29, %s7943_s21  ;;  %v3078_v29 = vrot.slane %v2839_v52, 1  ;;  %v3074_v52 = vsel %vm2254_vm0, %v3071_v33, %v3073_v62  ;;  %v3085_v62 = vrot.slane %v2843_v37, 1  ;;  %v2848_v37 = vmul.f32 %v9705_v16, %v9822_v59  ;;  %v9891_v59 = vld [vmem:[%s8223_s20 + $0x2c8] sm:$0x3] }
 0x3d9   : > { %3206 = vrot.lane.b32.xlu1 %v3069_v6, %s7943_s21  ;;  %3204 = vrot.lane.b32.xlu0 %v3067_v18, %s7943_s21  ;;  %v2844_v6 = vmul.f32 %v9790_v15, %v9573_v27  ;;  %v9796_v18 = vld [vmem:[%s8223_s20 + $0x250] sm:$0x3]  ;;  %15412 = vst [vmem:[#allocation249_spill] sm:$0xff] %v9891_v59 }
 0x3da   : > { %v9778_v57 = vpop.permute.xlu2 %3142  ;;  %v9780_v24 = vpop.permute.xlu0 %3120  ;;  %v3079_v0 = vsel %vm2254_vm0, %v3076_v39, %v3078_v29  ;;  %v2842_v29 = vmul.f32 %v9668_v7, %v9796_v18 }
 0x3db   : > { %15390 = vst [vmem:[#allocation227_spill] sm:$0xff] %v9778_v57  ;;  %v9782_v55 = vpop.permute.xlu1 %3122  ;;  %v3086_v57 = vrot.slane %v2844_v6, 1 }
 0x3dc   : > { %15391 = vst [vmem:[#allocation228_spill] sm:$0xff] %v9780_v24  ;;  %v3083_v26 = vrot.slane %v2842_v29, 1 }
 0x3dd   : > { %15392 = vst [vmem:[#allocation229_spill] sm:$0xff] %v9782_v55  ;;  %v9806_v55 = vld [vmem:[%s8223_s20 + $0x248] sm:$0xff]  ;;  %v3087_v6 = vsel %vm2254_vm0, %v3085_v62, %v3086_v57 }
 0x3de   : > { %15396 = vst [vmem:[#allocation233_spill] sm:$0xff] %v9806_v55  ;;  %v2841_v24 = vmul.f32 %v9806_v55, %v9668_v7  ;;  %v9825_v7 = vld [vmem:[%s8223_s20 + $0x268] sm:$0x3] }
 0x3df   : > { %15401 = vst [vmem:[#allocation238_spill] sm:$0xff] %v9825_v7 }
 0x3e0   : > { %3214 = vrot.lane.b32.xlu2 %v3079_v0, %s7943_s21  ;;  %v3077_v0 = vsel %vm2254_vm0, %v3075_v60, %v3076_v39  ;;  %v3081_v55 = vrot.slane %v2841_v24, 1  ;;  %v9828_v39 = vld [vmem:[%s8223_s20 + $0x278] sm:$0xff]  ;;  %v9839_v24 = vld [vmem:[%s8223_s20 + $0x270] sm:$0xff] }
 0x3e1   : > { %3212 = vrot.lane.b32.xlu1 %v3077_v0, %s7943_s21  ;;  %3210 = vrot.lane.b32.xlu0 %v3074_v52, %s7943_s21  ;;  %v2847_v60 = vmul.f32 %v9828_v39, %v9705_v16  ;;  %v2845_v52 = vmul.f32 %v9573_v27, %v9825_v7  ;;  %v2846_v40 = vmul.f32 %v9839_v24, %v9705_v16 }
 0x3e2   : > { %v9815_v33 = vpop.permute.xlu2 %3148  ;;  %v3084_v29 = vsel %vm2254_vm0, %v3081_v55, %v3083_v26  ;;  %v3082_v0 = vsel %vm2254_vm0, %v3080_v4, %v3081_v55  ;;  %v9854_v26 = vld [vmem:[%s8223_s20 + $0x2a0] sm:$0xff]  ;;  %v9859_v4 = vld [vmem:[%s8223_s20 + $0x2a8] sm:$0xff] }
 0x3e3   : > { %15397 = vst [vmem:[#allocation234_spill] sm:$0xff] %v9815_v33  ;;  %v9817_v3 = vpop.permute.xlu0 %3126  ;;  %v9819_v15 = vpop.permute.xlu1 %3128  ;;  %v3091_v27 = vrot.slane %v2847_v60, 1  ;;  %v3090_v16 = vrot.slane %v2846_v40, 1  ;;  %v2852_v55 = vmul.f32 %v9854_v26, %v9609_v23 }
 0x3e4   : > { %15398 = vst [vmem:[#allocation235_spill] sm:$0xff] %v9817_v3 }
 0x3e5   : > { %15399 = vst [vmem:[#allocation236_spill] sm:$0xff] %v9819_v15  ;;  %v3088_v15 = vrot.slane %v2845_v52, 1  ;;  %v9870_v52 = vld [vmem:[%s8223_s20 + $0x288] sm:$0xff] }
 0x3e6   : > { %15405 = vst [vmem:[#allocation242_spill] sm:$0xff] %v9854_v26  ;;  %v2849_v40 = vmul.f32 %v9870_v52, %v9709_v46 }
 0x3e7   : > { %15406 = vst [vmem:[#allocation243_spill] sm:$0xff] %v9859_v4 }
 0x3e8   : > { %3220 = vrot.lane.b32.xlu2 %v3087_v6, %s7943_s21  ;;  %v3093_v6 = vrot.slane %v2848_v37, 1  ;;  %v3089_v37 = vsel %vm2254_vm0, %v3086_v57, %v3088_v15  ;;  %15407 = vst [vmem:[#allocation244_spill] sm:$0xff] %v9870_v52  ;;  %v3100_v15 = vrot.slane %v2852_v55, 1  ;;  %v3095_v26 = vrot.slane %v2849_v40, 1 }
 0x3e9   : > { %3218 = vrot.lane.b32.xlu1 %v3084_v29, %s7943_s21  ;;  %3216 = vrot.lane.b32.xlu0 %v3082_v0, %s7943_s21  ;;  %v2853_v29 = vmul.f32 %v9859_v4, %v9609_v23  ;;  %v9865_v0 = vld [vmem:[%s8223_s20 + $0x298] sm:$0x3]  ;;  %v2857_v55 = vmul.f32 %v9748_v13, %v9891_v59 }
 0x3ea   : > { %v9847_v62 = vpop.permute.xlu2 %3154  ;;  %v3094_v60 = vsel %vm2254_vm0, %v3091_v27, %v3093_v6  ;;  %v2851_v6 = vmul.f32 %v9709_v46, %v9865_v0 }
 0x3eb   : > { %15402 = vst [vmem:[#allocation239_spill] sm:$0xff] %v9847_v62  ;;  %v9849_v3 = vpop.permute.xlu0 %3132  ;;  %v9851_v33 = vpop.permute.xlu1 %3134  ;;  %v3101_v62 = vrot.slane %v2853_v29, 1 }
 0x3ec   : > { %15403 = vst [vmem:[#allocation240_spill] sm:$0xff] %v9849_v3  ;;  %v3098_v7 = vrot.slane %v2851_v6, 1 }
 0x3ed   : > { %15404 = vst [vmem:[#allocation241_spill] sm:$0xff] %v9851_v33  ;;  %v9875_v33 = vld [vmem:[%s8223_s20 + $0x290] sm:$0xff]  ;;  %v3102_v29 = vsel %vm2254_vm0, %v3100_v15, %v3101_v62 }
 0x3ee   : > { %15408 = vst [vmem:[#allocation245_spill] sm:$0xff] %v9875_v33  ;;  %v2850_v3 = vmul.f32 %v9875_v33, %v9709_v46  ;;  %v9894_v46 = vld [vmem:[%s8223_s20 + $0x2b0] sm:$0x3] }
 0x3ef   : > { %15413 = vst [vmem:[#allocation250_spill] sm:$0xff] %v9894_v46 }
 0x3f0   : > { %3226 = vrot.lane.b32.xlu2 %v3094_v60, %s7943_s21  ;;  %v3092_v60 = vsel %vm2254_vm0, %v3090_v16, %v3091_v27  ;;  %v3096_v33 = vrot.slane %v2850_v3, 1  ;;  %v9897_v27 = vld [vmem:[%s8223_s20 + $0x2c0] sm:$0xff]  ;;  %v9908_v3 = vld [vmem:[%s8223_s20 + $0x2b8] sm:$0xff] }
 0x3f1   : > { %3224 = vrot.lane.b32.xlu1 %v3092_v60, %s7943_s21  ;;  %3222 = vrot.lane.b32.xlu0 %v3089_v37, %s7943_s21  ;;  %v2856_v16 = vmul.f32 %v9897_v27, %v9748_v13  ;;  %v2854_v37 = vmul.f32 %v9609_v23, %v9894_v46  ;;  %v2855_v40 = vmul.f32 %v9908_v3, %v9748_v13 }
 0x3f2   : > { %v9884_v57 = vpop.permute.xlu2 %3160  ;;  %v3099_v6 = vsel %vm2254_vm0, %v3096_v33, %v3098_v7  ;;  %v3097_v60 = vsel %vm2254_vm0, %v3095_v26, %v3096_v33  ;;  %v9923_v7 = vld [vmem:[%s8223_s20 + $0x2e8] sm:$0xff]  ;;  %v9928_v26 = vld [vmem:[%s8223_s20 + $0x2f0] sm:$0xff] }
 0x3f3   : > { %15409 = vst [vmem:[#allocation246_spill] sm:$0xff] %v9884_v57  ;;  %v9886_v52 = vpop.permute.xlu0 %3138  ;;  %v9888_v4 = vpop.permute.xlu1 %3140  ;;  %v3106_v23 = vrot.slane %v2856_v16, 1  ;;  %v3105_v13 = vrot.slane %v2855_v40, 1  ;;  %v2861_v33 = vmul.f32 %v9923_v7, %v9648_v44 }
 0x3f4   : > { %15410 = vst [vmem:[#allocation247_spill] sm:$0xff] %v9886_v52 }
 0x3f5   : > { %15411 = vst [vmem:[#allocation248_spill] sm:$0xff] %v9888_v4  ;;  %v3103_v4 = vrot.slane %v2854_v37, 1  ;;  %v9939_v37 = vld [vmem:[%s8223_s20 + $0x2d0] sm:$0xff] }
 0x3f6   : > { %15417 = vst [vmem:[#allocation254_spill] sm:$0xff] %v9923_v7  ;;  %v2858_v40 = vmul.f32 %v9939_v37, %v9750_v17 }
 0x3f7   : > { %15418 = vst [vmem:[#allocation255_spill] sm:$0xff] %v9928_v26 }
 0x3f8   : > { %3232 = vrot.lane.b32.xlu2 %v3102_v29, %s7943_s21  ;;  %v3108_v29 = vrot.slane %v2857_v55, 1  ;;  %v3104_v55 = vsel %vm2254_vm0, %v3101_v62, %v3103_v4  ;;  %15419 = vst [vmem:[#allocation256_spill] sm:$0xff] %v9939_v37  ;;  %v3115_v4 = vrot.slane %v2861_v33, 1  ;;  %v3110_v7 = vrot.slane %v2858_v40, 1 }
 0x3f9   : > { %3230 = vrot.lane.b32.xlu1 %v3099_v6, %s7943_s21  ;;  %3228 = vrot.lane.b32.xlu0 %v3097_v60, %s7943_s21  ;;  %v2862_v6 = vmul.f32 %v9928_v26, %v9648_v44  ;;  %v9934_v60 = vld [vmem:[%s8223_s20 + $0x2e0] sm:$0x3] }
 0x3fa   : > { %v9916_v15 = vpop.permute.xlu2 %3166  ;;  %v3109_v16 = vsel %vm2254_vm0, %v3106_v23, %v3108_v29  ;;  %v2860_v29 = vmul.f32 %v9750_v17, %v9934_v60 }
 0x3fb   : > { %15414 = vst [vmem:[#allocation251_spill] sm:$0xff] %v9916_v15  ;;  %v9918_v52 = vpop.permute.xlu0 %3144  ;;  %v9920_v57 = vpop.permute.xlu1 %3146  ;;  %v3107_v15 = vsel %vm2254_vm0, %v3105_v13, %v3106_v23 }
 0x3fc   : > { %15415 = vst [vmem:[#allocation252_spill] sm:$0xff] %v9918_v52 }
 0x3fd   : > { %15416 = vst [vmem:[#allocation253_spill] sm:$0xff] %v9920_v57  ;;  %v9944_v57 = vld [vmem:[%s8223_s20 + $0x2d8] sm:$0xff] }
 0x3fe   : > { %15420 = vst [vmem:[#allocation257_spill] sm:$0xff] %v9944_v57  ;;  %v2859_v52 = vmul.f32 %v9944_v57, %v9750_v17  ;;  %v3113_v57 = vrot.slane %v2860_v29, 1  ;;  %v9961_v17 = vld [vmem:[%s8223_s20 + $0x2f8] sm:$0x3]  ;;  %v7433_v29 = vld [vmem:[%s14915_s1 + $0xa4] ss:$0 sm:$0xff] }
 0x400   : > { %3238 = vrot.lane.b32.xlu2 %v3109_v16, %s7943_s21  ;;  %v3116_v16 = vrot.slane %v2862_v6, 1  ;;  %v3111_v46 = vrot.slane %v2859_v52, 1 }
 0x401   : > { %3236 = vrot.lane.b32.xlu1 %v3107_v15, %s7943_s21  ;;  %3234 = vrot.lane.b32.xlu0 %v3104_v55, %s7943_s21  ;;  %v2863_v15 = vmul.f32 %v9648_v44, %v9961_v17  ;;  %v7432_v44 = vld [vmem:[%s14915_s1 + $0xa0] ss:$0 sm:$0xff] }
 0x402   : > { %v9953_v62 = vpop.permute.xlu2 %3172  ;;  %v3117_v59 = vsel %vm2254_vm0, %v3115_v4, %v3116_v16  ;;  %v3114_v23 = vsel %vm2254_vm0, %v3111_v46, %v3113_v57  ;;  %v3112_v13 = vsel %vm2254_vm0, %v3110_v7, %v3111_v46  ;;  %v7434_v4 = vld [vmem:[%s14915_s1 + $0xa3] ss:$0 sm:$0xff] }
 0x403   : > { %15421 = vst [vmem:[#allocation258_spill] sm:$0xff] %v9953_v62  ;;  %v9955_v37 = vpop.permute.xlu0 %3150  ;;  %v9957_v26 = vpop.permute.xlu1 %3152  ;;  %v3118_v55 = vrot.slane %v2863_v15, 1 }
 0x404   : > { %15422 = vst [vmem:[#allocation259_spill] sm:$0xff] %v9955_v37 }
 0x405   : > { %15423 = vst [vmem:[#allocation260_spill] sm:$0xff] %v9957_v26  ;;  %v3119_v57 = vsel %vm2254_vm0, %v3116_v16, %v3118_v55  ;;  %v7435_v16 = vld [vmem:[%s14915_s1 + $0xa2] ss:$0 sm:$0xff]  ;;  %v7437_v55 = vld [vmem:[%s14915_s1 + $0xa6] ss:$0 sm:$0xff] }
 0x408   : > { %3244 = vrot.lane.b32.xlu2 %v3117_v59, %s7943_s21  ;;  %v7431_v59 = vld [vmem:[%s14915_s1 + $0xa1] ss:$0 sm:$0xff] }
 0x409   : > { %3242 = vrot.lane.b32.xlu1 %v3114_v23, %s7943_s21  ;;  %3240 = vrot.lane.b32.xlu0 %v3112_v13, %s7943_s21 }
 0x40a   : > { %v9970_v33 = vpop.permute.xlu2 %3178 }
 0x40b   : > { %15424 = vst [vmem:[#allocation261_spill] sm:$0xff] %v9970_v33  ;;  %v9972_v52 = vpop.permute.xlu0 %3156  ;;  %v9974_v6 = vpop.permute.xlu1 %3158 }
 0x40c   : > { %15425 = vst [vmem:[#allocation262_spill] sm:$0xff] %v9972_v52  ;;  %v7657_v52 = vld [vmem:[%s8223_s20 + $0x28] sm:$0x3] }
 0x40d   : > { %15426 = vst [vmem:[#allocation263_spill] sm:$0xff] %v9974_v6 }
 0x410   : > { %3478 = vperm.xlu2 %7270, %v7431_v59   ;;  %v7436_v59 = vld [vmem:[%s14915_s1 + $0xa7] ss:$0 sm:$0xff] }
 0x411   : > { %3474 = vperm.xlu1 %7269, %v7432_v44   ;;  %3246 = vrot.lane.b32.xlu0 %v3119_v57, %s7943_s21  ;;  %v7438_v44 = vld [vmem:[%s14915_s1 + $0xa5] ss:$0 sm:$0xff] }
 0x412   : > { %v9984_v46 = vpop.permute.xlu2 %3184 }
 0x413   : > { %15427 = vst [vmem:[#allocation264_spill] sm:$0xff] %v9984_v46  ;;  %v9986_v7 = vpop.permute.xlu0 %3162  ;;  %v9988_v40 = vpop.permute.xlu1 %3164 }
 0x414   : > { %15428 = vst [vmem:[#allocation265_spill] sm:$0xff] %v9986_v7 }
 0x415   : > { %15429 = vst [vmem:[#allocation266_spill] sm:$0xff] %v9988_v40 }
 0x418   : > { %3490 = vperm.xlu2 %7270, %v7433_v29  }
 0x419   : > { %3486 = vperm.xlu1 %7269, %v7434_v4   ;;  %3482 = vperm.xlu0 %7268, %v7435_v16   ;;  %v7439_v16 = vld [vmem:[%s14915_s1 + $0xaa] ss:$0 sm:$0xff] }
 0x41a   : > { %v9999_v15 = vpop.permute.xlu2 %3190 }
 0x41b   : > { %15430 = vst [vmem:[#allocation267_spill] sm:$0xff] %v9999_v15  ;;  %v10001_v23 = vpop.permute.xlu0 %3168  ;;  %v10003_v13 = vpop.permute.xlu1 %3170 }
 0x41c   : > { %15431 = vst [vmem:[#allocation268_spill] sm:$0xff] %v10001_v23 }
 0x41d   : > { %15432 = vst [vmem:[#allocation269_spill] sm:$0xff] %v10003_v13  ;;  %v7440_v13 = vld [vmem:[%s14915_s1 + $0xa9] ss:$0 sm:$0xff] }
 0x420   : > { %3502 = vperm.xlu2 %7270, %v7436_v59   ;;  %v7441_v59 = vld [vmem:[%s14915_s1 + $0xa8] ss:$0 sm:$0xff] }
 0x421   : > { %3498 = vperm.xlu1 %7269, %v7437_v55   ;;  %3494 = vperm.xlu0 %7268, %v7438_v44  }
 0x422   : > { %v10014_v57 = vpop.permute.xlu2 %3196 }
 0x423   : > { %15433 = vst [vmem:[#allocation270_spill] sm:$0xff] %v10014_v57  ;;  %v10016_v29 = vpop.permute.xlu0 %3174  ;;  %v10018_v4 = vpop.permute.xlu1 %3176  ;;  %v7443_v57 = vld [vmem:[%s14915_s1 + $0xac] ss:$0 sm:$0xff] }
 0x424   : > { %15434 = vst [vmem:[#allocation271_spill] sm:$0xff] %v10016_v29  ;;  %v7442_v29 = vld [vmem:[%s14915_s1 + $0xad] ss:$0 sm:$0xff] }
 0x425   : > { %15435 = vst [vmem:[#allocation272_spill] sm:$0xff] %v10018_v4 }
 0x428   : > { %3514 = vperm.xlu2 %7270, %v7439_v16   ;;  %v7444_v16 = vld [vmem:[%s14915_s1 + $0xab] ss:$0 sm:$0xff] }
 0x429   : > { %3510 = vperm.xlu1 %7269, %v7440_v13   ;;  %3506 = vperm.xlu0 %7268, %v7441_v59  }
 0x42a   : > { %v10029_v55 = vpop.permute.xlu2 %3202 }
 0x42b   : > { %15436 = vst [vmem:[#allocation273_spill] sm:$0xff] %v10029_v55  ;;  %v10031_v44 = vpop.permute.xlu0 %3180  ;;  %v10033_v4 = vpop.permute.xlu1 %3182  ;;  %v7446_v55 = vld [vmem:[%s14915_s1 + $0xaf] ss:$0 sm:$0xff] }
 0x42c   : > { %15437 = vst [vmem:[#allocation274_spill] sm:$0xff] %v10031_v44  ;;  %v7445_v44 = vld [vmem:[%s14915_s1 + $0xb0] ss:$0 sm:$0xff] }
 0x42d   : > { %15438 = vst [vmem:[#allocation275_spill] sm:$0xff] %v10033_v4 }
 0x430   : > { %3526 = vperm.xlu2 %7270, %v7442_v29   ;;  %v7447_v29 = vld [vmem:[%s14915_s1 + $0xae] ss:$0 sm:$0xff] }
 0x431   : > { %3522 = vperm.xlu1 %7269, %v7443_v57   ;;  %3518 = vperm.xlu0 %7268, %v7444_v16  }
 0x432   : > { %v10044_v13 = vpop.permute.xlu2 %3208 }
 0x433   : > { %15439 = vst [vmem:[#allocation276_spill] sm:$0xff] %v10044_v13  ;;  %v10046_v59 = vpop.permute.xlu0 %3186  ;;  %v10048_v4 = vpop.permute.xlu1 %3188 }
 0x434   : > { %15440 = vst [vmem:[#allocation277_spill] sm:$0xff] %v10046_v59  ;;  %v7449_v59 = vld [vmem:[%s14915_s1 + $0xb2] ss:$0 sm:$0xff] }
 0x435   : > { %15441 = vst [vmem:[#allocation278_spill] sm:$0xff] %v10048_v4  ;;  %v7448_v4 = vld [vmem:[%s14915_s1 + $0xb3] ss:$0 sm:$0xff] }
 0x438   : > { %3538 = vperm.xlu2 %7270, %v7445_v44   ;;  %v7450_v44 = vld [vmem:[%s14915_s1 + $0xb1] ss:$0 sm:$0xff] }
 0x439   : > { %3534 = vperm.xlu1 %7269, %v7446_v55   ;;  %3530 = vperm.xlu0 %7268, %v7447_v29  }
 0x43a   : > { %v10059_v57 = vpop.permute.xlu2 %3214 }
 0x43b   : > { %15442 = vst [vmem:[#allocation279_spill] sm:$0xff] %v10059_v57  ;;  %v10061_v16 = vpop.permute.xlu0 %3192  ;;  %v10063_v13 = vpop.permute.xlu1 %3194  ;;  %v7452_v57 = vld [vmem:[%s14915_s1 + $0xb5] ss:$0 sm:$0xff] }
 0x43c   : > { %15443 = vst [vmem:[#allocation280_spill] sm:$0xff] %v10061_v16  ;;  %v7451_v16 = vld [vmem:[%s14915_s1 + $0xb6] ss:$0 sm:$0xff] }
 0x43d   : > { %15444 = vst [vmem:[#allocation281_spill] sm:$0xff] %v10063_v13 }
 0x440   : > { %3550 = vperm.xlu2 %7270, %v7448_v4   ;;  %v7453_v4 = vld [vmem:[%s14915_s1 + $0xb4] ss:$0 sm:$0xff] }
 0x441   : > { %3546 = vperm.xlu1 %7269, %v7449_v59   ;;  %3542 = vperm.xlu0 %7268, %v7450_v44  }
 0x442   : > { %v10074_v55 = vpop.permute.xlu2 %3220 }
 0x443   : > { %15445 = vst [vmem:[#allocation282_spill] sm:$0xff] %v10074_v55  ;;  %v10076_v29 = vpop.permute.xlu0 %3198  ;;  %v10078_v13 = vpop.permute.xlu1 %3200  ;;  %v7455_v55 = vld [vmem:[%s14915_s1 + $0xb8] ss:$0 sm:$0xff] }
 0x444   : > { %15446 = vst [vmem:[#allocation283_spill] sm:$0xff] %v10076_v29  ;;  %v7454_v29 = vld [vmem:[%s14915_s1 + $0xb9] ss:$0 sm:$0xff] }
 0x445   : > { %15447 = vst [vmem:[#allocation284_spill] sm:$0xff] %v10078_v13 }
 0x448   : > { %3562 = vperm.xlu2 %7270, %v7451_v16   ;;  %v7456_v16 = vld [vmem:[%s14915_s1 + $0xb7] ss:$0 sm:$0xff] }
 0x449   : > { %3558 = vperm.xlu1 %7269, %v7452_v57   ;;  %3554 = vperm.xlu0 %7268, %v7453_v4  }
 0x44a   : > { %v10089_v59 = vpop.permute.xlu2 %3226 }
 0x44b   : > { %15448 = vst [vmem:[#allocation285_spill] sm:$0xff] %v10089_v59  ;;  %v10091_v44 = vpop.permute.xlu0 %3204  ;;  %v10093_v13 = vpop.permute.xlu1 %3206  ;;  %v7458_v59 = vld [vmem:[%s14915_s1 + $0xbb] ss:$0 sm:$0xff] }
 0x44c   : > { %15449 = vst [vmem:[#allocation286_spill] sm:$0xff] %v10091_v44  ;;  %v7457_v44 = vld [vmem:[%s14915_s1 + $0xbc] ss:$0 sm:$0xff] }
 0x44d   : > { %15450 = vst [vmem:[#allocation287_spill] sm:$0xff] %v10093_v13 }
 0x450   : > { %3574 = vperm.xlu2 %7270, %v7454_v29   ;;  %v7459_v29 = vld [vmem:[%s14915_s1 + $0xba] ss:$0 sm:$0xff] }
 0x451   : > { %3570 = vperm.xlu1 %7269, %v7455_v55   ;;  %3566 = vperm.xlu0 %7268, %v7456_v16  }
 0x452   : > { %v10104_v57 = vpop.permute.xlu2 %3232 }
 0x453   : > { %15451 = vst [vmem:[#allocation288_spill] sm:$0xff] %v10104_v57  ;;  %v10106_v4 = vpop.permute.xlu0 %3210  ;;  %v10108_v13 = vpop.permute.xlu1 %3212  ;;  %v7461_v57 = vld [vmem:[%s14915_s1 + $0xbe] ss:$0 sm:$0xff] }
 0x454   : > { %15452 = vst [vmem:[#allocation289_spill] sm:$0xff] %v10106_v4  ;;  %v7460_v4 = vld [vmem:[%s14915_s1 + $0xbf] ss:$0 sm:$0xff] }
 0x455   : > { %15453 = vst [vmem:[#allocation290_spill] sm:$0xff] %v10108_v13 }
 0x458   : > { %3586 = vperm.xlu2 %7270, %v7457_v44   ;;  %v7462_v44 = vld [vmem:[%s14915_s1 + $0xbd] ss:$0 sm:$0xff] }
 0x459   : > { %3582 = vperm.xlu1 %7269, %v7458_v59   ;;  %3578 = vperm.xlu0 %7268, %v7459_v29  }
 0x45a   : > { %v10119_v55 = vpop.permute.xlu2 %3238 }
 0x45b   : > { %15454 = vst [vmem:[#allocation291_spill] sm:$0xff] %v10119_v55  ;;  %v10121_v16 = vpop.permute.xlu0 %3216  ;;  %v10123_v13 = vpop.permute.xlu1 %3218 }
 0x45c   : > { %15455 = vst [vmem:[#allocation292_spill] sm:$0xff] %v10121_v16 }
 0x45d   : > { %15456 = vst [vmem:[#allocation293_spill] sm:$0xff] %v10123_v13 }
 0x460   : > { %3598 = vperm.xlu2 %7270, %v7460_v4  }
 0x461   : > { %3594 = vperm.xlu1 %7269, %v7461_v57   ;;  %3590 = vperm.xlu0 %7268, %v7462_v44  }
 0x462   : > { %v10134_v59 = vpop.permute.xlu2 %3244 }
 0x463   : > { %15457 = vst [vmem:[#allocation294_spill] sm:$0xff] %v10134_v59  ;;  %v10136_v29 = vpop.permute.xlu0 %3222  ;;  %v10138_v13 = vpop.permute.xlu1 %3224 }
 0x464   : > { %15458 = vst [vmem:[#allocation295_spill] sm:$0xff] %v10136_v29 }
 0x465   : > { %15459 = vst [vmem:[#allocation296_spill] sm:$0xff] %v10138_v13 }
 0x46a   : > { %v3479_v16 = vpop.permute.xlu2 %3478 }
 0x46b   : > { %v3604_v55 = vmul.f32 %v9344_v32, %v3479_v16  ;;  %v3605_v23 = vmul.f32 %v9348_v35, %v3479_v16  ;;  %v10142_v15 = vpop.permute.xlu0 %3228  ;;  %v10144_v40 = vpop.permute.xlu1 %3230 }
 0x46c   : > { %15460 = vst [vmem:[#allocation297_spill] sm:$0xff] %v10142_v15 }
 0x46d   : > { %15461 = vst [vmem:[#allocation298_spill] sm:$0xff] %v10144_v40  ;;  %v3798_v4 = vrot.slane %v3604_v55, 1  ;;  %v3799_v57 = vrot.slane %v3605_v23, 1  ;;  %v7655_v40 = vld [vmem:[%s8223_s20] sm:$0xff] }
 0x46f   : > { %v3800_v44 = vsel %vm2254_vm0, %v3798_v4, %v3799_v57  ;;  %v7656_v4 = vld [vmem:[%s8223_s20 + $0x10] sm:$0x3] }
 0x470   : > { %3957 = vrot.lane.b32.xlu2 %v3800_v44, %s7944_s15 }
 0x472   : > { %v3491_v35 = vpop.permute.xlu2 %3490 }
 0x473   : > { %v10148_v29 = vpop.permute.xlu0 %3234  ;;  %v10150_v13 = vpop.permute.xlu1 %3236 }
 0x474   : > { %15462 = vst [vmem:[#allocation299_spill] sm:$0xff] %v10148_v29 }
 0x475   : > { %15463 = vst [vmem:[#allocation300_spill] sm:$0xff] %v10150_v13 }
 0x47b   : > { %v10152_v59 = vpop.permute.xlu0 %3240  ;;  %v10154_v32 = vpop.permute.xlu1 %3242 }
 0x47c   : > { %15464 = vst [vmem:[#allocation301_spill] sm:$0xff] %v10152_v59 }
 0x47d   : > { %15465 = vst [vmem:[#allocation302_spill] sm:$0xff] %v10154_v32  ;;  %v3606_v32 = vmul.f32 %v7657_v52, %v3479_v16  ;;  %v3613_v52 = vmul.f32 %v9386_v5, %v3491_v35 }
 0x483   : > { %v10156_v15 = vpop.permute.xlu0 %3246  ;;  %v3475_v7 = vpop.permute.xlu1 %3474 }
 0x484   : > { %15466 = vst [vmem:[#allocation303_spill] sm:$0xff] %v10156_v15  ;;  %v3601_v55 = vmul.f32 %v7655_v40, %v3475_v7  ;;  %v3602_v23 = vmul.f32 %v9366_v47, %v3475_v7  ;;  %v3603_v44 = vmul.f32 %v7656_v4, %v3475_v7  ;;  %v10166_v40 = vpop.permute.xlu2 %3502  ;;  %v3801_v4 = vrot.slane %v3606_v32, 1 }
 0x486   : > { %v3793_v46 = vrot.slane %v3601_v55, 1  ;;  %v3794_v29 = vrot.slane %v3602_v23, 1  ;;  %v3796_v6 = vrot.slane %v3603_v44, 1  ;;  %v7658_v55 = vld [vmem:[%s8223_s20 + $0x40] sm:$0x3] }
 0x488   : > { %v3797_v13 = vsel %vm2254_vm0, %v3794_v29, %v3796_v6  ;;  %v3795_v59 = vsel %vm2254_vm0, %v3793_v46, %v3794_v29 }
 0x489   : > { %3955 = vrot.lane.b32.xlu1 %v3797_v13, %s7944_s15  ;;  %3953 = vrot.lane.b32.xlu0 %v3795_v59, %s7944_s15  ;;  %v3614_v13 = vmul.f32 %v9390_v19, %v3491_v35  ;;  %v3813_v19 = vrot.slane %v3613_v52, 1 }
 0x48b   : > { %v3483_v15 = vpop.permute.xlu0 %3482  ;;  %v3487_v6 = vpop.permute.xlu1 %3486  ;;  %v3814_v5 = vrot.slane %v3614_v13, 1 }
 0x48c   : > { %v3607_v47 = vmul.f32 %v9378_v42, %v3483_v15  ;;  %v3608_v7 = vmul.f32 %v9382_v28, %v3483_v15  ;;  %v3609_v23 = vmul.f32 %v7658_v55, %v3483_v15  ;;  %v3611_v16 = vmul.f32 %v9404_v14, %v3487_v6 }
 0x48d   : > { %v3612_v59 = vmul.f32 %v3487_v6, %v9396_v1  ;;  %v3610_v28 = vmul.f32 %v9400_v21, %v3487_v6  ;;  %v3802_v15 = vsel %vm2254_vm0, %v3799_v57, %v3801_v4  ;;  %v10182_v1 = vpop.permute.xlu2 %3514  ;;  %v7659_v4 = vld [vmem:[%s8223_s20 + $0x70] sm:$0x3] }
 0x48e   : > { %v3803_v44 = vrot.slane %v3607_v47, 1  ;;  %v3804_v33 = vrot.slane %v3608_v7, 1  ;;  %v3806_v46 = vrot.slane %v3609_v23, 1  ;;  %v3809_v14 = vrot.slane %v3611_v16, 1 }
 0x48f   : > { %v3811_v32 = vrot.slane %v3612_v59, 1  ;;  %v3808_v47 = vrot.slane %v3610_v28, 1 }
 0x490   : > { %v3807_v29 = vsel %vm2254_vm0, %v3804_v33, %v3806_v46  ;;  %v3805_v42 = vsel %vm2254_vm0, %v3803_v44, %v3804_v33  ;;  %v3815_v33 = vsel %vm2254_vm0, %v3813_v19, %v3814_v5  ;;  %v3615_v44 = vmul.f32 %v7659_v4, %v3491_v35 }
 0x491   : > { %3963 = vrot.lane.b32.xlu2 %v3807_v29, %s7944_s15  ;;  %3961 = vrot.lane.b32.xlu1 %v3805_v42, %s7944_s15  ;;  %v3812_v57 = vsel %vm2254_vm0, %v3809_v14, %v3811_v32  ;;  %v3810_v6 = vsel %vm2254_vm0, %v3808_v47, %v3809_v14 }
 0x492   : > { %3959 = vrot.lane.b32.xlu0 %v3802_v15, %s7944_s15 }
 0x493   : > { %v3495_v7 = vpop.permute.xlu0 %3494  ;;  %v3499_v16 = vpop.permute.xlu1 %3498 }
 0x494   : > { %v3616_v21 = vmul.f32 %v9425_v58, %v3495_v7  ;;  %v3617_v55 = vmul.f32 %v9418_v2, %v3495_v7  ;;  %v3618_v23 = vmul.f32 %v3495_v7, %v9414_v45  ;;  %v3816_v58 = vrot.slane %v3615_v44, 1 }
 0x495   : > { %v3622_v2 = vmul.f32 %v9435_v53, %v10166_v40  ;;  %v3623_v45 = vmul.f32 %v9440_v54, %v10166_v40  ;;  %v10198_v35 = vpop.permute.xlu2 %3526  ;;  %v3620_v59 = vmul.f32 %v9455_v11, %v3499_v16  ;;  %v3621_v29 = vmul.f32 %v3499_v16, %v9446_v12 }
 0x496   : > { %v3818_v46 = vrot.slane %v3616_v21, 1  ;;  %v3819_v52 = vrot.slane %v3617_v55, 1  ;;  %v3821_v13 = vrot.slane %v3618_v23, 1  ;;  %v3619_v15 = vmul.f32 %v9451_v41, %v3499_v16 }
 0x497   : > { %v3817_v53 = vsel %vm2254_vm0, %v3814_v5, %v3816_v58  ;;  %v3828_v54 = vrot.slane %v3622_v2, 1  ;;  %v3829_v19 = vrot.slane %v3623_v45, 1  ;;  %v3824_v14 = vrot.slane %v3620_v59, 1 }
 0x498   : > { %v3822_v42 = vsel %vm2254_vm0, %v3819_v52, %v3821_v13  ;;  %v3820_v28 = vsel %vm2254_vm0, %v3818_v46, %v3819_v52  ;;  %v3826_v11 = vrot.slane %v3621_v29, 1  ;;  %v3823_v32 = vrot.slane %v3619_v15, 1 }
 0x499   : > { %3969 = vrot.lane.b32.xlu2 %v3815_v33, %s7944_s15  ;;  %3967 = vrot.lane.b32.xlu1 %v3812_v57, %s7944_s15  ;;  %v3830_v47 = vsel %vm2254_vm0, %v3828_v54, %v3829_v19  ;;  %v3624_v5 = vmul.f32 %v10166_v40, %v9466_v56  ;;  %v3631_v44 = vmul.f32 %v9488_v9, %v10182_v1 }
 0x49a   : > { %3965 = vrot.lane.b32.xlu0 %v3810_v6, %s7944_s15  ;;  %v3827_v21 = vsel %vm2254_vm0, %v3824_v14, %v3826_v11  ;;  %v3825_v23 = vsel %vm2254_vm0, %v3823_v32, %v3824_v14  ;;  %v3632_v56 = vmul.f32 %v9493_v8, %v10182_v1 }
 0x49b   : > { %v3507_v12 = vpop.permute.xlu0 %3506  ;;  %v3831_v4 = vrot.slane %v3624_v5, 1  ;;  %v3843_v9 = vrot.slane %v3631_v44, 1 }
 0x49c   : > { %v3625_v7 = vmul.f32 %v9480_v51, %v3507_v12  ;;  %v3626_v41 = vmul.f32 %v9469_v36, %v3507_v12  ;;  %v3627_v33 = vmul.f32 %v3507_v12, %v9463_v63  ;;  %v3511_v63 = vpop.permute.xlu1 %3510  ;;  %v3844_v8 = vrot.slane %v3632_v56, 1  ;;  %v15470_v56 = vld [vmem:[#allocation195_spill] sm:$0xff] }
 0x49d   : > { %v10216_v55 = vpop.permute.xlu2 %3538  ;;  %v3629_v40 = vmul.f32 %v9508_v30, %v3511_v63  ;;  %v3630_v6 = vmul.f32 %v3511_v63, %v9499_v61  ;;  %v3628_v13 = vmul.f32 %v9504_v31, %v3511_v63  ;;  %v3832_v58 = vsel %vm2254_vm0, %v3829_v19, %v3831_v4  ;;  %v15469_v63 = vld [vmem:[#allocation197_spill] sm:$0xff] }
 0x49e   : > { %v3833_v51 = vrot.slane %v3625_v7, 1  ;;  %v3834_v57 = vrot.slane %v3626_v41, 1  ;;  %v3836_v36 = vrot.slane %v3627_v33, 1  ;;  %v3845_v59 = vsel %vm2254_vm0, %v3843_v9, %v3844_v8  ;;  %v15467_v7 = vld [vmem:[#allocation194_spill] sm:$0xff] }
 0x49f   : > { %v3839_v30 = vrot.slane %v3629_v40, 1  ;;  %v3841_v61 = vrot.slane %v3630_v6, 1  ;;  %v3838_v2 = vrot.slane %v3628_v13, 1 }
 0x4a0   : > { %v3837_v46 = vsel %vm2254_vm0, %v3834_v57, %v3836_v36  ;;  %v3835_v52 = vsel %vm2254_vm0, %v3833_v51, %v3834_v57  ;;  %v15468_v36 = vld [vmem:[#allocation198_spill] sm:$0xff] }
 0x4a1   : > { %3975 = vrot.lane.b32.xlu2 %v3822_v42, %s7944_s15  ;;  %3973 = vrot.lane.b32.xlu1 %v3820_v28, %s7944_s15  ;;  %v3842_v15 = vsel %vm2254_vm0, %v3839_v30, %v3841_v61  ;;  %v3840_v54 = vsel %vm2254_vm0, %v3838_v2, %v3839_v30 }
 0x4a2   : > { %3971 = vrot.lane.b32.xlu0 %v3817_v53, %s7944_s15  ;;  %v3633_v53 = vmul.f32 %v10182_v1, %v9521_v43  ;;  %v3641_v43 = vmul.f32 %v9548_v50, %v10198_v35 }
 0x4a3   : > { %v3519_v45 = vpop.permute.xlu0 %3518 }
 0x4a4   : > { %v3634_v31 = vmul.f32 %v9533_v10, %v3519_v45  ;;  %v3635_v29 = vmul.f32 %v9524_v22, %v3519_v45  ;;  %v3636_v42 = vmul.f32 %v3519_v45, %v9518_v49  ;;  %v3523_v28 = vpop.permute.xlu1 %3522  ;;  %v3846_v22 = vrot.slane %v3633_v53, 1  ;;  %v15472_v45 = vld [vmem:[#allocation199_spill] sm:$0xff] }
 0x4a5   : > { %v10235_v16 = vpop.permute.xlu2 %3550  ;;  %v3640_v49 = vmul.f32 %v9543_v48, %v10198_v35  ;;  %v3638_v1 = vmul.f32 %v9563_v20, %v3523_v28  ;;  %v3639_v32 = vmul.f32 %v3523_v28, %v9554_v38  ;;  %v3637_v41 = vmul.f32 %v15467_v7, %v3523_v28  ;;  %v15475_v28 = vld [vmem:[#allocation201_spill] sm:$0xff] }
 0x4a6   : > { %v3848_v19 = vrot.slane %v3634_v31, 1  ;;  %v3849_v10 = vrot.slane %v3635_v29, 1  ;;  %v3851_v14 = vrot.slane %v3636_v42, 1  ;;  %v3847_v48 = vsel %vm2254_vm0, %v3844_v8, %v3846_v22  ;;  %v15473_v31 = vld [vmem:[#allocation200_spill] sm:$0xff]  ;;  %v15474_v29 = vld [vmem:[#allocation203_spill] sm:$0xff] }
 0x4a7   : > { %v3858_v50 = vrot.slane %v3640_v49, 1  ;;  %v3859_v20 = vrot.slane %v3641_v43, 1  ;;  %v3854_v5 = vrot.slane %v3638_v1, 1  ;;  %v3856_v38 = vrot.slane %v3639_v32, 1 }
 0x4a8   : > { %v3852_v12 = vsel %vm2254_vm0, %v3849_v10, %v3851_v14 }
 0x4a9   : > { %3981 = vrot.lane.b32.xlu2 %v3830_v47, %s7944_s15  ;;  %3979 = vrot.lane.b32.xlu1 %v3827_v21, %s7944_s15  ;;  %v3850_v47 = vsel %vm2254_vm0, %v3848_v19, %v3849_v10  ;;  %v3860_v57 = vsel %vm2254_vm0, %v3858_v50, %v3859_v20  ;;  %v3857_v6 = vsel %vm2254_vm0, %v3854_v5, %v3856_v38  ;;  %v15476_v19 = vld [vmem:[#allocation202_spill] sm:$0xff] }
 0x4aa   : > { %3977 = vrot.lane.b32.xlu0 %v3825_v23, %s7944_s15  ;;  %v3853_v23 = vrot.slane %v3637_v41, 1 }
 0x4ab   : > { %v3531_v33 = vpop.permute.xlu0 %3530 }
 0x4ac   : > { %v3535_v21 = vpop.permute.xlu1 %3534  ;;  %v3643_v4 = vmul.f32 %v15468_v36, %v3531_v33  ;;  %v3644_v44 = vmul.f32 %v15469_v63, %v3531_v33  ;;  %v3645_v40 = vmul.f32 %v3531_v33, %v15470_v56  ;;  %v3855_v13 = vsel %vm2254_vm0, %v3853_v23, %v3854_v5  ;;  %v15477_v33 = vld [vmem:[#allocation207_spill] sm:$0xff]  ;;  %v15479_v5 = vld [vmem:[#allocation204_spill] sm:$0xff] }
 0x4ad   : > { %v10248_v11 = vpop.permute.xlu2 %3562  ;;  %v3647_v42 = vmul.f32 %v15474_v29, %v3535_v21  ;;  %v3646_v10 = vmul.f32 %v15476_v19, %v3535_v21  ;;  %v15486_v19 = vld [vmem:[#allocation216_spill] sm:$0xff] }
 0x4ae   : > { %v3863_v9 = vrot.slane %v3643_v4, 1  ;;  %v3864_v8 = vrot.slane %v3644_v44, 1  ;;  %v3866_v30 = vrot.slane %v3645_v40, 1 }
 0x4af   : > { %v3869_v1 = vrot.slane %v3647_v42, 1 }
 0x4b0   : > { %v3867_v53 = vsel %vm2254_vm0, %v3864_v8, %v3866_v30 }
 0x4b1   : > { %3987 = vrot.lane.b32.xlu2 %v3837_v46, %s7944_s15  ;;  %3985 = vrot.lane.b32.xlu1 %v3835_v52, %s7944_s15  ;;  %v15471_v46 = vld [vmem:[#allocation196_spill] sm:$0xff] }
 0x4b2   : > { %3983 = vrot.lane.b32.xlu0 %v3832_v58, %s7944_s15  ;;  %v3642_v52 = vmul.f32 %v10198_v35, %v15471_v46  ;;  %v3650_v35 = vmul.f32 %v15473_v31, %v10216_v55 }
 0x4b3   : > { %v3543_v58 = vpop.permute.xlu0 %3542 }
 0x4b4   : > { %v3547_v61 = vpop.permute.xlu1 %3546  ;;  %v3861_v2 = vrot.slane %v3642_v52, 1  ;;  %v3874_v43 = vrot.slane %v3650_v35, 1  ;;  %v3654_v38 = vmul.f32 %v3543_v58, %v15479_v5  ;;  %v15482_v52 = vld [vmem:[#allocation209_spill] sm:$0xff] }
 0x4b5   : > { %v10263_v51 = vpop.permute.xlu2 %3574 }
 0x4b6   : > { %v3862_v22 = vsel %vm2254_vm0, %v3859_v20, %v3861_v2  ;;  %v15480_v20 = vld [vmem:[#allocation205_spill] sm:$0xff]  ;;  %v3881_v56 = vrot.slane %v3654_v38, 1 }
 0x4b9   : > { %3993 = vrot.lane.b32.xlu2 %v3845_v59, %s7944_s15  ;;  %3991 = vrot.lane.b32.xlu1 %v3842_v15, %s7944_s15  ;;  %v3649_v59 = vmul.f32 %v15472_v45, %v10216_v55  ;;  %v3648_v15 = vmul.f32 %v3535_v21, %v15475_v28  ;;  %v15478_v21 = vld [vmem:[#allocation206_spill] sm:$0xff] }
 0x4ba   : > { %3989 = vrot.lane.b32.xlu0 %v3840_v54, %s7944_s15  ;;  %v3865_v54 = vsel %vm2254_vm0, %v3863_v9, %v3864_v8  ;;  %v3653_v50 = vmul.f32 %v15478_v21, %v3543_v58  ;;  %v3657_v8 = vmul.f32 %v3547_v61, %v9666_v34 }
 0x4bb   : > { %v3873_v49 = vrot.slane %v3649_v59, 1  ;;  %v3871_v32 = vrot.slane %v3648_v15, 1  ;;  %v15484_v59 = vld [vmem:[#allocation210_spill] sm:$0xff] }
 0x4bc   : > { %v3559_v7 = vpop.permute.xlu1 %3558  ;;  %v3879_v44 = vrot.slane %v3653_v50, 1  ;;  %v3655_v31 = vmul.f32 %v15484_v59, %v3547_v61  ;;  %v3886_v15 = vrot.slane %v3657_v8, 1 }
 0x4bd   : > { %v10285_v14 = vpop.permute.xlu2 %3586  ;;  %v3875_v41 = vsel %vm2254_vm0, %v3873_v49, %v3874_v43  ;;  %v3872_v23 = vsel %vm2254_vm0, %v3869_v1, %v3871_v32  ;;  %v15488_v49 = vld [vmem:[#allocation213_spill] sm:$0xff] }
 0x4be   : > { %v3882_v2 = vsel %vm2254_vm0, %v3879_v44, %v3881_v56 }
 0x4c1   : > { %3999 = vrot.lane.b32.xlu2 %v3852_v12, %s7944_s15  ;;  %3997 = vrot.lane.b32.xlu1 %v3850_v47, %s7944_s15  ;;  %v3868_v12 = vrot.slane %v3646_v10, 1  ;;  %v3555_v47 = vpop.permute.xlu0 %3554 }
 0x4c2   : > { %3995 = vrot.lane.b32.xlu0 %v3847_v48, %s7944_s15  ;;  %v3652_v48 = vmul.f32 %v15477_v33, %v3543_v58  ;;  %v15483_v58 = vld [vmem:[#allocation211_spill] sm:$0xff]  ;;  %v3661_v10 = vmul.f32 %v15486_v19, %v3555_v47 }
 0x4c3   : > { %v3870_v36 = vsel %vm2254_vm0, %v3868_v12, %v3869_v1  ;;  %v3656_v9 = vmul.f32 %v15483_v58, %v3547_v61  ;;  %v15487_v61 = vld [vmem:[#allocation215_spill] sm:$0xff]  ;;  %v3663_v1 = vmul.f32 %v3555_v47, %v15488_v49 }
 0x4c4   : > { %v3878_v63 = vrot.slane %v3652_v48, 1  ;;  %v10310_v30 = vpop.permute.xlu1 %3570 }
 0x4c5   : > { %v10302_v4 = vpop.permute.xlu2 %3598  ;;  %v3884_v34 = vrot.slane %v3656_v9, 1  ;;  %v3896_v5 = vrot.slane %v3663_v1, 1 }
 0x4c6   : > { %v3880_v45 = vsel %vm2254_vm0, %v3878_v63, %v3879_v44  ;;  %v3666_v44 = vmul.f32 %v3559_v7, %v9727_v25 }
 0x4c7   : > { %v3887_v32 = vsel %vm2254_vm0, %v3884_v34, %v3886_v15 }
 0x4c9   : > { %4005 = vrot.lane.b32.xlu2 %v3860_v57, %s7944_s15  ;;  %4003 = vrot.lane.b32.xlu1 %v3857_v6, %s7944_s15  ;;  %v3651_v57 = vmul.f32 %v10216_v55, %v15480_v20  ;;  %v15481_v6 = vld [vmem:[#allocation208_spill] sm:$0xff]  ;;  %v3659_v55 = vmul.f32 %v15482_v52, %v10235_v16  ;;  %v15492_v20 = vld [vmem:[#allocation219_spill] sm:$0xff] }
 0x4ca   : > { %4001 = vrot.lane.b32.xlu0 %v3855_v13, %s7944_s15  ;;  %v3658_v46 = vmul.f32 %v15481_v6, %v10235_v16  ;;  %v3567_v13 = vpop.permute.xlu0 %3566  ;;  %v15494_v6 = vld [vmem:[#allocation220_spill] sm:$0xff] }
 0x4cb   : > { %v3876_v40 = vrot.slane %v3651_v57, 1  ;;  %v3889_v42 = vrot.slane %v3659_v55, 1  ;;  %v3668_v57 = vmul.f32 %v15492_v20, %v10248_v11  ;;  %v15506_v20 = vld [vmem:[#allocation232_spill] sm:$0xff] }
 0x4cc   : > { %v3888_v29 = vrot.slane %v3658_v46, 1  ;;  %v10333_v48 = vpop.permute.xlu1 %3582  ;;  %v3664_v46 = vmul.f32 %v15494_v6, %v3559_v7 }
 0x4cd   : > { %v3877_v35 = vsel %vm2254_vm0, %v3874_v43, %v3876_v40  ;;  %v10319_v28 = vpop.permute.xlu2 %3957  ;;  %v15489_v43 = vld [vmem:[#allocation214_spill] sm:$0xff]  ;;  %v3904_v58 = vrot.slane %v3668_v57, 1  ;;  %v3673_v57 = vmul.f32 %v15506_v20, %v10310_v30 }
 0x4ce   : > { %15485 = vst [vmem:[#allocation194_spill] sm:$0xff] %v10319_v28  ;;  %v3660_v12 = vmul.f32 %v10235_v16, %v15489_v43  ;;  %v15491_v16 = vld [vmem:[#allocation218_spill] sm:$0xff]  ;;  %v3898_v59 = vrot.slane %v3664_v46, 1  ;;  %v11110_v28 = vld [vmem:[%s8223_s20 + $0x1d0] sm:$0xff] }
 0x4cf   : > { %15613 = vst [vmem:[#allocation358_spill] sm:$0xff] %v11110_v28 }
 0x4d0   : > { %v3891_v38 = vrot.slane %v3660_v12, 1 }
 0x4d1   : > { %4011 = vrot.lane.b32.xlu2 %v3867_v53, %s7944_s15  ;;  %4009 = vrot.lane.b32.xlu1 %v3865_v54, %s7944_s15  ;;  %v3883_v53 = vrot.slane %v3655_v31, 1  ;;  %v3890_v54 = vsel %vm2254_vm0, %v3888_v29, %v3889_v42  ;;  %v15496_v31 = vld [vmem:[#allocation226_spill] sm:$0xff]  ;;  %v15497_v29 = vld [vmem:[#allocation225_spill] sm:$0xff] }
 0x4d2   : > { %4007 = vrot.lane.b32.xlu0 %v3862_v22, %s7944_s15  ;;  %v3662_v22 = vmul.f32 %v15487_v61, %v3555_v47  ;;  %v3893_v47 = vrot.slane %v3661_v10, 1  ;;  %v3892_v52 = vsel %vm2254_vm0, %v3889_v42, %v3891_v38  ;;  %v15498_v42 = vld [vmem:[#allocation223_spill] sm:$0xff]  ;;  %v3675_v38 = vmul.f32 %v10310_v30, %v9796_v18 }
 0x4d3   : > { %v3885_v33 = vsel %vm2254_vm0, %v3883_v53, %v3884_v34  ;;  %v3671_v34 = vmul.f32 %v15497_v29, %v3567_v13  ;;  %v3672_v15 = vmul.f32 %v3567_v13, %v15498_v42 }
 0x4d4   : > { %v3894_v50 = vrot.slane %v3662_v22, 1 }
 0x4d5   : > { %v3909_v1 = vrot.slane %v3671_v34, 1 }
 0x4d6   : > { %v3897_v56 = vsel %vm2254_vm0, %v3894_v50, %v3896_v5  ;;  %v3895_v40 = vsel %vm2254_vm0, %v3893_v47, %v3894_v50  ;;  %v15505_v50 = vld [vmem:[#allocation233_spill] sm:$0xff] }
 0x4d7   : > { %v3674_v5 = vmul.f32 %v15505_v50, %v10310_v30 }
 0x4d9   : > { %4017 = vrot.lane.b32.xlu2 %v3875_v41, %s7944_s15  ;;  %4015 = vrot.lane.b32.xlu1 %v3872_v23, %s7944_s15  ;;  %v10328_v41 = vpop.permute.xlu0 %3578  ;;  %v3667_v23 = vmul.f32 %v15491_v16, %v10248_v11  ;;  %v3914_v18 = vrot.slane %v3674_v5, 1 }
 0x4da   : > { %4013 = vrot.lane.b32.xlu0 %v3870_v36, %s7944_s15  ;;  %v15493_v36 = vld [vmem:[#allocation221_spill] sm:$0xff] }
 0x4db   : > { %v3665_v63 = vmul.f32 %v15493_v36, %v3559_v7  ;;  %v3903_v55 = vrot.slane %v3667_v23, 1 }
 0x4dd   : > { %v3899_v25 = vrot.slane %v3665_v63, 1  ;;  %v3905_v7 = vsel %vm2254_vm0, %v3903_v55, %v3904_v58  ;;  %v3679_v55 = vmul.f32 %v9839_v24, %v10328_v41 }
 0x4df   : > { %v3900_v10 = vsel %vm2254_vm0, %v3898_v59, %v3899_v25  ;;  %v3923_v29 = vrot.slane %v3679_v55, 1 }
 0x4e1   : > { %4023 = vrot.lane.b32.xlu2 %v3882_v2, %s7944_s15  ;;  %4021 = vrot.lane.b32.xlu1 %v3880_v45, %s7944_s15  ;;  %v10351_v9 = vpop.permute.xlu0 %3590  ;;  %v3901_v2 = vrot.slane %v3666_v44, 1  ;;  %v10355_v45 = vpop.permute.xlu1 %3594 }
 0x4e2   : > { %4019 = vrot.lane.b32.xlu0 %v3877_v35, %s7944_s15  ;;  %v3670_v35 = vmul.f32 %v15496_v31, %v3567_v13  ;;  %v3911_v13 = vrot.slane %v3672_v15, 1 }
 0x4e3   : > { %v3902_v53 = vsel %vm2254_vm0, %v3899_v25, %v3901_v2  ;;  %v15510_v25 = vld [vmem:[#allocation237_spill] sm:$0xff] }
 0x4e4   : > { %v3908_v49 = vrot.slane %v3670_v35, 1  ;;  %v3912_v16 = vsel %vm2254_vm0, %v3909_v1, %v3911_v13  ;;  %v3681_v2 = vmul.f32 %v10328_v41, %v15510_v25 }
 0x4e6   : > { %v3910_v23 = vsel %vm2254_vm0, %v3908_v49, %v3909_v1  ;;  %v3926_v34 = vrot.slane %v3681_v2, 1  ;;  %v3684_v1 = vmul.f32 %v10333_v48, %v9865_v0 }
 0x4e9   : > { %4029 = vrot.lane.b32.xlu2 %v3890_v54, %s7944_s15  ;;  %4027 = vrot.lane.b32.xlu1 %v3887_v32, %s7944_s15  ;;  %v15499_v54 = vld [vmem:[#allocation224_spill] sm:$0xff] }
 0x4ea   : > { %4025 = vrot.lane.b32.xlu0 %v3885_v33, %s7944_s15  ;;  %v3669_v19 = vmul.f32 %v10248_v11, %v15499_v54  ;;  %v15503_v11 = vld [vmem:[#allocation230_spill] sm:$0xff]  ;;  %v15504_v33 = vld [vmem:[#allocation231_spill] sm:$0xff] }
 0x4eb   : > { %v10336_v21 = vpop.permute.xlu2 %3963  ;;  %v3676_v12 = vmul.f32 %v15503_v11, %v10263_v51  ;;  %v3677_v47 = vmul.f32 %v15504_v33, %v10263_v51  ;;  %v15516_v54 = vld [vmem:[#allocation243_spill] sm:$0xff]  ;;  %v15518_v11 = vld [vmem:[#allocation244_spill] sm:$0xff] }
 0x4ec   : > { %15490 = vst [vmem:[#allocation198_spill] sm:$0xff] %v10336_v21  ;;  %v3906_v43 = vrot.slane %v3669_v19, 1  ;;  %v3686_v19 = vmul.f32 %v15516_v54, %v10285_v14 }
 0x4ed   : > { %v3918_v63 = vrot.slane %v3676_v12, 1  ;;  %v3919_v44 = vrot.slane %v3677_v47, 1  ;;  %v3682_v12 = vmul.f32 %v15518_v11, %v10333_v48 }
 0x4ee   : > { %v3907_v36 = vsel %vm2254_vm0, %v3904_v58, %v3906_v43  ;;  %v3680_v58 = vmul.f32 %v9828_v39, %v10328_v41  ;;  %v3934_v50 = vrot.slane %v3686_v19, 1 }
 0x4ef   : > { %v3920_v30 = vsel %vm2254_vm0, %v3918_v63, %v3919_v44  ;;  %v3928_v20 = vrot.slane %v3682_v12, 1  ;;  %v15522_v63 = vld [vmem:[#allocation249_spill] sm:$0xff] }
 0x4f0   : > { %v3924_v39 = vrot.slane %v3680_v58, 1 }
 0x4f1   : > { %4035 = vrot.lane.b32.xlu2 %v3897_v56, %s7944_s15  ;;  %4033 = vrot.lane.b32.xlu1 %v3895_v40, %s7944_s15  ;;  %v3916_v40 = vrot.slane %v3675_v38, 1  ;;  %v3931_v38 = vrot.slane %v3684_v1, 1 }
 0x4f2   : > { %4031 = vrot.lane.b32.xlu0 %v3892_v52, %s7944_s15  ;;  %v3913_v52 = vrot.slane %v3673_v57, 1  ;;  %v3927_v13 = vsel %vm2254_vm0, %v3924_v39, %v3926_v34  ;;  %v3925_v43 = vsel %vm2254_vm0, %v3923_v29, %v3924_v39  ;;  %v3688_v57 = vmul.f32 %v9908_v3, %v10351_v9 }
 0x4f3   : > { %v10353_v8 = vpop.permute.xlu2 %3969  ;;  %v3917_v59 = vsel %vm2254_vm0, %v3914_v18, %v3916_v40  ;;  %v15523_v40 = vld [vmem:[#allocation250_spill] sm:$0xff]  ;;  %v3693_v39 = vmul.f32 %v10355_v45, %v9934_v60 }
 0x4f4   : > { %15495 = vst [vmem:[#allocation197_spill] sm:$0xff] %v10353_v8  ;;  %v3915_v35 = vsel %vm2254_vm0, %v3913_v52, %v3914_v18  ;;  %v3687_v52 = vmul.f32 %v10285_v14, %v15523_v40  ;;  %v3938_v55 = vrot.slane %v3688_v57, 1  ;;  %v7467_v40 = vld [vmem:[%s14915_s1 + $0xc2] ss:$0 sm:$0xff]  ;;  %v11069_v8 = vld [vmem:[%s8223_s20 + $0x198] sm:$0xff] }
 0x4f5   : > { %v3946_v1 = vrot.slane %v3693_v39, 1 }
 0x4f6   : > { %v3936_v2 = vrot.slane %v3687_v52, 1 }
 0x4f8   : > { %v3937_v54 = vsel %vm2254_vm0, %v3934_v50, %v3936_v2  ;;  %v7470_v2 = vld [vmem:[%s14915_s1 + $0xc5] ss:$0 sm:$0xff] }
 0x4f9   : > { %4041 = vrot.lane.b32.xlu2 %v3905_v7, %s7944_s15  ;;  %4039 = vrot.lane.b32.xlu1 %v3902_v53, %s7944_s15  ;;  %v15511_v7 = vld [vmem:[#allocation238_spill] sm:$0xff] }
 0x4fa   : > { %4037 = vrot.lane.b32.xlu0 %v3900_v10, %s7944_s15  ;;  %v3678_v31 = vmul.f32 %v10263_v51, %v15511_v7  ;;  %v15515_v51 = vld [vmem:[#allocation242_spill] sm:$0xff]  ;;  %v15517_v10 = vld [vmem:[#allocation245_spill] sm:$0xff]  ;;  %v15528_v7 = vld [vmem:[#allocation255_spill] sm:$0xff] }
 0x4fb   : > { %v10368_v61 = vpop.permute.xlu2 %3975  ;;  %v10370_v22 = vpop.permute.xlu0 %3953  ;;  %v3685_v53 = vmul.f32 %v15515_v51, %v10285_v14  ;;  %v3683_v49 = vmul.f32 %v15517_v10, %v10333_v48  ;;  %v15527_v14 = vld [vmem:[#allocation254_spill] sm:$0xff]  ;;  %v15530_v51 = vld [vmem:[#allocation256_spill] sm:$0xff] }
 0x4fc   : > { %15500 = vst [vmem:[#allocation195_spill] sm:$0xff] %v10368_v61  ;;  %v10372_v32 = vpop.permute.xlu1 %3955  ;;  %v3921_v15 = vrot.slane %v3678_v31, 1  ;;  %v3695_v31 = vmul.f32 %v15528_v7, %v10302_v4 }
 0x4fd   : > { %15501 = vst [vmem:[#allocation196_spill] sm:$0xff] %v10370_v22  ;;  %v3933_v47 = vrot.slane %v3685_v53, 1  ;;  %v3929_v0 = vrot.slane %v3683_v49, 1  ;;  %v3691_v53 = vmul.f32 %v15530_v51, %v10355_v45  ;;  %v7474_v51 = vld [vmem:[%s14915_s1 + $0xcd] ss:$0 sm:$0xff] }
 0x4fe   : > { %15502 = vst [vmem:[#allocation199_spill] sm:$0xff] %v10372_v32  ;;  %v3922_v33 = vsel %vm2254_vm0, %v3919_v44, %v3921_v15  ;;  %v3690_v44 = vmul.f32 %v10351_v9, %v15522_v63  ;;  %v3949_v49 = vrot.slane %v3695_v31, 1  ;;  %v7471_v31 = vld [vmem:[%s14915_s1 + $0xca] ss:$0 sm:$0xff] }
 0x4ff   : > { %v3935_v48 = vsel %vm2254_vm0, %v3933_v47, %v3934_v50  ;;  %v3932_v18 = vsel %vm2254_vm0, %v3929_v0, %v3931_v38  ;;  %v3943_v11 = vrot.slane %v3691_v53, 1  ;;  %v7475_v53 = vld [vmem:[%s14915_s1 + $0xcc] ss:$0 sm:$0xff] }
 0x500   : > { %v3941_v58 = vrot.slane %v3690_v44, 1  ;;  %v7465_v44 = vld [vmem:[%s14915_s1 + $0xc4] ss:$0 sm:$0xff] }
 0x501   : > { %4047 = vrot.lane.b32.xlu2 %v3912_v16, %s7944_s15  ;;  %4045 = vrot.lane.b32.xlu1 %v3910_v23, %s7944_s15 }
 0x502   : > { %4043 = vrot.lane.b32.xlu0 %v3907_v36, %s7944_s15  ;;  %v3689_v36 = vmul.f32 %v9897_v27, %v10351_v9 }
 0x503   : > { %v10390_v56 = vpop.permute.xlu2 %3981 }
 0x504   : > { %15507 = vst [vmem:[#allocation200_spill] sm:$0xff] %v10390_v56  ;;  %v10392_v6 = vpop.permute.xlu0 %3959  ;;  %v10394_v46 = vpop.permute.xlu1 %3961  ;;  %v3939_v27 = vrot.slane %v3689_v36, 1 }
 0x505   : > { %15508 = vst [vmem:[#allocation203_spill] sm:$0xff] %v10392_v6 }
 0x506   : > { %15509 = vst [vmem:[#allocation201_spill] sm:$0xff] %v10394_v46  ;;  %v3942_v34 = vsel %vm2254_vm0, %v3939_v27, %v3941_v58  ;;  %v3940_v15 = vsel %vm2254_vm0, %v3938_v55, %v3939_v27  ;;  %v7468_v27 = vld [vmem:[%s14915_s1 + $0xc7] ss:$0 sm:$0xff]  ;;  %v7469_v58 = vld [vmem:[%s14915_s1 + $0xc6] ss:$0 sm:$0xff]  ;;  %v11022_v46 = vld [vmem:[%s8223_s20 + $0x158] sm:$0xff] }
 0x509   : > { %4053 = vrot.lane.b32.xlu2 %v3920_v30, %s7944_s15  ;;  %4051 = vrot.lane.b32.xlu1 %v3917_v59, %s7944_s15  ;;  %v3930_v30 = vsel %vm2254_vm0, %v3928_v20, %v3929_v0  ;;  %v3694_v59 = vmul.f32 %v15527_v14, %v10302_v4 }
 0x50a   : > { %4049 = vrot.lane.b32.xlu0 %v3915_v35, %s7944_s15  ;;  %v15529_v35 = vld [vmem:[#allocation257_spill] sm:$0xff] }
 0x50b   : > { %v10410_v24 = vpop.permute.xlu2 %3987  ;;  %v3692_v29 = vmul.f32 %v15529_v35, %v10355_v45  ;;  %v3948_v10 = vrot.slane %v3694_v59, 1  ;;  %v7472_v35 = vld [vmem:[%s14915_s1 + $0xc9] ss:$0 sm:$0xff] }
 0x50c   : > { %15512 = vst [vmem:[#allocation202_spill] sm:$0xff] %v10410_v24  ;;  %v10412_v42 = vpop.permute.xlu0 %3965  ;;  %v10414_v41 = vpop.permute.xlu1 %3967 }
 0x50d   : > { %15513 = vst [vmem:[#allocation207_spill] sm:$0xff] %v10412_v42  ;;  %v3944_v60 = vrot.slane %v3692_v29, 1  ;;  %v3950_v45 = vsel %vm2254_vm0, %v3948_v10, %v3949_v49  ;;  %v7473_v29 = vld [vmem:[%s14915_s1 + $0xc8] ss:$0 sm:$0xff]  ;;  %v11017_v42 = vld [vmem:[%s8223_s20 + $0x150] sm:$0xff] }
 0x50e   : > { %15514 = vst [vmem:[#allocation206_spill] sm:$0xff] %v10414_v41 }
 0x50f   : > { %v3947_v12 = vsel %vm2254_vm0, %v3944_v60, %v3946_v1  ;;  %v3945_v47 = vsel %vm2254_vm0, %v3943_v11, %v3944_v60  ;;  %v7477_v1 = vld [vmem:[%s14915_s1 + $0xd0] ss:$0 sm:$0xff]  ;;  %v7478_v11 = vld [vmem:[%s14915_s1 + $0xcf] ss:$0 sm:$0xff] }
 0x511   : > { %4059 = vrot.lane.b32.xlu2 %v3927_v13, %s7944_s15  ;;  %4057 = vrot.lane.b32.xlu1 %v3925_v43, %s7944_s15 }
 0x512   : > { %4055 = vrot.lane.b32.xlu0 %v3922_v33, %s7944_s15  ;;  %v3696_v33 = vmul.f32 %v10302_v4, %v9961_v17  ;;  %v7464_v17 = vld [vmem:[%s14915_s1 + $0xc0] ss:$0 sm:$0xff] }
 0x513   : > { %v10432_v5 = vpop.permute.xlu2 %3993 }
 0x514   : > { %15519 = vst [vmem:[#allocation204_spill] sm:$0xff] %v10432_v5  ;;  %v10434_v16 = vpop.permute.xlu0 %3971  ;;  %v10436_v23 = vpop.permute.xlu1 %3973  ;;  %v3951_v20 = vrot.slane %v3696_v33, 1 }
 0x515   : > { %15520 = vst [vmem:[#allocation205_spill] sm:$0xff] %v10434_v16 }
 0x516   : > { %15521 = vst [vmem:[#allocation208_spill] sm:$0xff] %v10436_v23  ;;  %v3952_v4 = vsel %vm2254_vm0, %v3949_v49, %v3951_v20  ;;  %v7480_v20 = vld [vmem:[%s14915_s1 + $0xd3] ss:$0 sm:$0xff] }
 0x519   : > { %4065 = vrot.lane.b32.xlu2 %v3935_v48, %s7944_s15  ;;  %4063 = vrot.lane.b32.xlu1 %v3932_v18, %s7944_s15  ;;  %v7463_v48 = vld [vmem:[%s14915_s1 + $0xc1] ss:$0 sm:$0xff]  ;;  %v7466_v18 = vld [vmem:[%s14915_s1 + $0xc3] ss:$0 sm:$0xff] }
 0x51a   : > { %4061 = vrot.lane.b32.xlu0 %v3930_v30, %s7944_s15 }
 0x51b   : > { %v10452_v3 = vpop.permute.xlu2 %3999 }
 0x51c   : > { %15524 = vst [vmem:[#allocation209_spill] sm:$0xff] %v10452_v3  ;;  %v10454_v25 = vpop.permute.xlu0 %3977  ;;  %v10456_v9 = vpop.permute.xlu1 %3979 }
 0x51d   : > { %15525 = vst [vmem:[#allocation211_spill] sm:$0xff] %v10454_v25 }
 0x51e   : > { %15526 = vst [vmem:[#allocation210_spill] sm:$0xff] %v10456_v9 }
 0x521   : > { %4071 = vrot.lane.b32.xlu2 %v3942_v34, %s7944_s15  ;;  %4069 = vrot.lane.b32.xlu1 %v3940_v15, %s7944_s15 }
 0x522   : > { %4067 = vrot.lane.b32.xlu0 %v3937_v54, %s7944_s15  ;;  %v7476_v54 = vld [vmem:[%s14915_s1 + $0xcb] ss:$0 sm:$0xff] }
 0x523   : > { %v10474_v19 = vpop.permute.xlu2 %4005 }
 0x524   : > { %15531 = vst [vmem:[#allocation216_spill] sm:$0xff] %v10474_v19  ;;  %v10476_v13 = vpop.permute.xlu0 %3983  ;;  %v10478_v43 = vpop.permute.xlu1 %3985  ;;  %v10973_v19 = vld [vmem:[%s8223_s20 + $0x108] sm:$0xff] }
 0x525   : > { %15532 = vst [vmem:[#allocation215_spill] sm:$0xff] %v10476_v13 }
 0x526   : > { %15533 = vst [vmem:[#allocation213_spill] sm:$0xff] %v10478_v43 }
 0x529   : > { %4077 = vrot.lane.b32.xlu2 %v3950_v45, %s7944_s15  ;;  %4075 = vrot.lane.b32.xlu1 %v3947_v12, %s7944_s15  ;;  %v7479_v45 = vld [vmem:[%s14915_s1 + $0xce] ss:$0 sm:$0xff] }
 0x52a   : > { %4073 = vrot.lane.b32.xlu0 %v3945_v47, %s7944_s15 }
 0x52b   : > { %v10488_v50 = vpop.permute.xlu2 %4011 }
 0x52c   : > { %15534 = vst [vmem:[#allocation214_spill] sm:$0xff] %v10488_v50  ;;  %v10490_v0 = vpop.permute.xlu0 %3989  ;;  %v10492_v38 = vpop.permute.xlu1 %3991 }
 0x52d   : > { %15535 = vst [vmem:[#allocation218_spill] sm:$0xff] %v10490_v0  ;;  %v7685_v0 = vld [vmem:[%s8223_s20 + $0xb8] sm:$0x3] }
 0x52e   : > { %15536 = vst [vmem:[#allocation219_spill] sm:$0xff] %v10492_v38  ;;  %v10934_v38 = vld [vmem:[%s8223_s20 + $0xc8] sm:$0xff] }
 0x531   : > { %4311 = vperm.xlu2 %7270, %v7463_v48   ;;  %4307 = vperm.xlu1 %7269, %v7464_v17   ;;  %v7481_v48 = vld [vmem:[%s14915_s1 + $0xd2] ss:$0 sm:$0xff]  ;;  %v7482_v17 = vld [vmem:[%s14915_s1 + $0xd1] ss:$0 sm:$0xff] }
 0x532   : > { %4079 = vrot.lane.b32.xlu0 %v3952_v4, %s7944_s15 }
 0x533   : > { %v10502_v57 = vpop.permute.xlu2 %4017 }
 0x534   : > { %15537 = vst [vmem:[#allocation221_spill] sm:$0xff] %v10502_v57  ;;  %v10504_v36 = vpop.permute.xlu0 %3995  ;;  %v10506_v63 = vpop.permute.xlu1 %3997 }
 0x535   : > { %15538 = vst [vmem:[#allocation220_spill] sm:$0xff] %v10504_v36  ;;  %v10930_v36 = vld [vmem:[%s8223_s20 + $0xc0] sm:$0xff] }
 0x536   : > { %15539 = vst [vmem:[#allocation226_spill] sm:$0xff] %v10506_v63 }
 0x539   : > { %4323 = vperm.xlu2 %7270, %v7465_v44   ;;  %4319 = vperm.xlu1 %7269, %v7466_v18  }
 0x53a   : > { %4315 = vperm.xlu0 %7268, %v7467_v40   ;;  %v7483_v40 = vld [vmem:[%s14915_s1 + $0xd6] ss:$0 sm:$0xff] }
 0x53b   : > { %v10517_v52 = vpop.permute.xlu2 %4023 }
 0x53c   : > { %15540 = vst [vmem:[#allocation225_spill] sm:$0xff] %v10517_v52  ;;  %v10519_v30 = vpop.permute.xlu0 %4001  ;;  %v10521_v55 = vpop.permute.xlu1 %4003 }
 0x53d   : > { %15541 = vst [vmem:[#allocation223_spill] sm:$0xff] %v10519_v30 }
 0x53e   : > { %15542 = vst [vmem:[#allocation224_spill] sm:$0xff] %v10521_v55  ;;  %v10893_v55 = vld [vmem:[%s8223_s20 + $0x80] sm:$0xff] }
 0x541   : > { %4335 = vperm.xlu2 %7270, %v7468_v27   ;;  %4331 = vperm.xlu1 %7269, %v7469_v58   ;;  %v7484_v27 = vld [vmem:[%s14915_s1 + $0xd5] ss:$0 sm:$0xff]  ;;  %v7485_v58 = vld [vmem:[%s14915_s1 + $0xd4] ss:$0 sm:$0xff] }
 0x542   : > { %4327 = vperm.xlu0 %7268, %v7470_v2  }
 0x543   : > { %v10532_v14 = vpop.permute.xlu2 %4029 }
 0x544   : > { %15543 = vst [vmem:[#allocation230_spill] sm:$0xff] %v10532_v14  ;;  %v10534_v59 = vpop.permute.xlu0 %4007  ;;  %v10536_v7 = vpop.permute.xlu1 %4009 }
 0x545   : > { %15544 = vst [vmem:[#allocation231_spill] sm:$0xff] %v10534_v59  ;;  %v10889_v59 = vld [vmem:[%s8223_s20 + $0x78] sm:$0xff] }
 0x546   : > { %15545 = vst [vmem:[#allocation233_spill] sm:$0xff] %v10536_v7 }
 0x549   : > { %4347 = vperm.xlu2 %7270, %v7471_v31   ;;  %4343 = vperm.xlu1 %7269, %v7472_v35  }
 0x54a   : > { %4339 = vperm.xlu0 %7268, %v7473_v29   ;;  %v7486_v29 = vld [vmem:[%s14915_s1 + $0xd9] ss:$0 sm:$0xff] }
 0x54b   : > { %v10547_v39 = vpop.permute.xlu2 %4035 }
 0x54c   : > { %15546 = vst [vmem:[#allocation232_spill] sm:$0xff] %v10547_v39  ;;  %v10549_v34 = vpop.permute.xlu0 %4013  ;;  %v10551_v15 = vpop.permute.xlu1 %4015 }
 0x54d   : > { %15547 = vst [vmem:[#allocation237_spill] sm:$0xff] %v10549_v34 }
 0x54e   : > { %15548 = vst [vmem:[#allocation238_spill] sm:$0xff] %v10551_v15 }
 0x551   : > { %4359 = vperm.xlu2 %7270, %v7474_v51   ;;  %4355 = vperm.xlu1 %7269, %v7475_v53   ;;  %v7487_v51 = vld [vmem:[%s14915_s1 + $0xd8] ss:$0 sm:$0xff]  ;;  %v7488_v53 = vld [vmem:[%s14915_s1 + $0xd7] ss:$0 sm:$0xff] }
 0x552   : > { %4351 = vperm.xlu0 %7268, %v7476_v54  }
 0x553   : > { %v10562_v10 = vpop.permute.xlu2 %4041 }
 0x554   : > { %15549 = vst [vmem:[#allocation242_spill] sm:$0xff] %v10562_v10  ;;  %v10564_v49 = vpop.permute.xlu0 %4019  ;;  %v10566_v60 = vpop.permute.xlu1 %4021  ;;  %v7496_v10 = vld [vmem:[%s14915_s1 + $0xe1] ss:$0 sm:$0xff] }
 0x555   : > { %15550 = vst [vmem:[#allocation243_spill] sm:$0xff] %v10564_v49  ;;  %v7667_v49 = vld [vmem:[%s8223_s20 + $0x28] sm:$0x3] }
 0x556   : > { %15551 = vst [vmem:[#allocation245_spill] sm:$0xff] %v10566_v60  ;;  %v10854_v60 = vld [vmem:[%s8223_s20 + $0x38] sm:$0xff] }
 0x559   : > { %4371 = vperm.xlu2 %7270, %v7477_v1   ;;  %4367 = vperm.xlu1 %7269, %v7478_v11  }
 0x55a   : > { %4363 = vperm.xlu0 %7268, %v7479_v45   ;;  %v7489_v45 = vld [vmem:[%s14915_s1 + $0xdc] ss:$0 sm:$0xff] }
 0x55b   : > { %v10577_v12 = vpop.permute.xlu2 %4047 }
 0x55c   : > { %15552 = vst [vmem:[#allocation244_spill] sm:$0xff] %v10577_v12  ;;  %v10579_v33 = vpop.permute.xlu0 %4025  ;;  %v10581_v47 = vpop.permute.xlu1 %4027 }
 0x55d   : > { %15553 = vst [vmem:[#allocation249_spill] sm:$0xff] %v10579_v33  ;;  %v7501_v33 = vld [vmem:[%s14915_s1 + $0xe8] ss:$0 sm:$0xff] }
 0x55e   : > { %15554 = vst [vmem:[#allocation250_spill] sm:$0xff] %v10581_v47 }
 0x561   : > { %4383 = vperm.xlu2 %7270, %v7480_v20   ;;  %4379 = vperm.xlu1 %7269, %v7481_v48   ;;  %v7490_v20 = vld [vmem:[%s14915_s1 + $0xdb] ss:$0 sm:$0xff]  ;;  %v7491_v48 = vld [vmem:[%s14915_s1 + $0xda] ss:$0 sm:$0xff] }
 0x562   : > { %4375 = vperm.xlu0 %7268, %v7482_v17  }
 0x563   : > { %v10592_v4 = vpop.permute.xlu2 %4053 }
 0x564   : > { %15555 = vst [vmem:[#allocation254_spill] sm:$0xff] %v10592_v4  ;;  %v10594_v44 = vpop.permute.xlu0 %4031  ;;  %v10596_v18 = vpop.permute.xlu1 %4033  ;;  %v10850_v4 = vld [vmem:[%s8223_s20 + $0x30] sm:$0xff] }
 0x565   : > { %15556 = vst [vmem:[#allocation255_spill] sm:$0xff] %v10594_v44  ;;  %v7499_v44 = vld [vmem:[%s14915_s1 + $0xe4] ss:$0 sm:$0xff] }
 0x566   : > { %15557 = vst [vmem:[#allocation257_spill] sm:$0xff] %v10596_v18 }
 0x569   : > { %4395 = vperm.xlu2 %7270, %v7483_v40   ;;  %4391 = vperm.xlu1 %7269, %v7484_v27  }
 0x56a   : > { %4387 = vperm.xlu0 %7268, %v7485_v58   ;;  %v7492_v58 = vld [vmem:[%s14915_s1 + $0xdf] ss:$0 sm:$0xff] }
 0x56b   : > { %v10607_v2 = vpop.permute.xlu2 %4059 }
 0x56c   : > { %15558 = vst [vmem:[#allocation256_spill] sm:$0xff] %v10607_v2  ;;  %v10609_v31 = vpop.permute.xlu0 %4037  ;;  %v10611_v35 = vpop.permute.xlu1 %4039 }
 0x56d   : > { %15559 = vst [vmem:[#allocation304_spill] sm:$0xff] %v10609_v31  ;;  %v7498_v31 = vld [vmem:[%s14915_s1 + $0xe5] ss:$0 sm:$0xff] }
 0x56e   : > { %15560 = vst [vmem:[#allocation305_spill] sm:$0xff] %v10611_v35 }
 0x571   : > { %4407 = vperm.xlu2 %7270, %v7486_v29   ;;  %4403 = vperm.xlu1 %7269, %v7487_v51   ;;  %v7493_v29 = vld [vmem:[%s14915_s1 + $0xde] ss:$0 sm:$0xff]  ;;  %v7494_v51 = vld [vmem:[%s14915_s1 + $0xdd] ss:$0 sm:$0xff] }
 0x572   : > { %4399 = vperm.xlu0 %7268, %v7488_v53  }
 0x573   : > { %v10622_v54 = vpop.permute.xlu2 %4065 }
 0x574   : > { %15561 = vst [vmem:[#allocation306_spill] sm:$0xff] %v10622_v54  ;;  %v10624_v1 = vpop.permute.xlu0 %4043  ;;  %v10626_v11 = vpop.permute.xlu1 %4045 }
 0x575   : > { %15562 = vst [vmem:[#allocation307_spill] sm:$0xff] %v10624_v1 }
 0x576   : > { %15563 = vst [vmem:[#allocation308_spill] sm:$0xff] %v10626_v11  ;;  %v10842_v11 = vld [vmem:[%s8223_s20 + $0x18] sm:$0xff] }
 0x579   : > { %4419 = vperm.xlu2 %7270, %v7489_v45   ;;  %4415 = vperm.xlu1 %7269, %v7490_v20  }
 0x57a   : > { %4411 = vperm.xlu0 %7268, %v7491_v48   ;;  %v7495_v48 = vld [vmem:[%s14915_s1 + $0xe2] ss:$0 sm:$0xff] }
 0x57b   : > { %v10637_v17 = vpop.permute.xlu2 %4071 }
 0x57c   : > { %15564 = vst [vmem:[#allocation309_spill] sm:$0xff] %v10637_v17  ;;  %v10639_v40 = vpop.permute.xlu0 %4049  ;;  %v10641_v27 = vpop.permute.xlu1 %4051  ;;  %v10837_v17 = vld [vmem:[%s8223_s20 + $0x8] sm:$0xff] }
 0x57d   : > { %15565 = vst [vmem:[#allocation310_spill] sm:$0xff] %v10639_v40  ;;  %v10833_v40 = vld [vmem:[%s8223_s20] sm:$0xff] }
 0x57e   : > { %15566 = vst [vmem:[#allocation311_spill] sm:$0xff] %v10641_v27 }
 0x581   : > { %4431 = vperm.xlu2 %7270, %v7492_v58   ;;  %4427 = vperm.xlu1 %7269, %v7493_v29   ;;  %v7497_v58 = vld [vmem:[%s14915_s1 + $0xe0] ss:$0 sm:$0xff] }
 0x582   : > { %4423 = vperm.xlu0 %7268, %v7494_v51  }
 0x583   : > { %v10652_v53 = vpop.permute.xlu2 %4077 }
 0x584   : > { %15567 = vst [vmem:[#allocation312_spill] sm:$0xff] %v10652_v53  ;;  %v10654_v45 = vpop.permute.xlu0 %4055  ;;  %v10656_v20 = vpop.permute.xlu1 %4057 }
 0x585   : > { %15568 = vst [vmem:[#allocation313_spill] sm:$0xff] %v10654_v45 }
 0x586   : > { %15569 = vst [vmem:[#allocation314_spill] sm:$0xff] %v10656_v20 }
 0x589   : > { %5021 = vperm.xlu2 %7270, %v7495_v48   ;;  %5017 = vperm.xlu1 %7269, %v7496_v10   ;;  %v7500_v48 = vld [vmem:[%s14915_s1 + $0xe3] ss:$0 sm:$0xff] }
 0x58a   : > { %5013 = vperm.xlu0 %7268, %v7497_v58  }
 0x58b   : > { %v10667_v29 = vpop.permute.xlu2 %4311 }
 0x58c   : > { %15570 = vst [vmem:[#allocation315_spill] sm:$0xff] %v10667_v29  ;;  %v10669_v51 = vpop.permute.xlu0 %4061  ;;  %v10671_v35 = vpop.permute.xlu1 %4063 }
 0x58d   : > { %15571 = vst [vmem:[#allocation316_spill] sm:$0xff] %v10669_v51  ;;  %v7506_v51 = vld [vmem:[%s14915_s1 + $0xe9] ss:$0 sm:$0xff] }
 0x58e   : > { %15572 = vst [vmem:[#allocation317_spill] sm:$0xff] %v10671_v35  ;;  %v7502_v35 = vld [vmem:[%s14915_s1 + $0xe7] ss:$0 sm:$0xff] }
 0x591   : > { %5033 = vperm.xlu2 %7270, %v7498_v31   ;;  %5029 = vperm.xlu1 %7269, %v7499_v44   ;;  %v7503_v31 = vld [vmem:[%s14915_s1 + $0xe6] ss:$0 sm:$0xff] }
 0x592   : > { %5025 = vperm.xlu0 %7268, %v7500_v48  }
 0x593   : > { %v10686_v47 = vpop.permute.xlu2 %4323 }
 0x594   : > { %v10682_v10 = vpop.permute.xlu0 %4067  ;;  %v10684_v58 = vpop.permute.xlu1 %4069  ;;  %15575 = vst [vmem:[#allocation320_spill] sm:$0xff] %v10686_v47 }
 0x595   : > { %15573 = vst [vmem:[#allocation318_spill] sm:$0xff] %v10682_v10  ;;  %v7505_v10 = vld [vmem:[%s14915_s1 + $0xea] ss:$0 sm:$0xff] }
 0x596   : > { %15574 = vst [vmem:[#allocation319_spill] sm:$0xff] %v10684_v58  ;;  %v7504_v58 = vld [vmem:[%s14915_s1 + $0xeb] ss:$0 sm:$0xff] }
 0x599   : > { %5045 = vperm.xlu2 %7270, %v7501_v33   ;;  %5041 = vperm.xlu1 %7269, %v7502_v35  }
 0x59a   : > { %5037 = vperm.xlu0 %7268, %v7503_v31   ;;  %v7507_v31 = vld [vmem:[%s14915_s1 + $0xee] ss:$0 sm:$0xff] }
 0x59b   : > { %v10710_v20 = vpop.permute.xlu2 %4335 }
 0x59c   : > { %v10697_v44 = vpop.permute.xlu0 %4073  ;;  %v10699_v48 = vpop.permute.xlu1 %4075  ;;  %15578 = vst [vmem:[#allocation323_spill] sm:$0xff] %v10710_v20 }
 0x59d   : > { %15576 = vst [vmem:[#allocation321_spill] sm:$0xff] %v10697_v44  ;;  %v7509_v44 = vld [vmem:[%s14915_s1 + $0xec] ss:$0 sm:$0xff] }
 0x59e   : > { %15577 = vst [vmem:[#allocation322_spill] sm:$0xff] %v10699_v48  ;;  %v7508_v48 = vld [vmem:[%s14915_s1 + $0xed] ss:$0 sm:$0xff] }
 0x5a1   : > { %5057 = vperm.xlu2 %7270, %v7504_v58   ;;  %5053 = vperm.xlu1 %7269, %v7505_v10   ;;  %v7510_v58 = vld [vmem:[%s14915_s1 + $0xf1] ss:$0 sm:$0xff] }
 0x5a2   : > { %5049 = vperm.xlu0 %7268, %v7506_v51  }
 0x5a3   : > { %v10725_v20 = vpop.permute.xlu2 %4347 }
 0x5a4   : > { %v10712_v33 = vpop.permute.xlu0 %4079  ;;  %v10714_v35 = vpop.permute.xlu1 %4307  ;;  %15581 = vst [vmem:[#allocation326_spill] sm:$0xff] %v10725_v20 }
 0x5a5   : > { %15579 = vst [vmem:[#allocation324_spill] sm:$0xff] %v10712_v33  ;;  %v7511_v33 = vld [vmem:[%s14915_s1 + $0xf0] ss:$0 sm:$0xff] }
 0x5a6   : > { %15580 = vst [vmem:[#allocation325_spill] sm:$0xff] %v10714_v35  ;;  %v7512_v35 = vld [vmem:[%s14915_s1 + $0xef] ss:$0 sm:$0xff] }
 0x5a9   : > { %5069 = vperm.xlu2 %7270, %v7507_v31   ;;  %5065 = vperm.xlu1 %7269, %v7508_v48  }
 0x5aa   : > { %5061 = vperm.xlu0 %7268, %v7509_v44  }
 0x5ab   : > { %v10740_v44 = vpop.permute.xlu2 %4359 }
 0x5ac   : > { %v10727_v51 = vpop.permute.xlu0 %4315  ;;  %v10729_v10 = vpop.permute.xlu1 %4319  ;;  %15584 = vst [vmem:[#allocation329_spill] sm:$0xff] %v10740_v44  ;;  %v7517_v44 = vld [vmem:[%s14915_s1 + $0xf6] ss:$0 sm:$0xff] }
 0x5ad   : > { %15582 = vst [vmem:[#allocation327_spill] sm:$0xff] %v10727_v51  ;;  %v7514_v51 = vld [vmem:[%s14915_s1 + $0xf3] ss:$0 sm:$0xff] }
 0x5ae   : > { %15583 = vst [vmem:[#allocation328_spill] sm:$0xff] %v10729_v10  ;;  %v7513_v10 = vld [vmem:[%s14915_s1 + $0xf4] ss:$0 sm:$0xff] }
 0x5b1   : > { %5081 = vperm.xlu2 %7270, %v7510_v58   ;;  %5077 = vperm.xlu1 %7269, %v7511_v33   ;;  %v7515_v58 = vld [vmem:[%s14915_s1 + $0xf2] ss:$0 sm:$0xff] }
 0x5b2   : > { %5073 = vperm.xlu0 %7268, %v7512_v35  }
 0x5b4   : > { %v10742_v48 = vpop.permute.xlu0 %4327  ;;  %v10744_v31 = vpop.permute.xlu1 %4331 }
 0x5b5   : > { %15585 = vst [vmem:[#allocation330_spill] sm:$0xff] %v10742_v48  ;;  %v7516_v48 = vld [vmem:[%s14915_s1 + $0xf7] ss:$0 sm:$0xff] }
 0x5b6   : > { %15586 = vst [vmem:[#allocation331_spill] sm:$0xff] %v10744_v31  ;;  %v10759_v31 = vpop.permute.xlu2 %4371 }
 0x5b7   : > { %15589 = vst [vmem:[#allocation334_spill] sm:$0xff] %v10759_v31  ;;  %v7521_v31 = vld [vmem:[%s14915_s1 + $0xf8] ss:$0 sm:$0xff] }
 0x5b9   : > { %5093 = vperm.xlu2 %7270, %v7513_v10   ;;  %5089 = vperm.xlu1 %7269, %v7514_v51   ;;  %v7518_v10 = vld [vmem:[%s14915_s1 + $0xf5] ss:$0 sm:$0xff] }
 0x5ba   : > { %5085 = vperm.xlu0 %7268, %v7515_v58  }
 0x5bc   : > { %v10755_v33 = vpop.permute.xlu0 %4339  ;;  %v10757_v35 = vpop.permute.xlu1 %4343 }
 0x5bd   : > { %15587 = vst [vmem:[#allocation332_spill] sm:$0xff] %v10755_v33  ;;  %v7520_v33 = vld [vmem:[%s14915_s1 + $0xf9] ss:$0 sm:$0xff] }
 0x5be   : > { %15588 = vst [vmem:[#allocation333_spill] sm:$0xff] %v10757_v35  ;;  %v7519_v35 = vld [vmem:[%s14915_s1 + $0xfa] ss:$0 sm:$0xff]  ;;  %v10783_v20 = vpop.permute.xlu2 %4383 }
 0x5bf   : > { %15592 = vst [vmem:[#allocation337_spill] sm:$0xff] %v10783_v20 }
 0x5c1   : > { %5105 = vperm.xlu2 %7270, %v7516_v48   ;;  %5101 = vperm.xlu1 %7269, %v7517_v44  }
 0x5c2   : > { %5097 = vperm.xlu0 %7268, %v7518_v10   ;;  %v7522_v10 = vld [vmem:[%s14915_s1 + $0xfd] ss:$0 sm:$0xff] }
 0x5c4   : > { %v10770_v51 = vpop.permute.xlu0 %4351  ;;  %v10772_v58 = vpop.permute.xlu1 %4355 }
 0x5c5   : > { %15590 = vst [vmem:[#allocation335_spill] sm:$0xff] %v10770_v51  ;;  %v7524_v51 = vld [vmem:[%s14915_s1 + $0xfb] ss:$0 sm:$0xff] }
 0x5c6   : > { %15591 = vst [vmem:[#allocation336_spill] sm:$0xff] %v10772_v58  ;;  %v7523_v58 = vld [vmem:[%s14915_s1 + $0xfc] ss:$0 sm:$0xff]  ;;  %v10798_v20 = vpop.permute.xlu2 %4395 }
 0x5c7   : > { %15595 = vst [vmem:[#allocation340_spill] sm:$0xff] %v10798_v20 }
 0x5c9   : > { %5117 = vperm.xlu2 %7270, %v7519_v35   ;;  %5113 = vperm.xlu1 %7269, %v7520_v33   ;;  %v7525_v35 = vld [vmem:[%s14915_s1 + $0xff] ss:$0 sm:$0xff] }
 0x5ca   : > { %5109 = vperm.xlu0 %7268, %v7521_v31  }
 0x5cc   : > { %v10785_v44 = vpop.permute.xlu0 %4363  ;;  %v10787_v48 = vpop.permute.xlu1 %4367 }
 0x5cd   : > { %15593 = vst [vmem:[#allocation338_spill] sm:$0xff] %v10785_v44 }
 0x5ce   : > { %15594 = vst [vmem:[#allocation339_spill] sm:$0xff] %v10787_v48  ;;  %v7526_v48 = vld [vmem:[%s14915_s1 + $0xfe] ss:$0 sm:$0xff]  ;;  %v10810_v44 = vpop.permute.xlu2 %4407 }
 0x5cf   : > { %15598 = vst [vmem:[#allocation343_spill] sm:$0xff] %v10810_v44 }
 0x5d1   : > { %5129 = vperm.xlu2 %7270, %v7522_v10   ;;  %5125 = vperm.xlu1 %7269, %v7523_v58  }
 0x5d2   : > { %5121 = vperm.xlu0 %7268, %v7524_v51  }
 0x5d4   : > { %v10800_v31 = vpop.permute.xlu0 %4375  ;;  %v10802_v33 = vpop.permute.xlu1 %4379 }
 0x5d5   : > { %15596 = vst [vmem:[#allocation341_spill] sm:$0xff] %v10800_v31 }
 0x5d6   : > { %15597 = vst [vmem:[#allocation342_spill] sm:$0xff] %v10802_v33  ;;  %v10820_v31 = vpop.permute.xlu2 %4419 }
 0x5d7   : > { %15603 = vst [vmem:[#allocation348_spill] sm:$0xff] %v10820_v31 }
 0x5d9   : > { %5137 = vperm.xlu1 %7269, %v7525_v35  }
 0x5da   : > { %5133 = vperm.xlu0 %7268, %v7526_v48  }
 0x5dc   : > { %v10812_v58 = vpop.permute.xlu0 %4387  ;;  %v10814_v51 = vpop.permute.xlu1 %4391 }
 0x5dd   : > { %15599 = vst [vmem:[#allocation344_spill] sm:$0xff] %v10812_v58 }
 0x5de   : > { %15600 = vst [vmem:[#allocation345_spill] sm:$0xff] %v10814_v51  ;;  %v10826_v48 = vpop.permute.xlu2 %4431 }
 0x5df   : > { %15606 = vst [vmem:[#allocation351_spill] sm:$0xff] %v10826_v48 }
 0x5e4   : > { %v10816_v10 = vpop.permute.xlu0 %4399  ;;  %v10818_v33 = vpop.permute.xlu1 %4403 }
 0x5e5   : > { %15601 = vst [vmem:[#allocation346_spill] sm:$0xff] %v10816_v10 }
 0x5e6   : > { %15602 = vst [vmem:[#allocation347_spill] sm:$0xff] %v10818_v33  ;;  %v5022_v51 = vpop.permute.xlu2 %5021 }
 0x5e7   : > { %v5146_v12 = vmul.f32 %v10850_v4, %v5022_v51 }
 0x5ec   : > { %v10822_v45 = vpop.permute.xlu0 %4411  ;;  %v10824_v35 = vpop.permute.xlu1 %4415 }
 0x5ed   : > { %15604 = vst [vmem:[#allocation349_spill] sm:$0xff] %v10822_v45 }
 0x5ee   : > { %15605 = vst [vmem:[#allocation350_spill] sm:$0xff] %v10824_v35  ;;  %v7662_v35 = vld [vmem:[%s8223_s20 + $0x10] sm:$0x3] }
 0x5f4   : > { %v10828_v53 = vpop.permute.xlu0 %4423  ;;  %v10830_v58 = vpop.permute.xlu1 %4427 }
 0x5f5   : > { %15607 = vst [vmem:[#allocation352_spill] sm:$0xff] %v10828_v53 }
 0x5f6   : > { %15608 = vst [vmem:[#allocation353_spill] sm:$0xff] %v10830_v58  ;;  %v10846_v58 = vld [vmem:[%s8223_s20 + $0x20] sm:$0xff] }
 0x5fc   : > { %v5014_v27 = vpop.permute.xlu0 %5013  ;;  %v5018_v10 = vpop.permute.xlu1 %5017 }
 0x5fd   : > { %v5140_v31 = vmul.f32 %v10833_v40, %v5014_v27  ;;  %v5141_v45 = vmul.f32 %v10837_v17, %v5014_v27  ;;  %v5142_v48 = vmul.f32 %v7662_v35, %v5014_v27  ;;  %v5143_v53 = vmul.f32 %v10842_v11, %v5018_v10 }
 0x5fe   : > { %v5144_v44 = vmul.f32 %v10846_v58, %v5018_v10  ;;  %v5147_v27 = vmul.f32 %v10854_v60, %v5022_v51  ;;  %v5145_v15 = vmul.f32 %v7667_v49, %v5018_v10 }
 0x5ff   : > { %v5332_v54 = vrot.slane %v5140_v31, 2  ;;  %v5333_v2 = vrot.slane %v5141_v45, 2  ;;  %v5335_v18 = vrot.slane %v5142_v48, 2  ;;  %v5337_v35 = vrot.slane %v5143_v53, 2  ;;  %v7668_v45 = vld [vmem:[%s8223_s20 + $0x40] sm:$0x3] }
 0x600   : > { %v5338_v47 = vrot.slane %v5144_v44, 2  ;;  %v5148_v48 = vmul.f32 %v7668_v45, %v5022_v51  ;;  %v5342_v53 = vrot.slane %v5146_v12, 2  ;;  %v5343_v49 = vrot.slane %v5147_v27, 2  ;;  %v10867_v45 = vld [vmem:[%s8223_s20 + $0x48] sm:$0xff]  ;;  %v10877_v27 = vld [vmem:[%s8223_s20 + $0x60] sm:$0xff] }
 0x601   : > { %v5336_v34 = vsel %vm4626_vm1, %v5333_v2, %v5335_v18  ;;  %v5334_v31 = vsel %vm4626_vm1, %v5332_v54, %v5333_v2  ;;  %v5034_v18 = vpop.permute.xlu2 %5033  ;;  %v5340_v44 = vrot.slane %v5145_v15, 2 }
 0x602   : > { %5494 = vrot.lane.b32.xlu0 %v5336_v34, %s7943_s21  ;;  %5492 = vrot.lane.b32.xlu2 %v5334_v31, %s7943_s21  ;;  %v5339_v1 = vsel %vm4626_vm1, %v5337_v35, %v5338_v47  ;;  %v5345_v10 = vrot.slane %v5148_v48, 2  ;;  %v5344_v51 = vsel %vm4626_vm1, %v5342_v53, %v5343_v49  ;;  %v10871_v31 = vld [vmem:[%s8223_s20 + $0x50] sm:$0xff]  ;;  %v10881_v48 = vld [vmem:[%s8223_s20 + $0x68] sm:$0xff]  ;;  %v5155_v14 = vmul.f32 %v10889_v59, %v5034_v18 }
 0x603   : > { %5496 = vrot.lane.b32.xlu1 %v5339_v1, %s7943_s21  ;;  %v7671_v1 = vld [vmem:[%s8223_s20 + $0x58] sm:$0x3]  ;;  %v5341_v12 = vsel %vm4626_vm1, %v5338_v47, %v5340_v44 }
 0x604   : > { %v5026_v2 = vpop.permute.xlu0 %5025  ;;  %v5030_v54 = vpop.permute.xlu1 %5029  ;;  %v5346_v33 = vsel %vm4626_vm1, %v5343_v49, %v5345_v10  ;;  %v7677_v10 = vld [vmem:[%s8223_s20 + $0x88] sm:$0x3] }
 0x605   : > { %v5149_v34 = vmul.f32 %v10867_v45, %v5026_v2  ;;  %v5150_v35 = vmul.f32 %v10871_v31, %v5026_v2  ;;  %v5151_v39 = vmul.f32 %v7671_v1, %v5026_v2  ;;  %v5152_v15 = vmul.f32 %v10877_v27, %v5030_v54 }
 0x606   : > { %v5153_v53 = vmul.f32 %v10881_v48, %v5030_v54 }
 0x607   : > { %v5347_v47 = vrot.slane %v5149_v34, 2  ;;  %v5348_v44 = vrot.slane %v5150_v35, 2  ;;  %v5350_v2 = vrot.slane %v5151_v39, 2  ;;  %v5352_v29 = vrot.slane %v5152_v15, 2 }
 0x608   : > { %v5353_v7 = vrot.slane %v5153_v53, 2  ;;  %v5157_v39 = vmul.f32 %v7677_v10, %v5034_v18  ;;  %v5357_v35 = vrot.slane %v5155_v14, 2  ;;  %v7680_v10 = vld [vmem:[%s8223_s20 + $0xa0] sm:$0x3] }
 0x609   : > { %v5046_v1 = vpop.permute.xlu2 %5045  ;;  %v5351_v49 = vsel %vm4626_vm1, %v5348_v44, %v5350_v2 }
 0x60a   : > { %5500 = vrot.lane.b32.xlu0 %v5344_v51, %s7943_s21  ;;  %5498 = vrot.lane.b32.xlu2 %v5341_v12, %s7943_s21  ;;  %v5156_v51 = vmul.f32 %v10893_v55, %v5034_v18  ;;  %v7676_v12 = vld [vmem:[%s8223_s20 + $0x70] sm:$0x3]  ;;  %v5354_v34 = vsel %vm4626_vm1, %v5352_v29, %v5353_v7  ;;  %v5360_v53 = vrot.slane %v5157_v39, 2  ;;  %v5164_v57 = vmul.f32 %v10930_v36, %v5046_v1 }
 0x60b   : > { %5502 = vrot.lane.b32.xlu1 %v5346_v33, %s7943_s21  ;;  %v5154_v30 = vmul.f32 %v7676_v12, %v5030_v54  ;;  %v5349_v33 = vsel %vm4626_vm1, %v5347_v47, %v5348_v44  ;;  %v10908_v12 = vld [vmem:[%s8223_s20 + $0x90] sm:$0xff] }
 0x60c   : > { %v5358_v54 = vrot.slane %v5156_v51, 2  ;;  %v5038_v2 = vpop.permute.xlu0 %5037  ;;  %v5042_v47 = vpop.permute.xlu1 %5041  ;;  %v10918_v51 = vld [vmem:[%s8223_s20 + $0xa8] sm:$0xff] }
 0x60d   : > { %v5355_v15 = vrot.slane %v5154_v30, 2  ;;  %v5160_v14 = vmul.f32 %v7680_v10, %v5038_v2  ;;  %v5161_v39 = vmul.f32 %v10918_v51, %v5042_v47 }
 0x60e   : > { %v5359_v18 = vsel %vm4626_vm1, %v5357_v35, %v5358_v54  ;;  %v5361_v52 = vsel %vm4626_vm1, %v5358_v54, %v5360_v53  ;;  %v7686_v54 = vld [vmem:[%s8223_s20 + $0xd0] sm:$0x3] }
 0x60f   : > { %v5356_v30 = vsel %vm4626_vm1, %v5353_v7, %v5355_v15  ;;  %v5367_v10 = vrot.slane %v5161_v39, 2  ;;  %v5166_v53 = vmul.f32 %v7686_v54, %v5046_v1 }
 0x611   : > { %v10904_v44 = vpop.permute.xlu2 %5057  ;;  %v5375_v39 = vrot.slane %v5166_v53, 2  ;;  %v10963_v53 = vld [vmem:[%s8223_s20 + $0xf8] sm:$0xff] }
 0x612   : > { %5506 = vrot.lane.b32.xlu0 %v5351_v49, %s7943_s21  ;;  %5504 = vrot.lane.b32.xlu2 %v5349_v33, %s7943_s21  ;;  %v5158_v49 = vmul.f32 %v10908_v12, %v5038_v2  ;;  %v10912_v33 = vld [vmem:[%s8223_s20 + $0x98] sm:$0xff]  ;;  %v5173_v9 = vmul.f32 %v10973_v19, %v10904_v44 }
 0x613   : > { %5508 = vrot.lane.b32.xlu1 %v5354_v34, %s7943_s21  ;;  %v5159_v29 = vmul.f32 %v10912_v33, %v5038_v2  ;;  %v10922_v34 = vld [vmem:[%s8223_s20 + $0xb0] sm:$0xff]  ;;  %v5365_v2 = vrot.slane %v5160_v14, 2 }
 0x614   : > { %v5162_v35 = vmul.f32 %v10922_v34, %v5042_v47  ;;  %v5362_v7 = vrot.slane %v5158_v49, 2 }
 0x615   : > { %v5363_v15 = vrot.slane %v5159_v29, 2 }
 0x616   : > { %v5368_v63 = vrot.slane %v5162_v35, 2  ;;  %v5050_v35 = vpop.permute.xlu0 %5049 }
 0x617   : > { %v5366_v50 = vsel %vm4626_vm1, %v5363_v15, %v5365_v2  ;;  %v10953_v2 = vld [vmem:[%s8223_s20 + $0xe0] sm:$0xff] }
 0x618   : > { %v5369_v29 = vsel %vm4626_vm1, %v5367_v10, %v5368_v63  ;;  %v5168_v10 = vmul.f32 %v10953_v2, %v5050_v35 }
 0x619   : > { %v10941_v49 = vpop.permute.xlu2 %5069 }
 0x61a   : > { %5512 = vrot.lane.b32.xlu0 %v5359_v18, %s7943_s21  ;;  %5510 = vrot.lane.b32.xlu2 %v5356_v30, %s7943_s21  ;;  %v5165_v18 = vmul.f32 %v10934_v38, %v5046_v1  ;;  %v5163_v30 = vmul.f32 %v7685_v0, %v5042_v47  ;;  %v5372_v0 = vrot.slane %v5164_v57, 2  ;;  %v5182_v24 = vmul.f32 %v11017_v42, %v10941_v49 }
 0x61b   : > { %5514 = vrot.lane.b32.xlu1 %v5361_v52, %s7943_s21  ;;  %v5364_v52 = vsel %vm4626_vm1, %v5362_v7, %v5363_v15  ;;  %v5054_v7 = vpop.permute.xlu1 %5053  ;;  %v10949_v15 = vld [vmem:[%s8223_s20 + $0xd8] sm:$0xff] }
 0x61c   : > { %v5373_v47 = vrot.slane %v5165_v18, 2  ;;  %v5370_v14 = vrot.slane %v5163_v30, 2  ;;  %v10959_v18 = vld [vmem:[%s8223_s20 + $0xf0] sm:$0xff] }
 0x61d   : > { %v5170_v30 = vmul.f32 %v10959_v18, %v5054_v7 }
 0x61e   : > { %v5374_v1 = vsel %vm4626_vm1, %v5372_v0, %v5373_v47  ;;  %v5371_v57 = vsel %vm4626_vm1, %v5368_v63, %v5370_v14  ;;  %v5376_v0 = vsel %vm4626_vm1, %v5373_v47, %v5375_v39  ;;  %v5378_v14 = vrot.slane %v5168_v10, 2  ;;  %v5062_v39 = vpop.permute.xlu0 %5061 }
 0x61f   : > { %v5382_v43 = vrot.slane %v5170_v30, 2 }
 0x622   : > { %5518 = vrot.lane.b32.xlu0 %v5366_v50, %s7943_s21  ;;  %5516 = vrot.lane.b32.xlu2 %v5364_v52, %s7943_s21  ;;  %v5167_v50 = vmul.f32 %v10949_v15, %v5050_v35  ;;  %v7689_v52 = vld [vmem:[%s8223_s20 + $0xe8] sm:$0x3] }
 0x623   : > { %5520 = vrot.lane.b32.xlu1 %v5369_v29, %s7943_s21  ;;  %v5169_v54 = vmul.f32 %v7689_v52, %v5050_v35  ;;  %v5171_v29 = vmul.f32 %v10963_v53, %v5054_v7  ;;  %v10970_v35 = vpop.permute.xlu2 %5081  ;;  %v5066_v25 = vpop.permute.xlu1 %5065 }
 0x624   : > { %v5377_v63 = vrot.slane %v5167_v50, 2 }
 0x625   : > { %v5380_v52 = vrot.slane %v5169_v54, 2  ;;  %v5383_v13 = vrot.slane %v5171_v29, 2  ;;  %v7695_v54 = vld [vmem:[%s8223_s20 + $0x118] sm:$0x3] }
 0x626   : > { %v5379_v10 = vsel %vm4626_vm1, %v5377_v63, %v5378_v14  ;;  %v5175_v30 = vmul.f32 %v7695_v54, %v10904_v44 }
 0x627   : > { %v5381_v50 = vsel %vm4626_vm1, %v5378_v14, %v5380_v52  ;;  %v5384_v29 = vsel %vm4626_vm1, %v5382_v43, %v5383_v13  ;;  %v10995_v14 = vld [vmem:[%s8223_s20 + $0x120] sm:$0xff]  ;;  %v7698_v43 = vld [vmem:[%s8223_s20 + $0x130] sm:$0x3] }
 0x628   : > { %v5390_v3 = vrot.slane %v5175_v30, 2  ;;  %v5178_v54 = vmul.f32 %v7698_v43, %v5062_v39 }
 0x62a   : > { %5524 = vrot.lane.b32.xlu0 %v5374_v1, %s7943_s21  ;;  %5522 = vrot.lane.b32.xlu2 %v5371_v57, %s7943_s21  ;;  %v10978_v1 = vld [vmem:[%s8223_s20 + $0x110] sm:$0xff]  ;;  %v7694_v57 = vld [vmem:[%s8223_s20 + $0x100] sm:$0x3]  ;;  %v5395_v16 = vrot.slane %v5178_v54, 2 }
 0x62b   : > { %5526 = vrot.lane.b32.xlu1 %v5376_v0, %s7943_s21  ;;  %v5174_v47 = vmul.f32 %v10978_v1, %v10904_v44  ;;  %v5172_v0 = vmul.f32 %v7694_v57, %v5054_v7  ;;  %v5387_v7 = vrot.slane %v5173_v9, 2  ;;  %v10991_v23 = vpop.permute.xlu2 %5093  ;;  %v5176_v44 = vmul.f32 %v10995_v14, %v5062_v39  ;;  %v11005_v9 = vld [vmem:[%s8223_s20 + $0x138] sm:$0xff]  ;;  %v5078_v43 = vpop.permute.xlu1 %5077  ;;  %v7704_v54 = vld [vmem:[%s8223_s20 + $0x160] sm:$0x3] }
 0x62d   : > { %v5388_v57 = vrot.slane %v5174_v47, 2  ;;  %v5385_v52 = vrot.slane %v5172_v0, 2  ;;  %v5179_v47 = vmul.f32 %v11005_v9, %v5066_v25  ;;  %v11009_v0 = vld [vmem:[%s8223_s20 + $0x140] sm:$0xff] }
 0x62e   : > { %v5180_v30 = vmul.f32 %v11009_v0, %v5066_v25 }
 0x62f   : > { %v5389_v63 = vsel %vm4626_vm1, %v5387_v7, %v5388_v57  ;;  %v5074_v7 = vpop.permute.xlu0 %5073  ;;  %v5397_v5 = vrot.slane %v5179_v47, 2  ;;  %v5184_v47 = vmul.f32 %v7704_v54, %v10941_v49  ;;  %v11041_v54 = vld [vmem:[%s8223_s20 + $0x168] sm:$0xff] }
 0x630   : > { %v5398_v41 = vrot.slane %v5180_v30, 2 }
 0x632   : > { %5530 = vrot.lane.b32.xlu0 %v5381_v50, %s7943_s21  ;;  %5528 = vrot.lane.b32.xlu2 %v5379_v10, %s7943_s21  ;;  %v10999_v50 = vld [vmem:[%s8223_s20 + $0x128] sm:$0xff]  ;;  %v5399_v30 = vsel %vm4626_vm1, %v5397_v5, %v5398_v41 }
 0x633   : > { %5532 = vrot.lane.b32.xlu1 %v5384_v29, %s7943_s21  ;;  %v5177_v10 = vmul.f32 %v10999_v50, %v5062_v39  ;;  %v5386_v29 = vsel %vm4626_vm1, %v5383_v13, %v5385_v52  ;;  %v5391_v39 = vsel %vm4626_vm1, %v5388_v57, %v5390_v3  ;;  %v5392_v13 = vrot.slane %v5176_v44, 2  ;;  %v11026_v3 = vpop.permute.xlu2 %5105  ;;  %v7703_v57 = vld [vmem:[%s8223_s20 + $0x148] sm:$0x3] }
 0x635   : > { %v5393_v52 = vrot.slane %v5177_v10, 2 }
 0x637   : > { %v5396_v44 = vsel %vm4626_vm1, %v5393_v52, %v5395_v16  ;;  %v5394_v10 = vsel %vm4626_vm1, %v5392_v13, %v5393_v52  ;;  %v5086_v16 = vpop.permute.xlu0 %5085  ;;  %v11037_v13 = vpop.permute.xlu1 %5089  ;;  %v5405_v52 = vrot.slane %v5184_v47, 2 }
 0x638   : > { %v5198_v26 = vmul.f32 %v11110_v28, %v11037_v13 }
 0x63a   : > { %5536 = vrot.lane.b32.xlu0 %v5389_v63, %s7943_s21  ;;  %5534 = vrot.lane.b32.xlu2 %v5386_v29, %s7943_s21  ;;  %v5183_v63 = vmul.f32 %v11022_v46, %v10941_v49  ;;  %v5181_v29 = vmul.f32 %v7703_v57, %v5066_v25  ;;  %v5402_v25 = vrot.slane %v5182_v24, 2 }
 0x63b   : > { %5538 = vrot.lane.b32.xlu1 %v5391_v39, %s7943_s21 }
 0x63c   : > { %v5403_v39 = vrot.slane %v5183_v63, 2  ;;  %v5400_v57 = vrot.slane %v5181_v29, 2  ;;  %v11050_v63 = vpop.permute.xlu2 %5117  ;;  %v11053_v29 = vld [vmem:[%s8223_s20 + $0x180] sm:$0xff] }
 0x63d   : > { %v5188_v47 = vmul.f32 %v11053_v29, %v5078_v43 }
 0x63e   : > { %v5404_v49 = vsel %vm4626_vm1, %v5402_v25, %v5403_v39  ;;  %v5401_v24 = vsel %vm4626_vm1, %v5398_v41, %v5400_v57  ;;  %v11057_v25 = vld [vmem:[%s8223_s20 + $0x188] sm:$0xff] }
 0x63f   : > { %v5189_v20 = vmul.f32 %v11057_v25, %v5078_v43  ;;  %v5412_v56 = vrot.slane %v5188_v47, 2  ;;  %v11064_v22 = vpop.permute.xlu0 %5097  ;;  %v11066_v61 = vpop.permute.xlu1 %5101 }
 0x641   : > { %v5413_v32 = vrot.slane %v5189_v20, 2 }
 0x642   : > { %5542 = vrot.lane.b32.xlu0 %v5396_v44, %s7943_s21  ;;  %5540 = vrot.lane.b32.xlu2 %v5394_v10, %s7943_s21  ;;  %v5185_v44 = vmul.f32 %v11041_v54, %v5074_v7  ;;  %v11045_v10 = vld [vmem:[%s8223_s20 + $0x170] sm:$0xff] }
 0x643   : > { %5544 = vrot.lane.b32.xlu1 %v5399_v30, %s7943_s21  ;;  %15609 = vst [vmem:[#allocation354_spill] sm:$0xff] %v11045_v10  ;;  %v5186_v5 = vmul.f32 %v11045_v10, %v5074_v7  ;;  %v7707_v30 = vld [vmem:[%s8223_s20 + $0x178] sm:$0x3] }
 0x644   : > { %v5187_v6 = vmul.f32 %v7707_v30, %v5074_v7  ;;  %v5406_v7 = vsel %vm4626_vm1, %v5403_v39, %v5405_v52  ;;  %v5407_v41 = vrot.slane %v5185_v44, 2  ;;  %v7712_v52 = vld [vmem:[%s8223_s20 + $0x190] sm:$0x3] }
 0x645   : > { %v5408_v57 = vrot.slane %v5186_v5, 2  ;;  %v5190_v44 = vmul.f32 %v7712_v52, %v5078_v43  ;;  %v7713_v5 = vld [vmem:[%s8223_s20 + $0x1a8] sm:$0x3] }
 0x646   : > { %v5410_v30 = vrot.slane %v5187_v6, 2  ;;  %v5193_v47 = vmul.f32 %v7713_v5, %v10970_v35  ;;  %v11093_v5 = vld [vmem:[%s8223_s20 + $0x1b0] sm:$0xff] }
 0x647   : > { %v5409_v20 = vsel %vm4626_vm1, %v5407_v41, %v5408_v57  ;;  %v5415_v41 = vrot.slane %v5190_v44, 2  ;;  %v11089_v21 = vpop.permute.xlu0 %5109  ;;  %15610 = vst [vmem:[#allocation355_spill] sm:$0xff] %v11093_v5 }
 0x648   : > { %v5411_v6 = vsel %vm4626_vm1, %v5408_v57, %v5410_v30  ;;  %v11087_v30 = vpop.permute.xlu2 %5129  ;;  %v5420_v57 = vrot.slane %v5193_v47, 2  ;;  %v11105_v47 = vld [vmem:[%s8223_s20 + $0x1c8] sm:$0xff] }
 0x649   : > { %v5416_v44 = vsel %vm4626_vm1, %v5413_v32, %v5415_v41  ;;  %15612 = vst [vmem:[#allocation357_spill] sm:$0xff] %v11105_v47 }
 0x64a   : > { %5548 = vrot.lane.b32.xlu0 %v5404_v49, %s7943_s21  ;;  %5546 = vrot.lane.b32.xlu2 %v5401_v24, %s7943_s21  ;;  %v5191_v49 = vmul.f32 %v11069_v8, %v10970_v35  ;;  %v11074_v24 = vld [vmem:[%s8223_s20 + $0x1a0] sm:$0xff] }
 0x64b   : > { %5550 = vrot.lane.b32.xlu1 %v5406_v7, %s7943_s21  ;;  %v5192_v39 = vmul.f32 %v11074_v24, %v10970_v35  ;;  %v5414_v7 = vsel %vm4626_vm1, %v5412_v56, %v5413_v32 }
 0x64c   : > { %v5417_v43 = vrot.slane %v5191_v49, 2 }
 0x64d   : > { %v5418_v52 = vrot.slane %v5192_v39, 2  ;;  %v11101_v39 = vpop.permute.xlu1 %5113 }
 0x64f   : > { %v5419_v35 = vsel %vm4626_vm1, %v5417_v43, %v5418_v52  ;;  %v5197_v43 = vmul.f32 %v11105_v47, %v11037_v13 }
 0x651   : > { %v5427_v62 = vrot.slane %v5197_v43, 2 }
 0x652   : > { %5554 = vrot.lane.b32.xlu0 %v5411_v6, %s7943_s21  ;;  %5552 = vrot.lane.b32.xlu2 %v5409_v20, %s7943_s21  ;;  %v5194_v6 = vmul.f32 %v11093_v5, %v5086_v16  ;;  %v11097_v20 = vld [vmem:[%s8223_s20 + $0x1b8] sm:$0xff]  ;;  %v11121_v5 = vld [vmem:[%s8223_s20 + $0x1e0] sm:$0xff] }
 0x653   : > { %5556 = vrot.lane.b32.xlu1 %v5414_v7, %s7943_s21  ;;  %15611 = vst [vmem:[#allocation356_spill] sm:$0xff] %v11097_v20  ;;  %v5195_v56 = vmul.f32 %v11097_v20, %v5086_v16  ;;  %v7716_v7 = vld [vmem:[%s8223_s20 + $0x1c0] sm:$0x3]  ;;  %v5428_v20 = vrot.slane %v5198_v26, 2  ;;  %v5200_v28 = vmul.f32 %v11121_v5, %v10991_v23 }
 0x654   : > { %v5196_v49 = vmul.f32 %v7716_v7, %v5086_v16  ;;  %v5421_v16 = vsel %vm4626_vm1, %v5418_v52, %v5420_v57  ;;  %v5422_v41 = vrot.slane %v5194_v6, 2  ;;  %v7721_v57 = vld [vmem:[%s8223_s20 + $0x1d8] sm:$0x3] }
 0x655   : > { %v5423_v7 = vrot.slane %v5195_v56, 2  ;;  %v7722_v56 = vld [vmem:[%s8223_s20 + $0x1f0] sm:$0x3]  ;;  %v5429_v43 = vsel %vm4626_vm1, %v5427_v62, %v5428_v20  ;;  %v11153_v62 = vld [vmem:[%s8223_s20 + $0x200] sm:$0xff] }
 0x656   : > { %v5425_v37 = vrot.slane %v5196_v49, 2  ;;  %v5202_v26 = vmul.f32 %v7722_v56, %v10991_v23  ;;  %v11136_v49 = vpop.permute.xlu0 %5121  ;;  %15617 = vst [vmem:[#allocation362_spill] sm:$0xff] %v11153_v62 }
 0x657   : > { %v5424_v6 = vsel %vm4626_vm1, %v5422_v41, %v5423_v7 }
 0x65a   : > { %5560 = vrot.lane.b32.xlu0 %v5419_v35, %s7943_s21  ;;  %5558 = vrot.lane.b32.xlu2 %v5416_v44, %s7943_s21  ;;  %v11126_v35 = vld [vmem:[%s8223_s20 + $0x1e8] sm:$0xff]  ;;  %v5199_v44 = vmul.f32 %v7721_v57, %v11037_v13  ;;  %v11141_v13 = vpop.permute.xlu1 %5125  ;;  %v5435_v57 = vrot.slane %v5202_v26, 2  ;;  %v11166_v26 = vld [vmem:[%s8223_s20 + $0x218] sm:$0xff] }
 0x65b   : > { %5562 = vrot.lane.b32.xlu1 %v5421_v16, %s7943_s21  ;;  %v5201_v52 = vmul.f32 %v11126_v35, %v10991_v23  ;;  %v5426_v16 = vsel %vm4626_vm1, %v5423_v7, %v5425_v37  ;;  %v5432_v37 = vrot.slane %v5200_v28, 2  ;;  %15619 = vst [vmem:[#allocation364_spill] sm:$0xff] %v11166_v26 }
 0x65c   : > { %v11118_v32 = vpop.permute.xlu2 %5492  ;;  %v5430_v23 = vrot.slane %v5199_v44, 2 }
 0x65d   : > { %15614 = vst [vmem:[#allocation359_spill] sm:$0xff] %v11118_v32  ;;  %v5433_v41 = vrot.slane %v5201_v52, 2  ;;  %v11148_v32 = vld [vmem:[%s8223_s20 + $0x1f8] sm:$0xff] }
 0x65e   : > { %15616 = vst [vmem:[#allocation361_spill] sm:$0xff] %v11148_v32  ;;  %v5431_v52 = vsel %vm4626_vm1, %v5428_v20, %v5430_v23  ;;  %v11174_v20 = vpop.permute.xlu0 %5133 }
 0x65f   : > { %v5434_v56 = vsel %vm4626_vm1, %v5432_v37, %v5433_v41  ;;  %v5207_v37 = vmul.f32 %v11166_v26, %v11066_v61 }
 0x661   : > { %v5443_v47 = vrot.slane %v5207_v37, 2 }
 0x662   : > { %5566 = vrot.lane.b32.xlu0 %v5426_v16, %s7943_s21  ;;  %5564 = vrot.lane.b32.xlu2 %v5424_v6, %s7943_s21  ;;  %v5203_v16 = vmul.f32 %v11148_v32, %v11064_v22  ;;  %v5204_v6 = vmul.f32 %v11153_v62, %v11064_v22 }
 0x663   : > { %5568 = vrot.lane.b32.xlu1 %v5429_v43, %s7943_s21  ;;  %v7725_v43 = vld [vmem:[%s8223_s20 + $0x208] sm:$0x3] }
 0x664   : > { %v11144_v7 = vpop.permute.xlu2 %5498  ;;  %v5205_v28 = vmul.f32 %v7725_v43, %v11064_v22  ;;  %v5436_v22 = vsel %vm4626_vm1, %v5433_v41, %v5435_v57  ;;  %v5437_v43 = vrot.slane %v5203_v16, 2  ;;  %v5438_v62 = vrot.slane %v5204_v6, 2  ;;  %v11186_v41 = vld [vmem:[%s8223_s20 + $0x230] sm:$0xff] }
 0x665   : > { %15615 = vst [vmem:[#allocation360_spill] sm:$0xff] %v11144_v7  ;;  %v11161_v7 = vld [vmem:[%s8223_s20 + $0x210] sm:$0xff]  ;;  %v5210_v57 = vmul.f32 %v11186_v41, %v11026_v3 }
 0x666   : > { %15618 = vst [vmem:[#allocation363_spill] sm:$0xff] %v11161_v7  ;;  %v5206_v44 = vmul.f32 %v11161_v7, %v11066_v61  ;;  %v5440_v32 = vrot.slane %v5205_v28, 2  ;;  %v11178_v7 = vpop.permute.xlu1 %5137  ;;  %v5439_v6 = vsel %vm4626_vm1, %v5437_v43, %v5438_v62  ;;  %v7731_v28 = vld [vmem:[%s8223_s20 + $0x238] sm:$0x3] }
 0x668   : > { %v5442_v26 = vrot.slane %v5206_v44, 2  ;;  %v5441_v16 = vsel %vm4626_vm1, %v5438_v62, %v5440_v32  ;;  %v5211_v44 = vmul.f32 %v7731_v28, %v11026_v3  ;;  %v11208_v28 = vld [vmem:[%s8223_s20 + $0x240] sm:$0xff] }
 0x669   : > { %15624 = vst [vmem:[#allocation369_spill] sm:$0xff] %v11208_v28 }
 0x66a   : > { %5572 = vrot.lane.b32.xlu0 %v5434_v56, %s7943_s21  ;;  %5570 = vrot.lane.b32.xlu2 %v5431_v52, %s7943_s21  ;;  %v11181_v56 = vld [vmem:[%s8223_s20 + $0x228] sm:$0xff]  ;;  %v5444_v37 = vsel %vm4626_vm1, %v5442_v26, %v5443_v47  ;;  %v5212_v26 = vmul.f32 %v11208_v28, %v11089_v21 }
 0x66b   : > { %5574 = vrot.lane.b32.xlu1 %v5436_v22, %s7943_s21  ;;  %v5209_v52 = vmul.f32 %v11181_v56, %v11026_v3  ;;  %v7730_v22 = vld [vmem:[%s8223_s20 + $0x220] sm:$0x3]  ;;  %v5450_v3 = vrot.slane %v5211_v44, 2 }
 0x66c   : > { %v11176_v23 = vpop.permute.xlu2 %5504 }
 0x66d   : > { %15620 = vst [vmem:[#allocation365_spill] sm:$0xff] %v11176_v23  ;;  %v5208_v23 = vmul.f32 %v7730_v22, %v11066_v61  ;;  %v5447_v61 = vrot.slane %v5209_v52, 2  ;;  %v5448_v22 = vrot.slane %v5210_v57, 2  ;;  %v7734_v57 = vld [vmem:[%s8223_s20 + $0x250] sm:$0x3] }
 0x66f   : > { %v5445_v43 = vrot.slane %v5208_v23, 2 }
 0x671   : > { %v5446_v23 = vsel %vm4626_vm1, %v5443_v47, %v5445_v43 }
 0x672   : > { %5578 = vrot.lane.b32.xlu0 %v5441_v16, %s7943_s21  ;;  %5576 = vrot.lane.b32.xlu2 %v5439_v6, %s7943_s21  ;;  %v5449_v16 = vsel %vm4626_vm1, %v5447_v61, %v5448_v22  ;;  %v11213_v6 = vld [vmem:[%s8223_s20 + $0x248] sm:$0xff]  ;;  %v11226_v61 = vld [vmem:[%s8223_s20 + $0x260] sm:$0xff] }
 0x673   : > { %5580 = vrot.lane.b32.xlu1 %v5444_v37, %s7943_s21  ;;  %15625 = vst [vmem:[#allocation370_spill] sm:$0xff] %v11213_v6  ;;  %v5213_v52 = vmul.f32 %v11213_v6, %v11089_v21  ;;  %v5214_v37 = vmul.f32 %v7734_v57, %v11089_v21  ;;  %v5451_v21 = vsel %vm4626_vm1, %v5448_v22, %v5450_v3  ;;  %v5452_v57 = vrot.slane %v5212_v26, 2  ;;  %v11246_v22 = vld [vmem:[%s8223_s20 + $0x278] sm:$0xff] }
 0x674   : > { %v11200_v32 = vpop.permute.xlu0 %5494  ;;  %v11202_v62 = vpop.permute.xlu2 %5510  ;;  %15627 = vst [vmem:[#allocation372_spill] sm:$0xff] %v11226_v61  ;;  %v5219_v3 = vmul.f32 %v11246_v22, %v11050_v63 }
 0x675   : > { %15621 = vst [vmem:[#allocation366_spill] sm:$0xff] %v11200_v32  ;;  %v11204_v10 = vpop.permute.xlu1 %5496  ;;  %v5453_v32 = vrot.slane %v5213_v52, 2  ;;  %v5455_v6 = vrot.slane %v5214_v37, 2  ;;  %v7740_v37 = vld [vmem:[%s8223_s20 + $0x280] sm:$0x3] }
 0x676   : > { %15622 = vst [vmem:[#allocation367_spill] sm:$0xff] %v11202_v62  ;;  %v11221_v62 = vld [vmem:[%s8223_s20 + $0x258] sm:$0xff] }
 0x677   : > { %15623 = vst [vmem:[#allocation368_spill] sm:$0xff] %v11204_v10  ;;  %v5215_v44 = vmul.f32 %v11221_v62, %v11101_v39  ;;  %v5216_v10 = vmul.f32 %v11226_v61, %v11101_v39  ;;  %v5456_v26 = vsel %vm4626_vm1, %v5453_v32, %v5455_v6  ;;  %v5454_v52 = vsel %vm4626_vm1, %v5452_v57, %v5453_v32 }
 0x678   : > { %15626 = vst [vmem:[#allocation371_spill] sm:$0xff] %v11221_v62 }
 0x679   : > { %v5457_v61 = vrot.slane %v5215_v44, 2  ;;  %v5458_v62 = vrot.slane %v5216_v10, 2  ;;  %v5220_v10 = vmul.f32 %v7740_v37, %v11050_v63  ;;  %v11268_v37 = vld [vmem:[%s8223_s20 + $0x288] sm:$0xff] }
 0x67a   : > { %5584 = vrot.lane.b32.xlu0 %v5449_v16, %s7943_s21  ;;  %5582 = vrot.lane.b32.xlu2 %v5446_v23, %s7943_s21  ;;  %v11241_v16 = vld [vmem:[%s8223_s20 + $0x270] sm:$0xff]  ;;  %15634 = vst [vmem:[#allocation379_spill] sm:$0xff] %v11268_v37 }
 0x67b   : > { %5586 = vrot.lane.b32.xlu1 %v5451_v21, %s7943_s21  ;;  %v5218_v23 = vmul.f32 %v11241_v16, %v11050_v63  ;;  %v7739_v21 = vld [vmem:[%s8223_s20 + $0x268] sm:$0x3]  ;;  %v5459_v44 = vsel %vm4626_vm1, %v5457_v61, %v5458_v62  ;;  %v5465_v63 = vrot.slane %v5220_v10, 2  ;;  %v5221_v61 = vmul.f32 %v11268_v37, %v11136_v49 }
 0x67c   : > { %v11234_v47 = vpop.permute.xlu0 %5500  ;;  %v11236_v43 = vpop.permute.xlu2 %5516 }
 0x67d   : > { %15628 = vst [vmem:[#allocation373_spill] sm:$0xff] %v11234_v47  ;;  %v11238_v28 = vpop.permute.xlu1 %5502 }
 0x67e   : > { %15629 = vst [vmem:[#allocation374_spill] sm:$0xff] %v11236_v43  ;;  %v5217_v43 = vmul.f32 %v7739_v21, %v11101_v39  ;;  %v5462_v39 = vrot.slane %v5218_v23, 2  ;;  %v5463_v21 = vrot.slane %v5219_v3, 2  ;;  %v7743_v3 = vld [vmem:[%s8223_s20 + $0x298] sm:$0x3] }
 0x67f   : > { %15630 = vst [vmem:[#allocation375_spill] sm:$0xff] %v11238_v28 }
 0x680   : > { %v5460_v57 = vrot.slane %v5217_v43, 2 }
 0x682   : > { %5590 = vrot.lane.b32.xlu0 %v5456_v26, %s7943_s21  ;;  %5588 = vrot.lane.b32.xlu2 %v5454_v52, %s7943_s21  ;;  %v5464_v26 = vsel %vm4626_vm1, %v5462_v39, %v5463_v21  ;;  %v11273_v52 = vld [vmem:[%s8223_s20 + $0x290] sm:$0xff]  ;;  %v5461_v43 = vsel %vm4626_vm1, %v5458_v62, %v5460_v57  ;;  %v11286_v39 = vld [vmem:[%s8223_s20 + $0x2a8] sm:$0xff] }
 0x683   : > { %5592 = vrot.lane.b32.xlu1 %v5459_v44, %s7943_s21  ;;  %15635 = vst [vmem:[#allocation380_spill] sm:$0xff] %v11273_v52  ;;  %v5222_v23 = vmul.f32 %v11273_v52, %v11136_v49  ;;  %v5223_v44 = vmul.f32 %v7743_v3, %v11136_v49  ;;  %v5466_v49 = vsel %vm4626_vm1, %v5463_v21, %v5465_v63  ;;  %v5467_v3 = vrot.slane %v5221_v61, 2  ;;  %v11306_v21 = vld [vmem:[%s8223_s20 + $0x2c0] sm:$0xff] }
 0x684   : > { %v11260_v6 = vpop.permute.xlu0 %5506  ;;  %v11262_v32 = vpop.permute.xlu2 %5522  ;;  %15636 = vst [vmem:[#allocation381_spill] sm:$0xff] %v11286_v39  ;;  %v5228_v63 = vmul.f32 %v11306_v21, %v11087_v30 }
 0x685   : > { %15631 = vst [vmem:[#allocation376_spill] sm:$0xff] %v11260_v6  ;;  %v11264_v28 = vpop.permute.xlu1 %5508  ;;  %v5468_v6 = vrot.slane %v5222_v23, 2  ;;  %v5470_v47 = vrot.slane %v5223_v44, 2  ;;  %v7749_v44 = vld [vmem:[%s8223_s20 + $0x2c8] sm:$0x3] }
 0x686   : > { %15632 = vst [vmem:[#allocation377_spill] sm:$0xff] %v11262_v32  ;;  %v11281_v32 = vld [vmem:[%s8223_s20 + $0x2a0] sm:$0xff] }
 0x687   : > { %15633 = vst [vmem:[#allocation378_spill] sm:$0xff] %v11264_v28  ;;  %v5224_v10 = vmul.f32 %v11281_v32, %v11141_v13  ;;  %v5225_v28 = vmul.f32 %v11286_v39, %v11141_v13  ;;  %v5471_v61 = vsel %vm4626_vm1, %v5468_v6, %v5470_v47  ;;  %v5469_v23 = vsel %vm4626_vm1, %v5467_v3, %v5468_v6 }
 0x689   : > { %v5472_v37 = vrot.slane %v5224_v10, 2  ;;  %v5473_v39 = vrot.slane %v5225_v28, 2  ;;  %v5229_v28 = vmul.f32 %v7749_v44, %v11087_v30  ;;  %v11328_v44 = vld [vmem:[%s8223_s20 + $0x2d0] sm:$0xff] }
 0x68a   : > { %5596 = vrot.lane.b32.xlu0 %v5464_v26, %s7943_s21  ;;  %5594 = vrot.lane.b32.xlu2 %v5461_v43, %s7943_s21  ;;  %v11301_v26 = vld [vmem:[%s8223_s20 + $0x2b8] sm:$0xff]  ;;  %15643 = vst [vmem:[#allocation388_spill] sm:$0xff] %v11328_v44 }
 0x68b   : > { %5598 = vrot.lane.b32.xlu1 %v5466_v49, %s7943_s21  ;;  %v5227_v43 = vmul.f32 %v11301_v26, %v11087_v30  ;;  %v7748_v49 = vld [vmem:[%s8223_s20 + $0x2b0] sm:$0x3]  ;;  %v5474_v10 = vsel %vm4626_vm1, %v5472_v37, %v5473_v39  ;;  %v5480_v30 = vrot.slane %v5229_v28, 2  ;;  %v5230_v37 = vmul.f32 %v11328_v44, %v11174_v20 }
 0x68c   : > { %v11294_v62 = vpop.permute.xlu0 %5512  ;;  %v11296_v57 = vpop.permute.xlu2 %5528 }
 0x68d   : > { %15637 = vst [vmem:[#allocation382_spill] sm:$0xff] %v11294_v62  ;;  %v11298_v52 = vpop.permute.xlu1 %5514 }
 0x68e   : > { %15638 = vst [vmem:[#allocation383_spill] sm:$0xff] %v11296_v57  ;;  %v5226_v57 = vmul.f32 %v7748_v49, %v11141_v13  ;;  %v5477_v13 = vrot.slane %v5227_v43, 2  ;;  %v5478_v49 = vrot.slane %v5228_v63, 2  ;;  %v7752_v63 = vld [vmem:[%s8223_s20 + $0x2e0] sm:$0x3] }
 0x68f   : > { %15639 = vst [vmem:[#allocation384_spill] sm:$0xff] %v11298_v52 }
 0x690   : > { %v5475_v3 = vrot.slane %v5226_v57, 2 }
 0x692   : > { %5602 = vrot.lane.b32.xlu0 %v5471_v61, %s7943_s21  ;;  %5600 = vrot.lane.b32.xlu2 %v5469_v23, %s7943_s21  ;;  %v5479_v61 = vsel %vm4626_vm1, %v5477_v13, %v5478_v49  ;;  %v11333_v23 = vld [vmem:[%s8223_s20 + $0x2d8] sm:$0xff]  ;;  %v5476_v57 = vsel %vm4626_vm1, %v5473_v39, %v5475_v3  ;;  %v11346_v13 = vld [vmem:[%s8223_s20 + $0x2f0] sm:$0xff]  ;;  %v5482_v3 = vrot.slane %v5230_v37, 2 }
 0x693   : > { %5604 = vrot.lane.b32.xlu1 %v5474_v10, %s7943_s21  ;;  %15644 = vst [vmem:[#allocation389_spill] sm:$0xff] %v11333_v23  ;;  %v5231_v43 = vmul.f32 %v11333_v23, %v11174_v20  ;;  %v5232_v10 = vmul.f32 %v7752_v63, %v11174_v20 }
 0x694   : > { %v11320_v47 = vpop.permute.xlu0 %5518  ;;  %v11322_v6 = vpop.permute.xlu2 %5534  ;;  %15646 = vst [vmem:[#allocation391_spill] sm:$0xff] %v11346_v13 }
 0x695   : > { %15640 = vst [vmem:[#allocation385_spill] sm:$0xff] %v11320_v47  ;;  %v11324_v52 = vpop.permute.xlu1 %5520  ;;  %v5481_v47 = vsel %vm4626_vm1, %v5478_v49, %v5480_v30  ;;  %v5483_v63 = vrot.slane %v5231_v43, 2  ;;  %v5485_v62 = vrot.slane %v5232_v10, 2 }
 0x696   : > { %15641 = vst [vmem:[#allocation386_spill] sm:$0xff] %v11322_v6  ;;  %v11341_v6 = vld [vmem:[%s8223_s20 + $0x2e8] sm:$0xff] }
 0x697   : > { %15642 = vst [vmem:[#allocation387_spill] sm:$0xff] %v11324_v52  ;;  %v5233_v28 = vmul.f32 %v11341_v6, %v11178_v7  ;;  %v5234_v52 = vmul.f32 %v11346_v13, %v11178_v7  ;;  %v7755_v13 = vld [vmem:[%s8223_s20 + $0x2f8] sm:$0x3]  ;;  %v5484_v49 = vsel %vm4626_vm1, %v5482_v3, %v5483_v63  ;;  %v7529_v3 = vld [vmem:[%s14915_s1 + $0x103] ss:$0 sm:$0xff] }
 0x698   : > { %15645 = vst [vmem:[#allocation390_spill] sm:$0xff] %v11341_v6 }
 0x699   : > { %v5487_v44 = vrot.slane %v5233_v28, 2  ;;  %v5488_v6 = vrot.slane %v5234_v52, 2 }
 0x69a   : > { %5608 = vrot.lane.b32.xlu0 %v5479_v61, %s7943_s21  ;;  %5606 = vrot.lane.b32.xlu2 %v5476_v57, %s7943_s21  ;;  %v5235_v61 = vmul.f32 %v7755_v13, %v11178_v7  ;;  %v5486_v57 = vsel %vm4626_vm1, %v5483_v63, %v5485_v62  ;;  %v7527_v7 = vld [vmem:[%s14915_s1 + $0x100] ss:$0 sm:$0xff]  ;;  %v7528_v62 = vld [vmem:[%s14915_s1 + $0x101] ss:$0 sm:$0xff] }
 0x69b   : > { %5610 = vrot.lane.b32.xlu1 %v5481_v47, %s7943_s21  ;;  %v5489_v47 = vsel %vm4626_vm1, %v5487_v44, %v5488_v6  ;;  %v7530_v63 = vld [vmem:[%s14915_s1 + $0x102] ss:$0 sm:$0xff] }
 0x69c   : > { %v11354_v20 = vpop.permute.xlu0 %5524  ;;  %v11356_v39 = vpop.permute.xlu2 %5540  ;;  %v5490_v52 = vrot.slane %v5235_v61, 2 }
 0x69d   : > { %15647 = vst [vmem:[#allocation392_spill] sm:$0xff] %v11354_v20  ;;  %v11358_v23 = vpop.permute.xlu1 %5526 }
 0x69e   : > { %15648 = vst [vmem:[#allocation393_spill] sm:$0xff] %v11356_v39  ;;  %v5491_v10 = vsel %vm4626_vm1, %v5488_v6, %v5490_v52  ;;  %v7531_v6 = vld [vmem:[%s14915_s1 + $0x104] ss:$0 sm:$0xff]  ;;  %v7533_v52 = vld [vmem:[%s14915_s1 + $0x105] ss:$0 sm:$0xff] }
 0x69f   : > { %15649 = vst [vmem:[#allocation394_spill] sm:$0xff] %v11358_v23  ;;  %v7552_v39 = vld [vmem:[%s14915_s1 + $0x119] ss:$0 sm:$0xff] }
 0x6a2   : > { %5614 = vrot.lane.b32.xlu0 %v5486_v57, %s7943_s21  ;;  %5612 = vrot.lane.b32.xlu2 %v5484_v49, %s7943_s21 }
 0x6a3   : > { %5616 = vrot.lane.b32.xlu1 %v5489_v47, %s7943_s21  ;;  %v7532_v47 = vld [vmem:[%s14915_s1 + $0x106] ss:$0 sm:$0xff] }
 0x6a4   : > { %v11368_v30 = vpop.permute.xlu0 %5530  ;;  %v11370_v37 = vpop.permute.xlu2 %5546 }
 0x6a5   : > { %15650 = vst [vmem:[#allocation395_spill] sm:$0xff] %v11368_v30  ;;  %v11372_v43 = vpop.permute.xlu1 %5532  ;;  %v7558_v30 = vld [vmem:[%s14915_s1 + $0x11f] ss:$0 sm:$0xff] }
 0x6a6   : > { %15651 = vst [vmem:[#allocation396_spill] sm:$0xff] %v11370_v37  ;;  %v7544_v37 = vld [vmem:[%s14915_s1 + $0x112] ss:$0 sm:$0xff] }
 0x6a7   : > { %15652 = vst [vmem:[#allocation397_spill] sm:$0xff] %v11372_v43 }
 0x6aa   : > { %5846 = vperm.xlu0 %7268, %v7527_v7   ;;  %5618 = vrot.lane.b32.xlu2 %v5491_v10, %s7943_s21  ;;  %v7534_v7 = vld [vmem:[%s14915_s1 + $0x107] ss:$0 sm:$0xff]  ;;  %s7255_s21 = sshll.u32 %s16648_s13, 9 }
 0x6ab   : > { %5850 = vperm.xlu1 %7269, %v7528_v62   ;;  %s14458_s17 = scalar_lea.vmem %s14917_s3, %s7255_s21 }
 0x6ac   : > { %v11382_v44 = vpop.permute.xlu0 %5536  ;;  %v11384_v28 = vpop.permute.xlu2 %5552 }
 0x6ad   : > { %15653 = vst [vmem:[#allocation398_spill] sm:$0xff] %v11382_v44  ;;  %v11386_v13 = vpop.permute.xlu1 %5538 }
 0x6ae   : > { %15654 = vst [vmem:[#allocation399_spill] sm:$0xff] %v11384_v28  ;;  %v7539_v28 = vld [vmem:[%s14915_s1 + $0x10b] ss:$0 sm:$0xff] }
 0x6af   : > { %15655 = vst [vmem:[#allocation400_spill] sm:$0xff] %v11386_v13 }
 0x6b2   : > { %5858 = vperm.xlu0 %7268, %v7529_v3   ;;  %5854 = vperm.xlu2 %7270, %v7530_v63   ;;  %v7535_v63 = vld [vmem:[%s14915_s1 + $0x109] ss:$0 sm:$0xff] }
 0x6b3   : > { %5862 = vperm.xlu1 %7269, %v7531_v6   ;;  %v7536_v6 = vld [vmem:[%s14915_s1 + $0x108] ss:$0 sm:$0xff] }
 0x6b4   : > { %v11397_v61 = vpop.permute.xlu0 %5542  ;;  %v11399_v57 = vpop.permute.xlu2 %5558 }
 0x6b5   : > { %15656 = vst [vmem:[#allocation401_spill] sm:$0xff] %v11397_v61  ;;  %v11401_v49 = vpop.permute.xlu1 %5544  ;;  %v7548_v61 = vld [vmem:[%s14915_s1 + $0x114] ss:$0 sm:$0xff] }
 0x6b6   : > { %15657 = vst [vmem:[#allocation402_spill] sm:$0xff] %v11399_v57  ;;  %v7538_v57 = vld [vmem:[%s14915_s1 + $0x10c] ss:$0 sm:$0xff] }
 0x6b7   : > { %15658 = vst [vmem:[#allocation403_spill] sm:$0xff] %v11401_v49  ;;  %v7545_v49 = vld [vmem:[%s14915_s1 + $0x111] ss:$0 sm:$0xff] }
 0x6ba   : > { %5870 = vperm.xlu0 %7268, %v7532_v47   ;;  %5866 = vperm.xlu2 %7270, %v7533_v52   ;;  %v7537_v47 = vld [vmem:[%s14915_s1 + $0x10a] ss:$0 sm:$0xff] }
 0x6bb   : > { %5874 = vperm.xlu1 %7269, %v7534_v7  }
 0x6bc   : > { %v11412_v62 = vpop.permute.xlu0 %5548  ;;  %v11414_v10 = vpop.permute.xlu2 %5564 }
 0x6bd   : > { %15659 = vst [vmem:[#allocation404_spill] sm:$0xff] %v11412_v62  ;;  %v11416_v3 = vpop.permute.xlu1 %5550 }
 0x6be   : > { %15660 = vst [vmem:[#allocation405_spill] sm:$0xff] %v11414_v10 }
 0x6bf   : > { %15661 = vst [vmem:[#allocation406_spill] sm:$0xff] %v11416_v3 }
 0x6c2   : > { %5882 = vperm.xlu0 %7268, %v7535_v63   ;;  %5878 = vperm.xlu2 %7270, %v7536_v6   ;;  %v7540_v63 = vld [vmem:[%s14915_s1 + $0x10d] ss:$0 sm:$0xff] }
 0x6c3   : > { %5886 = vperm.xlu1 %7269, %v7537_v47  }
 0x6c4   : > { %v11427_v52 = vpop.permute.xlu0 %5554  ;;  %v11429_v7 = vpop.permute.xlu2 %5570 }
 0x6c5   : > { %15662 = vst [vmem:[#allocation407_spill] sm:$0xff] %v11427_v52  ;;  %v11431_v10 = vpop.permute.xlu1 %5556  ;;  %v7542_v52 = vld [vmem:[%s14915_s1 + $0x10e] ss:$0 sm:$0xff] }
 0x6c6   : > { %15663 = vst [vmem:[#allocation408_spill] sm:$0xff] %v11429_v7 }
 0x6c7   : > { %15664 = vst [vmem:[#allocation409_spill] sm:$0xff] %v11431_v10  ;;  %v7541_v10 = vld [vmem:[%s14915_s1 + $0x10f] ss:$0 sm:$0xff] }
 0x6ca   : > { %5894 = vperm.xlu0 %7268, %v7538_v57   ;;  %5890 = vperm.xlu2 %7270, %v7539_v28   ;;  %v7543_v57 = vld [vmem:[%s14915_s1 + $0x110] ss:$0 sm:$0xff] }
 0x6cb   : > { %5898 = vperm.xlu1 %7269, %v7540_v63  }
 0x6cc   : > { %v11442_v6 = vpop.permute.xlu0 %5560  ;;  %v11444_v47 = vpop.permute.xlu2 %5576 }
 0x6cd   : > { %15665 = vst [vmem:[#allocation410_spill] sm:$0xff] %v11442_v6  ;;  %v11446_v7 = vpop.permute.xlu1 %5562  ;;  %v7557_v6 = vld [vmem:[%s14915_s1 + $0x11d] ss:$0 sm:$0xff] }
 0x6ce   : > { %15666 = vst [vmem:[#allocation411_spill] sm:$0xff] %v11444_v47 }
 0x6cf   : > { %15667 = vst [vmem:[#allocation412_spill] sm:$0xff] %v11446_v7 }
 0x6d2   : > { %5906 = vperm.xlu0 %7268, %v7541_v10   ;;  %5902 = vperm.xlu2 %7270, %v7542_v52   ;;  %v7546_v10 = vld [vmem:[%s14915_s1 + $0x113] ss:$0 sm:$0xff] }
 0x6d3   : > { %5910 = vperm.xlu1 %7269, %v7543_v57  }
 0x6d4   : > { %v11457_v28 = vpop.permute.xlu0 %5566  ;;  %v11459_v63 = vpop.permute.xlu2 %5582 }
 0x6d5   : > { %15668 = vst [vmem:[#allocation413_spill] sm:$0xff] %v11457_v28  ;;  %v11461_v47 = vpop.permute.xlu1 %5568  ;;  %v7547_v28 = vld [vmem:[%s14915_s1 + $0x115] ss:$0 sm:$0xff] }
 0x6d6   : > { %15669 = vst [vmem:[#allocation414_spill] sm:$0xff] %v11459_v63  ;;  %v11761_v63 = vld [vmem:[%s8223_s20 + $0x20] sm:$0xff] }
 0x6d7   : > { %15670 = vst [vmem:[#allocation415_spill] sm:$0xff] %v11461_v47 }
 0x6da   : > { %5918 = vperm.xlu0 %7268, %v7544_v37   ;;  %5914 = vperm.xlu2 %7270, %v7545_v49   ;;  %v7549_v37 = vld [vmem:[%s14915_s1 + $0x116] ss:$0 sm:$0xff] }
 0x6db   : > { %5922 = vperm.xlu1 %7269, %v7546_v10  }
 0x6dc   : > { %v11472_v52 = vpop.permute.xlu0 %5572  ;;  %v11476_v47 = vpop.permute.xlu2 %5588 }
 0x6dd   : > { %15671 = vst [vmem:[#allocation416_spill] sm:$0xff] %v11472_v52  ;;  %v11474_v57 = vpop.permute.xlu1 %5574  ;;  %v7551_v52 = vld [vmem:[%s14915_s1 + $0x117] ss:$0 sm:$0xff] }
 0x6de   : > { %15672 = vst [vmem:[#allocation417_spill] sm:$0xff] %v11474_v57  ;;  %v7550_v57 = vld [vmem:[%s14915_s1 + $0x118] ss:$0 sm:$0xff] }
 0x6df   : > { %15673 = vst [vmem:[#allocation418_spill] sm:$0xff] %v11476_v47 }
 0x6e2   : > { %5930 = vperm.xlu0 %7268, %v7547_v28   ;;  %5926 = vperm.xlu2 %7270, %v7548_v61  }
 0x6e3   : > { %5934 = vperm.xlu1 %7269, %v7549_v37   ;;  %v7553_v37 = vld [vmem:[%s14915_s1 + $0x11b] ss:$0 sm:$0xff] }
 0x6e4   : > { %v11487_v49 = vpop.permute.xlu0 %5578  ;;  %v11500_v43 = vpop.permute.xlu2 %5594 }
 0x6e5   : > { %15674 = vst [vmem:[#allocation419_spill] sm:$0xff] %v11487_v49  ;;  %v11489_v10 = vpop.permute.xlu1 %5580  ;;  %v7555_v49 = vld [vmem:[%s14915_s1 + $0x11c] ss:$0 sm:$0xff] }
 0x6e6   : > { %15675 = vst [vmem:[#allocation420_spill] sm:$0xff] %v11489_v10  ;;  %v7554_v10 = vld [vmem:[%s14915_s1 + $0x11a] ss:$0 sm:$0xff] }
 0x6e7   : > { %15676 = vst [vmem:[#allocation421_spill] sm:$0xff] %v11500_v43  ;;  %v11757_v43 = vld [vmem:[%s8223_s20 + $0x18] sm:$0xff] }
 0x6ea   : > { %5942 = vperm.xlu0 %7268, %v7550_v57   ;;  %5938 = vperm.xlu2 %7270, %v7551_v52   ;;  %v7556_v57 = vld [vmem:[%s14915_s1 + $0x11e] ss:$0 sm:$0xff] }
 0x6eb   : > { %5946 = vperm.xlu1 %7269, %v7552_v39  }
 0x6ec   : > { %v11502_v61 = vpop.permute.xlu0 %5584  ;;  %v11515_v7 = vpop.permute.xlu2 %5600 }
 0x6ed   : > { %15677 = vst [vmem:[#allocation422_spill] sm:$0xff] %v11502_v61  ;;  %v11504_v28 = vpop.permute.xlu1 %5586 }
 0x6ee   : > { %15678 = vst [vmem:[#allocation423_spill] sm:$0xff] %v11504_v28  ;;  %v15729_v28 = vld [vmem:[#allocation25_spill] sm:$0xff] }
 0x6ef   : > { %15679 = vst [vmem:[#allocation424_spill] sm:$0xff] %v11515_v7  ;;  %v15730_v7 = vld [vmem:[#allocation355_spill] sm:$0xff] }
 0x6f0   : > { %v11750_v61 = vmul.f32 %v15730_v7, %v15729_v28 }
 0x6f2   : > { %5954 = vperm.xlu0 %7268, %v7553_v37   ;;  %5950 = vperm.xlu2 %7270, %v7554_v10  }
 0x6f3   : > { %5958 = vperm.xlu1 %7269, %v7555_v49  }
 0x6f4   : > { %v11517_v39 = vpop.permute.xlu0 %5590  ;;  %v11530_v49 = vpop.permute.xlu2 %5606 }
 0x6f5   : > { %15680 = vst [vmem:[#allocation425_spill] sm:$0xff] %v11517_v39  ;;  %v11519_v52 = vpop.permute.xlu1 %5592 }
 0x6f6   : > { %15681 = vst [vmem:[#allocation426_spill] sm:$0xff] %v11519_v52  ;;  %v15724_v52 = vld [vmem:[#allocation358_spill] sm:$0xff] }
 0x6f7   : > { %15682 = vst [vmem:[#allocation427_spill] sm:$0xff] %v11530_v49 }
 0x6fa   : > { %5966 = vperm.xlu0 %7268, %v7556_v57   ;;  %5962 = vperm.xlu2 %7270, %v7557_v6   ;;  %v15691_v6 = vld [vmem:[#allocation2_spill] sm:$0xff] }
 0x6fb   : > { %5970 = vperm.xlu1 %7269, %v7558_v30   ;;  %v11550_v30 = vmul.f32 %v10877_v27, %v15691_v6  ;;  %v11554_v57 = vmul.f32 %v10881_v48, %v15691_v6  ;;  %v15695_v6 = vld [vmem:[#allocation6_spill] sm:$0xff] }
 0x6fc   : > { %v11532_v10 = vpop.permute.xlu0 %5596  ;;  %v11540_v13 = vpop.permute.xlu2 %5612 }
 0x6fd   : > { %15683 = vst [vmem:[#allocation428_spill] sm:$0xff] %v11532_v10  ;;  %v11534_v37 = vpop.permute.xlu1 %5598  ;;  %v15719_v10 = vld [vmem:[#allocation23_spill] sm:$0xff] }
 0x6fe   : > { %15684 = vst [vmem:[#allocation429_spill] sm:$0xff] %v11534_v37  ;;  %v15692_v37 = vld [vmem:[#allocation3_spill] sm:$0xff] }
 0x6ff   : > { %15687 = vst [vmem:[#allocation432_spill] sm:$0xff] %v11540_v13 }
 0x704   : > { %v11536_v3 = vpop.permute.xlu0 %5602  ;;  %v11546_v20 = vpop.permute.xlu2 %5618 }
 0x705   : > { %15685 = vst [vmem:[#allocation430_spill] sm:$0xff] %v11536_v3  ;;  %v11538_v62 = vpop.permute.xlu1 %5604  ;;  %v11558_v3 = vmul.f32 %v10889_v59, %v15692_v37 }
 0x706   : > { %15686 = vst [vmem:[#allocation431_spill] sm:$0xff] %v11538_v62  ;;  %v11562_v62 = vmul.f32 %v10893_v55, %v15692_v37  ;;  %v11582_v55 = vmul.f32 %v10850_v4, %v15695_v6  ;;  %v15696_v37 = vld [vmem:[#allocation7_spill] sm:$0xff] }
 0x707   : > { %15690 = vst [vmem:[#allocation435_spill] sm:$0xff] %v11546_v20  ;;  %v15694_v20 = vld [vmem:[#allocation5_spill] sm:$0xff] }
 0x708   : > { %v11574_v48 = vmul.f32 %v10973_v19, %v15694_v20  ;;  %v11578_v59 = vmul.f32 %v10978_v1, %v15694_v20  ;;  %v11594_v19 = vmul.f32 %v10837_v17, %v15696_v37  ;;  %v15700_v17 = vld [vmem:[#allocation10_spill] sm:$0xff] }
 0x70c   : > { %v11542_v44 = vpop.permute.xlu0 %5608 }
 0x70d   : > { %15688 = vst [vmem:[#allocation433_spill] sm:$0xff] %v11542_v44  ;;  %v11544_v23 = vpop.permute.xlu1 %5610  ;;  %v15693_v44 = vld [vmem:[#allocation4_spill] sm:$0xff] }
 0x70e   : > { %15689 = vst [vmem:[#allocation434_spill] sm:$0xff] %v11544_v23  ;;  %v11566_v23 = vmul.f32 %v10930_v36, %v15693_v44  ;;  %v11570_v27 = vmul.f32 %v10934_v38, %v15693_v44  ;;  %v11586_v36 = vmul.f32 %v10854_v60, %v15695_v6  ;;  %v11590_v38 = vmul.f32 %v10833_v40, %v15696_v37  ;;  %v15697_v44 = vld [vmem:[#allocation8_spill] sm:$0xff]  ;;  %v15699_v60 = vld [vmem:[#allocation9_spill] sm:$0xff] }
 0x70f   : > { %v11598_v1 = vmul.f32 %v11017_v42, %v15697_v44  ;;  %v11604_v4 = vmul.f32 %v11022_v46, %v15697_v44  ;;  %v11608_v6 = vmul.f32 %v10867_v45, %v15699_v60  ;;  %v11612_v40 = vmul.f32 %v10871_v31, %v15699_v60  ;;  %v15702_v46 = vld [vmem:[#allocation11_spill] sm:$0xff]  ;;  %v15703_v31 = vld [vmem:[#allocation12_spill] sm:$0xff] }
 0x710   : > { %v11616_v37 = vmul.f32 %v10842_v11, %v15700_v17  ;;  %v11626_v44 = vmul.f32 %v11069_v8, %v15702_v46  ;;  %v11630_v45 = vmul.f32 %v11074_v24, %v15702_v46  ;;  %v11634_v60 = vmul.f32 %v10918_v51, %v15703_v31  ;;  %v15707_v46 = vld [vmem:[#allocation15_spill] sm:$0xff] }
 0x711   : > { %v11638_v11 = vmul.f32 %v10922_v34, %v15703_v31  ;;  %v11658_v34 = vmul.f32 %v10959_v18, %v15707_v46  ;;  %v15708_v31 = vld [vmem:[#allocation16_spill] sm:$0xff]  ;;  %15733 = vst [vmem:[#allocation15_spill] sm:$0xff] %v11761_v63 }
 0x714   : > { %v11600_v20 = vpop.permute.xlu0 %5614 }
 0x715   : > { %15698 = vst [vmem:[#allocation2_spill] sm:$0xff] %v11600_v20  ;;  %v11618_v42 = vpop.permute.xlu1 %5616  ;;  %v11622_v20 = vmul.f32 %v10846_v58, %v15700_v17  ;;  %v15705_v17 = vld [vmem:[#allocation14_spill] sm:$0xff] }
 0x716   : > { %15701 = vst [vmem:[#allocation3_spill] sm:$0xff] %v11618_v42  ;;  %v15704_v42 = vld [vmem:[#allocation13_spill] sm:$0xff]  ;;  %v11650_v24 = vmul.f32 %v11121_v5, %v15705_v17  ;;  %v11654_v51 = vmul.f32 %v11126_v35, %v15705_v17  ;;  %v11670_v5 = vmul.f32 %v10953_v2, %v15708_v31  ;;  %v15711_v17 = vld [vmem:[#allocation18_spill] sm:$0xff] }
 0x717   : > { %v11642_v58 = vmul.f32 %v10908_v12, %v15704_v42  ;;  %v11646_v8 = vmul.f32 %v10912_v33, %v15704_v42  ;;  %v11662_v12 = vmul.f32 %v10963_v53, %v15707_v46  ;;  %v11666_v33 = vmul.f32 %v10949_v15, %v15708_v31  ;;  %v15709_v42 = vld [vmem:[#allocation17_spill] sm:$0xff]  ;;  %v15712_v46 = vld [vmem:[#allocation19_spill] sm:$0xff]  ;;  %15732 = vst [vmem:[#allocation14_spill] sm:$0xff] %v11757_v43 }
 0x718   : > { %15706 = vst [vmem:[#allocation4_spill] sm:$0xff] %v11654_v51  ;;  %v11674_v35 = vmul.f32 %v11181_v56, %v15709_v42  ;;  %v11678_v18 = vmul.f32 %v11186_v41, %v15709_v42  ;;  %v11682_v53 = vmul.f32 %v11005_v9, %v15711_v17  ;;  %v11686_v15 = vmul.f32 %v11009_v0, %v15711_v17  ;;  %v15713_v41 = vld [vmem:[#allocation20_spill] sm:$0xff]  ;;  %v5855_v9 = vpop.permute.xlu2 %5854  ;;  %v15716_v0 = vld [vmem:[#allocation21_spill] sm:$0xff]  ;;  %v11781_v51 = vld [vmem:[%s8223_s20 + $0x28] sm:$0x3] }
 0x719   : > { %v11690_v2 = vmul.f32 %v10995_v14, %v15712_v46  ;;  %v11694_v56 = vmul.f32 %v10999_v50, %v15712_v46  ;;  %v11698_v31 = vmul.f32 %v11241_v16, %v15713_v41  ;;  %v11702_v42 = vmul.f32 %v11246_v22, %v15713_v41  ;;  %v15717_v50 = vld [vmem:[#allocation22_spill] sm:$0xff]  ;;  %v15723_v41 = vld [vmem:[#allocation357_spill] sm:$0xff]  ;;  %15741 = vst [vmem:[#allocation20_spill] sm:$0xff] %v11781_v51 }
 0x71a   : > { %15710 = vst [vmem:[#allocation5_spill] sm:$0xff] %v11678_v18  ;;  %v11706_v17 = vmul.f32 %v11053_v29, %v15716_v0  ;;  %v11710_v14 = vmul.f32 %v11057_v25, %v15716_v0  ;;  %v11714_v46 = vmul.f32 %v11041_v54, %v15717_v50  ;;  %v15718_v16 = vld [vmem:[#allocation354_spill] sm:$0xff]  ;;  %v11722_v22 = vmul.f32 %v11301_v26, %v15719_v10  ;;  %v15722_v25 = vld [vmem:[#allocation24_spill] sm:$0xff]  ;;  %v11741_v26 = vld [vmem:[%s8223_s20 + $0x8] sm:$0xff] }
 0x71b   : > { %15714 = vst [vmem:[#allocation6_spill] sm:$0xff] %v11698_v31  ;;  %v11718_v13 = vmul.f32 %v15718_v16, %v15717_v50  ;;  %v11726_v29 = vmul.f32 %v11306_v21, %v15719_v10  ;;  %v11730_v0 = vmul.f32 %v15723_v41, %v15722_v25  ;;  %v11734_v49 = vmul.f32 %v15724_v52, %v15722_v25  ;;  %v11737_v50 = vld [vmem:[%s8223_s20] sm:$0xff]  ;;  %v11745_v21 = vld [vmem:[%s8223_s20 + $0x10] sm:$0x3] }
 0x71c   : > { %15715 = vst [vmem:[#allocation7_spill] sm:$0xff] %v11702_v42  ;;  %v5847_v54 = vpop.permute.xlu0 %5846  ;;  %v15731_v52 = vld [vmem:[#allocation356_spill] sm:$0xff] }
 0x71d   : > { %15720 = vst [vmem:[#allocation8_spill] sm:$0xff] %v11722_v22  ;;  %v5973_v16 = vmul.f32 %v11737_v50, %v5847_v54  ;;  %v5974_v39 = vmul.f32 %v11741_v26, %v5847_v54  ;;  %v5975_v10 = vmul.f32 %v11745_v21, %v5847_v54  ;;  %v5851_v41 = vpop.permute.xlu1 %5850  ;;  %v11754_v25 = vmul.f32 %v15731_v52, %v15729_v28  ;;  %v15735_v54 = vld [vmem:[#allocation363_spill] sm:$0xff]  ;;  %v15737_v22 = vld [vmem:[#allocation364_spill] sm:$0xff] }
 0x71e   : > { %15721 = vst [vmem:[#allocation9_spill] sm:$0xff] %v11726_v29  ;;  %v5976_v47 = vmul.f32 %v11757_v43, %v5851_v41  ;;  %v11773_v28 = vld [vmem:[%s8223_s20 + $0x30] sm:$0xff]  ;;  %v11777_v43 = vld [vmem:[%s8223_s20 + $0x38] sm:$0xff] }
 0x71f   : > { %15725 = vst [vmem:[#allocation10_spill] sm:$0xff] %v11734_v49  ;;  %v6165_v29 = vrot.slane %v5973_v16, 2  ;;  %v6166_v7 = vrot.slane %v5974_v39, 2  ;;  %v6168_v42 = vrot.slane %v5975_v10, 2  ;;  %v5979_v52 = vmul.f32 %v11773_v28, %v5855_v9  ;;  %v15745_v49 = vld [vmem:[#allocation28_spill] sm:$0xff] }
 0x720   : > { %15726 = vst [vmem:[#allocation11_spill] sm:$0xff] %v11737_v50  ;;  %v15734_v50 = vld [vmem:[#allocation26_spill] sm:$0xff]  ;;  %v6170_v31 = vrot.slane %v5976_v47, 2  ;;  %v5978_v16 = vmul.f32 %v11781_v51, %v5851_v41 }
 0x721   : > { %15727 = vst [vmem:[#allocation12_spill] sm:$0xff] %v11741_v26  ;;  %v5977_v26 = vmul.f32 %v11761_v63, %v5851_v41  ;;  %v11770_v18 = vmul.f32 %v15737_v22, %v15734_v50  ;;  %v5980_v63 = vmul.f32 %v11777_v43, %v5855_v9  ;;  %v6169_v10 = vsel %vm4626_vm1, %v6166_v7, %v6168_v42  ;;  %v15748_v42 = vld [vmem:[#allocation372_spill] sm:$0xff]  ;;  %v15751_v41 = vld [vmem:[#allocation369_spill] sm:$0xff] }
 0x722   : > { %15728 = vst [vmem:[#allocation13_spill] sm:$0xff] %v11745_v21  ;;  %v11766_v21 = vmul.f32 %v15735_v54, %v15734_v50  ;;  %v6167_v22 = vsel %vm4626_vm1, %v6165_v29, %v6166_v7  ;;  %v15742_v50 = vld [vmem:[#allocation27_spill] sm:$0xff]  ;;  %v15743_v54 = vld [vmem:[#allocation361_spill] sm:$0xff]  ;;  %6327 = vrot.lane.b32.xlu0 %v6169_v10, %s7944_s15  ;;  %v15755_v10 = vld [vmem:[#allocation30_spill] sm:$0xff] }
 0x723   : > { %15738 = vst [vmem:[#allocation17_spill] sm:$0xff] %v11770_v18  ;;  %v6171_v39 = vrot.slane %v5977_v26, 2  ;;  %v11788_v18 = vmul.f32 %v15743_v54, %v15742_v50  ;;  %6325 = vrot.lane.b32.xlu2 %v6167_v22, %s7944_s15  ;;  %v11802_v26 = vmul.f32 %v15748_v42, %v15745_v49  ;;  %v15750_v29 = vld [vmem:[#allocation29_spill] sm:$0xff]  ;;  %v11809_v54 = vld [vmem:[%s8223_s20 + $0x40] sm:$0x3]  ;;  %v11819_v22 = vmul.f32 %v11281_v32, %v15755_v10 }
 0x724   : > { %15736 = vst [vmem:[#allocation16_spill] sm:$0xff] %v11766_v21  ;;  %v11806_v7 = vmul.f32 %v15751_v41, %v15750_v29  ;;  %v6176_v42 = vrot.slane %v5980_v63, 2  ;;  %v15757_v41 = vld [vmem:[#allocation381_spill] sm:$0xff]  ;;  %v6173_v32 = vrot.slane %v5978_v16, 2  ;;  %v15764_v63 = vld [vmem:[#allocation390_spill] sm:$0xff] }
 0x725   : > { %15739 = vst [vmem:[#allocation18_spill] sm:$0xff] %v11773_v28  ;;  %v15744_v28 = vld [vmem:[#allocation362_spill] sm:$0xff] }
 0x726   : > { %15740 = vst [vmem:[#allocation19_spill] sm:$0xff] %v11777_v43  ;;  %v11792_v21 = vmul.f32 %v15744_v28, %v15742_v50  ;;  %v15746_v43 = vld [vmem:[#allocation371_spill] sm:$0xff]  ;;  %v5981_v28 = vmul.f32 %v11809_v54, %v5855_v9  ;;  %v6172_v50 = vsel %vm4626_vm1, %v6170_v31, %v6171_v39  ;;  %v15772_v16 = vld [vmem:[#allocation34_spill] sm:$0xff] }
 0x727   : > { %v11796_v47 = vmul.f32 %v15746_v43, %v15745_v49  ;;  %15749 = vst [vmem:[#allocation22_spill] sm:$0xff] %v11802_v26  ;;  %v15754_v43 = vld [vmem:[#allocation370_spill] sm:$0xff]  ;;  %v6175_v49 = vrot.slane %v5979_v52, 2  ;;  %v11821_v26 = vpop.permute.xlu2 %5866  ;;  %6329 = vrot.lane.b32.xlu1 %v6172_v50, %s7944_s15  ;;  %v15759_v9 = vld [vmem:[#allocation31_spill] sm:$0xff]  ;;  %v15763_v52 = vld [vmem:[#allocation32_spill] sm:$0xff] }
 0x728   : > { %15752 = vst [vmem:[#allocation354_spill] sm:$0xff] %v11806_v7  ;;  %v11815_v51 = vmul.f32 %v15754_v43, %v15750_v29  ;;  %v15760_v31 = vld [vmem:[#allocation379_spill] sm:$0xff]  ;;  %v15762_v29 = vld [vmem:[#allocation380_spill] sm:$0xff] }
 0x729   : > { %15747 = vst [vmem:[#allocation21_spill] sm:$0xff] %v11796_v47  ;;  %v11826_v47 = vmul.f32 %v15757_v41, %v15755_v10  ;;  %v11834_v43 = vmul.f32 %v15762_v29, %v15759_v9  ;;  %v15766_v50 = vld [vmem:[#allocation391_spill] sm:$0xff]  ;;  %v15768_v10 = vld [vmem:[#allocation33_spill] sm:$0xff]  ;;  %v15769_v41 = vld [vmem:[#allocation388_spill] sm:$0xff]  ;;  %v5859_v29 = vpop.permute.xlu0 %5858 }
 0x72a   : > { %15753 = vst [vmem:[#allocation23_spill] sm:$0xff] %v11809_v54  ;;  %v11830_v54 = vmul.f32 %v15760_v31, %v15759_v9  ;;  %v11842_v7 = vmul.f32 %v15766_v50, %v15763_v52  ;;  %v15771_v31 = vld [vmem:[#allocation389_spill] sm:$0xff] }
 0x72b   : > { %15756 = vst [vmem:[#allocation24_spill] sm:$0xff] %v11819_v22  ;;  %v11838_v22 = vmul.f32 %v15764_v63, %v15763_v52  ;;  %v11850_v9 = vmul.f32 %v15771_v31, %v15768_v10  ;;  %v15773_v63 = vld [vmem:[#allocation38_spill] sm:$0xff]  ;;  %v15774_v52 = vld [vmem:[#allocation35_spill] sm:$0xff] }
 0x72c   : > { %15758 = vst [vmem:[#allocation357_spill] sm:$0xff] %v11826_v47  ;;  %v11846_v47 = vmul.f32 %v15769_v41, %v15768_v10  ;;  %v11862_v50 = vadd.f32 %v15774_v52, %v11582_v55  ;;  %v6178_v41 = vrot.slane %v5981_v28, 2  ;;  %v15776_v10 = vld [vmem:[#allocation37_spill] sm:$0xff]  ;;  %v11878_v55 = vld [vmem:[%s8223_s20 + $0x48] sm:$0xff]  ;;  %v11882_v52 = vld [vmem:[%s8223_s20 + $0x50] sm:$0xff] }
 0x72d   : > { %15761 = vst [vmem:[#allocation358_spill] sm:$0xff] %v11830_v54  ;;  %v11854_v54 = vadd.f32 %v15772_v16, %v11594_v19  ;;  %v11870_v31 = vadd.f32 %v15776_v10, %v11558_v3  ;;  %v15778_v19 = vld [vmem:[#allocation40_spill] sm:$0xff]  ;;  %v5982_v28 = vmul.f32 %v11878_v55, %v5859_v29  ;;  %v15783_v10 = vld [vmem:[#allocation41_spill] sm:$0xff] }
 0x72e   : > { %15765 = vst [vmem:[#allocation25_spill] sm:$0xff] %v11838_v22  ;;  %v11858_v22 = vadd.f32 %v15773_v63, %v11590_v38  ;;  %v11874_v16 = vadd.f32 %v15778_v19, %v11646_v8  ;;  %v5863_v38 = vpop.permute.xlu1 %5862  ;;  %v6177_v63 = vsel %vm4626_vm1, %v6175_v49, %v6176_v42  ;;  %v6174_v8 = vsel %vm4626_vm1, %v6171_v39, %v6173_v32  ;;  %v15784_v49 = vld [vmem:[#allocation42_spill] sm:$0xff]  ;;  %v11913_v32 = vld [vmem:[%s8223_s20 + $0x68] sm:$0xff] }
 0x72f   : > { %15767 = vst [vmem:[#allocation355_spill] sm:$0xff] %v11842_v7  ;;  %v15775_v7 = vld [vmem:[#allocation36_spill] sm:$0xff]  ;;  %v11892_v19 = vadd.f32 %v15783_v10, %v11616_v37  ;;  %6333 = vrot.lane.b32.xlu0 %v6177_v63, %s7944_s15  ;;  %6331 = vrot.lane.b32.xlu2 %v6174_v8, %s7944_s15  ;;  %v11909_v39 = vld [vmem:[%s8223_s20 + $0x60] sm:$0xff] }
 0x730   : > { %15770 = vst [vmem:[#allocation356_spill] sm:$0xff] %v11846_v47  ;;  %v11866_v47 = vadd.f32 %v15775_v7, %v11612_v40  ;;  %v5983_v40 = vmul.f32 %v11882_v52, %v5859_v29  ;;  %v11886_v7 = vld [vmem:[%s8223_s20 + $0x58] sm:$0x3]  ;;  %v5985_v37 = vmul.f32 %v11909_v39, %v5863_v38  ;;  %v15790_v8 = vld [vmem:[#allocation50_spill] sm:$0xff] }
 0x731   : > { %15777 = vst [vmem:[#allocation26_spill] sm:$0xff] %v11870_v31  ;;  %v5984_v3 = vmul.f32 %v11886_v7, %v5859_v29  ;;  %v15786_v29 = vld [vmem:[#allocation45_spill] sm:$0xff]  ;;  %v11925_v10 = vadd.f32 %v15790_v8, %v11550_v30  ;;  %v15794_v8 = vld [vmem:[#allocation55_spill] sm:$0xff] }
 0x732   : > { %15779 = vst [vmem:[#allocation363_spill] sm:$0xff] %v11874_v16  ;;  %v11896_v16 = vadd.f32 %v15784_v49, %v11622_v20  ;;  %v11916_v20 = vmul.f32 %v11913_v32, %v5863_v38 }
 0x733   : > { %15780 = vst [vmem:[#allocation364_spill] sm:$0xff] %v11878_v55  ;;  %v15785_v55 = vld [vmem:[#allocation44_spill] sm:$0xff]  ;;  %v6183_v30 = vrot.slane %v5984_v3, 2 }
 0x734   : > { %15781 = vst [vmem:[#allocation27_spill] sm:$0xff] %v11882_v52  ;;  %v11900_v31 = vadd.f32 %v15785_v55, %v11566_v23  ;;  %v6179_v23 = vsel %vm4626_vm1, %v6176_v42, %v6178_v41  ;;  %v15789_v55 = vld [vmem:[#allocation46_spill] sm:$0xff]  ;;  %v15808_v52 = vld [vmem:[#allocation69_spill] sm:$0xff] }
 0x735   : > { %15782 = vst [vmem:[#allocation361_spill] sm:$0xff] %v11886_v7  ;;  %v11906_v7 = vadd.f32 %v15786_v29, %v11586_v36  ;;  %v11921_v63 = vadd.f32 %v15789_v55, %v11608_v6  ;;  %v15791_v36 = vld [vmem:[#allocation49_spill] sm:$0xff]  ;;  %v15792_v29 = vld [vmem:[#allocation51_spill] sm:$0xff]  ;;  %6335 = vrot.lane.b32.xlu1 %v6179_v23, %s7944_s15  ;;  %v15793_v42 = vld [vmem:[#allocation54_spill] sm:$0xff]  ;;  %v6180_v6 = vrot.slane %v5982_v28, 2  ;;  %v6181_v55 = vrot.slane %v5983_v40, 2  ;;  %v11956_v28 = vpop.permute.xlu2 %5878 }
 0x736   : > { %15787 = vst [vmem:[#allocation362_spill] sm:$0xff] %v11909_v39  ;;  %v11929_v49 = vadd.f32 %v15791_v36, %v11670_v5  ;;  %v11933_v39 = vadd.f32 %v15792_v29, %v11554_v57  ;;  %v11938_v41 = vadd.f32 %v15793_v42, %v11574_v48  ;;  %v15795_v5 = vld [vmem:[#allocation56_spill] sm:$0xff]  ;;  %v15797_v48 = vld [vmem:[#allocation59_spill] sm:$0xff]  ;;  %v15798_v40 = vld [vmem:[#allocation61_spill] sm:$0xff] }
 0x737   : > { %15788 = vst [vmem:[#allocation28_spill] sm:$0xff] %v11913_v32  ;;  %v11942_v32 = vadd.f32 %v15794_v8, %v11562_v62  ;;  %v11946_v57 = vadd.f32 %v15795_v5, %v11642_v58  ;;  %v15796_v23 = vld [vmem:[#allocation60_spill] sm:$0xff]  ;;  %v11954_v29 = vadd.f32 %v15797_v48, %v11694_v56  ;;  %v11960_v3 = vadd.f32 %v15798_v40, %v11638_v11  ;;  %v15799_v62 = vld [vmem:[#allocation63_spill] sm:$0xff]  ;;  %v15802_v56 = vld [vmem:[#allocation65_spill] sm:$0xff] }
 0x738   : > { %v11950_v36 = vadd.f32 %v15796_v23, %v11634_v60  ;;  %v11964_v42 = vadd.f32 %v15799_v62, %v11598_v1  ;;  %v6185_v58 = vrot.slane %v5985_v37, 2  ;;  %v6186_v8 = vrot.slane %v11916_v20, 2  ;;  %v15801_v60 = vld [vmem:[#allocation64_spill] sm:$0xff]  ;;  %v11976_v48 = vld [vmem:[%s8223_s20 + $0x78] sm:$0xff]  ;;  %v11981_v40 = vld [vmem:[%s8223_s20 + $0x80] sm:$0xff] }
 0x739   : > { %v11969_v5 = vadd.f32 %v15801_v60, %v11570_v27  ;;  %v11973_v23 = vadd.f32 %v15802_v56, %v11666_v33  ;;  %15803 = vst [vmem:[#allocation372_spill] sm:$0xff] %v11976_v48  ;;  %v5988_v11 = vmul.f32 %v11976_v48, %v11821_v26  ;;  %v5989_v1 = vmul.f32 %v11981_v40, %v11821_v26  ;;  %v15805_v37 = vld [vmem:[#allocation67_spill] sm:$0xff]  ;;  %v11990_v27 = vld [vmem:[%s8223_s20 + $0x70] sm:$0x3] }
 0x73a   : > { %15800 = vst [vmem:[#allocation371_spill] sm:$0xff] %v11964_v42  ;;  %v11987_v20 = vadd.f32 %v15805_v37, %v11718_v13  ;;  %v5987_v33 = vmul.f32 %v11990_v27, %v5863_v38  ;;  %v6184_v62 = vsel %vm4626_vm1, %v6181_v55, %v6183_v30  ;;  %v6182_v60 = vsel %vm4626_vm1, %v6180_v6, %v6181_v55  ;;  %v15807_v56 = vld [vmem:[#allocation68_spill] sm:$0xff]  ;;  %v15810_v38 = vld [vmem:[#allocation71_spill] sm:$0xff]  ;;  %v15814_v37 = vld [vmem:[#allocation73_spill] sm:$0xff] }
 0x73b   : > { %15804 = vst [vmem:[#allocation29_spill] sm:$0xff] %v11981_v40  ;;  %v11997_v48 = vadd.f32 %v15807_v56, %v11658_v34  ;;  %v12001_v42 = vadd.f32 %v15808_v52, %v11662_v12  ;;  %v15809_v40 = vld [vmem:[#allocation70_spill] sm:$0xff]  ;;  %6339 = vrot.lane.b32.xlu0 %v6184_v62, %s7944_s15  ;;  %6337 = vrot.lane.b32.xlu2 %v6182_v60, %s7944_s15  ;;  %v15811_v6 = vld [vmem:[#allocation72_spill] sm:$0xff]  ;;  %v12018_v55 = vld [vmem:[%s8223_s20 + $0x88] sm:$0x3]  ;;  %v6191_v60 = vrot.slane %v5989_v1, 2 }
 0x73c   : > { %15806 = vst [vmem:[#allocation369_spill] sm:$0xff] %v11990_v27  ;;  %v12005_v13 = vadd.f32 %v15809_v40, %v11626_v44  ;;  %v12011_v30 = vadd.f32 %v15810_v38, %v11578_v59  ;;  %v12015_v34 = vadd.f32 %v15811_v6, %v11690_v2  ;;  %v5990_v12 = vmul.f32 %v12018_v55, %v11821_v26  ;;  %v15813_v52 = vld [vmem:[#allocation74_spill] sm:$0xff]  ;;  %v15815_v2 = vld [vmem:[#allocation75_spill] sm:$0xff]  ;;  %v15816_v26 = vld [vmem:[#allocation77_spill] sm:$0xff] }
 0x73d   : > { %15812 = vst [vmem:[#allocation370_spill] sm:$0xff] %v12018_v55  ;;  %v6187_v44 = vsel %vm4626_vm1, %v6185_v58, %v6186_v8  ;;  %v12025_v40 = vadd.f32 %v15813_v52, %v11682_v53  ;;  %v12029_v62 = vadd.f32 %v15814_v37, %v11754_v25  ;;  %v6190_v59 = vrot.slane %v5988_v11, 2  ;;  %v15817_v58 = vld [vmem:[#allocation76_spill] sm:$0xff]  ;;  %v15818_v25 = vld [vmem:[#allocation78_spill] sm:$0xff]  ;;  %v12084_v55 = vpop.permute.xlu2 %5890 }
 0x73e   : > { %6341 = vrot.lane.b32.xlu1 %v6187_v44, %s7944_s15  ;;  %v12034_v56 = vadd.f32 %v15815_v2, %v11686_v15  ;;  %v12038_v38 = vadd.f32 %v15816_v26, %v11604_v4  ;;  %v12042_v53 = vadd.f32 %v15817_v58, %v11650_v24  ;;  %v6188_v6 = vrot.slane %v5987_v33, 2  ;;  %v15819_v1 = vld [vmem:[#allocation80_spill] sm:$0xff]  ;;  %v15820_v15 = vld [vmem:[#allocation79_spill] sm:$0xff]  ;;  %v15821_v4 = vld [vmem:[#allocation81_spill] sm:$0xff]  ;;  %v5871_v24 = vpop.permute.xlu0 %5870 }
 0x73f   : > { %v12046_v11 = vadd.f32 %v15818_v25, %v11714_v46  ;;  %v12050_v44 = vadd.f32 %v15819_v1, %v11706_v17  ;;  %v12054_v52 = vadd.f32 %v15820_v15, %v11792_v21  ;;  %v12058_v37 = vadd.f32 %v15821_v4, %v11710_v14  ;;  %v15822_v33 = vld [vmem:[#allocation83_spill] sm:$0xff]  ;;  %v15823_v46 = vld [vmem:[#allocation82_spill] sm:$0xff]  ;;  %v15824_v17 = vld [vmem:[#allocation84_spill] sm:$0xff] }
 0x740   : > { %v12062_v2 = vadd.f32 %v15822_v33, %v11630_v45  ;;  %v12066_v26 = vadd.f32 %v15823_v46, %v11674_v35  ;;  %v12070_v58 = vadd.f32 %v15824_v17, %v11750_v61  ;;  %v6193_v21 = vrot.slane %v5990_v12, 2  ;;  %v15825_v25 = vld [vmem:[#allocation86_spill] sm:$0xff]  ;;  %v15827_v14 = vld [vmem:[#allocation85_spill] sm:$0xff]  ;;  %v15830_v45 = vld [vmem:[#allocation87_spill] sm:$0xff]  ;;  %v5875_v35 = vpop.permute.xlu1 %5874 }
 0x741   : > { %v12074_v1 = vadd.f32 %v15825_v25, %v11730_v0  ;;  %v12078_v15 = vadd.f32 %v15827_v14, %v11815_v51  ;;  %v15829_v4 = vld [vmem:[#allocation10_spill] sm:$0xff]  ;;  %v6192_v61 = vsel %vm4626_vm1, %v6190_v59, %v6191_v60  ;;  %v12088_v12 = vld [vmem:[%s8223_s20 + $0x90] sm:$0xff]  ;;  %v12092_v46 = vld [vmem:[%s8223_s20 + $0x98] sm:$0xff]  ;;  %v6189_v14 = vsel %vm4626_vm1, %v6186_v8, %v6188_v6 }
 0x742   : > { %v12082_v33 = vadd.f32 %v15830_v45, %v15829_v4  ;;  %15832 = vst [vmem:[#allocation379_spill] sm:$0xff] %v12088_v12  ;;  %v5991_v0 = vmul.f32 %v12088_v12, %v5871_v24  ;;  %v5992_v51 = vmul.f32 %v12092_v46, %v5871_v24  ;;  %v12096_v17 = vld [vmem:[%s8223_s20 + $0xa0] sm:$0x3]  ;;  %v15835_v4 = vld [vmem:[#allocation4_spill] sm:$0xff]  ;;  %v15836_v45 = vld [vmem:[#allocation89_spill] sm:$0xff] }
 0x743   : > { %15826 = vst [vmem:[#allocation30_spill] sm:$0xff] %v12074_v1  ;;  %v5993_v25 = vmul.f32 %v12096_v17, %v5871_v24  ;;  %v12102_v27 = vadd.f32 %v15836_v45, %v15835_v4  ;;  %v15837_v59 = vld [vmem:[#allocation6_spill] sm:$0xff]  ;;  %6345 = vrot.lane.b32.xlu0 %v6192_v61, %s7944_s15  ;;  %6343 = vrot.lane.b32.xlu2 %v6189_v14, %s7944_s15  ;;  %v15842_v24 = vld [vmem:[#allocation91_spill] sm:$0xff]  ;;  %v12123_v4 = vld [vmem:[%s8223_s20 + $0xb0] sm:$0xff] }
 0x744   : > { %15828 = vst [vmem:[#allocation381_spill] sm:$0xff] %v12078_v15  ;;  %v15838_v15 = vld [vmem:[#allocation88_spill] sm:$0xff]  ;;  %v15840_v12 = vld [vmem:[#allocation90_spill] sm:$0xff]  ;;  %v12119_v8 = vld [vmem:[%s8223_s20 + $0xa8] sm:$0xff] }
 0x745   : > { %15831 = vst [vmem:[#allocation31_spill] sm:$0xff] %v12082_v33  ;;  %v12106_v33 = vadd.f32 %v15838_v15, %v15837_v59  ;;  %v12110_v1 = vadd.f32 %v15840_v12, %v11788_v18  ;;  %v5994_v6 = vmul.f32 %v12119_v8, %v5875_v35  ;;  %v12126_v15 = vmul.f32 %v12123_v4, %v5875_v35  ;;  %v15846_v12 = vld [vmem:[#allocation16_spill] sm:$0xff]  ;;  %v15849_v14 = vld [vmem:[#allocation17_spill] sm:$0xff] }
 0x746   : > { %15833 = vst [vmem:[#allocation380_spill] sm:$0xff] %v12092_v46  ;;  %v6194_v18 = vsel %vm4626_vm1, %v6191_v60, %v6193_v21  ;;  %v15847_v45 = vld [vmem:[#allocation92_spill] sm:$0xff]  ;;  %v15850_v59 = vld [vmem:[#allocation93_spill] sm:$0xff]  ;;  %v15858_v60 = vld [vmem:[#allocation354_spill] sm:$0xff] }
 0x747   : > { %15834 = vst [vmem:[#allocation32_spill] sm:$0xff] %v12096_v17  ;;  %v12116_v17 = vadd.f32 %v15842_v24, %v11834_v43  ;;  %v12131_v61 = vadd.f32 %v15847_v45, %v15846_v12  ;;  %v12135_v46 = vadd.f32 %v15850_v59, %v15849_v14  ;;  %v15852_v43 = vld [vmem:[#allocation5_spill] sm:$0xff]  ;;  %v15853_v24 = vld [vmem:[#allocation95_spill] sm:$0xff]  ;;  %6347 = vrot.lane.b32.xlu1 %v6194_v18, %s7944_s15  ;;  %v15859_v21 = vld [vmem:[#allocation96_spill] sm:$0xff]  ;;  %v6195_v12 = vrot.slane %v5991_v0, 2 }
 0x748   : > { %15839 = vst [vmem:[#allocation390_spill] sm:$0xff] %v12106_v33  ;;  %v15856_v33 = vld [vmem:[#allocation94_spill] sm:$0xff]  ;;  %v6196_v45 = vrot.slane %v5992_v51, 2  ;;  %v6198_v14 = vrot.slane %v5993_v25, 2  ;;  %v15861_v59 = vld [vmem:[#allocation21_spill] sm:$0xff] }
 0x749   : > { %15841 = vst [vmem:[#allocation391_spill] sm:$0xff] %v12110_v1  ;;  %v15871_v0 = vld [vmem:[#allocation358_spill] sm:$0xff]  ;;  %v15872_v51 = vld [vmem:[#allocation101_spill] sm:$0xff] }
 0x74a   : > { %15843 = vst [vmem:[#allocation33_spill] sm:$0xff] %v12116_v17  ;;  %v12139_v17 = vadd.f32 %v15853_v24, %v15852_v43  ;;  %v15864_v24 = vld [vmem:[#allocation97_spill] sm:$0xff]  ;;  %v12168_v25 = vadd.f32 %v15872_v51, %v15871_v0  ;;  %v12189_v0 = vld [vmem:[%s8223_s20 + $0xc8] sm:$0xff] }
 0x74b   : > { %15844 = vst [vmem:[#allocation388_spill] sm:$0xff] %v12119_v8  ;;  %v15855_v8 = vld [vmem:[#allocation8_spill] sm:$0xff] }
 0x74c   : > { %15845 = vst [vmem:[#allocation389_spill] sm:$0xff] %v12123_v4  ;;  %v12143_v1 = vadd.f32 %v15856_v33, %v15855_v8  ;;  %v12148_v4 = vadd.f32 %v15859_v21, %v15858_v60  ;;  %v12156_v33 = vadd.f32 %v15864_v24, %v11850_v9  ;;  %v15866_v8 = vld [vmem:[#allocation22_spill] sm:$0xff]  ;;  %v15870_v60 = vld [vmem:[#allocation100_spill] sm:$0xff]  ;;  %v6201_v9 = vrot.slane %v12126_v15, 2  ;;  %v15877_v24 = vld [vmem:[#allocation357_spill] sm:$0xff] }
 0x74d   : > { %15848 = vst [vmem:[#allocation34_spill] sm:$0xff] %v12131_v61  ;;  %v15875_v61 = vld [vmem:[#allocation102_spill] sm:$0xff]  ;;  %v15886_v15 = vld [vmem:[#allocation105_spill] sm:$0xff] }
 0x74e   : > { %15851 = vst [vmem:[#allocation38_spill] sm:$0xff] %v12135_v46  ;;  %v15862_v46 = vld [vmem:[#allocation98_spill] sm:$0xff] }
 0x74f   : > { %15854 = vst [vmem:[#allocation35_spill] sm:$0xff] %v12139_v17  ;;  %v12152_v43 = vadd.f32 %v15862_v46, %v15861_v59  ;;  %v15869_v17 = vld [vmem:[#allocation7_spill] sm:$0xff]  ;;  %v6200_v59 = vrot.slane %v5994_v6, 2  ;;  %v5998_v6 = vmul.f32 %v12189_v0, %v11956_v28 }
 0x750   : > { %15857 = vst [vmem:[#allocation36_spill] sm:$0xff] %v12143_v1  ;;  %v15867_v1 = vld [vmem:[#allocation99_spill] sm:$0xff]  ;;  %v12164_v21 = vadd.f32 %v15870_v60, %v15869_v17  ;;  %v12184_v17 = vld [vmem:[%s8223_s20 + $0xc0] sm:$0xff] }
 0x751   : > { %15860 = vst [vmem:[#allocation37_spill] sm:$0xff] %v12148_v4  ;;  %v12160_v18 = vadd.f32 %v15867_v1, %v15866_v8  ;;  %v15874_v4 = vld [vmem:[#allocation24_spill] sm:$0xff]  ;;  %v15880_v1 = vld [vmem:[#allocation9_spill] sm:$0xff]  ;;  %v5997_v60 = vmul.f32 %v12184_v17, %v11956_v28 }
 0x752   : > { %15863 = vst [vmem:[#allocation40_spill] sm:$0xff] %v12152_v43  ;;  %v12172_v46 = vadd.f32 %v15875_v61, %v15874_v4  ;;  %v15881_v8 = vld [vmem:[#allocation104_spill] sm:$0xff] }
 0x753   : > { %15865 = vst [vmem:[#allocation41_spill] sm:$0xff] %v12156_v33  ;;  %v15878_v33 = vld [vmem:[#allocation103_spill] sm:$0xff]  ;;  %v15885_v4 = vld [vmem:[#allocation356_spill] sm:$0xff] }
 0x754   : > { %15868 = vst [vmem:[#allocation42_spill] sm:$0xff] %v12160_v18  ;;  %v12177_v43 = vadd.f32 %v15878_v33, %v15877_v24  ;;  %v12181_v18 = vadd.f32 %v15881_v8, %v15880_v1  ;;  %v12195_v61 = vadd.f32 %v15886_v15, %v15885_v4  ;;  %v12198_v33 = vld [vmem:[%s8223_s20 + $0xb8] sm:$0x3]  ;;  %v6199_v24 = vsel %vm4626_vm1, %v6196_v45, %v6198_v14  ;;  %v12215_v15 = vpop.permute.xlu2 %5902 }
 0x755   : > { %15873 = vst [vmem:[#allocation44_spill] sm:$0xff] %v12168_v25  ;;  %v5996_v51 = vmul.f32 %v12198_v33, %v5875_v35  ;;  %v6197_v1 = vsel %vm4626_vm1, %v6195_v12, %v6196_v45  ;;  %v15888_v8 = vld [vmem:[#allocation25_spill] sm:$0xff]  ;;  %6351 = vrot.lane.b32.xlu0 %v6199_v24, %s7944_s15  ;;  %v15893_v35 = vld [vmem:[#allocation111_spill] sm:$0xff]  ;;  %v15897_v24 = vld [vmem:[#allocation26_spill] sm:$0xff] }
 0x756   : > { %15876 = vst [vmem:[#allocation45_spill] sm:$0xff] %v12172_v46  ;;  %v15891_v46 = vld [vmem:[#allocation107_spill] sm:$0xff]  ;;  %6349 = vrot.lane.b32.xlu2 %v6197_v1, %s7944_s15  ;;  %v12221_v12 = vadd.f32 %v15893_v35, %v11858_v22  ;;  %v15894_v45 = vld [vmem:[#allocation109_spill] sm:$0xff]  ;;  %v15898_v1 = vld [vmem:[#allocation112_spill] sm:$0xff]  ;;  %v6205_v22 = vrot.slane %v5997_v60, 2  ;;  %v6206_v35 = vrot.slane %v5998_v6, 2 }
 0x757   : > { %15879 = vst [vmem:[#allocation46_spill] sm:$0xff] %v12177_v43  ;;  %v15890_v43 = vld [vmem:[#allocation355_spill] sm:$0xff]  ;;  %v12225_v14 = vadd.f32 %v15894_v45, %v11862_v50  ;;  %v15905_v6 = vld [vmem:[#allocation116_spill] sm:$0xff] }
 0x758   : > { %15882 = vst [vmem:[#allocation50_spill] sm:$0xff] %v12181_v18  ;;  %v12209_v25 = vadd.f32 %v15891_v46, %v15890_v43  ;;  %v12228_v43 = vld [vmem:[%s8223_s20 + $0xd0] sm:$0x3]  ;;  %v6202_v46 = vsel %vm4626_vm1, %v6200_v59, %v6201_v9  ;;  %v15900_v50 = vld [vmem:[#allocation39_spill] sm:$0xff]  ;;  %v15903_v59 = vld [vmem:[#allocation113_spill] sm:$0xff] }
 0x759   : > { %15883 = vst [vmem:[#allocation49_spill] sm:$0xff] %v12184_v17  ;;  %v15889_v17 = vld [vmem:[#allocation106_spill] sm:$0xff]  ;;  %6353 = vrot.lane.b32.xlu1 %v6202_v46, %s7944_s15  ;;  %v12244_v45 = vadd.f32 %v15900_v50, %v11892_v19  ;;  %v12260_v46 = vadd.f32 %v15905_v6, %v11900_v31  ;;  %v15907_v19 = vld [vmem:[#allocation115_spill] sm:$0xff]  ;;  %v5883_v50 = vpop.permute.xlu0 %5882  ;;  %v15911_v31 = vld [vmem:[#allocation53_spill] sm:$0xff] }
 0x75a   : > { %15884 = vst [vmem:[#allocation51_spill] sm:$0xff] %v12189_v0  ;;  %v12205_v18 = vadd.f32 %v15889_v17, %v15888_v8  ;;  %v15892_v0 = vld [vmem:[#allocation108_spill] sm:$0xff]  ;;  %v15896_v17 = vld [vmem:[#allocation110_spill] sm:$0xff]  ;;  %v12239_v8 = vadd.f32 %v15898_v1, %v15897_v24  ;;  %v15904_v24 = vld [vmem:[#allocation43_spill] sm:$0xff]  ;;  %v12264_v1 = vadd.f32 %v15907_v19, %v11921_v63 }
 0x75b   : > { %15887 = vst [vmem:[#allocation54_spill] sm:$0xff] %v12198_v33  ;;  %v12213_v4 = vadd.f32 %v15892_v0, %v11854_v54  ;;  %v5999_v54 = vmul.f32 %v12228_v43, %v11956_v28  ;;  %v12235_v0 = vadd.f32 %v15896_v17, %v11866_v47  ;;  %v15901_v33 = vld [vmem:[#allocation363_spill] sm:$0xff]  ;;  %v15902_v28 = vld [vmem:[#allocation114_spill] sm:$0xff]  ;;  %v12252_v47 = vadd.f32 %v15903_v59, %v11896_v16 }
 0x75c   : > { %15895 = vst [vmem:[#allocation55_spill] sm:$0xff] %v12228_v43  ;;  %v12248_v43 = vadd.f32 %v15902_v28, %v15901_v33  ;;  %v6203_v17 = vrot.slane %v5996_v51, 2  ;;  %v12256_v60 = vadd.f32 %v15904_v24, %v11906_v7  ;;  %v15908_v33 = vld [vmem:[#allocation48_spill] sm:$0xff]  ;;  %v15909_v51 = vld [vmem:[#allocation117_spill] sm:$0xff]  ;;  %v15910_v7 = vld [vmem:[#allocation47_spill] sm:$0xff]  ;;  %v12280_v24 = vadd.f32 %v15911_v31, %v11942_v32 }
 0x75d   : > { %15899 = vst [vmem:[#allocation56_spill] sm:$0xff] %v12239_v8  ;;  %v12268_v16 = vadd.f32 %v15908_v33, %v11925_v10  ;;  %v12272_v28 = vadd.f32 %v15909_v51, %v11929_v49  ;;  %v12276_v59 = vadd.f32 %v15910_v7, %v11933_v39  ;;  %v6208_v63 = vrot.slane %v5999_v54, 2  ;;  %v15912_v6 = vld [vmem:[#allocation118_spill] sm:$0xff]  ;;  %v15914_v10 = vld [vmem:[#allocation52_spill] sm:$0xff]  ;;  %v5887_v39 = vpop.permute.xlu1 %5886  ;;  %v12296_v32 = vld [vmem:[%s8223_s20 + $0xd8] sm:$0xff] }
 0x75e   : > { %15906 = vst [vmem:[#allocation60_spill] sm:$0xff] %v12260_v46  ;;  %v12284_v19 = vadd.f32 %v15912_v6, %v11938_v41  ;;  %v12288_v33 = vadd.f32 %v15914_v10, %v11946_v57  ;;  %v15915_v49 = vld [vmem:[#allocation58_spill] sm:$0xff]  ;;  %v6207_v7 = vsel %vm4626_vm1, %v6205_v22, %v6206_v35  ;;  %v6000_v54 = vmul.f32 %v12296_v32, %v5883_v50  ;;  %v12304_v6 = vld [vmem:[%s8223_s20 + $0xe8] sm:$0x3]  ;;  %v15918_v22 = vld [vmem:[#allocation57_spill] sm:$0xff] }
 0x75f   : > { %v12292_v51 = vadd.f32 %v15915_v49, %v11950_v36  ;;  %v12300_v31 = vld [vmem:[%s8223_s20 + $0xe0] sm:$0xff]  ;;  %v6002_v57 = vmul.f32 %v12304_v6, %v5883_v50  ;;  %v6204_v36 = vsel %vm4626_vm1, %v6201_v9, %v6203_v17  ;;  %v15917_v10 = vld [vmem:[#allocation119_spill] sm:$0xff]  ;;  %6357 = vrot.lane.b32.xlu0 %v6207_v7, %s7944_s15  ;;  %v12327_v9 = vld [vmem:[%s8223_s20 + $0xf0] sm:$0xff] }
 0x760   : > { %15913 = vst [vmem:[#allocation59_spill] sm:$0xff] %v12284_v19  ;;  %v6001_v41 = vmul.f32 %v12300_v31, %v5883_v50  ;;  %v12310_v49 = vadd.f32 %v15917_v10, %v11954_v29  ;;  %v12314_v19 = vadd.f32 %v15918_v22, %v11960_v3  ;;  %v15920_v46 = vld [vmem:[#allocation62_spill] sm:$0xff]  ;;  %6355 = vrot.lane.b32.xlu2 %v6204_v36, %s7944_s15  ;;  %v15922_v50 = vld [vmem:[#allocation120_spill] sm:$0xff]  ;;  %v12331_v17 = vld [vmem:[%s8223_s20 + $0xf8] sm:$0xff] }
 0x761   : > { %15916 = vst [vmem:[#allocation61_spill] sm:$0xff] %v12292_v51  ;;  %v12318_v51 = vadd.f32 %v15920_v46, %v11969_v5  ;;  %v12324_v8 = vadd.f32 %v15922_v50, %v11973_v23  ;;  %v6003_v29 = vmul.f32 %v12327_v9, %v5887_v39  ;;  %v12334_v3 = vmul.f32 %v12331_v17, %v5887_v39  ;;  %v15925_v46 = vld [vmem:[#allocation371_spill] sm:$0xff]  ;;  %v15926_v10 = vld [vmem:[#allocation121_spill] sm:$0xff]  ;;  %v15928_v36 = vld [vmem:[#allocation66_spill] sm:$0xff] }
 0x762   : > { %15919 = vst [vmem:[#allocation63_spill] sm:$0xff] %v12314_v19  ;;  %v6209_v5 = vsel %vm4626_vm1, %v6206_v35, %v6208_v63  ;;  %v12339_v7 = vadd.f32 %v15926_v10, %v15925_v46  ;;  %v12343_v22 = vadd.f32 %v15928_v36, %v11997_v48  ;;  %v15930_v23 = vld [vmem:[#allocation123_spill] sm:$0xff]  ;;  %v15931_v19 = vld [vmem:[#allocation122_spill] sm:$0xff]  ;;  %v15933_v35 = vld [vmem:[#allocation124_spill] sm:$0xff]  ;;  %v6210_v48 = vrot.slane %v6000_v54, 2 }
 0x763   : > { %15921 = vst [vmem:[#allocation64_spill] sm:$0xff] %v12318_v51  ;;  %v12347_v50 = vadd.f32 %v15930_v23, %v11987_v20  ;;  %v12351_v51 = vadd.f32 %v15931_v19, %v12001_v42  ;;  %6359 = vrot.lane.b32.xlu1 %v6209_v5, %s7944_s15  ;;  %v12358_v63 = vadd.f32 %v15933_v35, %v12011_v30  ;;  %v6211_v46 = vrot.slane %v6001_v41, 2  ;;  %v15935_v20 = vld [vmem:[#allocation126_spill] sm:$0xff]  ;;  %v15937_v42 = vld [vmem:[#allocation125_spill] sm:$0xff]  ;;  %v15938_v23 = vld [vmem:[#allocation127_spill] sm:$0xff] }
 0x764   : > { %15923 = vst [vmem:[#allocation65_spill] sm:$0xff] %v12327_v9  ;;  %v6213_v10 = vrot.slane %v6002_v57, 2  ;;  %v12362_v36 = vadd.f32 %v15935_v20, %v12005_v13  ;;  %v12366_v19 = vadd.f32 %v15937_v42, %v12015_v34  ;;  %v12370_v5 = vadd.f32 %v15938_v23, %v12025_v40  ;;  %v15940_v30 = vld [vmem:[#allocation128_spill] sm:$0xff]  ;;  %v15942_v54 = vld [vmem:[#allocation129_spill] sm:$0xff]  ;;  %v15944_v13 = vld [vmem:[#allocation130_spill] sm:$0xff] }
 0x765   : > { %15924 = vst [vmem:[#allocation67_spill] sm:$0xff] %v12331_v17  ;;  %v12353_v17 = vpop.permute.xlu2 %5914  ;;  %v12374_v35 = vadd.f32 %v15940_v30, %v12034_v56  ;;  %v12378_v41 = vadd.f32 %v15942_v54, %v12029_v62  ;;  %v12382_v57 = vadd.f32 %v15944_v13, %v12038_v38  ;;  %v6215_v20 = vrot.slane %v6003_v29, 2  ;;  %v15946_v42 = vld [vmem:[#allocation132_spill] sm:$0xff]  ;;  %v15948_v40 = vld [vmem:[#allocation131_spill] sm:$0xff]  ;;  %v5895_v29 = vpop.permute.xlu0 %5894  ;;  %v12408_v54 = vld [vmem:[%s8223_s20 + $0x100] sm:$0x3] }
 0x766   : > { %15927 = vst [vmem:[#allocation68_spill] sm:$0xff] %v12339_v7  ;;  %v6216_v34 = vrot.slane %v12334_v3, 2  ;;  %v12391_v23 = vadd.f32 %v15948_v40, %v12046_v11  ;;  %v12394_v56 = vld [vmem:[%s8223_s20 + $0x108] sm:$0xff]  ;;  %v12399_v30 = vld [vmem:[%s8223_s20 + $0x110] sm:$0xff]  ;;  %v15951_v3 = vld [vmem:[#allocation133_spill] sm:$0xff]  ;;  %v6005_v11 = vmul.f32 %v12408_v54, %v5887_v39  ;;  %v6214_v13 = vsel %vm4626_vm1, %v6211_v46, %v6213_v10 }
 0x767   : > { %15929 = vst [vmem:[#allocation69_spill] sm:$0xff] %v12343_v22  ;;  %v6006_v62 = vmul.f32 %v12394_v56, %v12084_v55  ;;  %v6007_v38 = vmul.f32 %v12399_v30, %v12084_v55  ;;  %v15954_v40 = vld [vmem:[#allocation135_spill] sm:$0xff]  ;;  %v15956_v7 = vld [vmem:[#allocation134_spill] sm:$0xff]  ;;  %6363 = vrot.lane.b32.xlu0 %v6214_v13, %s7944_s15 }
 0x768   : > { %15932 = vst [vmem:[#allocation70_spill] sm:$0xff] %v12351_v51  ;;  %v15960_v39 = vld [vmem:[#allocation138_spill] sm:$0xff]  ;;  %v12529_v51 = vld [vmem:[%s8223_s20 + $0x138] sm:$0xff] }
 0x769   : > { %15934 = vst [vmem:[#allocation71_spill] sm:$0xff] %v12358_v63  ;;  %v15965_v10 = vld [vmem:[#allocation30_spill] sm:$0xff]  ;;  %v16010_v63 = vld [vmem:[#allocation361_spill] sm:$0xff] }
 0x76a   : > { %15936 = vst [vmem:[#allocation72_spill] sm:$0xff] %v12362_v36  ;;  %v12387_v36 = vadd.f32 %v15946_v42, %v12042_v53  ;;  %v12405_v53 = vadd.f32 %v15951_v3, %v12050_v44  ;;  %v6212_v42 = vsel %vm4626_vm1, %v6210_v48, %v6211_v46  ;;  %v12425_v3 = vpop.permute.xlu1 %5898  ;;  %v12431_v48 = vadd.f32 %v15960_v39, %v12066_v26 }
 0x76b   : > { %15939 = vst [vmem:[#allocation74_spill] sm:$0xff] %v12370_v5  ;;  %6361 = vrot.lane.b32.xlu2 %v6212_v42, %s7944_s15  ;;  %v15968_v42 = vld [vmem:[#allocation31_spill] sm:$0xff]  ;;  %v6220_v26 = vrot.slane %v6006_v62, 2  ;;  %v6221_v39 = vrot.slane %v6007_v38, 2  ;;  %v15982_v38 = vld [vmem:[#allocation34_spill] sm:$0xff]  ;;  %v16005_v5 = vld [vmem:[#allocation12_spill] sm:$0xff] }
 0x76c   : > { %15941 = vst [vmem:[#allocation73_spill] sm:$0xff] %v12374_v35  ;;  %v15958_v35 = vld [vmem:[#allocation136_spill] sm:$0xff] }
 0x76d   : > { %15943 = vst [vmem:[#allocation75_spill] sm:$0xff] %v12378_v41  ;;  %v12423_v44 = vadd.f32 %v15958_v35, %v12062_v2  ;;  %v15966_v35 = vld [vmem:[#allocation139_spill] sm:$0xff] }
 0x76e   : > { %15945 = vst [vmem:[#allocation77_spill] sm:$0xff] %v12382_v57  ;;  %v12419_v57 = vadd.f32 %v15956_v7, %v12058_v37  ;;  %v12438_v37 = vld [vmem:[%s8223_s20 + $0x118] sm:$0x3]  ;;  %v6217_v7 = vsel %vm4626_vm1, %v6215_v20, %v6216_v34  ;;  %v12445_v13 = vadd.f32 %v15966_v35, %v15965_v10  ;;  %v15976_v20 = vld [vmem:[#allocation391_spill] sm:$0xff]  ;;  %v6218_v35 = vrot.slane %v6005_v11, 2 }
 0x76f   : > { %15947 = vst [vmem:[#allocation76_spill] sm:$0xff] %v12387_v36  ;;  %v12415_v36 = vadd.f32 %v15954_v40, %v12054_v52  ;;  %v15962_v52 = vld [vmem:[#allocation137_spill] sm:$0xff]  ;;  %v6008_v2 = vmul.f32 %v12438_v37, %v12084_v55  ;;  %v15969_v40 = vld [vmem:[#allocation140_spill] sm:$0xff]  ;;  %6365 = vrot.lane.b32.xlu1 %v6217_v7, %s7944_s15  ;;  %v15974_v55 = vld [vmem:[#allocation142_spill] sm:$0xff] }
 0x770   : > { %15949 = vst [vmem:[#allocation78_spill] sm:$0xff] %v12394_v56  ;;  %v12435_v46 = vadd.f32 %v15962_v52, %v12070_v58  ;;  %v15971_v58 = vld [vmem:[#allocation381_spill] sm:$0xff]  ;;  %v15991_v11 = vld [vmem:[#allocation35_spill] sm:$0xff]  ;;  %v16022_v56 = vld [vmem:[#allocation32_spill] sm:$0xff] }
 0x771   : > { %15950 = vst [vmem:[#allocation80_spill] sm:$0xff] %v12399_v30  ;;  %v15972_v52 = vld [vmem:[#allocation141_spill] sm:$0xff] }
 0x772   : > { %15952 = vst [vmem:[#allocation79_spill] sm:$0xff] %v12405_v53  ;;  %v15977_v53 = vld [vmem:[#allocation143_spill] sm:$0xff]  ;;  %v15983_v7 = vld [vmem:[#allocation145_spill] sm:$0xff] }
 0x773   : > { %15953 = vst [vmem:[#allocation81_spill] sm:$0xff] %v12408_v54  ;;  %v12462_v10 = vadd.f32 %v15977_v53, %v15976_v20  ;;  %v12480_v53 = vpop.permute.xlu2 %5926  ;;  %v15992_v20 = vld [vmem:[#allocation148_spill] sm:$0xff]  ;;  %v16019_v30 = vld [vmem:[#allocation41_spill] sm:$0xff] }
 0x774   : > { %15955 = vst [vmem:[#allocation83_spill] sm:$0xff] %v12415_v36 }
 0x775   : > { %15957 = vst [vmem:[#allocation82_spill] sm:$0xff] %v12419_v57  ;;  %v12458_v57 = vadd.f32 %v15974_v55, %v12102_v27  ;;  %v15988_v55 = vld [vmem:[#allocation38_spill] sm:$0xff] }
 0x776   : > { %15959 = vst [vmem:[#allocation84_spill] sm:$0xff] %v12423_v44  ;;  %v12449_v44 = vadd.f32 %v15969_v40, %v15968_v42  ;;  %v15979_v42 = vld [vmem:[#allocation390_spill] sm:$0xff]  ;;  %v15980_v40 = vld [vmem:[#allocation144_spill] sm:$0xff] }
 0x777   : > { %15961 = vst [vmem:[#allocation86_spill] sm:$0xff] %v12431_v48  ;;  %v12454_v48 = vadd.f32 %v15972_v52, %v15971_v58  ;;  %v12466_v62 = vadd.f32 %v15980_v40, %v15979_v42  ;;  %v15985_v58 = vld [vmem:[#allocation33_spill] sm:$0xff]  ;;  %v15986_v52 = vld [vmem:[#allocation147_spill] sm:$0xff]  ;;  %v15994_v42 = vld [vmem:[#allocation36_spill] sm:$0xff] }
 0x778   : > { %15963 = vst [vmem:[#allocation85_spill] sm:$0xff] %v12435_v46  ;;  %v12474_v27 = vadd.f32 %v15986_v52, %v15985_v58  ;;  %v15995_v40 = vld [vmem:[#allocation150_spill] sm:$0xff]  ;;  %v6223_v58 = vrot.slane %v6008_v2, 2  ;;  %v16000_v52 = vld [vmem:[#allocation40_spill] sm:$0xff]  ;;  %v12547_v46 = vpop.permute.xlu1 %5910 }
 0x779   : > { %15964 = vst [vmem:[#allocation10_spill] sm:$0xff] %v12438_v37 }
 0x77a   : > { %15967 = vst [vmem:[#allocation87_spill] sm:$0xff] %v12445_v13 }
 0x77b   : > { %15970 = vst [vmem:[#allocation4_spill] sm:$0xff] %v12449_v44  ;;  %v12470_v44 = vadd.f32 %v15983_v7, %v15982_v38  ;;  %v15997_v38 = vld [vmem:[#allocation37_spill] sm:$0xff] }
 0x77c   : > { %15973 = vst [vmem:[#allocation89_spill] sm:$0xff] %v12454_v48  ;;  %v12484_v48 = vadd.f32 %v15992_v20, %v15991_v11  ;;  %v15998_v7 = vld [vmem:[#allocation149_spill] sm:$0xff]  ;;  %v6222_v20 = vsel %vm4626_vm1, %v6220_v26, %v6221_v39  ;;  %v16008_v26 = vld [vmem:[#allocation364_spill] sm:$0xff] }
 0x77d   : > { %15975 = vst [vmem:[#allocation6_spill] sm:$0xff] %v12458_v57  ;;  %v15989_v57 = vld [vmem:[#allocation146_spill] sm:$0xff]  ;;  %6369 = vrot.lane.b32.xlu0 %v6222_v20, %s7944_s15  ;;  %v16014_v20 = vld [vmem:[#allocation152_spill] sm:$0xff] }
 0x77e   : > { %15978 = vst [vmem:[#allocation88_spill] sm:$0xff] %v12462_v10  ;;  %v12478_v13 = vadd.f32 %v15989_v57, %v15988_v55  ;;  %v16003_v57 = vld [vmem:[#allocation156_spill] sm:$0xff]  ;;  %v16004_v55 = vld [vmem:[#allocation11_spill] sm:$0xff]  ;;  %v12522_v10 = vpop.permute.xlu0 %5906 }
 0x77f   : > { %15981 = vst [vmem:[#allocation90_spill] sm:$0xff] %v12466_v62  ;;  %v12488_v62 = vadd.f32 %v15995_v40, %v15994_v42  ;;  %v2063_v11 = vmul.f32 %v16005_v5, %v16003_v57  ;;  %v12504_v42 = vld [vmem:[%s8223_s20 + $0x120] sm:$0xff]  ;;  %v16006_v5 = vld [vmem:[#allocation13_spill] sm:$0xff] }
 0x780   : > { %15984 = vst [vmem:[#allocation91_spill] sm:$0xff] %v12470_v44  ;;  %v12492_v44 = vadd.f32 %v15998_v7, %v15997_v38  ;;  %v6009_v40 = vmul.f32 %v12504_v42, %v5895_v29  ;;  %v12508_v38 = vld [vmem:[%s8223_s20 + $0x128] sm:$0xff] }
 0x781   : > { %15987 = vst [vmem:[#allocation16_spill] sm:$0xff] %v12474_v27  ;;  %v16001_v27 = vld [vmem:[#allocation151_spill] sm:$0xff]  ;;  %v6010_v2 = vmul.f32 %v12508_v38, %v5895_v29  ;;  %v2256_v22 = vrot.slane %v2063_v11, 1 }
 0x782   : > { %15990 = vst [vmem:[#allocation92_spill] sm:$0xff] %v12478_v13  ;;  %v12496_v36 = vadd.f32 %v16001_v27, %v16000_v52  ;;  %v2062_v13 = vmul.f32 %v16004_v55, %v16003_v57  ;;  %v12512_v27 = vld [vmem:[%s8223_s20 + $0x130] sm:$0x3]  ;;  %v6219_v52 = vsel %vm4626_vm1, %v6216_v34, %v6218_v35  ;;  %v2064_v55 = vmul.f32 %v16006_v5, %v16003_v57  ;;  %v12534_v35 = vld [vmem:[%s8223_s20 + $0x140] sm:$0xff] }
 0x783   : > { %15993 = vst [vmem:[#allocation17_spill] sm:$0xff] %v12484_v48  ;;  %v6011_v7 = vmul.f32 %v12512_v27, %v5895_v29  ;;  %v16009_v48 = vld [vmem:[#allocation27_spill] sm:$0xff]  ;;  %6367 = vrot.lane.b32.xlu2 %v6219_v52, %s7944_s15  ;;  %v6012_v34 = vmul.f32 %v12529_v51, %v12425_v3  ;;  %v12538_v57 = vmul.f32 %v12534_v35, %v12425_v3  ;;  %v16013_v5 = vld [vmem:[#allocation42_spill] sm:$0xff]  ;;  %v6225_v37 = vrot.slane %v6009_v40, 2 }
 0x784   : > { %15996 = vst [vmem:[#allocation93_spill] sm:$0xff] %v12488_v62  ;;  %v16007_v62 = vld [vmem:[#allocation159_spill] sm:$0xff]  ;;  %v2255_v52 = vrot.slane %v2062_v13, 1  ;;  %v2258_v13 = vrot.slane %v2064_v55, 1 }
 0x785   : > { %15999 = vst [vmem:[#allocation5_spill] sm:$0xff] %v12492_v44  ;;  %v2072_v44 = vmul.f32 %v16009_v48, %v16007_v62  ;;  %v2073_v29 = vmul.f32 %v16010_v63, %v16007_v62  ;;  %v6224_v48 = vsel %vm4626_vm1, %v6221_v39, %v6223_v58  ;;  %v16016_v63 = vld [vmem:[#allocation162_spill] sm:$0xff]  ;;  %v6226_v39 = vrot.slane %v6010_v2, 2  ;;  %v12561_v2 = vld [vmem:[%s8223_s20 + $0x150] sm:$0xff]  ;;  %v12573_v55 = vld [vmem:[%s8223_s20 + $0x148] sm:$0x3] }
 0x786   : > { %16002 = vst [vmem:[#allocation95_spill] sm:$0xff] %v12496_v36  ;;  %v2071_v36 = vmul.f32 %v16008_v26, %v16007_v62  ;;  %v12543_v26 = vadd.f32 %v16014_v20, %v16013_v5  ;;  %v16017_v62 = vld [vmem:[#allocation379_spill] sm:$0xff]  ;;  %6371 = vrot.lane.b32.xlu1 %v6224_v48, %s7944_s15  ;;  %v6228_v58 = vrot.slane %v6011_v7, 2  ;;  %v16020_v5 = vld [vmem:[#allocation153_spill] sm:$0xff]  ;;  %v2082_v54 = vmul.f32 %v16022_v56, %v16016_v63 }
 0x787   : > { %16011 = vst [vmem:[#allocation8_spill] sm:$0xff] %v12529_v51  ;;  %v2080_v41 = vmul.f32 %v16017_v62, %v16016_v63  ;;  %v16018_v51 = vld [vmem:[#allocation380_spill] sm:$0xff]  ;;  %v12554_v20 = vadd.f32 %v16020_v5, %v16019_v30  ;;  %v2271_v62 = vrot.slane %v2072_v44, 1  ;;  %v6230_v48 = vrot.slane %v6012_v34, 2  ;;  %v12566_v7 = vld [vmem:[%s8223_s20 + $0x158] sm:$0xff]  ;;  %v12570_v44 = vpop.permute.xlu2 %5938 }
 0x788   : > { %16012 = vst [vmem:[#allocation94_spill] sm:$0xff] %v12534_v35  ;;  %v2081_v35 = vmul.f32 %v16018_v51, %v16016_v63  ;;  %v2270_v11 = vrot.slane %v2071_v36, 1  ;;  %v6231_v9 = vrot.slane %v12538_v57, 2  ;;  %v2257_v40 = vsel %vm2254_vm0, %v2255_v52, %v2256_v22  ;;  %v16023_v57 = vld [vmem:[#allocation154_spill] sm:$0xff] }
 0x789   : > { %16015 = vst [vmem:[#allocation354_spill] sm:$0xff] %v12543_v26  ;;  %v2273_v26 = vrot.slane %v2073_v29, 1  ;;  %v2285_v51 = vrot.slane %v2080_v41, 1  ;;  %v6015_v30 = vmul.f32 %v12561_v2, %v12215_v15  ;;  %v6016_v36 = vmul.f32 %v12566_v7, %v12215_v15 }
 0x78a   : > { %16021 = vst [vmem:[#allocation96_spill] sm:$0xff] %v12554_v20  ;;  %v2286_v56 = vrot.slane %v2081_v35, 1  ;;  %v6014_v41 = vmul.f32 %v12573_v55, %v12425_v3  ;;  %v6229_v29 = vsel %vm4626_vm1, %v6226_v39, %v6228_v58  ;;  %v6227_v34 = vsel %vm4626_vm1, %v6225_v37, %v6226_v39  ;;  %v12589_v3 = vld [vmem:[%s8223_s20 + $0x160] sm:$0x3]  ;;  %v16026_v58 = vld [vmem:[#allocation155_spill] sm:$0xff] }
 0x78b   : > { %v12581_v52 = vadd.f32 %v16023_v57, %v12164_v21  ;;  %v2259_v63 = vsel %vm2254_vm0, %v2256_v22, %v2258_v13  ;;  %v2272_v5 = vsel %vm2254_vm0, %v2270_v11, %v2271_v62  ;;  %6375 = vrot.lane.b32.xlu0 %v6229_v29, %s7944_s15  ;;  %6373 = vrot.lane.b32.xlu2 %v6227_v34, %s7944_s15  ;;  %v2288_v35 = vrot.slane %v2082_v54, 1  ;;  %v16025_v21 = vld [vmem:[#allocation44_spill] sm:$0xff]  ;;  %v12601_v29 = vpop.permute.xlu0 %5918  ;;  %v16029_v54 = vld [vmem:[#allocation45_spill] sm:$0xff] }
 0x78c   : > { %v2274_v20 = vsel %vm2254_vm0, %v2271_v62, %v2273_v26  ;;  %v6017_v37 = vmul.f32 %v12589_v3, %v12215_v15  ;;  %v6232_v39 = vsel %vm4626_vm1, %v6230_v48, %v6231_v9  ;;  %v12596_v57 = vadd.f32 %v16026_v58, %v16025_v21  ;;  %v16030_v26 = vld [vmem:[#allocation157_spill] sm:$0xff]  ;;  %v16033_v21 = vld [vmem:[#allocation46_spill] sm:$0xff] }
 0x78d   : > { %16024 = vst [vmem:[#allocation21_spill] sm:$0xff] %v12581_v52  ;;  %v12599_v22 = vadd.f32 %v2257_v40, %v12221_v12  ;;  %v6235_v13 = vrot.slane %v6015_v30, 2  ;;  %v6236_v11 = vrot.slane %v6016_v36, 2  ;;  %v12606_v62 = vadd.f32 %v16030_v26, %v16029_v54  ;;  %v16034_v12 = vld [vmem:[#allocation158_spill] sm:$0xff]  ;;  %v16036_v30 = vld [vmem:[#allocation165_spill] sm:$0xff] }
 0x78e   : > { %16027 = vst [vmem:[#allocation98_spill] sm:$0xff] %v12596_v57  ;;  %6377 = vrot.lane.b32.xlu1 %v6232_v39, %s7944_s15  ;;  %v12609_v15 = vadd.f32 %v2259_v63, %v12213_v4  ;;  %v2287_v48 = vsel %vm2254_vm0, %v2285_v51, %v2286_v56  ;;  %v6233_v34 = vrot.slane %v6014_v41, 2  ;;  %v12614_v40 = vadd.f32 %v16034_v12, %v16033_v21  ;;  %v12626_v63 = vpop.permute.xlu1 %5922  ;;  %v16039_v51 = vld [vmem:[#allocation50_spill] sm:$0xff]  ;;  %v16040_v41 = vld [vmem:[#allocation160_spill] sm:$0xff]  ;;  %v16042_v54 = vld [vmem:[#allocation161_spill] sm:$0xff] }
 0x78f   : > { %16028 = vst [vmem:[#allocation97_spill] sm:$0xff] %v12599_v22  ;;  %v12618_v36 = vmul.f32 %v12296_v32, %v16036_v30  ;;  %v12621_v39 = vadd.f32 %v2272_v5, %v12264_v1  ;;  %v12624_v4 = vadd.f32 %v2274_v20, %v12235_v0  ;;  %v12630_v58 = vadd.f32 %v16040_v41, %v16039_v51  ;;  %v12646_v12 = vld [vmem:[%s8223_s20 + $0x168] sm:$0xff]  ;;  %v16048_v51 = vld [vmem:[#allocation14_spill] sm:$0xff] }
 0x790   : > { %16031 = vst [vmem:[#allocation22_spill] sm:$0xff] %v12606_v62  ;;  %v12634_v26 = vadd.f32 %v16042_v54, %v12195_v61  ;;  %v2289_v32 = vsel %vm2254_vm0, %v2286_v56, %v2288_v35  ;;  %v6238_v21 = vrot.slane %v6017_v37, 2  ;;  %v2090_v1 = vmul.f32 %v12300_v31, %v16036_v30  ;;  %v12651_v56 = vld [vmem:[%s8223_s20 + $0x170] sm:$0xff]  ;;  %v12656_v35 = vld [vmem:[%s8223_s20 + $0x178] sm:$0x3]  ;;  %v16045_v37 = vld [vmem:[#allocation163_spill] sm:$0xff] }
 0x791   : > { %16032 = vst [vmem:[#allocation99_spill] sm:$0xff] %v12609_v15  ;;  %v2091_v0 = vmul.f32 %v12304_v6, %v16036_v30  ;;  %v12642_v20 = vadd.f32 %v2287_v48, %v12288_v33  ;;  %v6237_v5 = vsel %vm4626_vm1, %v6235_v13, %v6236_v11  ;;  %v6018_v61 = vmul.f32 %v12646_v12, %v12522_v10  ;;  %v16047_v30 = vld [vmem:[#allocation166_spill] sm:$0xff]  ;;  %v12733_v57 = vld [vmem:[%s8223_s20 + $0x1a8] sm:$0x3] }
 0x792   : > { %16035 = vst [vmem:[#allocation7_spill] sm:$0xff] %v12614_v40  ;;  %v6019_v31 = vmul.f32 %v12651_v56, %v12522_v10  ;;  %v6020_v33 = vmul.f32 %v12656_v35, %v12522_v10  ;;  %v6234_v6 = vsel %vm4626_vm1, %v6231_v9, %v6233_v34  ;;  %v12663_v13 = vadd.f32 %v16045_v37, %v12205_v18  ;;  %v16050_v9 = vld [vmem:[#allocation15_spill] sm:$0xff]  ;;  %v12678_v34 = vld [vmem:[%s8223_s20 + $0x180] sm:$0xff]  ;;  %v12709_v40 = vld [vmem:[%s8223_s20 + $0x198] sm:$0xff] }
 0x793   : > { %16037 = vst [vmem:[#allocation100_spill] sm:$0xff] %v12621_v39  ;;  %v2300_v48 = vrot.slane %v12618_v36, 1  ;;  %v2065_v41 = vmul.f32 %v16048_v51, %v16047_v30  ;;  %v12669_v54 = vadd.f32 %v2289_v32, %v12248_v43  ;;  %6381 = vrot.lane.b32.xlu0 %v6237_v5, %s7944_s15  ;;  %6379 = vrot.lane.b32.xlu2 %v6234_v6, %s7944_s15  ;;  %v12683_v36 = vld [vmem:[%s8223_s20 + $0x188] sm:$0xff]  ;;  %v2301_v37 = vrot.slane %v2090_v1, 1  ;;  %v16051_v6 = vld [vmem:[#allocation20_spill] sm:$0xff]  ;;  %v16054_v1 = vld [vmem:[#allocation18_spill] sm:$0xff] }
 0x794   : > { %16038 = vst [vmem:[#allocation358_spill] sm:$0xff] %v12624_v4  ;;  %v2066_v10 = vmul.f32 %v16050_v9, %v16047_v30  ;;  %v6021_v18 = vmul.f32 %v12678_v34, %v12547_v46  ;;  %v12687_v43 = vmul.f32 %v12683_v36, %v12547_v46  ;;  %v6239_v32 = vsel %vm4626_vm1, %v6236_v11, %v6238_v21  ;;  %v16053_v21 = vld [vmem:[#allocation167_spill] sm:$0xff] }
 0x795   : > { %16041 = vst [vmem:[#allocation101_spill] sm:$0xff] %v12630_v58  ;;  %v2303_v5 = vrot.slane %v2091_v0, 1  ;;  %v2067_v51 = vmul.f32 %v16051_v6, %v16047_v30  ;;  %v6240_v39 = vrot.slane %v6018_v61, 2  ;;  %v6241_v15 = vrot.slane %v6019_v31, 2 }
 0x796   : > { %16043 = vst [vmem:[#allocation24_spill] sm:$0xff] %v12634_v26  ;;  %6383 = vrot.lane.b32.xlu1 %v6239_v32, %s7944_s15  ;;  %v6243_v22 = vrot.slane %v6020_v33, 2  ;;  %v2068_v0 = vmul.f32 %v16054_v1, %v16053_v21  ;;  %v12703_v32 = vpop.permute.xlu0 %5930  ;;  %v2261_v6 = vrot.slane %v2066_v10, 1  ;;  %v6245_v58 = vrot.slane %v6021_v18, 2  ;;  %v12718_v10 = vpop.permute.xlu1 %5934 }
 0x797   : > { %16044 = vst [vmem:[#allocation102_spill] sm:$0xff] %v12642_v20  ;;  %v12671_v20 = vpop.permute.xlu2 %5950  ;;  %v6246_v31 = vrot.slane %v12687_v43, 2  ;;  %v2263_v33 = vrot.slane %v2067_v51, 1  ;;  %v6242_v51 = vsel %vm4626_vm1, %v6240_v39, %v6241_v15  ;;  %v2302_v62 = vsel %vm2254_vm0, %v2300_v48, %v2301_v37 }
 0x798   : > { %16046 = vst [vmem:[#allocation357_spill] sm:$0xff] %v12663_v13  ;;  %v2260_v13 = vrot.slane %v2065_v41, 1  ;;  %v6244_v43 = vsel %vm4626_vm1, %v6241_v15, %v6243_v22  ;;  %v2304_v52 = vsel %vm2254_vm0, %v2301_v37, %v2303_v5  ;;  %v2265_v15 = vrot.slane %v2068_v0, 1  ;;  %v16057_v5 = vld [vmem:[#allocation164_spill] sm:$0xff]  ;;  %v16060_v0 = vld [vmem:[#allocation169_spill] sm:$0xff] }
 0x799   : > { %16049 = vst [vmem:[#allocation103_spill] sm:$0xff] %v12669_v54  ;;  %v16052_v54 = vld [vmem:[#allocation168_spill] sm:$0xff]  ;;  %v6247_v22 = vsel %vm4626_vm1, %v6245_v58, %v6246_v31  ;;  %v2264_v39 = vsel %vm2254_vm0, %v2261_v6, %v2263_v33 }
 0x79a   : > { %v2098_v9 = vmul.f32 %v12504_v42, %v16052_v54  ;;  %v2099_v4 = vmul.f32 %v12508_v38, %v16052_v54  ;;  %v2100_v11 = vmul.f32 %v12512_v27, %v16052_v54  ;;  %v16055_v42 = vld [vmem:[#allocation19_spill] sm:$0xff]  ;;  %v6024_v27 = vmul.f32 %v12709_v40, %v12353_v17  ;;  %v12714_v54 = vld [vmem:[%s8223_s20 + $0x1a0] sm:$0xff]  ;;  %v16062_v33 = vld [vmem:[#allocation28_spill] sm:$0xff] }
 0x79b   : > { %v2069_v30 = vmul.f32 %v16055_v42, %v16053_v21  ;;  %v16056_v38 = vld [vmem:[#allocation23_spill] sm:$0xff]  ;;  %v6025_v1 = vmul.f32 %v12714_v54, %v12353_v17  ;;  %6387 = vrot.lane.b32.xlu0 %v6244_v43, %s7944_s15  ;;  %6385 = vrot.lane.b32.xlu2 %v6242_v51, %s7944_s15  ;;  %v2262_v26 = vsel %vm2254_vm0, %v2260_v13, %v2261_v6 }
 0x79c   : > { %v2070_v61 = vmul.f32 %v16056_v38, %v16053_v21  ;;  %v2315_v41 = vrot.slane %v2098_v9, 1  ;;  %v2316_v42 = vrot.slane %v2099_v4, 1  ;;  %v12721_v21 = vld [vmem:[%s8223_s20 + $0x190] sm:$0x3]  ;;  %v2318_v9 = vrot.slane %v2100_v11, 1 }
 0x79d   : > { %v6023_v18 = vmul.f32 %v12721_v21, %v12547_v46  ;;  %v2266_v38 = vrot.slane %v2069_v30, 1  ;;  %v6026_v46 = vmul.f32 %v12733_v57, %v12353_v17  ;;  %v6250_v48 = vrot.slane %v6024_v27, 2 }
 0x79e   : > { %v2268_v4 = vrot.slane %v2070_v61, 1  ;;  %v6251_v11 = vrot.slane %v6025_v1, 2  ;;  %6389 = vrot.lane.b32.xlu1 %v6247_v22, %s7944_s15  ;;  %v12744_v30 = vadd.f32 %v16057_v5, %v12209_v25  ;;  %v12747_v13 = vadd.f32 %v2302_v62, %v12324_v8  ;;  %v16061_v61 = vld [vmem:[#allocation362_spill] sm:$0xff]  ;;  %v16065_v8 = vld [vmem:[#allocation369_spill] sm:$0xff] }
 0x79f   : > { %v12739_v37 = vpop.permute.xlu2 %5962  ;;  %v2317_v17 = vsel %vm2254_vm0, %v2315_v41, %v2316_v42  ;;  %v6248_v58 = vrot.slane %v6023_v18, 2  ;;  %v2074_v6 = vmul.f32 %v16061_v61, %v16060_v0  ;;  %v2075_v27 = vmul.f32 %v16062_v33, %v16060_v0  ;;  %v12798_v61 = vld [vmem:[%s8223_s20 + $0x1c8] sm:$0xff] }
 0x7a0   : > { %16058 = vst [vmem:[#allocation9_spill] sm:$0xff] %v12744_v30  ;;  %v12755_v1 = vadd.f32 %v2262_v26, %v12244_v45  ;;  %v12758_v25 = vadd.f32 %v2304_v52, %v12272_v28  ;;  %v2076_v62 = vmul.f32 %v16065_v8, %v16060_v0  ;;  %v2269_v41 = vsel %vm2254_vm0, %v2266_v38, %v2268_v4  ;;  %v12771_v26 = vpop.permute.xlu0 %5942  ;;  %v7810_v52 = vld [vmem:[%s8223_s20 + $0x1b0] sm:$0xff]  ;;  %v12777_v4 = vld [vmem:[%s8223_s20 + $0x1b8] sm:$0xff] }
 0x7a1   : > { %16059 = vst [vmem:[#allocation104_spill] sm:$0xff] %v12747_v13  ;;  %v12764_v18 = vadd.f32 %v2264_v39, %v12252_v47  ;;  %v6253_v43 = vrot.slane %v6026_v46, 2  ;;  %v2267_v51 = vsel %vm2254_vm0, %v2265_v15, %v2266_v38  ;;  %v12768_v22 = vadd.f32 %v2317_v17, %v12366_v19  ;;  %v12782_v38 = vld [vmem:[%s8223_s20 + $0x1c0] sm:$0x3]  ;;  %v16068_v15 = vld [vmem:[#allocation171_spill] sm:$0xff]  ;;  %v12793_v17 = vpop.permute.xlu1 %5946 }
 0x7a2   : > { %16063 = vst [vmem:[#allocation356_spill] sm:$0xff] %v12755_v1  ;;  %v2319_v45 = vsel %vm2254_vm0, %v2316_v42, %v2318_v9  ;;  %v6252_v28 = vsel %vm4626_vm1, %v6250_v48, %v6251_v11  ;;  %v6027_v5 = vmul.f32 %v7810_v52, %v12601_v29  ;;  %v6028_v47 = vmul.f32 %v12777_v4, %v12601_v29 }
 0x7a3   : > { %16064 = vst [vmem:[#allocation105_spill] sm:$0xff] %v12758_v25  ;;  %v6029_v19 = vmul.f32 %v12782_v38, %v12601_v29  ;;  %v6249_v42 = vsel %vm4626_vm1, %v6246_v31, %v6248_v58  ;;  %v2275_v9 = vrot.slane %v2074_v6, 1  ;;  %v2276_v46 = vrot.slane %v2075_v27, 1  ;;  %6393 = vrot.lane.b32.xlu0 %v6252_v28, %s7944_s15  ;;  %v12803_v31 = vld [vmem:[%s8223_s20 + $0x1d0] sm:$0xff]  ;;  %v16069_v58 = vld [vmem:[#allocation170_spill] sm:$0xff]  ;;  %v16071_v27 = vld [vmem:[#allocation29_spill] sm:$0xff] }
 0x7a4   : > { %16066 = vst [vmem:[#allocation25_spill] sm:$0xff] %v12764_v18  ;;  %v2107_v39 = vmul.f32 %v12646_v12, %v16068_v15  ;;  %v12791_v48 = vmul.f32 %v12651_v56, %v16068_v15  ;;  %6391 = vrot.lane.b32.xlu2 %v6249_v42, %s7944_s15  ;;  %v2278_v0 = vrot.slane %v2076_v62, 1  ;;  %v6030_v29 = vmul.f32 %v12798_v61, %v12626_v63  ;;  %v16070_v6 = vld [vmem:[#allocation372_spill] sm:$0xff] }
 0x7a5   : > { %16067 = vst [vmem:[#allocation106_spill] sm:$0xff] %v12768_v22  ;;  %v12807_v12 = vmul.f32 %v12803_v31, %v12626_v63  ;;  %v6254_v56 = vsel %vm4626_vm1, %v6251_v11, %v6253_v43  ;;  %v2077_v33 = vmul.f32 %v16070_v6, %v16069_v58  ;;  %v2078_v8 = vmul.f32 %v16071_v27, %v16069_v58  ;;  %v16075_v22 = vld [vmem:[#allocation370_spill] sm:$0xff] }
 0x7a6   : > { %v12815_v62 = vadd.f32 %v2269_v41, %v12256_v60  ;;  %v12818_v28 = vadd.f32 %v2267_v51, %v12225_v14  ;;  %6395 = vrot.lane.b32.xlu1 %v6254_v56, %s7944_s15  ;;  %v2079_v11 = vmul.f32 %v16075_v22, %v16069_v58  ;;  %v6255_v43 = vrot.slane %v6027_v5, 2 }
 0x7a7   : > { %v12821_v42 = vpop.permute.xlu2 %6325  ;;  %v6256_v6 = vrot.slane %v6028_v47, 2  ;;  %v6258_v25 = vrot.slane %v6029_v19, 2  ;;  %v2109_v60 = vmul.f32 %v12656_v35, %v16068_v15  ;;  %v2330_v41 = vrot.slane %v2107_v39, 1  ;;  %v12835_v19 = vld [vmem:[%s8223_s20 + $0x1e0] sm:$0xff]  ;;  %v12840_v15 = vld [vmem:[%s8223_s20 + $0x1e8] sm:$0xff] }
 0x7a8   : > { %16072 = vst [vmem:[#allocation355_spill] sm:$0xff] %v12815_v62  ;;  %v2331_v14 = vrot.slane %v12791_v48, 1  ;;  %v12829_v51 = vadd.f32 %v2319_v45, %v12310_v49  ;;  %v2277_v56 = vsel %vm2254_vm0, %v2275_v9, %v2276_v46  ;;  %v2279_v27 = vsel %vm2254_vm0, %v2276_v46, %v2278_v0  ;;  %v12845_v9 = vld [vmem:[%s8223_s20 + $0x1d8] sm:$0x3] }
 0x7a9   : > { %16073 = vst [vmem:[#allocation107_spill] sm:$0xff] %v12818_v28  ;;  %v6261_v22 = vrot.slane %v12807_v12, 2  ;;  %v2280_v5 = vrot.slane %v2077_v33, 1  ;;  %v2281_v47 = vrot.slane %v2078_v8, 1  ;;  %v6033_v35 = vmul.f32 %v12835_v19, %v12480_v53  ;;  %v12858_v33 = vpop.permute.xlu0 %5954  ;;  %v16080_v8 = vld [vmem:[#allocation388_spill] sm:$0xff]  ;;  %v7820_v28 = vld [vmem:[%s8223_s20 + $0x200] sm:$0xff] }
 0x7aa   : > { %16074 = vst [vmem:[#allocation108_spill] sm:$0xff] %v12821_v42  ;;  %v6260_v42 = vrot.slane %v6030_v29, 2  ;;  %v6034_v49 = vmul.f32 %v12840_v15, %v12480_v53  ;;  %v2283_v45 = vrot.slane %v2079_v11, 1  ;;  %v6032_v46 = vmul.f32 %v12845_v9, %v12626_v63  ;;  %v16079_v63 = vld [vmem:[#allocation172_spill] sm:$0xff]  ;;  %v16081_v11 = vld [vmem:[#allocation389_spill] sm:$0xff] }
 0x7ab   : > { %16076 = vst [vmem:[#allocation111_spill] sm:$0xff] %v12829_v51  ;;  %v6259_v39 = vsel %vm4626_vm1, %v6256_v6, %v6258_v25  ;;  %v6257_v48 = vsel %vm4626_vm1, %v6255_v43, %v6256_v6  ;;  %v2333_v0 = vrot.slane %v2109_v60, 1  ;;  %v12852_v29 = vadd.f32 %v2277_v56, %v12268_v16  ;;  %v12867_v6 = vld [vmem:[%s8223_s20 + $0x1f0] sm:$0x3]  ;;  %v16082_v60 = vld [vmem:[#allocation54_spill] sm:$0xff]  ;;  %v12875_v51 = vpop.permute.xlu1 %5958 }
 0x7ac   : > { %v12855_v12 = vadd.f32 %v2279_v27, %v12276_v59  ;;  %v2332_v58 = vsel %vm2254_vm0, %v2330_v41, %v2331_v14  ;;  %6399 = vrot.lane.b32.xlu0 %v6259_v39, %s7944_s15  ;;  %6397 = vrot.lane.b32.xlu2 %v6257_v48, %s7944_s15  ;;  %v2083_v25 = vmul.f32 %v16080_v8, %v16079_v63  ;;  %v16083_v56 = vld [vmem:[#allocation174_spill] sm:$0xff]  ;;  %v6265_v39 = vrot.slane %v6033_v35, 2  ;;  %v16086_v35 = vld [vmem:[#allocation173_spill] sm:$0xff] }
 0x7ad   : > { %16077 = vst [vmem:[#allocation109_spill] sm:$0xff] %v12852_v29  ;;  %v2084_v43 = vmul.f32 %v16081_v11, %v16079_v63  ;;  %v6035_v16 = vmul.f32 %v12867_v6, %v12480_v53  ;;  %v6262_v59 = vsel %vm4626_vm1, %v6260_v42, %v6261_v22  ;;  %v2085_v41 = vmul.f32 %v16082_v60, %v16079_v63  ;;  %v12984_v62 = vld [vmem:[%s8223_s20 + $0x238] sm:$0x3] }
 0x7ae   : > { %16078 = vst [vmem:[#allocation110_spill] sm:$0xff] %v12855_v12  ;;  %v2116_v27 = vmul.f32 %v7810_v52, %v16083_v56  ;;  %v6266_v48 = vrot.slane %v6034_v49, 2  ;;  %6401 = vrot.lane.b32.xlu1 %v6262_v59, %s7944_s15  ;;  %v2284_v11 = vsel %vm2254_vm0, %v2281_v47, %v2283_v45  ;;  %v2282_v53 = vsel %vm2254_vm0, %v2280_v5, %v2281_v47  ;;  %v16087_v49 = vld [vmem:[#allocation49_spill] sm:$0xff]  ;;  %v16088_v59 = vld [vmem:[#allocation51_spill] sm:$0xff] }
 0x7af   : > { %v12878_v8 = vpop.permute.xlu2 %6331  ;;  %v12883_v42 = vadd.f32 %v2332_v58, %v12391_v23  ;;  %v6263_v63 = vrot.slane %v6032_v46, 2  ;;  %v2117_v52 = vmul.f32 %v12777_v4, %v16083_v56  ;;  %v2086_v60 = vmul.f32 %v16087_v49, %v16086_v35  ;;  %v16089_v45 = vld [vmem:[#allocation55_spill] sm:$0xff]  ;;  %v7819_v49 = vld [vmem:[%s8223_s20 + $0x1f8] sm:$0xff] }
 0x7b0   : > { %16084 = vst [vmem:[#allocation26_spill] sm:$0xff] %v12878_v8  ;;  %v2087_v8 = vmul.f32 %v16088_v59, %v16086_v35  ;;  %v2088_v13 = vmul.f32 %v16089_v45, %v16086_v35  ;;  %v2290_v12 = vrot.slane %v2083_v25, 1  ;;  %v2291_v5 = vrot.slane %v2084_v43, 1  ;;  %v12902_v25 = vld [vmem:[%s8223_s20 + $0x208] sm:$0x3]  ;;  %v12916_v45 = vld [vmem:[%s8223_s20 + $0x218] sm:$0xff] }
 0x7b1   : > { %16085 = vst [vmem:[#allocation112_spill] sm:$0xff] %v12883_v42  ;;  %v2334_v23 = vsel %vm2254_vm0, %v2331_v14, %v2333_v0  ;;  %v6268_v47 = vrot.slane %v6035_v16, 2  ;;  %v2293_v58 = vrot.slane %v2085_v41, 1  ;;  %v2118_v46 = vmul.f32 %v12782_v38, %v16083_v56 }
 0x7b2   : > { %v2345_v4 = vrot.slane %v2116_v27, 1  ;;  %v6267_v42 = vsel %vm4626_vm1, %v6265_v39, %v6266_v48  ;;  %v6036_v59 = vmul.f32 %v7819_v49, %v12703_v32  ;;  %v6037_v35 = vmul.f32 %v7820_v28, %v12703_v32  ;;  %v12911_v27 = vld [vmem:[%s8223_s20 + $0x210] sm:$0xff]  ;;  %16090 = vst [vmem:[#allocation39_spill] sm:$0xff] %v12916_v45 }
 0x7b3   : > { %v6038_v14 = vmul.f32 %v12902_v25, %v12703_v32  ;;  %v6264_v0 = vsel %vm4626_vm1, %v6261_v22, %v6263_v63  ;;  %v2346_v43 = vrot.slane %v2117_v52, 1  ;;  %v2295_v38 = vrot.slane %v2086_v60, 1  ;;  %v12932_v52 = vpop.permute.xlu0 %5966 }
 0x7b4   : > { %v2296_v16 = vrot.slane %v2087_v8, 1  ;;  %v2298_v41 = vrot.slane %v2088_v13, 1  ;;  %6405 = vrot.lane.b32.xlu0 %v6267_v42, %s7944_s15  ;;  %6403 = vrot.lane.b32.xlu2 %v6264_v0, %s7944_s15  ;;  %v2292_v56 = vsel %vm2254_vm0, %v2290_v12, %v2291_v5  ;;  %v6039_v39 = vmul.f32 %v12911_v27, %v12718_v10  ;;  %v16092_v42 = vld [vmem:[#allocation56_spill] sm:$0xff] }
 0x7b5   : > { %v12920_v32 = vmul.f32 %v12916_v45, %v12718_v10  ;;  %v6269_v22 = vsel %vm4626_vm1, %v6266_v48, %v6268_v47  ;;  %v2348_v13 = vrot.slane %v2118_v46, 1  ;;  %v12924_v8 = vadd.f32 %v2284_v11, %v12280_v24  ;;  %v16096_v11 = vld [vmem:[#allocation61_spill] sm:$0xff] }
 0x7b6   : > { %v12927_v63 = vadd.f32 %v2282_v53, %v16092_v42  ;;  %v12930_v12 = vadd.f32 %v2334_v23, %v12347_v50  ;;  %6407 = vrot.lane.b32.xlu1 %v6269_v22, %s7944_s15  ;;  %v2294_v0 = vsel %vm2254_vm0, %v2291_v5, %v2293_v58  ;;  %v6270_v48 = vrot.slane %v6036_v59, 2  ;;  %v12944_v22 = vpop.permute.xlu1 %5970  ;;  %v16098_v42 = vld [vmem:[#allocation175_spill] sm:$0xff] }
 0x7b7   : > { %16091 = vst [vmem:[#allocation363_spill] sm:$0xff] %v12924_v8  ;;  %v12935_v60 = vpop.permute.xlu2 %6337  ;;  %v6271_v47 = vrot.slane %v6037_v35, 2  ;;  %v6273_v24 = vrot.slane %v6038_v14, 2  ;;  %v12939_v46 = vadd.f32 %v2292_v56, %v16096_v11  ;;  %v2299_v50 = vsel %vm2254_vm0, %v2296_v16, %v2298_v41  ;;  %v16100_v5 = vld [vmem:[#allocation67_spill] sm:$0xff]  ;;  %v16101_v14 = vld [vmem:[#allocation81_spill] sm:$0xff] }
 0x7b8   : > { %16093 = vst [vmem:[#allocation114_spill] sm:$0xff] %v12927_v63  ;;  %v2297_v53 = vsel %vm2254_vm0, %v2295_v38, %v2296_v16  ;;  %v2347_v23 = vsel %vm2254_vm0, %v2345_v4, %v2346_v43  ;;  %v2093_v58 = vmul.f32 %v16100_v5, %v16098_v42  ;;  %v6275_v59 = vrot.slane %v6039_v39, 2  ;;  %v12955_v11 = vld [vmem:[%s8223_s20 + $0x228] sm:$0xff]  ;;  %v12960_v38 = vld [vmem:[%s8223_s20 + $0x230] sm:$0xff]  ;;  %v16103_v39 = vld [vmem:[#allocation78_spill] sm:$0xff] }
 0x7b9   : > { %16094 = vst [vmem:[#allocation113_spill] sm:$0xff] %v12930_v12  ;;  %v6276_v35 = vrot.slane %v12920_v32, 2  ;;  %v2094_v56 = vmul.f32 %v16101_v14, %v16098_v42  ;;  %v2349_v41 = vsel %vm2254_vm0, %v2346_v43, %v2348_v13  ;;  %v6042_v4 = vmul.f32 %v12955_v11, %v12570_v44  ;;  %v12969_v32 = vld [vmem:[%s8223_s20 + $0x220] sm:$0x3]  ;;  %v16104_v14 = vld [vmem:[#allocation177_spill] sm:$0xff] }
 0x7ba   : > { %16095 = vst [vmem:[#allocation43_spill] sm:$0xff] %v12935_v60  ;;  %v16099_v60 = vld [vmem:[#allocation65_spill] sm:$0xff]  ;;  %v6043_v16 = vmul.f32 %v12960_v38, %v12570_v44  ;;  %v6041_v43 = vmul.f32 %v12969_v32, %v12718_v10  ;;  %v6274_v13 = vsel %vm4626_vm1, %v6271_v47, %v6273_v24  ;;  %v2125_v63 = vmul.f32 %v7819_v49, %v16104_v14 }
 0x7bb   : > { %16097 = vst [vmem:[#allocation116_spill] sm:$0xff] %v12939_v46  ;;  %v2092_v12 = vmul.f32 %v16099_v60, %v16098_v42  ;;  %v16102_v60 = vld [vmem:[#allocation176_spill] sm:$0xff]  ;;  %v6272_v42 = vsel %vm4626_vm1, %v6270_v48, %v6271_v47  ;;  %v12977_v18 = vmul.f32 %v7820_v28, %v16104_v14  ;;  %v2306_v29 = vrot.slane %v2093_v58, 1  ;;  %v16106_v28 = vld [vmem:[#allocation10_spill] sm:$0xff] }
 0x7bc   : > { %v12966_v5 = vmul.f32 %v16103_v39, %v16102_v60  ;;  %v16105_v46 = vld [vmem:[#allocation80_spill] sm:$0xff]  ;;  %6411 = vrot.lane.b32.xlu0 %v6274_v13, %s7944_s15  ;;  %6409 = vrot.lane.b32.xlu2 %v6272_v42, %s7944_s15  ;;  %v6044_v10 = vmul.f32 %v12984_v62, %v12570_v44  ;;  %v6277_v48 = vsel %vm4626_vm1, %v6275_v59, %v6276_v35  ;;  %v2308_v49 = vrot.slane %v2094_v56, 1  ;;  %v16110_v42 = vld [vmem:[#allocation63_spill] sm:$0xff]  ;;  %v16112_v44 = vld [vmem:[#allocation85_spill] sm:$0xff] }
 0x7bd   : > { %v2096_v8 = vmul.f32 %v16105_v46, %v16102_v60  ;;  %v2305_v39 = vrot.slane %v2092_v12, 1  ;;  %v2097_v47 = vmul.f32 %v16106_v28, %v16102_v60  ;;  %v6280_v24 = vrot.slane %v6042_v4, 2  ;;  %v12992_v46 = vpop.permute.xlu0 %6327  ;;  %v16109_v12 = vld [vmem:[#allocation64_spill] sm:$0xff]  ;;  %v16116_v28 = vld [vmem:[#allocation75_spill] sm:$0xff] }
 0x7be   : > { %v6281_v1 = vrot.slane %v6043_v16, 2  ;;  %6413 = vrot.lane.b32.xlu1 %v6277_v48, %s7944_s15  ;;  %16107 = vst [vmem:[#allocation115_spill] sm:$0xff] %v12992_v46  ;;  %v12997_v58 = vadd.f32 %v2299_v50, %v16109_v12  ;;  %v13000_v30 = vadd.f32 %v2294_v0, %v16110_v42  ;;  %v13003_v59 = vadd.f32 %v2347_v23, %v16112_v44  ;;  %v16114_v60 = vld [vmem:[#allocation60_spill] sm:$0xff]  ;;  %v13013_v12 = vpop.permute.xlu1 %6329 }
 0x7bf   : > { %v12994_v13 = vpop.permute.xlu2 %6343  ;;  %v6278_v56 = vrot.slane %v6041_v43, 2  ;;  %v2127_v4 = vmul.f32 %v12902_v25, %v16104_v14  ;;  %v2360_v16 = vrot.slane %v2125_v63, 1  ;;  %v13008_v48 = vadd.f32 %v2297_v53, %v16114_v60  ;;  %16118 = vst [vmem:[#allocation52_spill] sm:$0xff] %v13013_v12  ;;  %v13023_v53 = vld [vmem:[%s8223_s20 + $0x240] sm:$0xff]  ;;  %v7830_v14 = vld [vmem:[%s8223_s20 + $0x250] sm:$0x3] }
 0x7c0   : > { %16108 = vst [vmem:[#allocation48_spill] sm:$0xff] %v12994_v13  ;;  %v13011_v50 = vadd.f32 %v2349_v41, %v16116_v28  ;;  %v2361_v0 = vrot.slane %v12977_v18, 1  ;;  %v2310_v23 = vrot.slane %v12966_v5, 1  ;;  %v2307_v43 = vsel %vm2254_vm0, %v2305_v39, %v2306_v29  ;;  %v13028_v18 = vld [vmem:[%s8223_s20 + $0x248] sm:$0xff]  ;;  %v16124_v28 = vld [vmem:[#allocation69_spill] sm:$0xff] }
 0x7c1   : > { %16111 = vst [vmem:[#allocation117_spill] sm:$0xff] %v13000_v30  ;;  %v6283_v42 = vrot.slane %v6044_v10, 2  ;;  %v2311_v44 = vrot.slane %v2096_v8, 1  ;;  %v2313_v13 = vrot.slane %v2097_v47, 1  ;;  %v13019_v25 = vsel %vm2254_vm0, %v2306_v29, %v2308_v49  ;;  %v16121_v10 = vld [vmem:[#allocation178_spill] sm:$0xff]  ;;  %v16122_v49 = vld [vmem:[#allocation8_spill] sm:$0xff] }
 0x7c2   : > { %16113 = vst [vmem:[#allocation47_spill] sm:$0xff] %v13003_v59  ;;  %v6282_v63 = vsel %vm4626_vm1, %v6280_v24, %v6281_v1  ;;  %v6045_v41 = vmul.f32 %v13023_v53, %v12771_v26  ;;  %v6046_v5 = vmul.f32 %v13028_v18, %v12771_v26  ;;  %v6047_v8 = vmul.f32 %v7830_v14, %v12771_v26  ;;  %v16123_v24 = vld [vmem:[#allocation94_spill] sm:$0xff]  ;;  %v13047_v26 = vld [vmem:[%s8223_s20 + $0x258] sm:$0xff] }
 0x7c3   : > { %16115 = vst [vmem:[#allocation53_spill] sm:$0xff] %v13008_v48  ;;  %v6279_v29 = vsel %vm4626_vm1, %v6276_v35, %v6278_v56  ;;  %v2363_v39 = vrot.slane %v2127_v4, 1  ;;  %v2101_v47 = vmul.f32 %v16122_v49, %v16121_v10  ;;  %v2102_v60 = vmul.f32 %v16123_v24, %v16121_v10  ;;  %v13052_v56 = vld [vmem:[%s8223_s20 + $0x260] sm:$0xff]  ;;  %v16126_v49 = vld [vmem:[#allocation180_spill] sm:$0xff] }
 0x7c4   : > { %16117 = vst [vmem:[#allocation118_spill] sm:$0xff] %v13011_v50  ;;  %v13040_v12 = vadd.f32 %v2307_v43, %v16124_v28  ;;  %6417 = vrot.lane.b32.xlu0 %v6282_v63, %s7944_s15  ;;  %6415 = vrot.lane.b32.xlu2 %v6279_v29, %s7944_s15  ;;  %v2103_v46 = vmul.f32 %v12573_v55, %v16121_v10  ;;  %v6288_v50 = vrot.slane %v6047_v8, 2  ;;  %v13084_v8 = vld [vmem:[%s8223_s20 + $0x270] sm:$0xff]  ;;  %v13107_v30 = vld [vmem:[%s8223_s20 + $0x280] sm:$0x3] }
 0x7c5   : > { %16119 = vst [vmem:[#allocation58_spill] sm:$0xff] %v13023_v53  ;;  %v6048_v35 = vmul.f32 %v13047_v26, %v12793_v17  ;;  %v13056_v4 = vmul.f32 %v13052_v56, %v12793_v17  ;;  %v6284_v43 = vsel %vm4626_vm1, %v6281_v1, %v6283_v42  ;;  %v2134_v63 = vmul.f32 %v13023_v53, %v16126_v49  ;;  %v13068_v24 = vpop.permute.xlu0 %6333 }
 0x7c6   : > { %16120 = vst [vmem:[#allocation119_spill] sm:$0xff] %v13028_v18  ;;  %v13063_v29 = vmul.f32 %v13028_v18, %v16126_v49  ;;  %v2314_v55 = vsel %vm2254_vm0, %v2311_v44, %v2313_v13  ;;  %v2362_v10 = vsel %vm2254_vm0, %v2360_v16, %v2361_v0  ;;  %6419 = vrot.lane.b32.xlu1 %v6284_v43, %s7944_s15  ;;  %v6285_v42 = vrot.slane %v6045_v41, 2  ;;  %v16129_v18 = vld [vmem:[#allocation179_spill] sm:$0xff] }
 0x7c7   : > { %16125 = vst [vmem:[#allocation57_spill] sm:$0xff] %v13052_v56  ;;  %v13070_v28 = vpop.permute.xlu2 %6349  ;;  %v2312_v1 = vsel %vm2254_vm0, %v2310_v23, %v2311_v44  ;;  %v6286_v53 = vrot.slane %v6046_v5, 2  ;;  %v2320_v59 = vrot.slane %v2101_v47, 1  ;;  %v2104_v13 = vmul.f32 %v12561_v2, %v16129_v18 }
 0x7c8   : > { %16127 = vst [vmem:[#allocation62_spill] sm:$0xff] %v13068_v24  ;;  %v2105_v16 = vmul.f32 %v12566_v7, %v16129_v18  ;;  %v2106_v43 = vmul.f32 %v12589_v3, %v16129_v18  ;;  %v13079_v24 = vpop.permute.xlu1 %6335  ;;  %v2323_v48 = vrot.slane %v2103_v46, 1  ;;  %v6290_v23 = vrot.slane %v6048_v35, 2  ;;  %v13089_v7 = vld [vmem:[%s8223_s20 + $0x278] sm:$0xff]  ;;  %v13095_v46 = vld [vmem:[%s8223_s20 + $0x268] sm:$0x3] }
 0x7c9   : > { %16128 = vst [vmem:[#allocation120_spill] sm:$0xff] %v13070_v28  ;;  %v2321_v28 = vrot.slane %v2102_v60, 1  ;;  %v6291_v44 = vrot.slane %v13056_v4, 2  ;;  %v2375_v41 = vrot.slane %v2134_v63, 1  ;;  %v6051_v2 = vmul.f32 %v13084_v8, %v12671_v20 }
 0x7ca   : > { %16130 = vst [vmem:[#allocation371_spill] sm:$0xff] %v13079_v24  ;;  %v6052_v3 = vmul.f32 %v13089_v7, %v12671_v20  ;;  %v2364_v18 = vsel %vm2254_vm0, %v2361_v0, %v2363_v39  ;;  %v6050_v47 = vmul.f32 %v13095_v46, %v12793_v17  ;;  %v6289_v60 = vsel %vm4626_vm1, %v6286_v53, %v6288_v50 }
 0x7cb   : > { %16131 = vst [vmem:[#allocation121_spill] sm:$0xff] %v13095_v46  ;;  %v6287_v35 = vsel %vm4626_vm1, %v6285_v42, %v6286_v53  ;;  %v2136_v4 = vmul.f32 %v7830_v14, %v16126_v49  ;;  %v2325_v63 = vrot.slane %v2104_v13, 1  ;;  %v2326_v5 = vrot.slane %v2105_v16, 1  ;;  %v16132_v53 = vld [vmem:[#allocation70_spill] sm:$0xff] }
 0x7cc   : > { %v2328_v24 = vrot.slane %v2106_v43, 1  ;;  %6423 = vrot.lane.b32.xlu0 %v6289_v60, %s7944_s15  ;;  %6421 = vrot.lane.b32.xlu2 %v6287_v35, %s7944_s15  ;;  %v2322_v0 = vsel %vm2254_vm0, %v2320_v59, %v2321_v28  ;;  %v2324_v39 = vsel %vm2254_vm0, %v2321_v28, %v2323_v48  ;;  %v6053_v17 = vmul.f32 %v13107_v30, %v12671_v20  ;;  %v16136_v28 = vld [vmem:[#allocation71_spill] sm:$0xff] }
 0x7cd   : > { %v6292_v50 = vsel %vm4626_vm1, %v6290_v23, %v6291_v44  ;;  %v13114_v14 = vadd.f32 %v13019_v25, %v16132_v53  ;;  %v16133_v49 = vrot.slane %v13063_v29, 1  ;;  %v6295_v13 = vrot.slane %v6051_v2, 2  ;;  %v13120_v59 = vpop.permute.xlu0 %6339  ;;  %v16137_v43 = vld [vmem:[#allocation59_spill] sm:$0xff]  ;;  %v16138_v25 = vld [vmem:[#allocation88_spill] sm:$0xff]  ;;  %v16140_v2 = vld [vmem:[#allocation74_spill] sm:$0xff] }
 0x7ce   : > { %v6296_v16 = vrot.slane %v6052_v3, 2  ;;  %6425 = vrot.lane.b32.xlu1 %v6292_v50, %s7944_s15  ;;  %16134 = vst [vmem:[#allocation66_spill] sm:$0xff] %v13120_v59  ;;  %v13125_v20 = vadd.f32 %v2314_v55, %v16136_v28  ;;  %v13128_v23 = vadd.f32 %v2312_v1, %v16137_v43  ;;  %v13131_v60 = vadd.f32 %v2362_v10, %v16138_v25  ;;  %v16141_v50 = vld [vmem:[#allocation73_spill] sm:$0xff] }
 0x7cf   : > { %v2377_v42 = vsel %vm2254_vm0, %v2375_v41, %v16133_v49  ;;  %v13122_v48 = vpop.permute.xlu2 %6355  ;;  %v6293_v35 = vrot.slane %v6050_v47, 2  ;;  %v2378_v41 = vrot.slane %v2136_v4, 1  ;;  %v13134_v3 = vadd.f32 %v2322_v0, %v16140_v2  ;;  %v16142_v49 = vld [vmem:[#allocation83_spill] sm:$0xff]  ;;  %v16145_v43 = vld [vmem:[#allocation5_spill] sm:$0xff] }
 0x7d0   : > { %16135 = vst [vmem:[#allocation123_spill] sm:$0xff] %v13122_v48  ;;  %v13137_v53 = vadd.f32 %v2324_v39, %v16141_v50  ;;  %v13140_v55 = vadd.f32 %v2364_v18, %v16142_v49  ;;  %v13142_v28 = vpop.permute.xlu1 %6341  ;;  %v2329_v1 = vsel %vm2254_vm0, %v2326_v5, %v2328_v24  ;;  %v2327_v10 = vsel %vm2254_vm0, %v2325_v63, %v2326_v5  ;;  %v16146_v25 = vld [vmem:[#allocation181_spill] sm:$0xff]  ;;  %v13157_v24 = vld [vmem:[%s8223_s20 + $0x288] sm:$0xff]  ;;  %v13162_v63 = vld [vmem:[%s8223_s20 + $0x290] sm:$0xff] }
 0x7d1   : > { %16139 = vst [vmem:[#allocation122_spill] sm:$0xff] %v13131_v60  ;;  %v13147_v47 = vadd.f32 %v2377_v42, %v16145_v43  ;;  %v6298_v4 = vrot.slane %v6053_v17, 2  ;;  %v2110_v0 = vmul.f32 %v12678_v34, %v16146_v25  ;;  %v2111_v39 = vmul.f32 %v12683_v36, %v16146_v25  ;;  %v7839_v17 = vld [vmem:[%s8223_s20 + $0x298] sm:$0x3]  ;;  %v16149_v50 = vld [vmem:[#allocation183_spill] sm:$0xff]  ;;  %v16150_v49 = vld [vmem:[#allocation182_spill] sm:$0xff] }
 0x7d2   : > { %16143 = vst [vmem:[#allocation124_spill] sm:$0xff] %v13140_v55  ;;  %v2112_v18 = vmul.f32 %v12721_v21, %v16146_v25  ;;  %v6297_v2 = vsel %vm4626_vm1, %v6295_v13, %v6296_v16  ;;  %v6054_v5 = vmul.f32 %v13157_v24, %v12858_v33  ;;  %v6055_v34 = vmul.f32 %v13162_v63, %v12858_v33  ;;  %v16152_v48 = vld [vmem:[#allocation77_spill] sm:$0xff] }
 0x7d3   : > { %16144 = vst [vmem:[#allocation126_spill] sm:$0xff] %v13142_v28  ;;  %v6056_v36 = vmul.f32 %v7839_v17, %v12858_v33  ;;  %v6294_v42 = vsel %vm4626_vm1, %v6291_v44, %v6293_v35  ;;  %v2143_v21 = vmul.f32 %v13157_v24, %v16149_v50  ;;  %v13173_v13 = vmul.f32 %v13162_v63, %v16149_v50  ;;  %v13182_v33 = vld [vmem:[%s8223_s20 + $0x2a0] sm:$0xff]  ;;  %v13187_v35 = vld [vmem:[%s8223_s20 + $0x2a8] sm:$0xff] }
 0x7d4   : > { %16147 = vst [vmem:[#allocation125_spill] sm:$0xff] %v13157_v24  ;;  %v2114_v43 = vmul.f32 %v12714_v54, %v16150_v49  ;;  %6429 = vrot.lane.b32.xlu0 %v6297_v2, %s7944_s15  ;;  %6427 = vrot.lane.b32.xlu2 %v6294_v42, %s7944_s15  ;;  %v2115_v25 = vmul.f32 %v12733_v57, %v16150_v49  ;;  %v2335_v60 = vrot.slane %v2110_v0, 1  ;;  %v2336_v2 = vrot.slane %v2111_v39, 1 }
 0x7d5   : > { %16148 = vst [vmem:[#allocation127_spill] sm:$0xff] %v13162_v63  ;;  %v6057_v44 = vmul.f32 %v13182_v33, %v12875_v51  ;;  %v13191_v55 = vmul.f32 %v13187_v35, %v12875_v51  ;;  %v6299_v54 = vsel %vm4626_vm1, %v6296_v16, %v6298_v4  ;;  %v13195_v42 = vadd.f32 %v2329_v1, %v16152_v48  ;;  %v13201_v59 = vpop.permute.xlu0 %6345 }
 0x7d6   : > { %16151 = vst [vmem:[#allocation128_spill] sm:$0xff] %v13187_v35  ;;  %v16153_v57 = vrot.slane %v13063_v29, 1  ;;  %6431 = vrot.lane.b32.xlu1 %v6299_v54, %s7944_s15  ;;  %v2113_v24 = vmul.f32 %v12709_v40, %v16150_v49  ;;  %v6300_v16 = vrot.slane %v6054_v5, 2  ;;  %v6301_v4 = vrot.slane %v6055_v34, 2  ;;  %v16157_v5 = vld [vmem:[#allocation68_spill] sm:$0xff]  ;;  %v13217_v34 = vld [vmem:[%s8223_s20 + $0x2b8] sm:$0xff] }
 0x7d7   : > { %16154 = vst [vmem:[#allocation129_spill] sm:$0xff] %v13201_v59  ;;  %v13203_v63 = vpop.permute.xlu2 %6361  ;;  %v6303_v0 = vrot.slane %v6056_v36, 2  ;;  %v2338_v48 = vrot.slane %v2112_v18, 1  ;;  %v2145_v29 = vmul.f32 %v7839_v17, %v16149_v50  ;;  %v2390_v1 = vrot.slane %v2143_v21, 1  ;;  %v13222_v17 = vld [vmem:[%s8223_s20 + $0x2c0] sm:$0xff] }
 0x7d8   : > { %v2379_v28 = vsel %vm2254_vm0, %v16153_v57, %v2378_v41  ;;  %16155 = vst [vmem:[#allocation130_spill] sm:$0xff] %v13203_v63  ;;  %v2391_v41 = vrot.slane %v13173_v13, 1  ;;  %v13209_v39 = vpop.permute.xlu1 %6347  ;;  %v2341_v54 = vrot.slane %v2114_v43, 1  ;;  %v2343_v57 = vrot.slane %v2115_v25, 1  ;;  %v13227_v21 = vld [vmem:[%s8223_s20 + $0x2b0] sm:$0x3] }
 0x7d9   : > { %16156 = vst [vmem:[#allocation132_spill] sm:$0xff] %v13209_v39  ;;  %v6305_v63 = vrot.slane %v6057_v44, 2  ;;  %v6306_v59 = vrot.slane %v13191_v55, 2  ;;  %v2337_v40 = vsel %vm2254_vm0, %v2335_v60, %v2336_v2  ;;  %v13214_v49 = vadd.f32 %v2327_v10, %v16157_v5  ;;  %v16159_v25 = vld [vmem:[#allocation89_spill] sm:$0xff] }
 0x7da   : > { %v6060_v18 = vmul.f32 %v13217_v34, %v12739_v37  ;;  %v6061_v36 = vmul.f32 %v13222_v17, %v12739_v37  ;;  %v2340_v50 = vrot.slane %v2113_v24, 1  ;;  %16158 = vst [vmem:[#allocation131_spill] sm:$0xff] %v13227_v21  ;;  %v6059_v60 = vmul.f32 %v13227_v21, %v12875_v51  ;;  %v16161_v24 = vld [vmem:[#allocation79_spill] sm:$0xff] }
 0x7db   : > { %v6304_v55 = vsel %vm4626_vm1, %v6301_v4, %v6303_v0  ;;  %v6302_v10 = vsel %vm4626_vm1, %v6300_v16, %v6301_v4  ;;  %v2393_v13 = vrot.slane %v2145_v29, 1  ;;  %v2339_v43 = vsel %vm2254_vm0, %v2336_v2, %v2338_v48  ;;  %v13245_v0 = vld [vmem:[%s8223_s20 + $0x2c8] sm:$0x3]  ;;  %v16162_v16 = vld [vmem:[#allocation184_spill] sm:$0xff] }
 0x7dc   : > { %v13235_v44 = vadd.f32 %v2379_v28, %v16159_v25  ;;  %v2392_v5 = vsel %vm2254_vm0, %v2390_v1, %v2391_v41  ;;  %6435 = vrot.lane.b32.xlu0 %v6304_v55, %s7944_s15  ;;  %6433 = vrot.lane.b32.xlu2 %v6302_v10, %s7944_s15  ;;  %v13241_v39 = vadd.f32 %v2337_v40, %v16161_v24  ;;  %v6310_v29 = vrot.slane %v6060_v18, 2  ;;  %v16165_v55 = vld [vmem:[#allocation82_spill] sm:$0xff]  ;;  %v13271_v18 = vld [vmem:[%s8223_s20 + $0x2d0] sm:$0xff] }
 0x7dd   : > { %v2344_v51 = vsel %vm2254_vm0, %v2341_v54, %v2343_v57  ;;  %v6062_v2 = vmul.f32 %v13245_v0, %v12739_v37  ;;  %v6307_v28 = vsel %vm4626_vm1, %v6305_v63, %v6306_v59  ;;  %v2119_v4 = vmul.f32 %v12798_v61, %v16162_v16  ;;  %v13255_v57 = vpop.permute.xlu0 %6351  ;;  %v16166_v10 = vld [vmem:[#allocation98_spill] sm:$0xff]  ;;  %16168 = vst [vmem:[#allocation138_spill] sm:$0xff] %v13271_v18 }
 0x7de   : > { %16160 = vst [vmem:[#allocation133_spill] sm:$0xff] %v13235_v44  ;;  %v2120_v48 = vmul.f32 %v12803_v31, %v16162_v16  ;;  %v6311_v1 = vrot.slane %v6061_v36, 2  ;;  %6437 = vrot.lane.b32.xlu1 %v6307_v28, %s7944_s15  ;;  %v13260_v37 = vadd.f32 %v2339_v43, %v16165_v55  ;;  %v13263_v63 = vsel %vm2254_vm0, %v2340_v50, %v2341_v54  ;;  %v16169_v36 = vld [vmem:[#allocation186_spill] sm:$0xff]  ;;  %v13276_v28 = vld [vmem:[%s8223_s20 + $0x2d8] sm:$0xff] }
 0x7df   : > { %16163 = vst [vmem:[#allocation135_spill] sm:$0xff] %v13255_v57  ;;  %v13257_v40 = vpop.permute.xlu2 %6367  ;;  %v13266_v61 = vadd.f32 %v2392_v5, %v16166_v10  ;;  %v6308_v25 = vrot.slane %v6059_v60, 2  ;;  %v2121_v31 = vmul.f32 %v12845_v9, %v16162_v16  ;;  %v2152_v24 = vmul.f32 %v13271_v18, %v16169_v36  ;;  %v7848_v5 = vld [vmem:[%s8223_s20 + $0x2e0] sm:$0x3]  ;;  %v16172_v55 = vld [vmem:[#allocation185_spill] sm:$0xff]  ;;  %v16173_v16 = vld [vmem:[#allocation84_spill] sm:$0xff] }
 0x7e0   : > { %16164 = vst [vmem:[#allocation134_spill] sm:$0xff] %v13257_v40  ;;  %v2153_v43 = vmul.f32 %v13276_v28, %v16169_v36  ;;  %v2394_v54 = vsel %vm2254_vm0, %v2391_v41, %v2393_v13  ;;  %v13281_v50 = vpop.permute.xlu1 %6353  ;;  %v2154_v60 = vmul.f32 %v7848_v5, %v16169_v36  ;;  %v2122_v9 = vmul.f32 %v12835_v19, %v16172_v55 }
 0x7e1   : > { %16167 = vst [vmem:[#allocation136_spill] sm:$0xff] %v13266_v61  ;;  %v13288_v10 = vadd.f32 %v2344_v51, %v16173_v16  ;;  %v6313_v40 = vrot.slane %v6062_v2, 2  ;;  %v2350_v57 = vrot.slane %v2119_v4, 1  ;;  %v2351_v61 = vrot.slane %v2120_v48, 1 }
 0x7e2   : > { %16170 = vst [vmem:[#allocation137_spill] sm:$0xff] %v13276_v28  ;;  %v2123_v44 = vmul.f32 %v12840_v15, %v16172_v55  ;;  %v6312_v41 = vsel %vm4626_vm1, %v6310_v29, %v6311_v1  ;;  %v6063_v13 = vmul.f32 %v13271_v18, %v12932_v52  ;;  %v6064_v36 = vmul.f32 %v13276_v28, %v12932_v52  ;;  %v13304_v29 = vld [vmem:[%s8223_s20 + $0x2e8] sm:$0xff]  ;;  %v13309_v28 = vld [vmem:[%s8223_s20 + $0x2f0] sm:$0xff] }
 0x7e3   : > { %16171 = vst [vmem:[#allocation30_spill] sm:$0xff] %v13281_v50  ;;  %v6065_v19 = vmul.f32 %v7848_v5, %v12932_v52  ;;  %v6309_v51 = vsel %vm4626_vm1, %v6306_v59, %v6308_v25  ;;  %v2353_v2 = vrot.slane %v2121_v31, 1  ;;  %v2405_v16 = vrot.slane %v2152_v24, 1 }
 0x7e4   : > { %v2406_v4 = vrot.slane %v2153_v43, 1  ;;  %v2124_v48 = vmul.f32 %v12867_v6, %v16172_v55  ;;  %6441 = vrot.lane.b32.xlu0 %v6312_v41, %s7944_s15  ;;  %6439 = vrot.lane.b32.xlu2 %v6309_v51, %s7944_s15  ;;  %v2408_v15 = vrot.slane %v2154_v60, 1  ;;  %v6066_v50 = vmul.f32 %v13304_v29, %v12944_v22  ;;  %16174 = vst [vmem:[#allocation139_spill] sm:$0xff] %v13309_v28  ;;  %v16175_v6 = vld [vmem:[#allocation187_spill] sm:$0xff] }
 0x7e5   : > { %v13313_v52 = vmul.f32 %v13309_v28, %v12944_v22  ;;  %v6314_v59 = vsel %vm4626_vm1, %v6311_v1, %v6313_v40  ;;  %v2355_v25 = vrot.slane %v2122_v9, 1  ;;  %v2128_v31 = vmul.f32 %v12911_v27, %v16175_v6  ;;  %v13323_v5 = vpop.permute.xlu0 %6357 }
 0x7e6   : > { %v2129_v24 = vmul.f32 %v12916_v45, %v16175_v6  ;;  %v2130_v43 = vmul.f32 %v12969_v32, %v16175_v6  ;;  %6443 = vrot.lane.b32.xlu1 %v6314_v59, %s7944_s15  ;;  %16176 = vst [vmem:[#allocation31_spill] sm:$0xff] %v13323_v5  ;;  %v2356_v55 = vrot.slane %v2123_v44, 1  ;;  %v6315_v41 = vrot.slane %v6063_v13, 2  ;;  %v16179_v6 = vld [vmem:[#allocation188_spill] sm:$0xff] }
 0x7e7   : > { %v13325_v60 = vpop.permute.xlu2 %6373  ;;  %v6316_v51 = vrot.slane %v6064_v36, 2  ;;  %v6318_v1 = vrot.slane %v6065_v19, 2  ;;  %v2358_v40 = vrot.slane %v2124_v48, 1  ;;  %v2352_v27 = vsel %vm2254_vm0, %v2350_v57, %v2351_v61 }
 0x7e8   : > { %16177 = vst [vmem:[#allocation140_spill] sm:$0xff] %v13325_v60  ;;  %v2354_v9 = vsel %vm2254_vm0, %v2351_v61, %v2353_v2  ;;  %v2407_v18 = vsel %vm2254_vm0, %v2405_v16, %v2406_v4  ;;  %v13330_v45 = vpop.permute.xlu1 %6359  ;;  %v13334_v59 = vmul.f32 %v12955_v11, %v16179_v6  ;;  %v2409_v60 = vsel %vm2254_vm0, %v2406_v4, %v2408_v15  ;;  %v13345_v2 = vld [vmem:[%s8223_s20 + $0x2f8] sm:$0x3]  ;;  %v16181_v4 = vld [vmem:[#allocation87_spill] sm:$0xff] }
 0x7e9   : > { %16178 = vst [vmem:[#allocation381_spill] sm:$0xff] %v13330_v45  ;;  %v6320_v44 = vrot.slane %v6066_v50, 2  ;;  %v6321_v13 = vrot.slane %v13313_v52, 2  ;;  %v2365_v36 = vrot.slane %v2128_v31, 1  ;;  %v2366_v19 = vrot.slane %v2129_v24, 1  ;;  %v16182_v52 = vld [vmem:[#allocation72_spill] sm:$0xff] }
 0x7ea   : > { %v2368_v48 = vrot.slane %v2130_v43, 1  ;;  %v13340_v57 = vmul.f32 %v12960_v38, %v16179_v6  ;;  %v2133_v61 = vmul.f32 %v12984_v62, %v16179_v6  ;;  %16180 = vst [vmem:[#allocation141_spill] sm:$0xff] %v13345_v2  ;;  %v6068_v11 = vmul.f32 %v13345_v2, %v12944_v22  ;;  %v16183_v38 = vld [vmem:[#allocation16_spill] sm:$0xff] }
 0x7eb   : > { %v6319_v16 = vsel %vm4626_vm1, %v6316_v51, %v6318_v1  ;;  %v6317_v50 = vsel %vm4626_vm1, %v6315_v41, %v6316_v51  ;;  %v13352_v15 = vadd.f32 %v2352_v27, %v16181_v4  ;;  %v13356_v31 = vadd.f32 %v13263_v63, %v16182_v52  ;;  %v16184_v22 = vld [vmem:[#allocation4_spill] sm:$0xff]  ;;  %v16190_v4 = vld [vmem:[#allocation190_spill] sm:$0xff] }
 0x7ec   : > { %v13359_v24 = vadd.f32 %v2394_v54, %v16183_v38  ;;  %6447 = vrot.lane.b32.xlu0 %v6319_v16, %s7944_s15  ;;  %6445 = vrot.lane.b32.xlu2 %v6317_v50, %s7944_s15  ;;  %v2359_v62 = vsel %vm2254_vm0, %v2356_v55, %v2358_v40  ;;  %v13365_v43 = vadd.f32 %v2354_v9, %v16184_v22  ;;  %v2370_v1 = vrot.slane %v13334_v59, 1  ;;  %v16185_v27 = vld [vmem:[#allocation24_spill] sm:$0xff] }
 0x7ed   : > { %v2357_v41 = vsel %vm2254_vm0, %v2355_v25, %v2356_v55  ;;  %v6322_v51 = vsel %vm4626_vm1, %v6320_v44, %v6321_v13  ;;  %v2371_v63 = vrot.slane %v13340_v57, 1  ;;  %v13372_v54 = vadd.f32 %v2407_v18, %v16185_v27  ;;  %v16186_v6 = vld [vmem:[#allocation96_spill] sm:$0xff]  ;;  %v13378_v40 = vpop.permute.xlu0 %6363  ;;  %v16189_v44 = vld [vmem:[#allocation189_spill] sm:$0xff] }
 0x7ee   : > { %v13375_v16 = vadd.f32 %v2409_v60, %v16186_v6  ;;  %6449 = vrot.lane.b32.xlu1 %v6322_v51, %s7944_s15  ;;  %16187 = vst [vmem:[#allocation142_spill] sm:$0xff] %v13378_v40  ;;  %v2373_v50 = vrot.slane %v2133_v61, 1  ;;  %v2367_v25 = vsel %vm2254_vm0, %v2365_v36, %v2366_v19  ;;  %v2369_v55 = vsel %vm2254_vm0, %v2366_v19, %v2368_v48  ;;  %v7559_v36 = vld [vmem:[%s14916_s2] ss:$0 sm:$0xff]  ;;  %v16192_v48 = vld [vmem:[#allocation191_spill] sm:$0xff]  ;;  %v16193_v22 = vld [vmem:[#allocation192_spill] sm:$0xff] }
 0x7ef   : > { %v13380_v9 = vpop.permute.xlu2 %6379  ;;  %v6323_v59 = vrot.slane %v6068_v11, 2  ;;  %v2137_v57 = vmul.f32 %v13047_v26, %v16189_v44  ;;  %v2138_v18 = vmul.f32 %v13052_v56, %v16189_v44  ;;  %v2139_v60 = vmul.f32 %v13095_v46, %v16189_v44  ;;  %v16256_v46 = vld [vmem:[#allocation259_spill] sm:$0xff]  ;;  %v16258_v56 = vld [vmem:[#allocation260_spill] sm:$0xff] }
 0x7f0   : > { %16188 = vst [vmem:[#allocation391_spill] sm:$0xff] %v13380_v9  ;;  %v2140_v52 = vmul.f32 %v13084_v8, %v16190_v4  ;;  %v13392_v38 = vpop.permute.xlu1 %6365  ;;  %v2141_v19 = vmul.f32 %v13089_v7, %v16190_v4  ;;  %v2142_v26 = vmul.f32 %v13107_v30, %v16190_v4  ;;  %v2146_v61 = vmul.f32 %v13182_v33, %v16192_v48  ;;  %v7560_v30 = vld [vmem:[%s14916_s2 + $0x1] ss:$0 sm:$0xff]  ;;  %v16194_v33 = vld [vmem:[#allocation193_spill] sm:$0xff] }
 0x7f1   : > { %16191 = vst [vmem:[#allocation143_spill] sm:$0xff] %v13392_v38  ;;  %v2147_v11 = vmul.f32 %v13187_v35, %v16192_v48  ;;  %v2148_v8 = vmul.f32 %v13227_v21, %v16192_v48  ;;  %v2149_v51 = vmul.f32 %v13217_v34, %v16193_v22  ;;  %v2150_v27 = vmul.f32 %v13222_v17, %v16193_v22  ;;  %v16253_v35 = vld [vmem:[#allocation253_spill] sm:$0xff] }
 0x7f2   : > { %v2151_v7 = vmul.f32 %v13245_v0, %v16193_v22  ;;  %v2155_v6 = vmul.f32 %v13304_v29, %v16194_v33  ;;  %v2156_v44 = vmul.f32 %v13309_v28, %v16194_v33  ;;  %v2157_v4 = vmul.f32 %v13345_v2, %v16194_v33  ;;  %v16245_v2 = vld [vmem:[#allocation248_spill] sm:$0xff] }
 0x7f3   : > { %v6324_v34 = vsel %vm4626_vm1, %v6321_v13, %v6323_v59  ;;  %v2380_v48 = vrot.slane %v2137_v57, 1  ;;  %v2381_v17 = vrot.slane %v2138_v18, 1  ;;  %v2383_v9 = vrot.slane %v2139_v60, 1  ;;  %v16197_v60 = vld [vmem:[#allocation6_spill] sm:$0xff] }
 0x7f4   : > { %v2374_v0 = vsel %vm2254_vm0, %v2371_v63, %v2373_v50  ;;  %6678 = vperm.xlu0 %7268, %v7559_v36   ;;  %6451 = vrot.lane.b32.xlu2 %v6324_v34, %s7944_s15  ;;  %v2385_v22 = vrot.slane %v2140_v52, 1  ;;  %v2386_v38 = vrot.slane %v2141_v19, 1  ;;  %v2388_v40 = vrot.slane %v2142_v26, 1  ;;  %v16198_v52 = vld [vmem:[#allocation91_spill] sm:$0xff]  ;;  %v16200_v26 = vld [vmem:[#allocation76_spill] sm:$0xff] }
 0x7f5   : > { %v2395_v29 = vrot.slane %v2146_v61, 1  ;;  %v2396_v45 = vrot.slane %v2147_v11, 1  ;;  %v2398_v5 = vrot.slane %v2148_v8, 1  ;;  %v2400_v28 = vrot.slane %v2149_v51, 1  ;;  %v13425_v33 = vpop.permute.xlu0 %6369  ;;  %v16201_v11 = vld [vmem:[#allocation92_spill] sm:$0xff] }
 0x7f6   : > { %v2401_v21 = vrot.slane %v2150_v27, 1  ;;  %6682 = vperm.xlu1 %7269, %v7560_v30   ;;  %16195 = vst [vmem:[#allocation390_spill] sm:$0xff] %v13425_v33  ;;  %v2403_v59 = vrot.slane %v2151_v7, 1  ;;  %v2410_v57 = vrot.slane %v2155_v6, 1  ;;  %v2411_v18 = vrot.slane %v2156_v44, 1  ;;  %v16203_v7 = vld [vmem:[#allocation17_spill] sm:$0xff] }
 0x7f7   : > { %v13427_v13 = vpop.permute.xlu2 %6385  ;;  %v2413_v50 = vrot.slane %v2157_v4, 1  ;;  %v13430_v36 = vadd.f32 %v2359_v62, %v16197_v60  ;;  %v13433_v19 = vadd.f32 %v2367_v25, %v16198_v52  ;;  %v13436_v61 = vadd.f32 %v2357_v41, %v16200_v26  ;;  %v7561_v27 = vld [vmem:[%s14916_s2 + $0x3] ss:$0 sm:$0xff]  ;;  %v7562_v62 = vld [vmem:[%s14916_s2 + $0x2] ss:$0 sm:$0xff]  ;;  %v16211_v52 = vld [vmem:[#allocation101_spill] sm:$0xff] }
 0x7f8   : > { %16196 = vst [vmem:[#allocation144_spill] sm:$0xff] %v13427_v13  ;;  %v13439_v8 = vadd.f32 %v2369_v55, %v16201_v11  ;;  %v13441_v51 = vpop.permute.xlu1 %6371  ;;  %v13450_v30 = vadd.f32 %v2374_v0, %v16203_v7  ;;  %v2382_v25 = vsel %vm2254_vm0, %v2380_v48, %v2381_v17  ;;  %v2372_v41 = vsel %vm2254_vm0, %v2370_v1, %v2371_v63  ;;  %v7563_v60 = vld [vmem:[%s14916_s2 + $0x4] ss:$0 sm:$0xff]  ;;  %v16212_v11 = vld [vmem:[#allocation357_spill] sm:$0xff]  ;;  %v16243_v33 = vld [vmem:[#allocation247_spill] sm:$0xff] }
 0x7f9   : > { %16199 = vst [vmem:[#allocation34_spill] sm:$0xff] %v13433_v19  ;;  %v2384_v55 = vsel %vm2254_vm0, %v2381_v17, %v2383_v9  ;;  %v2389_v6 = vsel %vm2254_vm0, %v2386_v38, %v2388_v40  ;;  %v2397_v44 = vsel %vm2254_vm0, %v2395_v29, %v2396_v45  ;;  %v2387_v4 = vsel %vm2254_vm0, %v2385_v22, %v2386_v38  ;;  %v16204_v9 = vld [vmem:[#allocation95_spill] sm:$0xff]  ;;  %v16205_v17 = vld [vmem:[#allocation86_spill] sm:$0xff] }
 0x7fa   : > { %16202 = vst [vmem:[#allocation145_spill] sm:$0xff] %v13441_v51  ;;  %v2399_v34 = vsel %vm2254_vm0, %v2396_v45, %v2398_v5  ;;  %v2404_v0 = vsel %vm2254_vm0, %v2401_v21, %v2403_v59  ;;  %v2412_v48 = vsel %vm2254_vm0, %v2410_v57, %v2411_v18  ;;  %v2402_v1 = vsel %vm2254_vm0, %v2400_v28, %v2401_v21  ;;  %v16206_v38 = vld [vmem:[#allocation354_spill] sm:$0xff]  ;;  %v16207_v5 = vld [vmem:[#allocation21_spill] sm:$0xff] }
 0x7fb   : > { %v2414_v63 = vsel %vm2254_vm0, %v2411_v18, %v2413_v50  ;;  %v13467_v40 = vadd.f32 %v2382_v25, %v16204_v9  ;;  %v13470_v29 = vadd.f32 %v2372_v41, %v16205_v17  ;;  %v13473_v45 = vadd.f32 %v2384_v55, %v16206_v38  ;;  %v16208_v59 = vld [vmem:[#allocation22_spill] sm:$0xff]  ;;  %v16210_v18 = vld [vmem:[#allocation7_spill] sm:$0xff]  ;;  %v16214_v25 = vld [vmem:[#allocation9_spill] sm:$0xff] }
 0x7fc   : > { %6690 = vperm.xlu0 %7268, %v7561_v27   ;;  %6686 = vperm.xlu2 %7270, %v7562_v62   ;;  %v13476_v22 = vadd.f32 %v2389_v6, %v16207_v5  ;;  %v13479_v57 = vadd.f32 %v2397_v44, %v16208_v59  ;;  %v16209_v21 = vld [vmem:[#allocation90_spill] sm:$0xff]  ;;  %v13485_v50 = vadd.f32 %v2399_v34, %v16210_v18  ;;  %v16213_v27 = vld [vmem:[#allocation93_spill] sm:$0xff]  ;;  %v16217_v44 = vld [vmem:[#allocation356_spill] sm:$0xff] }
 0x7fd   : > { %v13482_v28 = vadd.f32 %v2387_v4, %v16209_v21  ;;  %v13488_v26 = vadd.f32 %v2404_v0, %v16211_v52  ;;  %v13491_v7 = vadd.f32 %v2412_v48, %v16212_v11  ;;  %v13494_v62 = vadd.f32 %v2402_v1, %v16213_v27  ;;  %v13499_v55 = vpop.permute.xlu0 %6375  ;;  %v16218_v4 = vld [vmem:[#allocation212_spill] sm:$0xff]  ;;  %v16219_v0 = vld [vmem:[#allocation355_spill] sm:$0xff]  ;;  %v16220_v9 = vld [vmem:[#allocation217_spill] sm:$0xff] }
 0x7fe   : > { %v13497_v41 = vadd.f32 %v2414_v63, %v16214_v25  ;;  %6694 = vperm.xlu1 %7269, %v7563_v60   ;;  %16215 = vst [vmem:[#allocation33_spill] sm:$0xff] %v13499_v55  ;;  %v13505_v34 = vadd.f32 %v16218_v4, %v16217_v44  ;;  %v13509_v17 = vadd.f32 %v16220_v9, %v16219_v0  ;;  %v16221_v48 = vld [vmem:[#allocation109_spill] sm:$0xff]  ;;  %v16222_v38 = vld [vmem:[#allocation222_spill] sm:$0xff]  ;;  %v16223_v5 = vld [vmem:[#allocation363_spill] sm:$0xff] }
 0x7ff   : > { %v13501_v6 = vpop.permute.xlu2 %6391  ;;  %v13513_v1 = vadd.f32 %v16222_v38, %v16221_v48  ;;  %v16224_v63 = vld [vmem:[#allocation227_spill] sm:$0xff]  ;;  %v16225_v60 = vld [vmem:[#allocation97_spill] sm:$0xff]  ;;  %v16226_v21 = vld [vmem:[#allocation228_spill] sm:$0xff] }
 0x800   : > { %16216 = vst [vmem:[#allocation147_spill] sm:$0xff] %v13501_v6  ;;  %v13517_v59 = vadd.f32 %v16224_v63, %v16223_v5  ;;  %v13521_v18 = vadd.f32 %v16226_v21, %v16225_v60  ;;  %v16227_v52 = vld [vmem:[#allocation99_spill] sm:$0xff]  ;;  %v16228_v11 = vld [vmem:[#allocation229_spill] sm:$0xff]  ;;  %v16229_v25 = vld [vmem:[#allocation116_spill] sm:$0xff]  ;;  %v13535_v38 = vpop.permute.xlu1 %6377 }
 0x801   : > { %v13525_v27 = vadd.f32 %v16228_v11, %v16227_v52  ;;  %v16230_v44 = vld [vmem:[#allocation234_spill] sm:$0xff]  ;;  %v16231_v0 = vld [vmem:[#allocation25_spill] sm:$0xff]  ;;  %v16232_v9 = vld [vmem:[#allocation235_spill] sm:$0xff]  ;;  %16233 = vst [vmem:[#allocation38_spill] sm:$0xff] %v13535_v38 }
 0x802   : > { %v13529_v4 = vadd.f32 %v16230_v44, %v16229_v25  ;;  %v13533_v48 = vadd.f32 %v16232_v9, %v16231_v0  ;;  %v7564_v5 = vld [vmem:[%s14916_s2 + $0x6] ss:$0 sm:$0xff]  ;;  %v7565_v63 = vld [vmem:[%s14916_s2 + $0x5] ss:$0 sm:$0xff]  ;;  %v16234_v60 = vld [vmem:[#allocation107_spill] sm:$0xff] }
 0x803   : > { %v16235_v21 = vld [vmem:[#allocation236_spill] sm:$0xff]  ;;  %v16236_v11 = vld [vmem:[#allocation239_spill] sm:$0xff]  ;;  %v16239_v19 = vld [vmem:[#allocation358_spill] sm:$0xff] }
 0x804   : > { %v13545_v52 = vadd.f32 %v16235_v21, %v16234_v60  ;;  %v13549_v25 = vadd.f32 %v16236_v11, %v12997_v58  ;;  %v16237_v44 = vld [vmem:[#allocation100_spill] sm:$0xff]  ;;  %v16240_v6 = vld [vmem:[#allocation241_spill] sm:$0xff]  ;;  %v16241_v38 = vld [vmem:[#allocation246_spill] sm:$0xff]  ;;  %6702 = vperm.xlu0 %7268, %v7564_v5   ;;  %6698 = vperm.xlu2 %7270, %v7565_v63  }
 0x805   : > { %v16238_v0 = vld [vmem:[#allocation240_spill] sm:$0xff]  ;;  %v13557_v13 = vadd.f32 %v16240_v6, %v16239_v19  ;;  %v13561_v55 = vadd.f32 %v16241_v38, %v13040_v12  ;;  %v16242_v51 = vld [vmem:[#allocation110_spill] sm:$0xff]  ;;  %v16247_v11 = vld [vmem:[#allocation251_spill] sm:$0xff] }
 0x806   : > { %v13553_v9 = vadd.f32 %v16238_v0, %v16237_v44  ;;  %v13565_v60 = vadd.f32 %v16243_v33, %v16242_v51  ;;  %v16244_v21 = vld [vmem:[#allocation114_spill] sm:$0xff]  ;;  %v13573_v44 = vadd.f32 %v16247_v11, %v13125_v20  ;;  %v16250_v0 = vld [vmem:[#allocation252_spill] sm:$0xff]  ;;  %v16252_v38 = vld [vmem:[#allocation103_spill] sm:$0xff] }
 0x807   : > { %v13569_v58 = vadd.f32 %v16245_v2, %v16244_v21  ;;  %v7566_v19 = vld [vmem:[%s14916_s2 + $0x7] ss:$0 sm:$0xff]  ;;  %v13584_v33 = vadd.f32 %v16253_v35, %v16252_v38  ;;  %v16255_v21 = vld [vmem:[#allocation117_spill] sm:$0xff]  ;;  %v16263_v38 = vld [vmem:[#allocation263_spill] sm:$0xff] }
 0x808   : > { %16248 = vst [vmem:[#allocation35_spill] sm:$0xff] %v13573_v44  ;;  %v16249_v6 = vld [vmem:[#allocation102_spill] sm:$0xff]  ;;  %v13592_v20 = vadd.f32 %v16256_v46, %v16255_v21  ;;  %v16257_v11 = vld [vmem:[#allocation53_spill] sm:$0xff]  ;;  %v16265_v46 = vld [vmem:[#allocation264_spill] sm:$0xff]  ;;  %6706 = vperm.xlu1 %7269, %v7566_v19  }
 0x809   : > { %16246 = vst [vmem:[#allocation146_spill] sm:$0xff] %v13569_v58  ;;  %v13580_v12 = vadd.f32 %v16250_v0, %v16249_v6  ;;  %v16254_v51 = vld [vmem:[#allocation258_spill] sm:$0xff]  ;;  %v13596_v44 = vadd.f32 %v16258_v56, %v16257_v11  ;;  %v16259_v58 = vld [vmem:[#allocation261_spill] sm:$0xff]  ;;  %v16260_v0 = vld [vmem:[#allocation104_spill] sm:$0xff]  ;;  %v13612_v21 = vadd.f32 %v16265_v46, %v13241_v39 }
 0x80a   : > { %v13588_v2 = vadd.f32 %v16254_v51, %v13134_v3  ;;  %v13600_v6 = vadd.f32 %v16259_v58, %v13195_v42  ;;  %v16262_v3 = vld [vmem:[#allocation105_spill] sm:$0xff]  ;;  %v16267_v42 = vld [vmem:[#allocation266_spill] sm:$0xff] }
 0x80b   : > { %16251 = vst [vmem:[#allocation148_spill] sm:$0xff] %v13580_v12  ;;  %v16261_v12 = vld [vmem:[#allocation262_spill] sm:$0xff]  ;;  %v13608_v51 = vadd.f32 %v16263_v38, %v16262_v3  ;;  %v16266_v56 = vld [vmem:[#allocation265_spill] sm:$0xff]  ;;  %v13620_v58 = vadd.f32 %v16267_v42, %v13128_v23  ;;  %v16271_v38 = vld [vmem:[#allocation111_spill] sm:$0xff]  ;;  %v13640_v23 = vpop.permute.xlu2 %6397 }
 0x80c   : > { %v13604_v35 = vadd.f32 %v16261_v12, %v16260_v0  ;;  %v13616_v11 = vadd.f32 %v16266_v56, %v13114_v14  ;;  %v16268_v12 = vld [vmem:[#allocation267_spill] sm:$0xff]  ;;  %v16269_v63 = vld [vmem:[#allocation106_spill] sm:$0xff]  ;;  %v16270_v0 = vld [vmem:[#allocation268_spill] sm:$0xff]  ;;  %v13638_v56 = vpop.permute.xlu0 %6381  ;;  %16276 = vst [vmem:[#allocation149_spill] sm:$0xff] %v13640_v23 }
 0x80d   : > { %16264 = vst [vmem:[#allocation36_spill] sm:$0xff] %v13608_v51  ;;  %v13624_v5 = vadd.f32 %v16268_v12, %v13288_v10  ;;  %v13628_v3 = vadd.f32 %v16270_v0, %v16269_v63  ;;  %v16272_v51 = vld [vmem:[#allocation269_spill] sm:$0xff]  ;;  %v16273_v46 = vld [vmem:[#allocation270_spill] sm:$0xff]  ;;  %v16277_v10 = vld [vmem:[#allocation271_spill] sm:$0xff] }
 0x80e   : > { %v13632_v39 = vadd.f32 %v16272_v51, %v16271_v38  ;;  %v13636_v14 = vadd.f32 %v16273_v46, %v13352_v15  ;;  %16275 = vst [vmem:[#allocation37_spill] sm:$0xff] %v13638_v56  ;;  %v13644_v42 = vadd.f32 %v16277_v10, %v13137_v53  ;;  %v16278_v12 = vld [vmem:[#allocation272_spill] sm:$0xff]  ;;  %v16279_v51 = vld [vmem:[#allocation273_spill] sm:$0xff]  ;;  %v16281_v15 = vld [vmem:[#allocation274_spill] sm:$0xff] }
 0x80f   : > { %v13648_v63 = vadd.f32 %v16278_v12, %v13214_v49  ;;  %v13652_v0 = vadd.f32 %v16279_v51, %v13430_v36  ;;  %v16280_v38 = vld [vmem:[#allocation112_spill] sm:$0xff]  ;;  %v16282_v19 = vld [vmem:[#allocation113_spill] sm:$0xff]  ;;  %v16283_v56 = vld [vmem:[#allocation275_spill] sm:$0xff]  ;;  %v13674_v51 = vpop.permute.xlu1 %6383 }
 0x810   : > { %16274 = vst [vmem:[#allocation150_spill] sm:$0xff] %v13636_v14  ;;  %v13656_v46 = vadd.f32 %v16281_v15, %v16280_v38  ;;  %v13660_v14 = vadd.f32 %v16283_v56, %v16282_v19  ;;  %v16285_v23 = vld [vmem:[#allocation277_spill] sm:$0xff]  ;;  %v16287_v10 = vld [vmem:[#allocation278_spill] sm:$0xff]  ;;  %v16289_v12 = vld [vmem:[#allocation279_spill] sm:$0xff] }
 0x811   : > { %v13664_v53 = vadd.f32 %v16285_v23, %v13260_v37  ;;  %v13668_v49 = vadd.f32 %v16287_v10, %v13356_v31  ;;  %v13672_v36 = vadd.f32 %v16289_v12, %v13450_v30  ;;  %16291 = vst [vmem:[#allocation12_spill] sm:$0xff] %v13674_v51  ;;  %v7567_v38 = vld [vmem:[%s14916_s2 + $0x9] ss:$0 sm:$0xff]  ;;  %v7568_v56 = vld [vmem:[%s14916_s2 + $0x8] ss:$0 sm:$0xff]  ;;  %v16293_v23 = vld [vmem:[#allocation280_spill] sm:$0xff] }
 0x812   : > { %16284 = vst [vmem:[#allocation40_spill] sm:$0xff] %v13660_v14  ;;  %v16292_v37 = vld [vmem:[#allocation47_spill] sm:$0xff]  ;;  %v16295_v31 = vld [vmem:[#allocation118_spill] sm:$0xff]  ;;  %v16296_v19 = vld [vmem:[#allocation281_spill] sm:$0xff]  ;;  %6714 = vperm.xlu0 %7268, %v7567_v38   ;;  %6710 = vperm.xlu2 %7270, %v7568_v56  }
 0x813   : > { %16286 = vst [vmem:[#allocation151_spill] sm:$0xff] %v13664_v53  ;;  %v13684_v15 = vadd.f32 %v16293_v23, %v16292_v37  ;;  %v13688_v10 = vadd.f32 %v16296_v19, %v16295_v31  ;;  %v16298_v30 = vld [vmem:[#allocation282_spill] sm:$0xff]  ;;  %v16299_v51 = vld [vmem:[#allocation283_spill] sm:$0xff]  ;;  %v16302_v14 = vld [vmem:[#allocation285_spill] sm:$0xff] }
 0x814   : > { %16288 = vst [vmem:[#allocation156_spill] sm:$0xff] %v13668_v49  ;;  %v13692_v12 = vadd.f32 %v16298_v30, %v13467_v40  ;;  %v16301_v49 = vld [vmem:[#allocation284_spill] sm:$0xff]  ;;  %v13704_v37 = vadd.f32 %v16302_v14, %v13476_v22  ;;  %v16304_v19 = vld [vmem:[#allocation289_spill] sm:$0xff]  ;;  %v16319_v56 = vld [vmem:[#allocation302_spill] sm:$0xff] }
 0x815   : > { %16290 = vst [vmem:[#allocation11_spill] sm:$0xff] %v13672_v36  ;;  %v13696_v36 = vadd.f32 %v16299_v51, %v13365_v43  ;;  %v13700_v53 = vadd.f32 %v16301_v49, %v13436_v61  ;;  %v16303_v23 = vld [vmem:[#allocation288_spill] sm:$0xff]  ;;  %v13712_v40 = vadd.f32 %v16304_v19, %v13439_v8  ;;  %v7569_v43 = vld [vmem:[%s14916_s2 + $0xa] ss:$0 sm:$0xff]  ;;  %v16305_v51 = vld [vmem:[#allocation290_spill] sm:$0xff] }
 0x816   : > { %16294 = vst [vmem:[#allocation13_spill] sm:$0xff] %v13684_v15  ;;  %v13708_v31 = vadd.f32 %v16303_v23, %v13479_v57  ;;  %v13719_v61 = vadd.f32 %v16305_v51, %v13470_v29  ;;  %v16306_v49 = vld [vmem:[#allocation291_spill] sm:$0xff]  ;;  %v16307_v14 = vld [vmem:[#allocation292_spill] sm:$0xff]  ;;  %v16308_v30 = vld [vmem:[#allocation133_spill] sm:$0xff]  ;;  %6718 = vperm.xlu1 %7269, %v7569_v43  }
 0x817   : > { %16297 = vst [vmem:[#allocation159_spill] sm:$0xff] %v13688_v10  ;;  %v13723_v22 = vadd.f32 %v16306_v49, %v13488_v26  ;;  %v13727_v57 = vadd.f32 %v16307_v14, %v13147_v47  ;;  %v16309_v23 = vld [vmem:[#allocation293_spill] sm:$0xff]  ;;  %v16310_v19 = vld [vmem:[#allocation294_spill] sm:$0xff]  ;;  %v16311_v10 = vld [vmem:[#allocation295_spill] sm:$0xff] }
 0x818   : > { %16300 = vst [vmem:[#allocation364_spill] sm:$0xff] %v13696_v36  ;;  %v13731_v8 = vadd.f32 %v16309_v23, %v16308_v30  ;;  %v13735_v36 = vadd.f32 %v16310_v19, %v13491_v7  ;;  %v13739_v29 = vadd.f32 %v16311_v10, %v13473_v45  ;;  %v16312_v51 = vld [vmem:[#allocation296_spill] sm:$0xff]  ;;  %v16314_v49 = vld [vmem:[#allocation297_spill] sm:$0xff]  ;;  %v16315_v30 = vld [vmem:[#allocation298_spill] sm:$0xff] }
 0x819   : > { %v13743_v26 = vadd.f32 %v16312_v51, %v13482_v28  ;;  %v16313_v47 = vld [vmem:[#allocation136_spill] sm:$0xff]  ;;  %v13751_v23 = vadd.f32 %v16315_v30, %v13359_v24  ;;  %v16316_v7 = vld [vmem:[#allocation299_spill] sm:$0xff]  ;;  %v16318_v28 = vld [vmem:[#allocation301_spill] sm:$0xff]  ;;  %v13767_v51 = vadd.f32 %v16319_v56, %v13375_v16  ;;  %v13777_v30 = vpop.permute.xlu0 %6387 }
 0x81a   : > { %v13747_v14 = vadd.f32 %v16314_v49, %v16313_v47  ;;  %v13755_v19 = vadd.f32 %v16316_v7, %v13485_v50  ;;  %v16317_v45 = vld [vmem:[#allocation300_spill] sm:$0xff]  ;;  %v13763_v38 = vadd.f32 %v16318_v28, %v13372_v54  ;;  %v16320_v47 = vld [vmem:[#allocation303_spill] sm:$0xff]  ;;  %v16321_v49 = vld [vmem:[#allocation194_spill] sm:$0xff]  ;;  %16322 = vst [vmem:[#allocation27_spill] sm:$0xff] %v13777_v30 }
 0x81b   : > { %v13759_v10 = vadd.f32 %v16317_v45, %v13494_v62  ;;  %v13771_v24 = vadd.f32 %v16320_v47, %v13497_v41  ;;  %v13775_v50 = vadd.f32 %v16321_v49, %v13505_v34  ;;  %v13779_v62 = vpop.permute.xlu2 %6403  ;;  %v16324_v54 = vld [vmem:[#allocation198_spill] sm:$0xff]  ;;  %v16325_v16 = vld [vmem:[#allocation197_spill] sm:$0xff]  ;;  %v16326_v41 = vld [vmem:[#allocation195_spill] sm:$0xff] }
 0x81c   : > { %16323 = vst [vmem:[#allocation361_spill] sm:$0xff] %v13779_v62  ;;  %v13783_v7 = vadd.f32 %v16324_v54, %v13509_v17  ;;  %v13787_v45 = vadd.f32 %v16325_v16, %v13513_v1  ;;  %v13791_v28 = vadd.f32 %v16326_v41, %v13517_v59  ;;  %v16328_v34 = vld [vmem:[#allocation196_spill] sm:$0xff]  ;;  %v16329_v43 = vld [vmem:[#allocation199_spill] sm:$0xff]  ;;  %v13811_v16 = vpop.permute.xlu1 %6389 }
 0x81d   : > { %v13795_v56 = vadd.f32 %v16328_v34, %v13521_v18  ;;  %v13799_v47 = vadd.f32 %v16329_v43, %v13525_v27  ;;  %v16330_v49 = vld [vmem:[#allocation200_spill] sm:$0xff]  ;;  %v16332_v62 = vld [vmem:[#allocation39_spill] sm:$0xff]  ;;  %16334 = vst [vmem:[#allocation162_spill] sm:$0xff] %v13811_v16  ;;  %v16340_v16 = vld [vmem:[#allocation206_spill] sm:$0xff] }
 0x81e   : > { %16327 = vst [vmem:[#allocation42_spill] sm:$0xff] %v13791_v28  ;;  %v13803_v17 = vadd.f32 %v16330_v49, %v13529_v4  ;;  %v16331_v54 = vld [vmem:[#allocation340_spill] sm:$0xff]  ;;  %v7570_v18 = vld [vmem:[%s14916_s2 + $0xc] ss:$0 sm:$0xff]  ;;  %v7571_v27 = vld [vmem:[%s14916_s2 + $0xb] ss:$0 sm:$0xff]  ;;  %v13837_v30 = vadd.f32 %v16340_v16, %v13557_v13 }
 0x81f   : > { %v13807_v1 = vmul.f32 %v16332_v62, %v16331_v54  ;;  %v4502_v59 = vmul.f32 %v12969_v32, %v16331_v54  ;;  %v16335_v4 = vld [vmem:[#allocation203_spill] sm:$0xff]  ;;  %v16336_v62 = vld [vmem:[#allocation201_spill] sm:$0xff]  ;;  %v16337_v32 = vld [vmem:[#allocation202_spill] sm:$0xff]  ;;  %6726 = vperm.xlu0 %7268, %v7570_v18   ;;  %6722 = vperm.xlu2 %7270, %v7571_v27  }
 0x820   : > { %v13821_v41 = vadd.f32 %v16335_v4, %v13533_v48  ;;  %v13825_v34 = vadd.f32 %v16336_v62, %v13545_v52  ;;  %v13829_v43 = vadd.f32 %v16337_v32, %v13549_v25  ;;  %v16339_v49 = vld [vmem:[#allocation207_spill] sm:$0xff]  ;;  %16341 = vst [vmem:[#allocation380_spill] sm:$0xff] %v13837_v30  ;;  %v16342_v15 = vld [vmem:[#allocation204_spill] sm:$0xff]  ;;  %v16343_v4 = vld [vmem:[#allocation205_spill] sm:$0xff] }
 0x821   : > { %16333 = vst [vmem:[#allocation152_spill] sm:$0xff] %v13807_v1  ;;  %v13833_v54 = vadd.f32 %v16339_v49, %v13553_v9  ;;  %v13841_v48 = vadd.f32 %v16342_v15, %v13561_v55  ;;  %v13845_v52 = vadd.f32 %v16343_v4, %v13565_v60  ;;  %v16344_v62 = vld [vmem:[#allocation146_spill] sm:$0xff]  ;;  %v16345_v28 = vld [vmem:[#allocation208_spill] sm:$0xff]  ;;  %v7572_v9 = vld [vmem:[%s14916_s2 + $0xd] ss:$0 sm:$0xff] }
 0x822   : > { %16338 = vst [vmem:[#allocation379_spill] sm:$0xff] %v13829_v43  ;;  %v13849_v25 = vadd.f32 %v16345_v28, %v16344_v62  ;;  %v16347_v32 = vld [vmem:[#allocation35_spill] sm:$0xff]  ;;  %v16348_v49 = vld [vmem:[#allocation209_spill] sm:$0xff]  ;;  %v16350_v16 = vld [vmem:[#allocation148_spill] sm:$0xff]  ;;  %6730 = vperm.xlu1 %7269, %v7572_v9  }
 0x823   : > { %v13856_v13 = vadd.f32 %v16348_v49, %v16347_v32  ;;  %v16351_v43 = vld [vmem:[#allocation211_spill] sm:$0xff]  ;;  %v16353_v15 = vld [vmem:[#allocation210_spill] sm:$0xff]  ;;  %v16355_v4 = vld [vmem:[#allocation216_spill] sm:$0xff] }
 0x824   : > { %16346 = vst [vmem:[#allocation41_spill] sm:$0xff] %v13849_v25  ;;  %v13860_v55 = vadd.f32 %v16351_v43, %v16350_v16  ;;  %v13864_v60 = vadd.f32 %v16353_v15, %v13584_v33  ;;  %v13868_v28 = vadd.f32 %v16355_v4, %v13588_v2  ;;  %v16356_v62 = vld [vmem:[#allocation215_spill] sm:$0xff]  ;;  %v16357_v30 = vld [vmem:[#allocation213_spill] sm:$0xff]  ;;  %v4740_v43 = vrot.slane %v4502_v59, 2  ;;  %v16359_v33 = vld [vmem:[#allocation214_spill] sm:$0xff] }
 0x825   : > { %16349 = vst [vmem:[#allocation153_spill] sm:$0xff] %v13856_v13  ;;  %v13872_v25 = vadd.f32 %v16356_v62, %v13592_v20  ;;  %v13876_v32 = vadd.f32 %v16357_v30, %v13596_v44  ;;  %v13881_v16 = vadd.f32 %v16359_v33, %v13600_v6  ;;  %v16361_v2 = vld [vmem:[#allocation218_spill] sm:$0xff]  ;;  %v16363_v20 = vld [vmem:[#allocation36_spill] sm:$0xff]  ;;  %v16364_v4 = vld [vmem:[#allocation219_spill] sm:$0xff] }
 0x826   : > { %16352 = vst [vmem:[#allocation32_spill] sm:$0xff] %v13860_v55  ;;  %v13885_v15 = vadd.f32 %v16361_v2, %v13604_v35  ;;  %v13889_v62 = vadd.f32 %v16364_v4, %v16363_v20  ;;  %v16366_v44 = vld [vmem:[#allocation221_spill] sm:$0xff]  ;;  %v16368_v59 = vld [vmem:[#allocation220_spill] sm:$0xff]  ;;  %v16369_v27 = vld [vmem:[#allocation226_spill] sm:$0xff]  ;;  %v13911_v4 = vpop.permute.xlu0 %6393 }
 0x827   : > { %16354 = vst [vmem:[#allocation154_spill] sm:$0xff] %v13864_v60  ;;  %v13893_v30 = vadd.f32 %v16366_v44, %v13612_v21  ;;  %v13897_v18 = vadd.f32 %v16368_v59, %v13616_v11  ;;  %v13901_v6 = vadd.f32 %v16369_v27, %v13620_v58  ;;  %v16371_v33 = vld [vmem:[#allocation225_spill] sm:$0xff]  ;;  %v16373_v2 = vld [vmem:[#allocation223_spill] sm:$0xff]  ;;  %v13913_v21 = vpop.permute.xlu2 %6409  ;;  %v16377_v11 = vld [vmem:[#allocation224_spill] sm:$0xff] }
 0x828   : > { %16358 = vst [vmem:[#allocation44_spill] sm:$0xff] %v13876_v32  ;;  %v13905_v35 = vadd.f32 %v16371_v33, %v13624_v5  ;;  %v13909_v20 = vadd.f32 %v16373_v2, %v13628_v3  ;;  %v13917_v44 = vadd.f32 %v16377_v11, %v13632_v39  ;;  %v16379_v58 = vld [vmem:[#allocation150_spill] sm:$0xff]  ;;  %v16382_v5 = vld [vmem:[#allocation231_spill] sm:$0xff]  ;;  %v16383_v3 = vld [vmem:[#allocation233_spill] sm:$0xff] }
 0x829   : > { %16360 = vst [vmem:[#allocation155_spill] sm:$0xff] %v13881_v16  ;;  %v16380_v59 = vld [vmem:[#allocation230_spill] sm:$0xff]  ;;  %v13925_v33 = vadd.f32 %v16382_v5, %v13644_v42  ;;  %v13929_v9 = vadd.f32 %v16383_v3, %v13648_v63  ;;  %v7852_v2 = vld [vmem:[%s8223_s20 + $0x18] sm:$0xff]  ;;  %v16385_v49 = vld [vmem:[#allocation315_spill] sm:$0xff] }
 0x82a   : > { %16362 = vst [vmem:[#allocation45_spill] sm:$0xff] %v13885_v15  ;;  %v13921_v27 = vadd.f32 %v16380_v59, %v16379_v58  ;;  %v16388_v11 = vld [vmem:[#allocation119_spill] sm:$0xff]  ;;  %v16389_v58 = vrot.slane %v13807_v1, 2  ;;  %v13942_v59 = vpop.permute.xlu1 %6395  ;;  %v7853_v1 = vld [vmem:[%s8223_s20 + $0x20] sm:$0xff]  ;;  %v16448_v55 = vld [vmem:[#allocation421_spill] sm:$0xff] }
 0x82b   : > { %16365 = vst [vmem:[#allocation157_spill] sm:$0xff] %v13889_v62  ;;  %v7573_v63 = vld [vmem:[%s14916_s2 + $0xf] ss:$0 sm:$0xff]  ;;  %v7574_v5 = vld [vmem:[%s14916_s2 + $0xe] ss:$0 sm:$0xff]  ;;  %v16397_v62 = vld [vmem:[#allocation238_spill] sm:$0xff] }
 0x82c   : > { %16367 = vst [vmem:[#allocation46_spill] sm:$0xff] %v13893_v30  ;;  %v16386_v30 = vld [vmem:[#allocation347_spill] sm:$0xff]  ;;  %v4741_v42 = vsel %vm4626_vm1, %v16389_v58, %v4740_v43  ;;  %v4438_v43 = vmul.f32 %v7853_v1, %v16385_v49  ;;  %v7575_v1 = vld [vmem:[%s14916_s2 + $0x10] ss:$0 sm:$0xff]  ;;  %6738 = vperm.xlu0 %7268, %v7573_v63   ;;  %6734 = vperm.xlu2 %7270, %v7574_v5  }
 0x82d   : > { %16370 = vst [vmem:[#allocation158_spill] sm:$0xff] %v13901_v6  ;;  %v7854_v58 = vld [vmem:[%s8223_s20 + $0x28] sm:$0x3]  ;;  %6742 = vperm.xlu1 %7269, %v7575_v1   ;;  %v16422_v1 = vld [vmem:[#allocation310_spill] sm:$0xff] }
 0x82e   : > { %16372 = vst [vmem:[#allocation165_spill] sm:$0xff] %v13905_v35  ;;  %v16396_v35 = vld [vmem:[#allocation40_spill] sm:$0xff]  ;;  %v16399_v16 = vld [vmem:[#allocation151_spill] sm:$0xff] }
 0x82f   : > { %16374 = vst [vmem:[#allocation50_spill] sm:$0xff] %v13909_v20  ;;  %v16387_v20 = vld [vmem:[#allocation58_spill] sm:$0xff]  ;;  %v13966_v15 = vadd.f32 %v16397_v62, %v16396_v35  ;;  %v7856_v35 = vld [vmem:[%s8223_s20 + $0x70] sm:$0x3]  ;;  %v6416_v5 = vpop.permute.xlu2 %6415 }
 0x830   : > { %16375 = vst [vmem:[#allocation160_spill] sm:$0xff] %v13911_v4  ;;  %v4506_v39 = vmul.f32 %v16387_v20, %v16386_v30  ;;  %v16391_v20 = vld [vmem:[#allocation232_spill] sm:$0xff] }
 0x831   : > { %16376 = vst [vmem:[#allocation161_spill] sm:$0xff] %v13913_v21  ;;  %v4437_v21 = vmul.f32 %v7852_v2, %v16385_v49  ;;  %v13952_v3 = vadd.f32 %v16391_v20, %v13652_v0  ;;  %v16393_v2 = vld [vmem:[#allocation307_spill] sm:$0xff] }
 0x832   : > { %16378 = vst [vmem:[#allocation163_spill] sm:$0xff] %v13917_v44  ;;  %v13937_v44 = vmul.f32 %v16388_v11, %v16386_v30  ;;  %v4190_v11 = vadd.f32 %v16393_v2, %v13712_v40  ;;  %v16400_v0 = vld [vmem:[#allocation243_spill] sm:$0xff]  ;;  %v16402_v40 = vld [vmem:[#allocation320_spill] sm:$0xff] }
 0x833   : > { %16381 = vst [vmem:[#allocation166_spill] sm:$0xff] %v13921_v27  ;;  %v4439_v27 = vmul.f32 %v7854_v58, %v16385_v49  ;;  %v13970_v20 = vadd.f32 %v16400_v0, %v16399_v16  ;;  %v16403_v49 = vld [vmem:[#allocation156_spill] sm:$0xff]  ;;  %v16404_v58 = vld [vmem:[#allocation245_spill] sm:$0xff]  ;;  %v4448_v16 = vmul.f32 %v7856_v35, %v16402_v40 }
 0x834   : > { %16384 = vst [vmem:[#allocation14_spill] sm:$0xff] %v13929_v9  ;;  %v4896_v0 = vadd.f32 %v4741_v42, %v4190_v11  ;;  %v4747_v9 = vrot.slane %v4506_v39, 2  ;;  %v15140_v13 = vrot.slane %v13937_v44, 2  ;;  %v16410_v35 = vld [vmem:[#allocation257_spill] sm:$0xff] }
 0x835   : > { %16390 = vst [vmem:[#allocation15_spill] sm:$0xff] %v13942_v59  ;;  %v16394_v59 = vld [vmem:[#allocation237_spill] sm:$0xff]  ;;  %v13997_v42 = vadd.f32 %v16410_v35, %v13700_v53 }
 0x836   : > { %16392 = vst [vmem:[#allocation20_spill] sm:$0xff] %v13952_v3  ;;  %v13962_v4 = vadd.f32 %v16394_v59, %v13656_v46  ;;  %v7855_v3 = vld [vmem:[%s8223_s20 + $0x68] sm:$0xff]  ;;  %v13979_v46 = vadd.f32 %v16404_v58, %v16403_v49  ;;  %v4633_v49 = vrot.slane %v4438_v43, 2  ;;  %v4635_v58 = vrot.slane %v4439_v27, 2  ;;  %v14007_v27 = vpop.permute.xlu0 %6399  ;;  %v16417_v53 = vld [vmem:[#allocation121_spill] sm:$0xff] }
 0x837   : > { %16398 = vst [vmem:[#allocation167_spill] sm:$0xff] %v13966_v15  ;;  %v4447_v2 = vmul.f32 %v7855_v3, %v16402_v40  ;;  %v16406_v59 = vld [vmem:[#allocation11_spill] sm:$0xff]  ;;  %v4632_v3 = vrot.slane %v4437_v21, 2  ;;  %v16413_v21 = vld [vmem:[#allocation306_spill] sm:$0xff]  ;;  %v4650_v43 = vrot.slane %v4448_v16, 2  ;;  %v4193_v16 = vadd.f32 %v16422_v1, %v13727_v57 }
 0x838   : > { %16395 = vst [vmem:[#allocation168_spill] sm:$0xff] %v13962_v4  ;;  %v16407_v4 = vld [vmem:[#allocation244_spill] sm:$0xff]  ;;  %v14005_v39 = vadd.f32 %v16413_v21, %v13708_v31  ;;  %v16420_v31 = vld [vmem:[#allocation309_spill] sm:$0xff]  ;;  %v14030_v21 = vpop.permute.xlu1 %6401  ;;  %v4636_v57 = vsel %vm4626_vm1, %v4633_v49, %v4635_v58 }
 0x839   : > { %16401 = vst [vmem:[#allocation18_spill] sm:$0xff] %v13970_v20  ;;  %v13983_v62 = vadd.f32 %v16407_v4, %v16406_v59  ;;  %v16408_v20 = vld [vmem:[#allocation254_spill] sm:$0xff]  ;;  %v4648_v63 = vrot.slane %v4447_v2, 2  ;;  %v14023_v2 = vadd.f32 %v16420_v31, %v13723_v22  ;;  %v16424_v22 = vld [vmem:[#allocation311_spill] sm:$0xff]  ;;  %v16427_v31 = vld [vmem:[#allocation313_spill] sm:$0xff] }
 0x83a   : > { %16405 = vst [vmem:[#allocation19_spill] sm:$0xff] %v13979_v46  ;;  %v13989_v15 = vadd.f32 %v16408_v20, %v13692_v12  ;;  %v7857_v46 = vld [vmem:[%s8223_s20 + $0x60] sm:$0xff]  ;;  %v16412_v12 = vld [vmem:[#allocation256_spill] sm:$0xff]  ;;  %v16415_v20 = vld [vmem:[#allocation343_spill] sm:$0xff]  ;;  %v4196_v1 = vadd.f32 %v16427_v31, %v13739_v29 }
 0x83b   : > { %v4446_v4 = vmul.f32 %v7857_v46, %v16402_v40  ;;  %v16409_v59 = vld [vmem:[#allocation414_spill] sm:$0xff]  ;;  %16411 = vst [vmem:[#allocation23_spill] sm:$0xff] %v13997_v42  ;;  %v14001_v11 = vadd.f32 %v16412_v12, %v13704_v37  ;;  %v16416_v40 = vld [vmem:[#allocation57_spill] sm:$0xff]  ;;  %v16419_v37 = vld [vmem:[#allocation308_spill] sm:$0xff]  ;;  %v4749_v12 = vsel %vm4626_vm1, %v4747_v9, %v15140_v13  ;;  %v4651_v29 = vsel %vm4626_vm1, %v4648_v63, %v4650_v43 }
 0x83c   : > { %v5729_v6 = vadd.f32 %v16409_v59, %v4896_v0  ;;  %16414 = vst [vmem:[#allocation164_spill] sm:$0xff] %v14007_v27  ;;  %v14011_v46 = vmul.f32 %v16416_v40, %v16415_v20  ;;  %v4511_v0 = vmul.f32 %v16417_v53, %v16415_v20  ;;  %v14019_v35 = vadd.f32 %v16419_v37, %v13719_v61  ;;  %v7577_v61 = vld [vmem:[%s14916_s2 + $0x11] ss:$0 sm:$0xff]  ;;  %v16428_v13 = vld [vmem:[#allocation314_spill] sm:$0xff]  ;;  %v16434_v43 = vld [vmem:[#allocation319_spill] sm:$0xff] }
 0x83d   : > { %16421 = vst [vmem:[#allocation362_spill] sm:$0xff] %v14023_v2  ;;  %v4647_v40 = vrot.slane %v4446_v4, 2  ;;  %v4634_v53 = vsel %vm4626_vm1, %v4632_v3, %v4633_v49  ;;  %v16425_v9 = vld [vmem:[#allocation312_spill] sm:$0xff]  ;;  %v4899_v58 = vadd.f32 %v4749_v12, %v4193_v16  ;;  %v14068_v4 = vadd.f32 %v4636_v57, %v13821_v41  ;;  %6746 = vperm.xlu2 %7270, %v7577_v61   ;;  %v16435_v12 = vld [vmem:[#allocation418_spill] sm:$0xff]  ;;  %v16436_v57 = vld [vmem:[#allocation323_spill] sm:$0xff] }
 0x83e   : > { %v14015_v59 = vadd.f32 %v6416_v5, %v5729_v6  ;;  %16423 = vst [vmem:[#allocation28_spill] sm:$0xff] %v14030_v21  ;;  %v7576_v6 = vld [vmem:[%s14916_s2 + $0x12] ss:$0 sm:$0xff]  ;;  %v14040_v5 = vadd.f32 %v16424_v22, %v13731_v8  ;;  %v14046_v37 = vadd.f32 %v16425_v9, %v13735_v36  ;;  %v7578_v3 = vld [vmem:[%s14916_s2 + $0x13] ss:$0 sm:$0xff]  ;;  %v15141_v36 = vrot.slane %v14011_v46, 2 }
 0x83f   : > { %v16429_v21 = vld [vmem:[#allocation316_spill] sm:$0xff]  ;;  %v4755_v49 = vrot.slane %v4511_v0, 2  ;;  %16431 = vst [vmem:[#allocation171_spill] sm:$0xff] %v14068_v4  ;;  %6750 = vperm.xlu0 %7268, %v7576_v6   ;;  %v14079_v16 = vadd.f32 %v16434_v43, %v13759_v10  ;;  %v5732_v41 = vadd.f32 %v16435_v12, %v4899_v58  ;;  %v7858_v22 = vld [vmem:[%s8223_s20 + $0xa8] sm:$0xff]  ;;  %v14094_v10 = vadd.f32 %v4651_v29, %v13845_v52  ;;  %v16439_v31 = vld [vmem:[#allocation326_spill] sm:$0xff] }
 0x840   : > { %16418 = vst [vmem:[#allocation169_spill] sm:$0xff] %v14015_v59  ;;  %v14052_v59 = vadd.f32 %v16428_v13, %v13743_v26  ;;  %v14056_v8 = vadd.f32 %v16429_v21, %v13747_v14  ;;  %v16430_v26 = vld [vmem:[#allocation317_spill] sm:$0xff]  ;;  %v14071_v14 = vadd.f32 %v4634_v53, %v13775_v50  ;;  %v16433_v21 = vld [vmem:[#allocation318_spill] sm:$0xff]  ;;  %v14085_v50 = vmul.f32 %v7858_v22, %v16436_v57  ;;  %v7859_v6 = vld [vmem:[%s8223_s20 + $0xb0] sm:$0xff] }
 0x841   : > { %16426 = vst [vmem:[#allocation369_spill] sm:$0xff] %v14046_v37  ;;  %v14065_v13 = vadd.f32 %v16430_v26, %v13751_v23  ;;  %v14075_v0 = vadd.f32 %v16433_v21, %v13755_v19  ;;  %v4649_v23 = vsel %vm4626_vm1, %v4647_v40, %v4648_v63  ;;  %v14089_v61 = vmul.f32 %v7859_v6, %v16436_v57  ;;  %v7860_v19 = vld [vmem:[%s8223_s20 + $0xb8] sm:$0x3]  ;;  %v14096_v63 = vpop.permute.xlu0 %6405  ;;  %v6422_v40 = vpop.permute.xlu2 %6421  ;;  %v7861_v9 = vld [vmem:[%s8223_s20 + $0xf0] sm:$0xff]  ;;  %v16441_v43 = vld [vmem:[#allocation346_spill] sm:$0xff] }
 0x842   : > { %16432 = vst [vmem:[#allocation170_spill] sm:$0xff] %v14071_v14  ;;  %v4457_v53 = vmul.f32 %v7860_v19, %v16436_v57  ;;  %6754 = vperm.xlu1 %7269, %v7578_v3   ;;  %v14100_v58 = vmul.f32 %v7861_v9, %v16439_v31  ;;  %v7862_v26 = vld [vmem:[%s8223_s20 + $0xf8] sm:$0xff]  ;;  %v4756_v52 = vsel %vm4626_vm1, %v15141_v36, %v4755_v49  ;;  %v7863_v3 = vld [vmem:[%s8223_s20 + $0x228] sm:$0xff]  ;;  %v7864_v22 = vld [vmem:[%s8223_s20 + $0x230] sm:$0xff]  ;;  %v4662_v42 = vrot.slane %v14085_v50, 2 }
 0x843   : > { %16437 = vst [vmem:[#allocation372_spill] sm:$0xff] %v14094_v10  ;;  %v14104_v21 = vmul.f32 %v7862_v26, %v16439_v31  ;;  %v14109_v29 = vadd.f32 %v6422_v40, %v5732_v41  ;;  %v4503_v12 = vmul.f32 %v7863_v3, %v16441_v43  ;;  %v14115_v57 = vmul.f32 %v7864_v22, %v16441_v43  ;;  %v16442_v6 = vld [vmem:[#allocation350_spill] sm:$0xff]  ;;  %v16443_v19 = vld [vmem:[#allocation125_spill] sm:$0xff]  ;;  %v16444_v26 = vld [vmem:[#allocation127_spill] sm:$0xff] }
 0x844   : > { %16438 = vst [vmem:[#allocation29_spill] sm:$0xff] %v14096_v63  ;;  %v4515_v9 = vmul.f32 %v16443_v19, %v16442_v6  ;;  %v14121_v27 = vmul.f32 %v16444_v26, %v16442_v6  ;;  %v14123_v63 = vpop.permute.xlu1 %6407  ;;  %v7579_v49 = vld [vmem:[%s14916_s2 + $0x15] ss:$0 sm:$0xff]  ;;  %v7580_v41 = vld [vmem:[%s14916_s2 + $0x14] ss:$0 sm:$0xff]  ;;  %v7866_v22 = vld [vmem:[%s8223_s20] sm:$0xff] }
 0x845   : > { %16440 = vst [vmem:[#allocation370_spill] sm:$0xff] %v14109_v29  ;;  %v7865_v40 = vld [vmem:[%s8223_s20 + $0x100] sm:$0x3]  ;;  %v16446_v19 = vld [vmem:[#allocation325_spill] sm:$0xff]  ;;  %v7867_v29 = vld [vmem:[%s8223_s20 + $0x8] sm:$0xff]  ;;  %v4663_v10 = vrot.slane %v14089_v61, 2  ;;  %6758 = vperm.xlu2 %7270, %v7580_v41  }
 0x846   : > { %16445 = vst [vmem:[#allocation172_spill] sm:$0xff] %v14123_v63  ;;  %v4466_v3 = vmul.f32 %v7865_v40, %v16439_v31  ;;  %v4434_v36 = vmul.f32 %v7866_v22, %v16446_v19  ;;  %v4435_v26 = vmul.f32 %v7867_v29, %v16446_v19  ;;  %v14138_v63 = vadd.f32 %v4649_v23, %v13787_v45  ;;  %v7868_v14 = vld [vmem:[%s8223_s20 + $0x238] sm:$0x3]  ;;  %v7581_v31 = vld [vmem:[%s14916_s2 + $0x16] ss:$0 sm:$0xff] }
 0x847   : > { %v4665_v4 = vrot.slane %v4457_v53, 2  ;;  %v4505_v32 = vmul.f32 %v7868_v14, %v16441_v43  ;;  %v4677_v40 = vrot.slane %v14100_v58, 2  ;;  %v4678_v22 = vrot.slane %v14104_v21, 2  ;;  %v7869_v29 = vld [vmem:[%s8223_s20 + $0x10] sm:$0x3]  ;;  %6762 = vperm.xlu0 %7268, %v7579_v49   ;;  %v16452_v41 = vld [vmem:[#allocation321_spill] sm:$0xff] }
 0x848   : > { %16447 = vst [vmem:[#allocation388_spill] sm:$0xff] %v14138_v63  ;;  %v4436_v45 = vmul.f32 %v7869_v29, %v16446_v19  ;;  %v4902_v23 = vadd.f32 %v4756_v52, %v4196_v1  ;;  %v4742_v63 = vrot.slane %v4503_v12, 2  ;;  %v4743_v50 = vrot.slane %v14115_v57, 2  ;;  %v16449_v37 = vld [vmem:[#allocation348_spill] sm:$0xff]  ;;  %v16451_v1 = vld [vmem:[#allocation131_spill] sm:$0xff]  ;;  %v16453_v29 = vld [vmem:[#allocation322_spill] sm:$0xff] }
 0x849   : > { %v4762_v61 = vrot.slane %v4515_v9, 2  ;;  %v15143_v53 = vrot.slane %v14121_v27, 2  ;;  %v4680_v14 = vrot.slane %v4466_v3, 2  ;;  %v4627_v43 = vrot.slane %v4434_v36, 2  ;;  %v16450_v21 = vld [vmem:[#allocation128_spill] sm:$0xff]  ;;  %v14161_v9 = vpop.permute.xlu0 %6411  ;;  %v6428_v49 = vpop.permute.xlu2 %6427 }
 0x84a   : > { %v4628_v60 = vrot.slane %v4435_v26, 2  ;;  %v5735_v58 = vadd.f32 %v16448_v55, %v4902_v23  ;;  %v14156_v2 = vmul.f32 %v16450_v21, %v16449_v37  ;;  %v4520_v52 = vmul.f32 %v16451_v1, %v16449_v37  ;;  %6766 = vperm.xlu1 %7269, %v7581_v31   ;;  %v7870_v3 = vld [vmem:[%s8223_s20 + $0x250] sm:$0x3] }
 0x84b   : > { %v4745_v12 = vrot.slane %v4505_v32, 2  ;;  %v4666_v57 = vsel %vm4626_vm1, %v4663_v10, %v4665_v4  ;;  %v14165_v36 = vadd.f32 %v16452_v41, %v13763_v38  ;;  %v4630_v55 = vrot.slane %v4436_v45, 2  ;;  %v7583_v45 = vld [vmem:[%s14916_s2 + $0x17] ss:$0 sm:$0xff]  ;;  %v7584_v41 = vld [vmem:[%s14916_s2 + $0x19] ss:$0 sm:$0xff] }
 0x84c   : > { %v4508_v19 = vmul.f32 %v7870_v3, %v16386_v30  ;;  %v14169_v26 = vadd.f32 %v6428_v49, %v5735_v58  ;;  %v14173_v32 = vadd.f32 %v16453_v29, %v13767_v51  ;;  %v4664_v4 = vsel %vm4626_vm1, %v4662_v42, %v4663_v10  ;;  %v14180_v23 = vpop.permute.xlu1 %6413  ;;  %v7582_v30 = vld [vmem:[%s14916_s2 + $0x18] ss:$0 sm:$0xff]  ;;  %v16457_v29 = vld [vmem:[#allocation423_spill] sm:$0xff] }
 0x84d   : > { %v4744_v31 = vsel %vm4626_vm1, %v4742_v63, %v4743_v50  ;;  %v4764_v38 = vsel %vm4626_vm1, %v4762_v61, %v15143_v53  ;;  %v4629_v51 = vsel %vm4626_vm1, %v4627_v43, %v4628_v60  ;;  %v14190_v42 = vadd.f32 %v4666_v57, %v13872_v25  ;;  %v7871_v61 = vld [vmem:[%s8223_s20 + $0x258] sm:$0xff]  ;;  %6770 = vperm.xlu2 %7270, %v7583_v45  }
 0x84e   : > { %v4681_v10 = vsel %vm4626_vm1, %v4678_v22, %v4680_v14  ;;  %v4679_v63 = vsel %vm4626_vm1, %v4677_v40, %v4678_v22  ;;  %v4509_v58 = vmul.f32 %v7871_v61, %v16415_v20  ;;  %v15142_v21 = vrot.slane %v14156_v2, 2  ;;  %v16454_v40 = vld [vmem:[#allocation324_spill] sm:$0xff]  ;;  %v16461_v61 = vld [vmem:[#allocation138_spill] sm:$0xff] }
 0x84f   : > { %v4770_v1 = vrot.slane %v4520_v52, 2  ;;  %v4746_v49 = vsel %vm4626_vm1, %v4743_v50, %v4745_v12  ;;  %v4750_v43 = vrot.slane %v4508_v19, 2  ;;  %v4631_v25 = vsel %vm4626_vm1, %v4628_v60, %v4630_v55  ;;  %6774 = vperm.xlu0 %7268, %v7582_v30   ;;  %v16455_v60 = vld [vmem:[#allocation422_spill] sm:$0xff]  ;;  %v16456_v12 = vld [vmem:[#allocation424_spill] sm:$0xff]  ;;  %v16459_v30 = vld [vmem:[#allocation349_spill] sm:$0xff] }
 0x850   : > { %v4897_v57 = vadd.f32 %v4744_v31, %v14019_v35  ;;  %v4905_v14 = vadd.f32 %v4764_v38, %v14056_v8  ;;  %v14206_v22 = vadd.f32 %v16454_v40, %v13771_v24  ;;  %v14209_v20 = vadd.f32 %v4681_v10, %v13897_v18  ;;  %v7872_v38 = vld [vmem:[%s8223_s20 + $0x270] sm:$0xff]  ;;  %v7875_v40 = vld [vmem:[%s8223_s20 + $0x140] sm:$0xff] }
 0x851   : > { %v14212_v50 = vadd.f32 %v4664_v4, %v13803_v17  ;;  %v14215_v52 = vadd.f32 %v4629_v51, %v13795_v56  ;;  %v4898_v24 = vadd.f32 %v4746_v49, %v13983_v62  ;;  %v4752_v55 = vrot.slane %v4509_v58, 2  ;;  %v6418_v56 = vpop.permute.xlu0 %6417  ;;  %v6434_v19 = vpop.permute.xlu2 %6433  ;;  %v7873_v51 = vld [vmem:[%s8223_s20 + $0x278] sm:$0xff] }
 0x852   : > { %v5730_v35 = vadd.f32 %v16455_v60, %v4897_v57  ;;  %v5738_v8 = vadd.f32 %v16456_v12, %v4905_v14  ;;  %v14221_v18 = vadd.f32 %v4631_v25, %v13799_v47  ;;  %v14224_v17 = vadd.f32 %v4679_v63, %v13841_v48  ;;  %6778 = vperm.xlu1 %7269, %v7584_v41   ;;  %v16460_v63 = vld [vmem:[#allocation353_spill] sm:$0xff] }
 0x853   : > { %v4771_v3 = vsel %vm4626_vm1, %v15142_v21, %v4770_v1  ;;  %v5731_v4 = vadd.f32 %v16457_v29, %v4898_v24  ;;  %v16458_v62 = vrot.slane %v13937_v44, 2  ;;  %v4512_v45 = vmul.f32 %v7872_v38, %v16459_v30  ;;  %v16462_v44 = vld [vmem:[#allocation137_spill] sm:$0xff]  ;;  %v7877_v24 = vld [vmem:[%s8223_s20 + $0x30] sm:$0xff]  ;;  %v7879_v38 = vld [vmem:[%s8223_s20 + $0x280] sm:$0x3] }
 0x854   : > { %v14233_v47 = vadd.f32 %v6418_v56, %v5730_v35  ;;  %v14235_v48 = vadd.f32 %v6434_v19, %v5738_v8  ;;  %v14241_v10 = vmul.f32 %v7873_v51, %v16459_v30  ;;  %v4524_v58 = vmul.f32 %v16461_v61, %v16460_v63  ;;  %v6420_v49 = vpop.permute.xlu1 %6419  ;;  %v7585_v41 = vld [vmem:[%s14916_s2 + $0x1b] ss:$0 sm:$0xff]  ;;  %v7876_v35 = vld [vmem:[%s8223_s20 + $0x148] sm:$0x3] }
 0x855   : > { %v4751_v31 = vsel %vm4626_vm1, %v16458_v62, %v4750_v43  ;;  %v14247_v1 = vmul.f32 %v16462_v44, %v16460_v63  ;;  %v7586_v43 = vld [vmem:[%s14916_s2 + $0x1a] ss:$0 sm:$0xff]  ;;  %v14265_v8 = vadd.f32 %v6420_v49, %v5731_v4  ;;  %v16464_v56 = vld [vmem:[#allocation327_spill] sm:$0xff]  ;;  %v4514_v51 = vmul.f32 %v7879_v38, %v16459_v30  ;;  %v7587_v4 = vld [vmem:[%s14916_s2 + $0x1c] ss:$0 sm:$0xff] }
 0x856   : > { %v7874_v25 = vld [vmem:[%s8223_s20 + $0x138] sm:$0xff]  ;;  %v14269_v19 = vmul.f32 %v7877_v24, %v16464_v56  ;;  %v16465_v61 = vrot.slane %v14011_v46, 2  ;;  %v7880_v49 = vld [vmem:[%s8223_s20 + $0x40] sm:$0x3]  ;;  %v4900_v24 = vadd.f32 %v4751_v31, %v14040_v5  ;;  %v4908_v30 = vadd.f32 %v4771_v3, %v14075_v0  ;;  %6782 = vperm.xlu2 %7270, %v7586_v43   ;;  %v16468_v21 = vld [vmem:[#allocation427_spill] sm:$0xff] }
 0x857   : > { %v16463_v57 = vld [vmem:[#allocation329_spill] sm:$0xff]  ;;  %v4757_v46 = vrot.slane %v4512_v45, 2  ;;  %v15144_v38 = vrot.slane %v14247_v1, 2  ;;  %6786 = vperm.xlu0 %7268, %v7585_v41   ;;  %v7882_v3 = vld [vmem:[%s8223_s20 + $0x50] sm:$0xff]  ;;  %v4760_v45 = vrot.slane %v4514_v51, 2  ;;  %v16469_v41 = vld [vmem:[#allocation351_spill] sm:$0xff] }
 0x858   : > { %v14257_v14 = vmul.f32 %v7874_v25, %v16463_v57  ;;  %v14261_v60 = vmul.f32 %v7875_v40, %v16463_v57  ;;  %v4475_v12 = vmul.f32 %v7876_v35, %v16463_v57  ;;  %v7878_v29 = vld [vmem:[%s8223_s20 + $0x38] sm:$0xff]  ;;  %v4754_v44 = vsel %vm4626_vm1, %v4752_v55, %v16465_v61  ;;  %v7881_v57 = vld [vmem:[%s8223_s20 + $0x48] sm:$0xff]  ;;  %v16466_v40 = vld [vmem:[#allocation328_spill] sm:$0xff] }
 0x859   : > { %v14273_v62 = vmul.f32 %v7878_v29, %v16464_v56  ;;  %v14285_v25 = vmul.f32 %v7880_v49, %v16464_v56  ;;  %v14289_v35 = vmul.f32 %v7881_v57, %v16466_v40  ;;  %v4758_v55 = vrot.slane %v14241_v10, 2  ;;  %v16467_v61 = vld [vmem:[#allocation425_spill] sm:$0xff]  ;;  %v6424_v10 = vpop.permute.xlu0 %6423  ;;  %v16470_v43 = vld [vmem:[#allocation139_spill] sm:$0xff] }
 0x85a   : > { %v4777_v29 = vrot.slane %v4524_v58, 2  ;;  %v4692_v56 = vrot.slane %v14257_v14, 2  ;;  %v5733_v49 = vadd.f32 %v16467_v61, %v4900_v24  ;;  %v5741_v57 = vadd.f32 %v16468_v21, %v4908_v30  ;;  %6790 = vperm.xlu1 %7269, %v7587_v4   ;;  %v6440_v58 = vpop.permute.xlu2 %6439  ;;  %v16471_v24 = vld [vmem:[#allocation426_spill] sm:$0xff] }
 0x85b   : > { %v4901_v53 = vadd.f32 %v4754_v44, %v13989_v15  ;;  %v4693_v5 = vrot.slane %v14261_v60, 2  ;;  %v4695_v0 = vrot.slane %v4475_v12, 2  ;;  %v14302_v31 = vmul.f32 %v7882_v3, %v16466_v40  ;;  %v16472_v60 = vld [vmem:[#allocation141_spill] sm:$0xff] }
 0x85c   : > { %v14306_v14 = vmul.f32 %v16470_v43, %v16469_v41  ;;  %v14309_v30 = vadd.f32 %v6424_v10, %v5733_v49  ;;  %v14311_v15 = vadd.f32 %v6440_v58, %v5741_v57  ;;  %v4529_v12 = vmul.f32 %v16472_v60, %v16469_v41  ;;  %v7883_v44 = vld [vmem:[%s8223_s20 + $0x298] sm:$0x3]  ;;  %v6426_v3 = vpop.permute.xlu1 %6425  ;;  %v7589_v49 = vld [vmem:[%s14916_s2 + $0x1d] ss:$0 sm:$0xff] }
 0x85d   : > { %v5734_v21 = vadd.f32 %v16471_v24, %v4901_v53  ;;  %v4517_v51 = vmul.f32 %v7883_v44, %v16442_v6  ;;  %v4759_v4 = vsel %vm4626_vm1, %v4757_v46, %v4758_v55  ;;  %v4779_v61 = vsel %vm4626_vm1, %v4777_v29, %v15144_v38  ;;  %v7588_v53 = vld [vmem:[%s14916_s2 + $0x1e] ss:$0 sm:$0xff]  ;;  %v7884_v6 = vld [vmem:[%s8223_s20 + $0x58] sm:$0x3]  ;;  %v7885_v24 = vld [vmem:[%s8223_s20 + $0x2a0] sm:$0xff] }
 0x85e   : > { %v4637_v57 = vrot.slane %v14269_v19, 2  ;;  %v4638_v10 = vrot.slane %v14273_v62, 2  ;;  %v4445_v46 = vmul.f32 %v7884_v6, %v16466_v40  ;;  %v4640_v29 = vrot.slane %v14285_v25, 2  ;;  %v7590_v19 = vld [vmem:[%s14916_s2 + $0x1f] ss:$0 sm:$0xff]  ;;  %6794 = vperm.xlu2 %7270, %v7589_v49  }
 0x85f   : > { %v14331_v58 = vadd.f32 %v6426_v3, %v5734_v21  ;;  %v4642_v43 = vrot.slane %v14289_v35, 2  ;;  %v4518_v60 = vmul.f32 %v7885_v24, %v16449_v37  ;;  %v4761_v44 = vsel %vm4626_vm1, %v4758_v55, %v4760_v45  ;;  %6798 = vperm.xlu0 %7268, %v7588_v53   ;;  %v16473_v45 = vld [vmem:[#allocation428_spill] sm:$0xff] }
 0x860   : > { %v4643_v62 = vrot.slane %v14302_v31, 2  ;;  %v4696_v38 = vsel %vm4626_vm1, %v4693_v5, %v4695_v0  ;;  %v4903_v40 = vadd.f32 %v4759_v4, %v14052_v59  ;;  %v4911_v21 = vadd.f32 %v4779_v61, %v14165_v36  ;;  %v16474_v24 = vld [vmem:[#allocation432_spill] sm:$0xff]  ;;  %v16475_v61 = vld [vmem:[#allocation429_spill] sm:$0xff] }
 0x861   : > { %v4783_v25 = vrot.slane %v14306_v14, 2  ;;  %v4785_v35 = vrot.slane %v4529_v12, 2  ;;  %v4765_v3 = vrot.slane %v4517_v51, 2  ;;  %v4694_v37 = vsel %vm4626_vm1, %v4692_v56, %v4693_v5  ;;  %v6430_v56 = vpop.permute.xlu0 %6429 }
 0x862   : > { %v4645_v55 = vrot.slane %v4445_v46, 2  ;;  %v5736_v6 = vadd.f32 %v16473_v45, %v4903_v40  ;;  %v5744_v31 = vadd.f32 %v16474_v24, %v4911_v21  ;;  %v4904_v0 = vadd.f32 %v4761_v44, %v14001_v11  ;;  %6802 = vperm.xlu1 %7269, %v7590_v19   ;;  %v6446_v5 = vpop.permute.xlu2 %6445  ;;  %v7886_v46 = vld [vmem:[%s8223_s20 + $0x2b8] sm:$0xff] }
 0x863   : > { %v4767_v59 = vrot.slane %v4518_v60, 2  ;;  %v4639_v36 = vsel %vm4626_vm1, %v4637_v57, %v4638_v10  ;;  %v4641_v4 = vsel %vm4626_vm1, %v4638_v10, %v4640_v29  ;;  %v14353_v12 = vadd.f32 %v4696_v38, %v13925_v33  ;;  %v16476_v57 = vld [vmem:[#allocation352_spill] sm:$0xff]  ;;  %v7887_v10 = vld [vmem:[%s8223_s20 + $0x2c0] sm:$0xff] }
 0x864   : > { %v4644_v51 = vsel %vm4626_vm1, %v4642_v43, %v4643_v62  ;;  %v5737_v53 = vadd.f32 %v16475_v61, %v4904_v0  ;;  %v14357_v49 = vadd.f32 %v6430_v56, %v5736_v6  ;;  %v14359_v11 = vadd.f32 %v6446_v5, %v5744_v31  ;;  %v6432_v44 = vpop.permute.xlu1 %6431  ;;  %v7888_v6 = vld [vmem:[%s8223_s20 + $0x78] sm:$0xff]  ;;  %v7890_v0 = vld [vmem:[%s8223_s20 + $0x188] sm:$0xff]  ;;  %v7891_v5 = vld [vmem:[%s8223_s20 + $0x80] sm:$0xff] }
 0x865   : > { %v4521_v60 = vmul.f32 %v7886_v46, %v16476_v57  ;;  %v4522_v33 = vmul.f32 %v7887_v10, %v16476_v57  ;;  %v16477_v38 = vrot.slane %v14121_v27, 2  ;;  %v4786_v43 = vsel %vm4626_vm1, %v4783_v25, %v4785_v35  ;;  %v16478_v27 = vld [vmem:[#allocation330_spill] sm:$0xff] }
 0x866   : > { %v4855_v19 = vadd.f32 %v4639_v36, %v13825_v34  ;;  %v4856_v40 = vadd.f32 %v4641_v4, %v13783_v7  ;;  %v14374_v21 = vadd.f32 %v4694_v37, %v13868_v28  ;;  %v14376_v45 = vadd.f32 %v6432_v44, %v5737_v53  ;;  %v16480_v36 = vld [vmem:[#allocation334_spill] sm:$0xff]  ;;  %v7893_v53 = vld [vmem:[%s8223_s20 + $0x190] sm:$0x3]  ;;  %v7895_v44 = vld [vmem:[%s8223_s20 + $0x98] sm:$0xff] }
 0x867   : > { %v4766_v29 = vsel %vm4626_vm1, %v16477_v38, %v4765_v3  ;;  %v4449_v24 = vmul.f32 %v7888_v6, %v16478_v27  ;;  %v7889_v3 = vld [vmem:[%s8223_s20 + $0x2c8] sm:$0x3]  ;;  %v14383_v35 = vadd.f32 %v4644_v51, %v13833_v54  ;;  %v16479_v34 = vrot.slane %v14156_v2, 2  ;;  %v7894_v38 = vld [vmem:[%s8223_s20 + $0x90] sm:$0xff] }
 0x868   : > { %v4523_v31 = vmul.f32 %v7889_v3, %v16476_v57  ;;  %v14390_v28 = vmul.f32 %v7890_v0, %v16480_v36  ;;  %v14393_v37 = vsel %vm4626_vm1, %v4643_v62, %v4645_v55  ;;  %v4906_v4 = vadd.f32 %v4766_v29, %v14065_v13  ;;  %v7892_v51 = vld [vmem:[%s8223_s20 + $0x88] sm:$0x3]  ;;  %v16481_v62 = vld [vmem:[#allocation430_spill] sm:$0xff] }
 0x869   : > { %v4769_v7 = vsel %vm4626_vm1, %v4767_v59, %v16479_v34  ;;  %v4914_v56 = vadd.f32 %v4786_v43, %v14206_v22  ;;  %v4450_v54 = vmul.f32 %v7891_v5, %v16478_v27  ;;  %v4451_v2 = vmul.f32 %v7892_v51, %v16478_v27  ;;  %v16482_v57 = vld [vmem:[#allocation435_spill] sm:$0xff]  ;;  %v6436_v6 = vpop.permute.xlu0 %6435  ;;  %v7896_v3 = vld [vmem:[%s8223_s20 + $0xa0] sm:$0x3] }
 0x86a   : > { %v4772_v59 = vrot.slane %v4521_v60, 2  ;;  %v4773_v61 = vrot.slane %v4522_v33, 2  ;;  %v14403_v46 = vmul.f32 %v7893_v53, %v16480_v36  ;;  %v5739_v55 = vadd.f32 %v16481_v62, %v4906_v4  ;;  %v16483_v29 = vld [vmem:[#allocation331_spill] sm:$0xff]  ;;  %v6452_v27 = vpop.permute.xlu2 %6451  ;;  %v7897_v5 = vld [vmem:[%s8223_s20 + $0x2e0] sm:$0x3] }
 0x86b   : > { %v5747_v13 = vadd.f32 %v16482_v57, %v4914_v56  ;;  %v4907_v10 = vadd.f32 %v4769_v7, %v14005_v39  ;;  %v4652_v22 = vrot.slane %v4449_v24, 2  ;;  %v4452_v43 = vmul.f32 %v7894_v38, %v16483_v29  ;;  %v16484_v0 = vld [vmem:[#allocation431_spill] sm:$0xff]  ;;  %v7898_v62 = vld [vmem:[%s8223_s20 + $0x180] sm:$0xff] }
 0x86c   : > { %v14412_v60 = vmul.f32 %v7895_v44, %v16483_v29  ;;  %v4775_v33 = vrot.slane %v4523_v31, 2  ;;  %v14416_v34 = vmul.f32 %v7896_v3, %v16483_v29  ;;  %v14419_v39 = vadd.f32 %v6436_v6, %v5739_v55  ;;  %v6438_v53 = vpop.permute.xlu1 %6437  ;;  %v7899_v38 = vld [vmem:[%s8223_s20 + $0x2e8] sm:$0xff]  ;;  %v16486_v44 = vld [vmem:[#allocation373_spill] sm:$0xff]  ;;  %v7900_v3 = vld [vmem:[%s8223_s20 + $0xc0] sm:$0xff] }
 0x86d   : > { %v5740_v4 = vadd.f32 %v16484_v0, %v4907_v10  ;;  %v14421_v24 = vadd.f32 %v6452_v27, %v5747_v13  ;;  %v4653_v7 = vrot.slane %v4450_v54, 2  ;;  %v4655_v56 = vrot.slane %v4451_v2, 2  ;;  %v16487_v6 = vld [vmem:[#allocation375_spill] sm:$0xff] }
 0x86e   : > { %v4526_v51 = vmul.f32 %v7897_v5, %v16460_v63  ;;  %v4774_v31 = vsel %vm4626_vm1, %v4772_v59, %v4773_v61  ;;  %v14428_v57 = vmul.f32 %v7898_v62, %v16480_v36  ;;  %v4708_v10 = vrot.slane %v14390_v28, 2  ;;  %v16489_v5 = vld [vmem:[#allocation433_spill] sm:$0xff]  ;;  %v16524_v28 = vld [vmem:[#allocation360_spill] sm:$0xff] }
 0x86f   : > { %16485 = vst [vmem:[#allocation389_spill] sm:$0xff] %v14421_v24  ;;  %v4710_v55 = vrot.slane %v14403_v46, 2  ;;  %v14432_v13 = vadd.f32 %v6438_v53, %v5740_v4  ;;  %v4657_v54 = vrot.slane %v4452_v43, 2  ;;  %v4658_v2 = vrot.slane %v14412_v60, 2  ;;  %v16488_v43 = vld [vmem:[#allocation332_spill] sm:$0xff]  ;;  %v16491_v53 = vld [vmem:[#allocation62_spill] sm:$0xff] }
 0x870   : > { %v4527_v63 = vmul.f32 %v7899_v38, %v16469_v41  ;;  %v4776_v59 = vsel %vm4626_vm1, %v4773_v61, %v4775_v33  ;;  %v4660_v29 = vrot.slane %v14416_v34, 2  ;;  %v5688_v36 = vadd.f32 %v16486_v44, %v4855_v19  ;;  %v16490_v33 = vld [vmem:[#allocation362_spill] sm:$0xff]  ;;  %v16492_v19 = vld [vmem:[#allocation371_spill] sm:$0xff] }
 0x871   : > { %v5689_v27 = vadd.f32 %v16487_v6, %v4856_v40  ;;  %v4909_v46 = vadd.f32 %v4774_v31, %v14079_v16  ;;  %v4458_v0 = vmul.f32 %v7900_v3, %v16488_v43  ;;  %v4780_v60 = vrot.slane %v4526_v51, 2  ;;  %v7901_v40 = vld [vmem:[%s8223_s20 + $0xc8] sm:$0xff]  ;;  %v7902_v31 = vld [vmem:[%s8223_s20 + $0xd0] sm:$0x3]  ;;  %v6442_v51 = vpop.permute.xlu0 %6441 }
 0x872   : > { %v4654_v4 = vsel %vm4626_vm1, %v4652_v22, %v4653_v7  ;;  %v4656_v41 = vsel %vm4626_vm1, %v4653_v7, %v4655_v56  ;;  %v4910_v34 = vadd.f32 %v4776_v59, %v16490_v33  ;;  %v6521_v62 = vadd.f32 %v16491_v53, %v5688_v36  ;;  %v6687_v22 = vpop.permute.xlu2 %6686  ;;  %v16493_v7 = vld [vmem:[#allocation434_spill] sm:$0xff]  ;;  %v16494_v3 = vld [vmem:[#allocation380_spill] sm:$0xff]  ;;  %v16496_v53 = vld [vmem:[#allocation41_spill] sm:$0xff] }
 0x873   : > { %v5742_v61 = vadd.f32 %v16489_v5, %v4909_v46  ;;  %v6522_v38 = vadd.f32 %v16492_v19, %v5689_v27  ;;  %v4459_v16 = vmul.f32 %v7901_v40, %v16488_v43  ;;  %v4460_v44 = vmul.f32 %v7902_v31, %v16488_v43 }
 0x874   : > { %v4782_v6 = vrot.slane %v4527_v63, 2  ;;  %v5743_v56 = vadd.f32 %v16493_v7, %v4910_v34  ;;  %v6809_v36 = vadd.f32 %v6687_v22, %v6521_v62  ;;  %v4707_v46 = vrot.slane %v14428_v57, 2  ;;  %v16497_v62 = vld [vmem:[#allocation42_spill] sm:$0xff] }
 0x875   : > { %v14461_v59 = vadd.f32 %v6442_v51, %v5742_v61  ;;  %v6810_v27 = vadd.f32 %v6687_v22, %v6522_v38  ;;  %v14466_v63 = vadd.f32 %v14393_v37, %v16494_v3  ;;  %v14471_v43 = vsel %vm4626_vm1, %v4708_v10, %v4710_v55  ;;  %v6444_v61 = vpop.permute.xlu1 %6443  ;;  %v7903_v22 = vld [vmem:[%s8223_s20 + $0xd8] sm:$0xff] }
 0x876   : > { %v16495_v5 = vrot.slane %v14247_v1, 2  ;;  %v4659_v34 = vsel %vm4626_vm1, %v4657_v54, %v4658_v2  ;;  %v4861_v57 = vadd.f32 %v4654_v4, %v16496_v53  ;;  %v4862_v19 = vadd.f32 %v4656_v41, %v16497_v62  ;;  %6874 = vst.msk [vmem:[%s14458_s17 + $0x20] sm:$0xff] %vm6869_vm2, %v6809_v36  ;;  %v16498_v54 = vld [vmem:[#allocation382_spill] sm:$0xff]  ;;  %v16499_v4 = vld [vmem:[#allocation384_spill] sm:$0xff]  ;;  %v7907_v53 = vld [vmem:[%s8223_s20 + $0xe8] sm:$0x3] }
 0x877   : > { %v14481_v37 = vadd.f32 %v6444_v61, %v5743_v56  ;;  %v4667_v55 = vrot.slane %v4458_v0, 2  ;;  %v4668_v38 = vrot.slane %v4459_v16, 2  ;;  %v4670_v1 = vrot.slane %v4460_v44, 2  ;;  %6875 = vst.msk [vmem:[%s14458_s17 + $0x28] sm:$0xff] %vm6869_vm2, %v6810_v27  ;;  %v16500_v0 = vld [vmem:[#allocation333_spill] sm:$0xff]  ;;  %v7904_v44 = vld [vmem:[%s8223_s20 + $0xe0] sm:$0xff] }
 0x878   : > { %v4781_v33 = vsel %vm4626_vm1, %v16495_v5, %v4780_v60  ;;  %v4784_v60 = vsel %vm4626_vm1, %v4782_v6, %v4783_v25  ;;  %v5694_v40 = vadd.f32 %v16498_v54, %v4861_v57  ;;  %v5695_v41 = vadd.f32 %v16499_v4, %v4862_v19  ;;  %v7905_v25 = vld [vmem:[%s8223_s20 + $0x108] sm:$0xff]  ;;  %v7906_v56 = vld [vmem:[%s8223_s20 + $0x110] sm:$0xff]  ;;  %v16502_v27 = vld [vmem:[#allocation2_spill] sm:$0xff] }
 0x879   : > { %v4661_v31 = vsel %vm4626_vm1, %v4658_v2, %v4660_v29  ;;  %v4912_v51 = vadd.f32 %v4781_v33, %v14173_v32  ;;  %v14494_v16 = vmul.f32 %v7903_v22, %v16500_v0  ;;  %v14498_v14 = vmul.f32 %v7904_v44, %v16500_v0  ;;  %v16501_v6 = vld [vmem:[#allocation335_spill] sm:$0xff]  ;;  %v16503_v2 = vld [vmem:[#allocation369_spill] sm:$0xff]  ;;  %v16505_v33 = vld [vmem:[#allocation132_spill] sm:$0xff] }
 0x87a   : > { %v4467_v7 = vmul.f32 %v7905_v25, %v16501_v6  ;;  %v4468_v36 = vmul.f32 %v7906_v56, %v16501_v6  ;;  %v4913_v29 = vadd.f32 %v4784_v60, %v16503_v2  ;;  %v16504_v5 = vld [vmem:[#allocation129_spill] sm:$0xff]  ;;  %v6528_v61 = vadd.f32 %v16505_v33, %v5695_v41  ;;  %v6699_v22 = vpop.permute.xlu2 %6698  ;;  %v16506_v60 = vld [vmem:[#allocation3_spill] sm:$0xff] }
 0x87b   : > { %v5745_v3 = vadd.f32 %v16502_v27, %v4912_v51  ;;  %v6527_v32 = vadd.f32 %v16504_v5, %v5694_v40  ;;  %v14510_v57 = vmul.f32 %v7907_v53, %v16500_v0  ;;  %v7908_v62 = vld [vmem:[%s8223_s20 + $0x118] sm:$0x3]  ;;  %v4669_v54 = vsel %vm4626_vm1, %v4667_v55, %v4668_v38  ;;  %v6448_v51 = vpop.permute.xlu0 %6447  ;;  %v16507_v27 = vld [vmem:[#allocation32_spill] sm:$0xff] }
 0x87c   : > { %v4469_v19 = vmul.f32 %v7908_v62, %v16501_v6  ;;  %v4671_v4 = vsel %vm4626_vm1, %v4668_v38, %v4670_v1  ;;  %v5746_v44 = vadd.f32 %v16506_v60, %v4913_v29  ;;  %v6816_v25 = vadd.f32 %v6699_v22, %v6528_v61  ;;  %v7909_v1 = vld [vmem:[%s8223_s20 + $0x1c8] sm:$0xff]  ;;  %v16508_v6 = vld [vmem:[#allocation337_spill] sm:$0xff]  ;;  %v16514_v62 = vld [vmem:[#allocation366_spill] sm:$0xff] }
 0x87d   : > { %v14517_v40 = vadd.f32 %v6448_v51, %v5745_v3  ;;  %v6815_v41 = vadd.f32 %v6699_v22, %v6527_v32  ;;  %v4682_v0 = vrot.slane %v4467_v7, 2  ;;  %v4683_v56 = vrot.slane %v4468_v36, 2  ;;  %v6450_v38 = vpop.permute.xlu1 %6449  ;;  %v16509_v3 = vld [vmem:[#allocation154_spill] sm:$0xff]  ;;  %v16510_v7 = vld [vmem:[#allocation44_spill] sm:$0xff]  ;;  %v16512_v32 = vld [vmem:[#allocation379_spill] sm:$0xff] }
 0x87e   : > { %v14520_v2 = vadd.f32 %v4659_v34, %v16507_v27  ;;  %v14525_v55 = vsel %vm4626_vm1, %v4707_v46, %v4708_v10  ;;  %v14529_v29 = vmul.f32 %v7909_v1, %v16508_v6  ;;  %v14532_v5 = vadd.f32 %v4661_v31, %v16509_v3  ;;  %6881 = vst.msk [vmem:[%s14458_s17 + $0x58] sm:$0xff] %vm6869_vm2, %v6816_v25  ;;  %v16513_v31 = vld [vmem:[#allocation359_spill] sm:$0xff]  ;;  %v16515_v51 = vld [vmem:[#allocation392_spill] sm:$0xff]  ;;  %v7911_v27 = vld [vmem:[%s8223_s20 + $0x158] sm:$0xff] }
 0x87f   : > { %v4867_v36 = vadd.f32 %v4669_v54, %v16510_v7  ;;  %6880 = vst.msk [vmem:[%s14458_s17 + $0x50] sm:$0xff] %vm6869_vm2, %v6815_v41  ;;  %v14537_v34 = vadd.f32 %v6450_v38, %v5746_v44  ;;  %v4685_v46 = vrot.slane %v4469_v19, 2  ;;  %v4868_v33 = vadd.f32 %v4671_v4, %v16512_v32  ;;  %v7910_v60 = vld [vmem:[%s8223_s20 + $0x150] sm:$0xff]  ;;  %v16516_v44 = vld [vmem:[#allocation338_spill] sm:$0xff] }
 0x880   : > { %v5684_v53 = vadd.f32 %v16513_v31, %v14215_v52  ;;  %v5685_v54 = vadd.f32 %v16514_v62, %v14221_v18  ;;  %v4476_v41 = vmul.f32 %v7910_v60, %v16516_v44  ;;  %v4477_v19 = vmul.f32 %v7911_v27, %v16516_v44  ;;  %v16517_v4 = vld [vmem:[#allocation394_spill] sm:$0xff]  ;;  %v16519_v3 = vld [vmem:[#allocation368_spill] sm:$0xff]  ;;  %v16521_v31 = vld [vmem:[#allocation115_spill] sm:$0xff] }
 0x881   : > { %16511 = vst [vmem:[#allocation54_spill] sm:$0xff] %v14537_v34  ;;  %v5700_v22 = vadd.f32 %v16515_v51, %v4867_v36  ;;  %v5701_v38 = vadd.f32 %v16517_v4, %v4868_v33  ;;  %v4684_v25 = vsel %vm4626_vm1, %v4682_v0, %v4683_v56  ;;  %v16518_v1 = vld [vmem:[#allocation170_spill] sm:$0xff]  ;;  %v16520_v32 = vld [vmem:[#allocation108_spill] sm:$0xff]  ;;  %v16522_v18 = vld [vmem:[#allocation31_spill] sm:$0xff]  ;;  %v4686_v33 = vsel %vm4626_vm1, %v4683_v56, %v4685_v46 }
 0x882   : > { %v5686_v7 = vadd.f32 %v16519_v3, %v16518_v1  ;;  %v6517_v52 = vadd.f32 %v16520_v32, %v5684_v53  ;;  %v6518_v61 = vadd.f32 %v16521_v31, %v5685_v54  ;;  %v7912_v36 = vld [vmem:[%s8223_s20 + $0x160] sm:$0x3]  ;;  %v16523_v60 = vld [vmem:[#allocation171_spill] sm:$0xff]  ;;  %v16525_v0 = vld [vmem:[#allocation381_spill] sm:$0xff]  ;;  %v6711_v1 = vpop.permute.xlu2 %6710  ;;  %v4697_v31 = vrot.slane %v4476_v41, 2 }
 0x883   : > { %v6533_v62 = vadd.f32 %v16522_v18, %v5700_v22  ;;  %v4478_v51 = vmul.f32 %v7912_v36, %v16516_v44  ;;  %v5687_v27 = vadd.f32 %v16524_v28, %v16523_v60  ;;  %v6534_v4 = vadd.f32 %v16525_v0, %v5701_v38  ;;  %v6679_v10 = vpop.permute.xlu0 %6678  ;;  %v16526_v53 = vld [vmem:[#allocation52_spill] sm:$0xff]  ;;  %v16527_v18 = vld [vmem:[#allocation26_spill] sm:$0xff]  ;;  %v7914_v0 = vld [vmem:[%s8223_s20 + $0x128] sm:$0xff] }
 0x884   : > { %v6519_v3 = vadd.f32 %v16526_v53, %v5686_v7  ;;  %v6805_v54 = vadd.f32 %v6679_v10, %v6517_v52  ;;  %v6806_v22 = vadd.f32 %v6679_v10, %v6518_v61  ;;  %v4698_v44 = vrot.slane %v4477_v19, 2  ;;  %v7913_v56 = vld [vmem:[%s8223_s20 + $0x120] sm:$0xff]  ;;  %v16528_v46 = vld [vmem:[#allocation336_spill] sm:$0xff]  ;;  %v7915_v19 = vld [vmem:[%s8223_s20 + $0x198] sm:$0xff] }
 0x885   : > { %v6821_v32 = vadd.f32 %v6711_v1, %v6533_v62  ;;  %v6520_v36 = vadd.f32 %v16527_v18, %v5687_v27  ;;  %v6822_v28 = vadd.f32 %v6711_v1, %v6534_v4  ;;  %v6683_v60 = vpop.permute.xlu1 %6682  ;;  %v14571_v38 = vmul.f32 %v7913_v56, %v16528_v46  ;;  %v16529_v52 = vld [vmem:[#allocation158_spill] sm:$0xff]  ;;  %v16530_v62 = vld [vmem:[#allocation341_spill] sm:$0xff]  ;;  %v7916_v18 = vld [vmem:[%s8223_s20 + $0x130] sm:$0x3] }
 0x886   : > { %v14575_v7 = vmul.f32 %v7914_v0, %v16528_v46  ;;  %v4873_v10 = vadd.f32 %v4684_v25, %v16529_v52  ;;  %6870 = vst.msk [vmem:[%s14458_s17] sm:$0xff] %vm6869_vm2, %v6805_v54  ;;  %v6807_v61 = vadd.f32 %v6683_v60, %v6519_v3  ;;  %v4700_v41 = vrot.slane %v4478_v51, 2  ;;  %v16531_v4 = vld [vmem:[#allocation153_spill] sm:$0xff]  ;;  %v16533_v3 = vld [vmem:[#allocation376_spill] sm:$0xff]  ;;  %v16534_v0 = vld [vmem:[#allocation398_spill] sm:$0xff] }
 0x887   : > { %v4485_v27 = vmul.f32 %v7915_v19, %v16530_v62  ;;  %v4874_v1 = vadd.f32 %v4686_v33, %v16531_v4  ;;  %6871 = vst.msk [vmem:[%s14458_s17 + $0x8] sm:$0xff] %vm6869_vm2, %v6806_v22  ;;  %v6808_v53 = vadd.f32 %v6683_v60, %v6520_v36  ;;  %v14587_v56 = vmul.f32 %v7916_v18, %v16528_v46  ;;  %v16532_v25 = vld [vmem:[#allocation365_spill] sm:$0xff]  ;;  %v7917_v19 = vld [vmem:[%s8223_s20 + $0x1a0] sm:$0xff]  ;;  %v7918_v22 = vld [vmem:[%s8223_s20 + $0x1a8] sm:$0x3] }
 0x888   : > { %v5690_v54 = vadd.f32 %v16532_v25, %v14383_v35  ;;  %v5691_v51 = vadd.f32 %v16533_v3, %v14466_v63  ;;  %v5706_v52 = vadd.f32 %v16534_v0, %v4873_v10  ;;  %6886 = vst.msk [vmem:[%s14458_s17 + $0x80] sm:$0xff] %vm6869_vm2, %v6821_v32  ;;  %v4486_v33 = vmul.f32 %v7917_v19, %v16530_v62  ;;  %v16535_v60 = vld [vmem:[#allocation400_spill] sm:$0xff]  ;;  %v16537_v18 = vld [vmem:[#allocation378_spill] sm:$0xff]  ;;  %v16538_v25 = vld [vmem:[#allocation43_spill] sm:$0xff] }
 0x889   : > { %v4487_v36 = vmul.f32 %v7918_v22, %v16530_v62  ;;  %v5707_v46 = vadd.f32 %v16535_v60, %v4874_v1  ;;  %v4699_v4 = vsel %vm4626_vm1, %v4697_v31, %v4698_v44  ;;  %6887 = vst.msk [vmem:[%s14458_s17 + $0x88] sm:$0xff] %vm6869_vm2, %v6822_v28  ;;  %v16536_v35 = vld [vmem:[#allocation388_spill] sm:$0xff]  ;;  %v16539_v3 = vld [vmem:[#allocation66_spill] sm:$0xff]  ;;  %v4712_v19 = vrot.slane %v4485_v27, 2  ;;  %v16542_v62 = vld [vmem:[#allocation367_spill] sm:$0xff] }
 0x88a   : > { %v5692_v63 = vadd.f32 %v16537_v18, %v16536_v35  ;;  %v6523_v10 = vadd.f32 %v16538_v25, %v5690_v54  ;;  %v6524_v32 = vadd.f32 %v16539_v3, %v5691_v51  ;;  %v16540_v0 = vld [vmem:[#allocation390_spill] sm:$0xff]  ;;  %6872 = vst.msk [vmem:[%s14458_s17 + $0x10] sm:$0xff] %vm6869_vm2, %v6807_v61  ;;  %v16541_v34 = vld [vmem:[#allocation372_spill] sm:$0xff]  ;;  %v4701_v1 = vsel %vm4626_vm1, %v4698_v44, %v4700_v41  ;;  %v16543_v31 = vld [vmem:[#allocation145_spill] sm:$0xff]  ;;  %v6723_v35 = vpop.permute.xlu2 %6722 }
 0x88b   : > { %v6539_v24 = vadd.f32 %v16540_v0, %v5706_v52  ;;  %v5693_v22 = vadd.f32 %v16542_v62, %v16541_v34  ;;  %v6540_v60 = vadd.f32 %v16543_v31, %v5707_v46  ;;  %6873 = vst.msk [vmem:[%s14458_s17 + $0x18] sm:$0xff] %vm6869_vm2, %v6808_v53  ;;  %v6691_v28 = vpop.permute.xlu0 %6690  ;;  %v16544_v54 = vld [vmem:[#allocation126_spill] sm:$0xff]  ;;  %v4713_v61 = vrot.slane %v4486_v33, 2  ;;  %v16545_v3 = vld [vmem:[#allocation48_spill] sm:$0xff] }
 0x88c   : > { %v6525_v18 = vadd.f32 %v16544_v54, %v5692_v63  ;;  %v6811_v51 = vadd.f32 %v6691_v28, %v6523_v10  ;;  %v6812_v52 = vadd.f32 %v6691_v28, %v6524_v32  ;;  %v4715_v27 = vrot.slane %v4487_v36, 2  ;;  %v16550_v33 = vld [vmem:[#allocation14_spill] sm:$0xff]  ;;  %v16553_v28 = vld [vmem:[#allocation385_spill] sm:$0xff]  ;;  %v16554_v54 = vld [vmem:[#allocation404_spill] sm:$0xff] }
 0x88d   : > { %v6827_v25 = vadd.f32 %v6723_v35, %v6539_v24  ;;  %v6526_v0 = vadd.f32 %v16545_v3, %v5693_v22  ;;  %v6828_v34 = vadd.f32 %v6723_v35, %v6540_v60  ;;  %v6695_v44 = vpop.permute.xlu1 %6694  ;;  %v16546_v41 = vrot.slane %v14498_v14, 2 }
 0x88e   : > { %v16547_v46 = vrot.slane %v14494_v16, 2  ;;  %v16548_v63 = vrot.slane %v14510_v57, 2  ;;  %v4879_v36 = vadd.f32 %v4699_v4, %v16550_v33  ;;  %6876 = vst.msk [vmem:[%s14458_s17 + $0x30] sm:$0xff] %vm6869_vm2, %v6811_v51  ;;  %v6813_v32 = vadd.f32 %v6695_v44, %v6525_v18  ;;  %v16551_v16 = vld [vmem:[#allocation155_spill] sm:$0xff]  ;;  %v16552_v57 = vld [vmem:[#allocation374_spill] sm:$0xff] }
 0x88f   : > { %v16549_v10 = vmov %v16546_v41  ;;  %v4687_v62 = vrot.slane %v14571_v38, 2  ;;  %v4688_v22 = vrot.slane %v14575_v7, 2  ;;  %v4880_v31 = vadd.f32 %v4701_v1, %v16551_v16  ;;  %6877 = vst.msk [vmem:[%s14458_s17 + $0x38] sm:$0xff] %vm6869_vm2, %v6812_v52  ;;  %v7919_v7 = vld [vmem:[%s8223_s20 + $0x1e0] sm:$0xff]  ;;  %v16555_v1 = vld [vmem:[#allocation344_spill] sm:$0xff] }
 0x890   : > { %v4674_v53 = vsel %vm4626_vm1, %v16547_v46, %v16546_v41  ;;  %v4676_v24 = vsel %vm4626_vm1, %v16549_v10, %v16548_v63  ;;  %v6814_v60 = vadd.f32 %v6695_v44, %v6526_v0  ;;  %v4690_v14 = vrot.slane %v14587_v56, 2  ;;  %6892 = vst.msk [vmem:[%s14458_s17 + $0xb0] sm:$0xff] %vm6869_vm2, %v6827_v25  ;;  %v16556_v51 = vld [vmem:[#allocation406_spill] sm:$0xff]  ;;  %v16558_v0 = vld [vmem:[#allocation120_spill] sm:$0xff]  ;;  %v16559_v41 = vld [vmem:[#allocation135_spill] sm:$0xff] }
 0x891   : > { %v5696_v4 = vadd.f32 %v16552_v57, %v14520_v2  ;;  %v5697_v35 = vadd.f32 %v16553_v28, %v14532_v5  ;;  %v5712_v38 = vadd.f32 %v16554_v54, %v4879_v36  ;;  %v4494_v18 = vmul.f32 %v7919_v7, %v16555_v1  ;;  %6893 = vst.msk [vmem:[%s14458_s17 + $0xb8] sm:$0xff] %vm6869_vm2, %v6828_v34  ;;  %v16557_v2 = vld [vmem:[#allocation387_spill] sm:$0xff]  ;;  %v16560_v25 = vld [vmem:[#allocation37_spill] sm:$0xff]  ;;  %v7921_v36 = vld [vmem:[%s8223_s20 + $0x1f0] sm:$0x3] }
 0x892   : > { %v5713_v52 = vadd.f32 %v16556_v51, %v4880_v31  ;;  %v4714_v56 = vsel %vm4626_vm1, %v4712_v19, %v4713_v61  ;;  %v4716_v3 = vsel %vm4626_vm1, %v4713_v61, %v4715_v27  ;;  %v5698_v5 = vadd.f32 %v16557_v2, %v14212_v50  ;;  %6878 = vst.msk [vmem:[%s14458_s17 + $0x40] sm:$0xff] %vm6869_vm2, %v6813_v32  ;;  %v7920_v10 = vld [vmem:[%s8223_s20 + $0x1e8] sm:$0xff]  ;;  %v16561_v61 = vld [vmem:[#allocation377_spill] sm:$0xff]  ;;  %v16562_v34 = vld [vmem:[#allocation12_spill] sm:$0xff]  ;;  %v6735_v31 = vpop.permute.xlu2 %6734 }
 0x893   : > { %v6529_v44 = vadd.f32 %v16558_v0, %v5696_v4  ;;  %v6530_v46 = vadd.f32 %v16559_v41, %v5697_v35  ;;  %v6545_v63 = vadd.f32 %v16560_v25, %v5712_v38  ;;  %v4495_v33 = vmul.f32 %v7920_v10, %v16555_v1  ;;  %6879 = vst.msk [vmem:[%s14458_s17 + $0x48] sm:$0xff] %vm6869_vm2, %v6814_v60  ;;  %v6703_v50 = vpop.permute.xlu0 %6702  ;;  %v16563_v57 = vld [vmem:[#allocation30_spill] sm:$0xff]  ;;  %v16564_v54 = vld [vmem:[#allocation45_spill] sm:$0xff]  ;;  %v16566_v51 = vld [vmem:[#allocation123_spill] sm:$0xff] }
 0x894   : > { %v4496_v19 = vmul.f32 %v7921_v36, %v16555_v1  ;;  %v5699_v27 = vadd.f32 %v16561_v61, %v14190_v42  ;;  %v6546_v16 = vadd.f32 %v16562_v34, %v5713_v52  ;;  %v6531_v4 = vadd.f32 %v16563_v57, %v5698_v5  ;;  %v16565_v7 = vld [vmem:[#allocation157_spill] sm:$0xff]  ;;  %v16567_v0 = vld [vmem:[#allocation19_spill] sm:$0xff]  ;;  %v16573_v57 = vld [vmem:[#allocation412_spill] sm:$0xff] }
 0x895   : > { %v6817_v28 = vadd.f32 %v6703_v50, %v6529_v44  ;;  %v6818_v32 = vadd.f32 %v6703_v50, %v6530_v46  ;;  %v6833_v35 = vadd.f32 %v6735_v31, %v6545_v63  ;;  %v4869_v38 = vadd.f32 %v4674_v53, %v16564_v54  ;;  %v6707_v52 = vpop.permute.xlu1 %6706  ;;  %v16568_v25 = vld [vmem:[#allocation165_spill] sm:$0xff]  ;;  %v16569_v10 = vld [vmem:[#allocation383_spill] sm:$0xff] }
 0x896   : > { %v4870_v1 = vadd.f32 %v4676_v24, %v16565_v7  ;;  %v6532_v2 = vadd.f32 %v16566_v51, %v5699_v27  ;;  %v6834_v42 = vadd.f32 %v6735_v31, %v6546_v16  ;;  %v4689_v60 = vsel %vm4626_vm1, %v4687_v62, %v4688_v22  ;;  %v16570_v61 = vld [vmem:[#allocation395_spill] sm:$0xff]  ;;  %v16571_v27 = vld [vmem:[#allocation410_spill] sm:$0xff]  ;;  %v7924_v50 = vld [vmem:[%s8223_s20 + $0x178] sm:$0x3] }
 0x897   : > { %v4885_v41 = vadd.f32 %v4714_v56, %v16567_v0  ;;  %v4886_v5 = vadd.f32 %v4716_v3, %v16568_v25  ;;  %6882 = vst.msk [vmem:[%s14458_s17 + $0x60] sm:$0xff] %vm6869_vm2, %v6817_v28  ;;  %v6819_v44 = vadd.f32 %v6707_v52, %v6531_v4  ;;  %v4727_v53 = vrot.slane %v4494_v18, 2  ;;  %v7922_v34 = vld [vmem:[%s8223_s20 + $0x168] sm:$0xff]  ;;  %v16575_v28 = vld [vmem:[#allocation130_spill] sm:$0xff] }
 0x898   : > { %v4728_v46 = vrot.slane %v4495_v33, 2  ;;  %v4730_v24 = vrot.slane %v4496_v19, 2  ;;  %6883 = vst.msk [vmem:[%s14458_s17 + $0x68] sm:$0xff] %vm6869_vm2, %v6818_v32  ;;  %v6820_v63 = vadd.f32 %v6707_v52, %v6532_v2  ;;  %v5702_v36 = vadd.f32 %v16569_v10, %v4869_v38  ;;  %v16572_v16 = vld [vmem:[#allocation339_spill] sm:$0xff]  ;;  %v7923_v33 = vld [vmem:[%s8223_s20 + $0x170] sm:$0xff] }
 0x899   : > { %v5703_v62 = vadd.f32 %v16570_v61, %v4870_v1  ;;  %v4691_v56 = vsel %vm4626_vm1, %v4688_v22, %v4690_v14  ;;  %v5718_v3 = vadd.f32 %v16571_v27, %v4885_v41  ;;  %6898 = vst.msk [vmem:[%s14458_s17 + $0xe0] sm:$0xff] %vm6869_vm2, %v6833_v35  ;;  %v4479_v18 = vmul.f32 %v7922_v34, %v16572_v16  ;;  %v16574_v22 = vld [vmem:[#allocation397_spill] sm:$0xff]  ;;  %v16576_v35 = vld [vmem:[#allocation142_spill] sm:$0xff]  ;;  %v16577_v38 = vld [vmem:[#allocation160_spill] sm:$0xff] }
 0x89a   : > { %v4480_v19 = vmul.f32 %v7923_v33, %v16572_v16  ;;  %v4481_v31 = vmul.f32 %v7924_v50, %v16572_v16  ;;  %v5719_v4 = vadd.f32 %v16573_v57, %v4886_v5  ;;  %6899 = vst.msk [vmem:[%s14458_s17 + $0xe8] sm:$0xff] %vm6869_vm2, %v6834_v42  ;;  %v5704_v14 = vadd.f32 %v16574_v22, %v14224_v17  ;;  %v16578_v1 = vld [vmem:[#allocation386_spill] sm:$0xff]  ;;  %v16579_v42 = vld [vmem:[#allocation15_spill] sm:$0xff]  ;;  %v6747_v41 = vpop.permute.xlu2 %6746  ;;  %v7925_v61 = vld [vmem:[%s8223_s20 + $0x1d0] sm:$0xff] }
 0x89b   : > { %v6535_v32 = vadd.f32 %v16575_v28, %v5702_v36  ;;  %v6536_v54 = vadd.f32 %v16576_v35, %v5703_v62  ;;  %v6551_v7 = vadd.f32 %v16577_v38, %v5718_v3  ;;  %6884 = vst.msk [vmem:[%s14458_s17 + $0x70] sm:$0xff] %vm6869_vm2, %v6819_v44  ;;  %v5705_v51 = vadd.f32 %v16578_v1, %v14209_v20  ;;  %v6715_v17 = vpop.permute.xlu0 %6714  ;;  %v16580_v25 = vld [vmem:[#allocation143_spill] sm:$0xff] }
 0x89c   : > { %v4729_v2 = vsel %vm4626_vm1, %v4727_v53, %v4728_v46  ;;  %v4731_v52 = vsel %vm4626_vm1, %v4728_v46, %v4730_v24  ;;  %v6552_v0 = vadd.f32 %v16579_v42, %v5719_v4  ;;  %6885 = vst.msk [vmem:[%s14458_s17 + $0x78] sm:$0xff] %vm6869_vm2, %v6820_v63  ;;  %v6537_v5 = vadd.f32 %v16580_v25, %v5704_v14  ;;  %v16581_v53 = vld [vmem:[#allocation50_spill] sm:$0xff]  ;;  %v16583_v34 = vld [vmem:[#allocation163_spill] sm:$0xff]  ;;  %v16585_v14 = vld [vmem:[#allocation20_spill] sm:$0xff] }
 0x89d   : > { %v6823_v10 = vadd.f32 %v6715_v17, %v6535_v32  ;;  %v6824_v36 = vadd.f32 %v6715_v17, %v6536_v54  ;;  %v6839_v44 = vadd.f32 %v6747_v41, %v6551_v7  ;;  %v14711_v20 = vmul.f32 %v7925_v61, %v16508_v6  ;;  %v16582_v24 = vld [vmem:[#allocation134_spill] sm:$0xff]  ;;  %v6719_v63 = vpop.permute.xlu1 %6718  ;;  %v16584_v33 = vld [vmem:[#allocation23_spill] sm:$0xff]  ;;  %v7926_v32 = vld [vmem:[%s8223_s20 + $0x1d8] sm:$0x3] }
 0x89e   : > { %v4875_v46 = vadd.f32 %v4689_v60, %v16581_v53  ;;  %v6538_v62 = vadd.f32 %v16582_v24, %v5705_v51  ;;  %v6840_v27 = vadd.f32 %v6747_v41, %v6552_v0  ;;  %v4702_v3 = vrot.slane %v4479_v18, 2  ;;  %v16587_v54 = vld [vmem:[#allocation401_spill] sm:$0xff]  ;;  %v16588_v7 = vld [vmem:[#allocation416_spill] sm:$0xff]  ;;  %v7929_v42 = vld [vmem:[%s8223_s20 + $0x1c0] sm:$0x3] }
 0x89f   : > { %v4876_v16 = vadd.f32 %v4691_v56, %v16583_v34  ;;  %v4891_v50 = vadd.f32 %v4729_v2, %v16584_v33  ;;  %6888 = vst.msk [vmem:[%s14458_s17 + $0x90] sm:$0xff] %vm6869_vm2, %v6823_v10  ;;  %v6825_v57 = vadd.f32 %v6719_v63, %v6537_v5  ;;  %v4703_v4 = vrot.slane %v4480_v19, 2  ;;  %v16586_v56 = vld [vmem:[#allocation393_spill] sm:$0xff]  ;;  %v7927_v19 = vld [vmem:[%s8223_s20 + $0x1b0] sm:$0xff]  ;;  %v16591_v41 = vld [vmem:[#allocation403_spill] sm:$0xff] }
 0x8a0   : > { %v4705_v22 = vrot.slane %v4481_v31, 2  ;;  %v4892_v60 = vadd.f32 %v4731_v52, %v16585_v14  ;;  %6889 = vst.msk [vmem:[%s14458_s17 + $0x98] sm:$0xff] %vm6869_vm2, %v6824_v36  ;;  %v6826_v28 = vadd.f32 %v6719_v63, %v6538_v62  ;;  %v14724_v18 = vmul.f32 %v7926_v32, %v16508_v6  ;;  %v16589_v31 = vld [vmem:[#allocation342_spill] sm:$0xff]  ;;  %v7928_v2 = vld [vmem:[%s8223_s20 + $0x1b8] sm:$0xff]  ;;  %v16592_v5 = vld [vmem:[#allocation140_spill] sm:$0xff] }
 0x8a1   : > { %v5708_v35 = vadd.f32 %v16586_v56, %v4875_v46  ;;  %v5709_v38 = vadd.f32 %v16587_v54, %v4876_v16  ;;  %v5724_v1 = vadd.f32 %v16588_v7, %v4891_v50  ;;  %6904 = vst.msk [vmem:[%s14458_s17 + $0x110] sm:$0xff] %vm6869_vm2, %v6839_v44  ;;  %v4488_v51 = vmul.f32 %v7927_v19, %v16589_v31  ;;  %v16590_v0 = vld [vmem:[#allocation417_spill] sm:$0xff]  ;;  %v16595_v46 = vld [vmem:[#allocation396_spill] sm:$0xff]  ;;  %v16597_v33 = vld [vmem:[#allocation38_spill] sm:$0xff] }
 0x8a2   : > { %v4489_v52 = vmul.f32 %v7928_v2, %v16589_v31  ;;  %v4490_v6 = vmul.f32 %v7929_v42, %v16589_v31  ;;  %v5725_v17 = vadd.f32 %v16590_v0, %v4892_v60  ;;  %6905 = vst.msk [vmem:[%s14458_s17 + $0x118] sm:$0xff] %vm6869_vm2, %v6840_v27  ;;  %v5710_v25 = vadd.f32 %v16591_v41, %v14374_v21  ;;  %v16593_v36 = vld [vmem:[#allocation33_spill] sm:$0xff]  ;;  %v16596_v34 = vld [vmem:[#allocation172_spill] sm:$0xff]  ;;  %v6759_v16 = vpop.permute.xlu2 %6758  ;;  %v16600_v7 = vld [vmem:[#allocation167_spill] sm:$0xff] }
 0x8a3   : > { %v6541_v10 = vadd.f32 %v16592_v5, %v5708_v35  ;;  %v6542_v44 = vadd.f32 %v16593_v36, %v5709_v38  ;;  %v16594_v61 = vld [vmem:[#allocation29_spill] sm:$0xff]  ;;  %6890 = vst.msk [vmem:[%s14458_s17 + $0xa0] sm:$0xff] %vm6869_vm2, %v6825_v57  ;;  %v5711_v24 = vadd.f32 %v16595_v46, %v14353_v12  ;;  %v4704_v62 = vsel %vm4626_vm1, %v4702_v3, %v4703_v4  ;;  %v6727_v21 = vpop.permute.xlu0 %6726  ;;  %v16598_v12 = vld [vmem:[#allocation391_spill] sm:$0xff]  ;;  %v16599_v54 = vld [vmem:[#allocation168_spill] sm:$0xff] }
 0x8a4   : > { %v6557_v53 = vadd.f32 %v16594_v61, %v5724_v1  ;;  %v4706_v63 = vsel %vm4626_vm1, %v4703_v4, %v4705_v22  ;;  %v6558_v27 = vadd.f32 %v16596_v34, %v5725_v17  ;;  %6891 = vst.msk [vmem:[%s14458_s17 + $0xa8] sm:$0xff] %vm6869_vm2, %v6826_v28  ;;  %v6543_v50 = vadd.f32 %v16597_v33, %v5710_v25  ;;  %v16601_v19 = vld [vmem:[#allocation13_spill] sm:$0xff]  ;;  %v16603_v42 = vld [vmem:[#allocation159_spill] sm:$0xff]  ;;  %v16605_v0 = vld [vmem:[#allocation364_spill] sm:$0xff] }
 0x8a5   : > { %v6829_v14 = vadd.f32 %v6727_v21, %v6541_v10  ;;  %v6830_v60 = vadd.f32 %v6727_v21, %v6542_v44  ;;  %v4717_v32 = vrot.slane %v4488_v51, 2  ;;  %v4718_v56 = vrot.slane %v4489_v52, 2  ;;  %v6731_v4 = vpop.permute.xlu1 %6730  ;;  %v16602_v31 = vld [vmem:[#allocation249_spill] sm:$0xff]  ;;  %v16604_v51 = vld [vmem:[#allocation250_spill] sm:$0xff]  ;;  %v16606_v17 = vld [vmem:[#allocation255_spill] sm:$0xff] }
 0x8a6   : > { %v6845_v57 = vadd.f32 %v6759_v16, %v6557_v53  ;;  %v6544_v35 = vadd.f32 %v16598_v12, %v5711_v24  ;;  %v6846_v3 = vadd.f32 %v6759_v16, %v6558_v27  ;;  %v4720_v22 = vrot.slane %v4490_v6, 2  ;;  %v16607_v25 = vld [vmem:[#allocation399_spill] sm:$0xff]  ;;  %v16608_v10 = vld [vmem:[#allocation18_spill] sm:$0xff]  ;;  %v16612_v16 = vld [vmem:[#allocation144_spill] sm:$0xff] }
 0x8a7   : > { %v4881_v38 = vadd.f32 %v4704_v62, %v16599_v54  ;;  %v4882_v28 = vadd.f32 %v4706_v63, %v16600_v7  ;;  %6894 = vst.msk [vmem:[%s14458_s17 + $0xc0] sm:$0xff] %vm6869_vm2, %v6829_v14  ;;  %v6831_v1 = vadd.f32 %v6731_v4, %v6543_v50  ;;  %v4181_v2 = vadd.f32 %v16602_v31, %v16601_v19  ;;  %v16609_v44 = vld [vmem:[#allocation407_spill] sm:$0xff]  ;;  %v16610_v53 = vld [vmem:[#allocation46_spill] sm:$0xff] }
 0x8a8   : > { %v4182_v52 = vadd.f32 %v16604_v51, %v16603_v42  ;;  %v4184_v41 = vadd.f32 %v16606_v17, %v16605_v0  ;;  %6895 = vst.msk [vmem:[%s14458_s17 + $0xc8] sm:$0xff] %vm6869_vm2, %v6830_v60  ;;  %v6832_v6 = vadd.f32 %v6731_v4, %v6544_v35  ;;  %v4884_v36 = vadd.f32 %v14471_v43, %v16608_v10  ;;  %v16611_v43 = vld [vmem:[#allocation409_spill] sm:$0xff]  ;;  %v16613_v33 = vld [vmem:[#allocation27_spill] sm:$0xff]  ;;  %v7931_v60 = vld [vmem:[%s8223_s20 + $0x200] sm:$0xff] }
 0x8a9   : > { %v5714_v5 = vadd.f32 %v16607_v25, %v4881_v38  ;;  %v5715_v61 = vadd.f32 %v16609_v44, %v4882_v28  ;;  %v4883_v46 = vadd.f32 %v14525_v55, %v16610_v53  ;;  %6910 = vst.msk [vmem:[%s14458_s17 + $0x140] sm:$0xff] %vm6869_vm2, %v6845_v57  ;;  %v4722_v24 = vrot.slane %v14529_v29, 2  ;;  %v7930_v29 = vld [vmem:[%s8223_s20 + $0x1f8] sm:$0xff]  ;;  %v7932_v57 = vld [vmem:[%s8223_s20 + $0x208] sm:$0x3]  ;;  %v16615_v12 = vld [vmem:[#allocation402_spill] sm:$0xff] }
 0x8aa   : > { %v4723_v62 = vrot.slane %v14711_v20, 2  ;;  %v4725_v63 = vrot.slane %v14724_v18, 2  ;;  %v4719_v34 = vsel %vm4626_vm1, %v4717_v32, %v4718_v56  ;;  %6911 = vst.msk [vmem:[%s14458_s17 + $0x148] sm:$0xff] %vm6869_vm2, %v6846_v3  ;;  %v4721_v21 = vsel %vm4626_vm1, %v4718_v56, %v4720_v22  ;;  %v16614_v20 = vld [vmem:[#allocation345_spill] sm:$0xff]  ;;  %v6771_v3 = vpop.permute.xlu2 %6770  ;;  %v16616_v4 = vld [vmem:[#allocation162_spill] sm:$0xff]  ;;  %v7933_v28 = vld [vmem:[%s8223_s20 + $0x210] sm:$0xff] }
 0x8ab   : > { %v5716_v27 = vadd.f32 %v16611_v43, %v4883_v46  ;;  %v6547_v55 = vadd.f32 %v16612_v16, %v5714_v5  ;;  %v6548_v50 = vadd.f32 %v16613_v33, %v5715_v61  ;;  %6896 = vst.msk [vmem:[%s14458_s17 + $0xd0] sm:$0xff] %vm6869_vm2, %v6831_v1  ;;  %v4497_v14 = vmul.f32 %v7930_v29, %v16614_v20  ;;  %v6739_v56 = vpop.permute.xlu0 %6738  ;;  %v16617_v1 = vld [vmem:[#allocation340_spill] sm:$0xff]  ;;  %v16618_v42 = vld [vmem:[#allocation147_spill] sm:$0xff]  ;;  %v16619_v53 = vld [vmem:[#allocation122_spill] sm:$0xff] }
 0x8ac   : > { %v4498_v18 = vmul.f32 %v7931_v60, %v16614_v20  ;;  %v4499_v32 = vmul.f32 %v7932_v57, %v16614_v20  ;;  %v5717_v35 = vadd.f32 %v16615_v12, %v4884_v36  ;;  %6897 = vst.msk [vmem:[%s14458_s17 + $0xd8] sm:$0xff] %vm6869_vm2, %v6832_v6  ;;  %v6851_v7 = vadd.f32 %v6771_v3, %v14233_v47  ;;  %v16620_v46 = vld [vmem:[#allocation286_spill] sm:$0xff]  ;;  %v16626_v16 = vld [vmem:[#allocation124_spill] sm:$0xff]  ;;  %v16629_v60 = vld [vmem:[#allocation415_spill] sm:$0xff] }
 0x8ad   : > { %v6549_v22 = vadd.f32 %v16616_v4, %v5716_v27  ;;  %v6835_v54 = vadd.f32 %v6739_v56, %v6547_v55  ;;  %v6836_v38 = vadd.f32 %v6739_v56, %v6548_v50  ;;  %v4500_v19 = vmul.f32 %v7933_v28, %v16617_v1  ;;  %v6743_v17 = vpop.permute.xlu1 %6742  ;;  %v16625_v27 = vld [vmem:[#allocation276_spill] sm:$0xff]  ;;  %v16627_v55 = vld [vmem:[#allocation287_spill] sm:$0xff]  ;;  %v16630_v57 = vld [vmem:[#allocation149_spill] sm:$0xff] }
 0x8ae   : > { %v4724_v31 = vsel %vm4626_vm1, %v4722_v24, %v4723_v62  ;;  %v6550_v51 = vadd.f32 %v16618_v42, %v5717_v35  ;;  %v6852_v0 = vadd.f32 %v6771_v3, %v14265_v8  ;;  %v4887_v6 = vadd.f32 %v4719_v34, %v4181_v2  ;;  %v16621_v24 = vld [vmem:[#allocation405_spill] sm:$0xff]  ;;  %6916 = vst.msk [vmem:[%s14458_s17 + $0x170] sm:$0xff] %vm6869_vm2, %v6851_v7  ;;  %v16628_v20 = vld [vmem:[#allocation304_spill] sm:$0xff] }
 0x8af   : > { %v4726_v25 = vsel %vm4626_vm1, %v4723_v62, %v4725_v63  ;;  %v4888_v5 = vadd.f32 %v4721_v21, %v4182_v52  ;;  %6900 = vst.msk [vmem:[%s14458_s17 + $0xf0] sm:$0xff] %vm6869_vm2, %v6835_v54  ;;  %v6837_v10 = vadd.f32 %v6743_v17, %v6549_v22  ;;  %v4732_v47 = vrot.slane %v4497_v14, 2  ;;  %v16622_v2 = vld [vmem:[#allocation413_spill] sm:$0xff]  ;;  %v16623_v62 = vld [vmem:[#allocation166_spill] sm:$0xff]  ;;  %v16631_v12 = vld [vmem:[#allocation164_spill] sm:$0xff] }
 0x8b0   : > { %v4733_v36 = vrot.slane %v4498_v18, 2  ;;  %v4735_v44 = vrot.slane %v4499_v32, 2  ;;  %6901 = vst.msk [vmem:[%s14458_s17 + $0xf8] sm:$0xff] %vm6869_vm2, %v6836_v38  ;;  %v6838_v61 = vadd.f32 %v6743_v17, %v6550_v51  ;;  %v3354_v8 = vadd.f32 %v16620_v46, %v16619_v53  ;;  %v16624_v63 = vld [vmem:[#allocation34_spill] sm:$0xff]  ;;  %v16632_v56 = vld [vmem:[#allocation305_spill] sm:$0xff]  ;;  %v16633_v4 = vld [vmem:[#allocation408_spill] sm:$0xff] }
 0x8b1   : > { %v5720_v43 = vadd.f32 %v16621_v24, %v4887_v6  ;;  %v5721_v34 = vadd.f32 %v16622_v2, %v4888_v5  ;;  %v4889_v52 = vadd.f32 %v4724_v31, %v16623_v62  ;;  %v3356_v21 = vadd.f32 %v16625_v27, %v16624_v63  ;;  %6917 = vst.msk [vmem:[%s14458_s17 + $0x178] sm:$0xff] %vm6869_vm2, %v6852_v0  ;;  %v16634_v28 = vld [vmem:[#allocation28_spill] sm:$0xff]  ;;  %v16637_v6 = vld [vmem:[#allocation361_spill] sm:$0xff]  ;;  %v16639_v46 = vld [vmem:[#allocation411_spill] sm:$0xff] }
 0x8b2   : > { %v3355_v33 = vadd.f32 %v16627_v55, %v16626_v16  ;;  %v4737_v50 = vrot.slane %v4500_v19, 2  ;;  %v4890_v29 = vadd.f32 %v4726_v25, %v4184_v41  ;;  %v4187_v14 = vadd.f32 %v16628_v20, %v3354_v8  ;;  %6902 = vst.msk [vmem:[%s14458_s17 + $0x100] sm:$0xff] %vm6869_vm2, %v6837_v10  ;;  %v6783_v7 = vpop.permute.xlu2 %6782  ;;  %v16635_v51 = vld [vmem:[#allocation152_spill] sm:$0xff]  ;;  %v16640_v24 = vld [vmem:[#allocation419_spill] sm:$0xff]  ;;  %v16642_v62 = vld [vmem:[#allocation161_spill] sm:$0xff] }
 0x8b3   : > { %v5722_v18 = vadd.f32 %v16629_v60, %v4889_v52  ;;  %v6553_v32 = vadd.f32 %v16630_v57, %v5720_v43  ;;  %v6554_v35 = vadd.f32 %v16631_v12, %v5721_v34  ;;  %v4734_v54 = vsel %vm4626_vm1, %v4732_v47, %v4733_v36  ;;  %6903 = vst.msk [vmem:[%s14458_s17 + $0x108] sm:$0xff] %vm6869_vm2, %v6838_v61  ;;  %v6751_v38 = vpop.permute.xlu0 %6750  ;;  %v16638_v47 = vld [vmem:[#allocation242_spill] sm:$0xff] }
 0x8b4   : > { %v4188_v3 = vadd.f32 %v16632_v56, %v3355_v33  ;;  %v5723_v22 = vadd.f32 %v16633_v4, %v4890_v29  ;;  %v4736_v41 = vsel %vm4626_vm1, %v4733_v36, %v4735_v44  ;;  %v6857_v42 = vadd.f32 %v6783_v7, %v14357_v49 }
 0x8b5   : > { %v6555_v1 = vadd.f32 %v16634_v28, %v5722_v18  ;;  %v6841_v19 = vadd.f32 %v6751_v38, %v6553_v32  ;;  %v6842_v31 = vadd.f32 %v6751_v38, %v6554_v35  ;;  %v16636_v0 = vrot.slane %v16635_v51, 2  ;;  %v6755_v10 = vpop.permute.xlu1 %6754  ;;  %v16646_v38 = vld [vmem:[#allocation389_spill] sm:$0xff] }
 0x8b6   : > { %v6556_v25 = vadd.f32 %v16637_v6, %v5723_v22  ;;  %v6858_v5 = vadd.f32 %v6783_v7, %v14376_v45  ;;  %v4189_v36 = vadd.f32 %v16638_v47, %v3356_v21  ;;  %v4893_v44 = vadd.f32 %v4734_v54, %v4187_v14  ;;  %6922 = vst.msk [vmem:[%s14458_s17 + $0x1a0] sm:$0xff] %vm6869_vm2, %v6857_v42  ;;  %v16641_v45 = vld [vmem:[#allocation420_spill] sm:$0xff]  ;;  %v16643_v14 = vld [vmem:[#allocation169_spill] sm:$0xff]  ;;  %v16645_v54 = vld [vmem:[#allocation54_spill] sm:$0xff] }
 0x8b7   : > { %v4739_v17 = vsel %vm4626_vm1, %v4737_v50, %v16636_v0  ;;  %v4894_v61 = vadd.f32 %v4736_v41, %v4188_v3  ;;  %6906 = vst.msk [vmem:[%s14458_s17 + $0x120] sm:$0xff] %vm6869_vm2, %v6841_v19  ;;  %v6843_v53 = vadd.f32 %v6755_v10, %v6555_v1 }
 0x8b8   : > { %6907 = vst.msk [vmem:[%s14458_s17 + $0x128] sm:$0xff] %vm6869_vm2, %v6842_v31  ;;  %v6844_v49 = vadd.f32 %v6755_v10, %v6556_v25  ;;  %v5726_v8 = vadd.f32 %v16639_v46, %v4893_v44  ;;  %v4895_v2 = vadd.f32 %v4739_v17, %v4189_v36 }
 0x8b9   : > { %v5727_v43 = vadd.f32 %v16640_v24, %v4894_v61  ;;  %6923 = vst.msk [vmem:[%s14458_s17 + $0x1a8] sm:$0xff] %vm6869_vm2, %v6858_v5 }
 0x8ba   : > { %v5728_v34 = vadd.f32 %v16641_v45, %v4895_v2  ;;  %v6559_v52 = vadd.f32 %v16642_v62, %v5726_v8  ;;  %6908 = vst.msk [vmem:[%s14458_s17 + $0x130] sm:$0xff] %vm6869_vm2, %v6843_v53  ;;  %v6795_v21 = vpop.permute.xlu2 %6794 }
 0x8bb   : > { %v6560_v63 = vadd.f32 %v14161_v9, %v5727_v43  ;;  %6909 = vst.msk [vmem:[%s14458_s17 + $0x138] sm:$0xff] %vm6869_vm2, %v6844_v49  ;;  %v6763_v27 = vpop.permute.xlu0 %6762  ;;  %v6863_v50 = vadd.f32 %v6795_v21, %v14461_v59  ;;  %v6864_v29 = vadd.f32 %v6795_v21, %v14481_v37  ;;  %v16644_v59 = vld [vmem:[#allocation370_spill] sm:$0xff] }
 0x8bc   : > { %v6561_v16 = vadd.f32 %v14180_v23, %v5728_v34  ;;  %v6847_v55 = vadd.f32 %v6763_v27, %v6559_v52 }
 0x8bd   : > { %v6848_v33 = vadd.f32 %v6763_v27, %v6560_v63  ;;  %v6767_v20 = vpop.permute.xlu1 %6766  ;;  %6928 = vst.msk [vmem:[%s14458_s17 + $0x1d0] sm:$0xff] %vm6869_vm2, %v6863_v50 }
 0x8be   : > { %6912 = vst.msk [vmem:[%s14458_s17 + $0x150] sm:$0xff] %vm6869_vm2, %v6847_v55  ;;  %v6849_v9 = vadd.f32 %v6767_v20, %v6561_v16  ;;  %v6850_v60 = vadd.f32 %v6767_v20, %v16643_v14 }
 0x8bf   : > { %6913 = vst.msk [vmem:[%s14458_s17 + $0x158] sm:$0xff] %vm6869_vm2, %v6848_v33 }
 0x8c0   : > { %6929 = vst.msk [vmem:[%s14458_s17 + $0x1d8] sm:$0xff] %vm6869_vm2, %v6864_v29 }
 0x8c1   : > { %6914 = vst.msk [vmem:[%s14458_s17 + $0x160] sm:$0xff] %vm6869_vm2, %v6849_v9 }
 0x8c2   : > { %6915 = vst.msk [vmem:[%s14458_s17 + $0x168] sm:$0xff] %vm6869_vm2, %v6850_v60 }
 0x8c3   : > { %v6775_v23 = vpop.permute.xlu0 %6774 }
 0x8c4   : > { %v6853_v37 = vadd.f32 %v6775_v23, %v16644_v59  ;;  %v6854_v18 = vadd.f32 %v6775_v23, %v14309_v30 }
 0x8c5   : > { %v6779_v57 = vpop.permute.xlu1 %6778 }
 0x8c6   : > { %6918 = vst.msk [vmem:[%s14458_s17 + $0x180] sm:$0xff] %vm6869_vm2, %v6853_v37  ;;  %v6855_v32 = vadd.f32 %v6779_v57, %v14331_v58  ;;  %v6856_v12 = vadd.f32 %v6779_v57, %v14169_v26 }
 0x8c7   : > { %6919 = vst.msk [vmem:[%s14458_s17 + $0x188] sm:$0xff] %vm6869_vm2, %v6854_v18 }
 0x8c8   : > { %6920 = vst.msk [vmem:[%s14458_s17 + $0x190] sm:$0xff] %vm6869_vm2, %v6855_v32 }
 0x8c9   : > { %6921 = vst.msk [vmem:[%s14458_s17 + $0x198] sm:$0xff] %vm6869_vm2, %v6856_v12 }
 0x8cb   : > { %v6787_v35 = vpop.permute.xlu0 %6786 }
 0x8cc   : > { %v6859_v56 = vadd.f32 %v6787_v35, %v14235_v48  ;;  %v6860_v30 = vadd.f32 %v6787_v35, %v14419_v39 }
 0x8cd   : > { %v6791_v3 = vpop.permute.xlu1 %6790 }
 0x8ce   : > { %6924 = vst.msk [vmem:[%s14458_s17 + $0x1b0] sm:$0xff] %vm6869_vm2, %v6859_v56  ;;  %v6861_v26 = vadd.f32 %v6791_v3, %v14432_v13  ;;  %v6862_v58 = vadd.f32 %v6791_v3, %v14311_v15 }
 0x8cf   : > { %6925 = vst.msk [vmem:[%s14458_s17 + $0x1b8] sm:$0xff] %vm6869_vm2, %v6860_v30 }
 0x8d0   : > { %6926 = vst.msk [vmem:[%s14458_s17 + $0x1c0] sm:$0xff] %vm6869_vm2, %v6861_v26 }
 0x8d1   : > { %6927 = vst.msk [vmem:[%s14458_s17 + $0x1c8] sm:$0xff] %vm6869_vm2, %v6862_v58 }
 0x8d3   : > { %v6799_v4 = vpop.permute.xlu0 %6798 }
 0x8d4   : > { %v6865_v48 = vadd.f32 %v6799_v4, %v14359_v11  ;;  %v6866_v39 = vadd.f32 %v6799_v4, %v14517_v40 }
 0x8d5   : > { %v6803_v22 = vpop.permute.xlu1 %6802 }
 0x8d6   : > { %6930 = vst.msk [vmem:[%s14458_s17 + $0x1e0] sm:$0xff] %vm6869_vm2, %v6865_v48  ;;  %v6867_v41 = vadd.f32 %v6803_v22, %v16645_v54  ;;  %v6868_v13 = vadd.f32 %v6803_v22, %v16646_v38 }
 0x8d7   : > { %6931 = vst.msk [vmem:[%s14458_s17 + $0x1e8] sm:$0xff] %vm6869_vm2, %v6866_v39 }
 0x8d8   : > { %6932 = vst.msk [vmem:[%s14458_s17 + $0x1f0] sm:$0xff] %vm6869_vm2, %v6867_v41 }
 0x8d9   : > { %6933 = vst.msk [vmem:[%s14458_s17 + $0x1f8] sm:$0xff] %vm6869_vm2, %v6868_v13 }
 0x8da PF: > { %s13_s12 = sadd.s32 1, %s7940_s12  }
 0x8db   : > { %p10_p4 = scmp.ge.s32.totalorder %s13_s12, 4  }
 0x8dd   :  { %12 = sbr.rel (!%p10_p4) target bundleno = 1 (0x1), region = 70 }

</bundles_post_ra>
